<compile_context>
chip_gen: v6e
topology: v6e:2x2x1
jax: 0.10.0
libtpu: 0.0.40
codegen_flags: <defaults>
</compile_context>

<pallas_src>
import jax
import jax.numpy as jnp
from jax.experimental import pallas as pl
from jax.experimental.pallas import tpu as pltpu


CK_PAD = 128   # padded contraction dim for the 3x3 conv (C*9=36 -> 128 lanes)
OUT_PAD = 128  # padded fc2 output width (5 -> 128 lanes, lane-dense store)
FEAT = 2048    # backbone feature width expected by fc1
HID = 128      # fc1 output width


def _pick_tp(p):
    """Largest P-tile that divides P and still yields >=2 pipeline steps."""
    for tp in (512, 256, 128):
        if p % tp == 0 and p // tp >= 2:
            return tp
    return p


# ----------------------------- Pallas kernel ------------------------------

def _make_kernel(inv_p):
    def kernel(p_ref, wc_ref, bc_ref, w1_ref, b1_ref, w2_ref, b2_ref,
               o_ref, pool_acc):
        # p_ref   : (1, TP, CK_PAD) bf16 im2col patch rows for one sample / P-tile
        # wc_ref  : (CK_PAD, FEAT)  bf16 conv weight (zero rows C*9..CK_PAD-1)
        # bc_ref  : (1, FEAT)       f32  conv bias
        # w1_ref  : (FEAT, HID)     bf16 fc1 weight
        # b1_ref  : (1, HID)        f32  fc1 bias
        # w2_ref  : (HID, OUT_PAD)  bf16 fc2 weight (zero cols 5..OUT_PAD-1)
        # b2_ref  : (1, OUT_PAD)    f32  fc2 bias (zero-padded)
        # o_ref   : (1, 1, OUT_PAD) f32  padded logits (cols 5..127 stay zero)
        # pool_acc: (1, FEAT)       f32  pooled-sum accumulator (VMEM scratch)
        pt = pl.program_id(1)

        @pl.when(pt == 0)
        def _():
            pool_acc[...] = jnp.zeros_like(pool_acc)

        patches = p_ref[0]                                              # (TP, CK_PAD) bf16
        acc = jnp.dot(patches, wc_ref[...],
                      preferred_element_type=jnp.float32)               # (TP, FEAT) f32
        acc = jnp.maximum(acc + bc_ref[...], 0.0)                       # bias + ReLU (f32)

        # Partial global-average-pool as a bf16 MXU matmul: (1, TP) @ (TP, FEAT).
        # Keeps the row reduce off the VPU/XLU; accumulation stays f32 in pool_acc.
        ones_row = jnp.ones((1, acc.shape[0]), dtype=jnp.bfloat16)
        pool_acc[...] += jnp.dot(ones_row, acc.astype(jnp.bfloat16),
                                 preferred_element_type=jnp.float32)

        @pl.when(pt == pl.num_programs(1) - 1)
        def _():
            feat = pool_acc[...] * inv_p                                # 1/P scale in f32
            h1 = jnp.dot(feat.astype(jnp.bfloat16), w1_ref[...],
                         preferred_element_type=jnp.float32) + b1_ref[...]   # (1, HID)
            out = jnp.dot(h1.astype(jnp.bfloat16), w2_ref[...],
                          preferred_element_type=jnp.float32) + b2_ref[...]  # (1, OUT_PAD)
            o_ref[0] = out

    return kernel


# ------------------------------- JAX glue -----------------------------------

def im2col_3x3(x):
    """x: (N, C, H, W) -> (N, H*W, CK_PAD) bf16 patches; pad=1, stride=1, (c,kh,kw) order."""
    N, C, H, W = x.shape
    xp = jnp.pad(x, ((0, 0), (0, 0), (1, 1), (1, 1)))
    cols = []
    for dh in range(3):
        for dw in range(3):
            cols.append(xp[:, :, dh:dh + H, dw:dw + W])        # (N, C, H, W)
    patches = jnp.stack(cols, axis=2)                          # (N, C, 9, H, W)
    patches = patches.reshape(N, C * 9, H, W)                  # (c, kh, kw) flattened
    patches = patches.transpose(0, 2, 3, 1).reshape(N, H * W, C * 9)
    patches = jnp.pad(patches, ((0, 0), (0, 0), (0, CK_PAD - C * 9)))
    return patches.astype(jnp.bfloat16)


def _pallas_forward(patches, params, N, P, TP, single_buffer):
    def inv_spec(shape):
        # Grid-invariant operand: constant block index across (n, p).
        if single_buffer:
            return pl.BlockSpec(shape, lambda n, p: (0,) * len(shape),
                                pipeline_mode=pl.Buffered(buffer_count=1))
        return pl.BlockSpec(shape, lambda n, p: (0,) * len(shape))

    return pl.pallas_call(
        _make_kernel(1.0 / P),
        out_shape=jax.ShapeDtypeStruct((N, 1, OUT_PAD), jnp.float32),
        grid=(N, P // TP),
        in_specs=[
            pl.BlockSpec((1, TP, CK_PAD), lambda n, p: (n, p, 0)),
            inv_spec((CK_PAD, FEAT)),
            inv_spec((1, FEAT)),
            inv_spec((FEAT, HID)),
            inv_spec((1, HID)),
            inv_spec((HID, OUT_PAD)),
            inv_spec((1, OUT_PAD)),
        ],
        out_specs=pl.BlockSpec((1, 1, OUT_PAD), lambda n, p: (n, 0, 0)),
        scratch_shapes=[pltpu.VMEM((1, FEAT), jnp.float32)],
        compiler_params=pltpu.CompilerParams(
            dimension_semantics=("parallel", "arbitrary"),
            vmem_limit_bytes=32 * 1024 * 1024),
    )(patches, params["wc"], params["bc"],
      params["w1"], params["b1"], params["w2"], params["b2"])


def siamese_forward(x, params):
    N, C, H, W = x.shape
    P = H * W
    TP = _pick_tp(P)
    patches = im2col_3x3(x)                                    # glue (pad/reshape only)
    try:
        out = _pallas_forward(patches, params, N, P, TP, single_buffer=True)
    except Exception:
        # pipeline_mode=pl.Buffered(1) not supported by this jax/Mosaic build;
        # fall back to default double-buffering of the (small) invariant weights.
        out = _pallas_forward(patches, params, N, P, TP, single_buffer=False)
    return out[:, 0, :5]                                       # (N, 5)


def siamese_reference(x, params):
    """Pure-f32 JAX reference of the same forward."""
    N, C, H, W = x.shape
    xp = jnp.pad(x, ((0, 0), (0, 0), (1, 1), (1, 1)))
    cols = []
    for dh in range(3):
        for dw in range(3):
            cols.append(xp[:, :, dh:dh + H, dw:dw + W])
    patches = jnp.stack(cols, axis=2).reshape(N, C * 9, H, W)
    patches = patches.transpose(0, 2, 3, 1).reshape(N, H * W, C * 9)
    h = jnp.maximum(jnp.einsum("npk,ko->npo", patches, params["wc_f32"])
                    + params["bc_f32"], 0.0)
    feat = h.mean(axis=1)
    h1 = feat @ params["w1_f32"] + params["b1_f32"]
    return h1 @ params["w2_f32"] + params["b2_f32"]


def make_params(key, c_in):
    k = jax.random.split(key, 6)
    conv_w = jax.random.normal(k[0], (FEAT, c_in, 3, 3), jnp.float32) * 0.05  # (O,C,kh,kw)
    conv_b = jax.random.normal(k[1], (FEAT,), jnp.float32) * 0.01
    fc1_w = jax.random.normal(k[2], (HID, FEAT), jnp.float32) * 0.02          # (out,in)
    fc1_b = jax.random.normal(k[3], (HID,), jnp.float32) * 0.01
    fc2_w = jax.random.normal(k[4], (5, HID), jnp.float32) * 0.05
    fc2_b = jax.random.normal(k[5], (5,), jnp.float32) * 0.01

    wc = conv_w.reshape(FEAT, c_in * 9).T                       # (C*9, 2048) im2col layout
    wc_pad = jnp.pad(wc, ((0, CK_PAD - c_in * 9), (0, 0)))      # (128, 2048)
    w2 = fc2_w.T                                                # (128, 5)  (y = x @ W^T + b)
    w2_pad = jnp.pad(w2, ((0, 0), (0, OUT_PAD - 5)))            # (128, 128)
    b2_pad = jnp.pad(fc2_b, ((0, OUT_PAD - 5),))                # (128,)

    return {
        # f32 masters (reference)
        "wc_f32": wc, "bc_f32": conv_b,
        "w1_f32": fc1_w.T, "b1_f32": fc1_b,
        "w2_f32": w2, "b2_f32": fc2_b,
        # kernel operands: bf16 MXU weights (lane-padded), f32 biases
        "wc": wc_pad.astype(jnp.bfloat16),                      # (128, 2048) bf16
        "bc": conv_b[None, :],                                  # (1, 2048)   f32
        "w1": fc1_w.T.astype(jnp.bfloat16),                     # (2048, 128) bf16
        "b1": fc1_b[None, :],                                   # (1, 128)    f32
        "w2": w2_pad.astype(jnp.bfloat16),                      # (128, 128)  bf16
        "b2": b2_pad[None, :],                                  # (1, 128)    f32
    }


if __name__ == "__main__":
    key = jax.random.PRNGKey(0)
    kx, kp = jax.random.split(key)
    N, C, H, W = 2, 4, 16, 16
    x = jax.random.normal(kx, (N, C, H, W), jnp.float32)
    params = make_params(kp, C)

    out = jax.block_until_ready(siamese_forward(x, params))
    ref = jax.block_until_ready(siamese_reference(x, params))

    assert out.shape == (N, 5), out.shape
    assert jnp.allclose(out, ref, rtol=2e-2, atol=2e-2), (out, ref)
    print("KERNEL_OK")
</pallas_src>

<mosaic_0001>
module attributes {stable_mosaic.version = 11 : i64} {
  func.func @kernel(%arg0: i32, %arg1: i32, %arg2: memref<1x128x128xbf16, #tpu.memory_space<vmem>>, %arg3: memref<128x2048xbf16, #tpu.memory_space<vmem>>, %arg4: memref<1x2048xf32, #tpu.memory_space<vmem>>, %arg5: memref<2048x128xbf16, #tpu.memory_space<vmem>>, %arg6: memref<1x128xf32, #tpu.memory_space<vmem>>, %arg7: memref<128x128xbf16, #tpu.memory_space<vmem>>, %arg8: memref<1x128xf32, #tpu.memory_space<vmem>>, %arg9: memref<1x1x128xf32, #tpu.memory_space<vmem>>, %arg10: memref<1x2048xf32, #tpu.memory_space<vmem>>) attributes {dimension_semantics = [#tpu.dimension_semantics<parallel>, #tpu.dimension_semantics<arbitrary>], iteration_bounds = array<i64: 2, 2>, scalar_prefetch = 0 : i64, scratch_operands = 1 : i64, tpu.core_type = #tpu.core_type<tc>, window_params = [{transform_indices = @transform_0, window_bounds = array<i64: 1, 128, 128>}, {pipeline_mode = #tpu.pipeline_mode<synchronous>, transform_indices = @transform_1, window_bounds = array<i64: 128, 2048>}, {pipeline_mode = #tpu.pipeline_mode<synchronous>, transform_indices = @transform_2, window_bounds = array<i64: 1, 2048>}, {pipeline_mode = #tpu.pipeline_mode<synchronous>, transform_indices = @transform_3, window_bounds = array<i64: 2048, 128>}, {pipeline_mode = #tpu.pipeline_mode<synchronous>, transform_indices = @transform_4, window_bounds = array<i64: 1, 128>}, {pipeline_mode = #tpu.pipeline_mode<synchronous>, transform_indices = @transform_5, window_bounds = array<i64: 128, 128>}, {pipeline_mode = #tpu.pipeline_mode<synchronous>, transform_indices = @transform_6, window_bounds = array<i64: 1, 128>}, {transform_indices = @transform_7, window_bounds = array<i64: 1, 1, 128>}]} {
    %c0_i32 = arith.constant 0 : i32
    %0 = arith.cmpi eq, %arg1, %c0_i32 : i32
    %1 = arith.extui %0 : i1 to i32
    %c0_i32_0 = arith.constant 0 : i32
    %2 = arith.cmpi ne, %1, %c0_i32_0 : i32
    scf.if %2 {
      %cst_15 = arith.constant 0.000000e+00 : f32
      %21 = vector.broadcast %cst_15 : f32 to vector<1x2048xf32>
      %c0_16 = arith.constant 0 : index
      %c0_17 = arith.constant 0 : index
      %22 = vector.load %arg10[%c0_16, %c0_17] : memref<1x2048xf32, #tpu.memory_space<vmem>>, vector<1x2048xf32>
      tpu.vector_store %arg10[%c0_16, %c0_17], %21 {strides = array<i32>} : memref<1x2048xf32, #tpu.memory_space<vmem>>, vector<1x2048xf32>,
    } else {
    }
    %c0 = arith.constant 0 : index
    %c0_1 = arith.constant 0 : index
    %c0_2 = arith.constant 0 : index
    %3 = vector.load %arg2[%c0, %c0_1, %c0_2] : memref<1x128x128xbf16, #tpu.memory_space<vmem>>, vector<1x128x128xbf16>
    %4 = vector.shape_cast %3 : vector<1x128x128xbf16> to vector<128x128xbf16>
    %c0_3 = arith.constant 0 : index
    %c0_4 = arith.constant 0 : index
    %5 = vector.load %arg3[%c0_3, %c0_4] : memref<128x2048xbf16, #tpu.memory_space<vmem>>, vector<128x2048xbf16>
    %cst = arith.constant dense<0.000000e+00> : vector<128x2048xf32>
    %6 = tpu.matmul %4, %5, %cst {dimension_numbers = #tpu.dot_dimension_numbers<[1], [0], [0], [1], [0, 0, 1, 1], [], []>} : vector<128x128xbf16>, vector<128x2048xbf16>, vector<128x2048xf32> -> vector<128x2048xf32>
    %c0_5 = arith.constant 0 : index
    %c0_6 = arith.constant 0 : index
    %7 = vector.load %arg4[%c0_5, %c0_6] : memref<1x2048xf32, #tpu.memory_space<vmem>>, vector<1x2048xf32>
    %8 = vector.broadcast %7 : vector<1x2048xf32> to vector<128x2048xf32>
    %9 = arith.addf %6, %8 : vector<128x2048xf32>
    %cst_7 = arith.constant 0.000000e+00 : f32
    %10 = vector.broadcast %cst_7 : f32 to vector<128x2048xf32>
    %11 = arith.maximumf %9, %10 : vector<128x2048xf32>
    %cst_8 = arith.constant 1.000000e+00 : bf16
    %12 = vector.broadcast %cst_8 : bf16 to vector<1x128xbf16>
    %c0_9 = arith.constant 0 : index
    %c0_10 = arith.constant 0 : index
    %13 = vector.load %arg10[%c0_9, %c0_10] : memref<1x2048xf32, #tpu.memory_space<vmem>>, vector<1x2048xf32>
    %14 = arith.truncf %11 : vector<128x2048xf32> to vector<128x2048xbf16>
    %cst_11 = arith.constant dense<0.000000e+00> : vector<1x2048xf32>
    %15 = tpu.matmul %12, %14, %cst_11 {dimension_numbers = #tpu.dot_dimension_numbers<[1], [0], [0], [1], [0, 0, 1, 1], [], []>} : vector<1x128xbf16>, vector<128x2048xbf16>, vector<1x2048xf32> -> vector<1x2048xf32>
    %16 = arith.addf %13, %15 : vector<1x2048xf32>
    %c0_12 = arith.constant 0 : index
    %c0_13 = arith.constant 0 : index
    %17 = vector.load %arg10[%c0_12, %c0_13] : memref<1x2048xf32, #tpu.memory_space<vmem>>, vector<1x2048xf32>
    tpu.vector_store %arg10[%c0_12, %c0_13], %16 {strides = array<i32>} : memref<1x2048xf32, #tpu.memory_space<vmem>>, vector<1x2048xf32>,
    %c1_i32 = arith.constant 1 : i32
    %18 = arith.cmpi eq, %arg1, %c1_i32 : i32
    %19 = arith.extui %18 : i1 to i32
    %c0_i32_14 = arith.constant 0 : i32
    %20 = arith.cmpi ne, %19, %c0_i32_14 : i32
    scf.if %20 {
      %c0_15 = arith.constant 0 : index
      %c0_16 = arith.constant 0 : index
      %21 = vector.load %arg10[%c0_15, %c0_16] : memref<1x2048xf32, #tpu.memory_space<vmem>>, vector<1x2048xf32>
      %cst_17 = arith.constant 3.906250e-03 : f32
      %22 = vector.broadcast %cst_17 : f32 to vector<1x2048xf32>
      %23 = arith.mulf %21, %22 : vector<1x2048xf32>
      %24 = arith.truncf %23 : vector<1x2048xf32> to vector<1x2048xbf16>
      %c0_18 = arith.constant 0 : index
      %c0_19 = arith.constant 0 : index
      %25 = vector.load %arg5[%c0_18, %c0_19] : memref<2048x128xbf16, #tpu.memory_space<vmem>>, vector<2048x128xbf16>
      %cst_20 = arith.constant dense<0.000000e+00> : vector<1x128xf32>
      %26 = tpu.matmul %24, %25, %cst_20 {dimension_numbers = #tpu.dot_dimension_numbers<[1], [0], [0], [1], [0, 0, 1, 1], [], []>} : vector<1x2048xbf16>, vector<2048x128xbf16>, vector<1x128xf32> -> vector<1x128xf32>
      %c0_21 = arith.constant 0 : index
      %c0_22 = arith.constant 0 : index
      %27 = vector.load %arg6[%c0_21, %c0_22] : memref<1x128xf32, #tpu.memory_space<vmem>>, vector<1x128xf32>
      %28 = arith.addf %26, %27 : vector<1x128xf32>
      %29 = arith.truncf %28 : vector<1x128xf32> to vector<1x128xbf16>
      %c0_23 = arith.constant 0 : index
      %c0_24 = arith.constant 0 : index
      %30 = vector.load %arg7[%c0_23, %c0_24] : memref<128x128xbf16, #tpu.memory_space<vmem>>, vector<128x128xbf16>
      %cst_25 = arith.constant dense<0.000000e+00> : vector<1x128xf32>
      %31 = tpu.matmul %29, %30, %cst_25 {dimension_numbers = #tpu.dot_dimension_numbers<[1], [0], [0], [1], [0, 0, 1, 1], [], []>} : vector<1x128xbf16>, vector<128x128xbf16>, vector<1x128xf32> -> vector<1x128xf32>
      %c0_26 = arith.constant 0 : index
      %c0_27 = arith.constant 0 : index
      %32 = vector.load %arg8[%c0_26, %c0_27] : memref<1x128xf32, #tpu.memory_space<vmem>>, vector<1x128xf32>
      %33 = arith.addf %31, %32 : vector<1x128xf32>
      %c0_28 = arith.constant 0 : index
      %c0_29 = arith.constant 0 : index
      %c0_30 = arith.constant 0 : index
      %34 = vector.load %arg9[%c0_28, %c0_29, %c0_30] : memref<1x1x128xf32, #tpu.memory_space<vmem>>, vector<1x1x128xf32>
      %35 = vector.shape_cast %34 : vector<1x1x128xf32> to vector<1x128xf32>
      %36 = vector.shape_cast %33 : vector<1x128xf32> to vector<1x1x128xf32>
      tpu.vector_store %arg9[%c0_28, %c0_29, %c0_30], %36 {strides = array<i32>} : memref<1x1x128xf32, #tpu.memory_space<vmem>>, vector<1x1x128xf32>,
    } else {
    }
    return
  }
  func.func @transform_0(%arg0: i32, %arg1: i32) -> (i32, i32, i32) {
    %c0_i32 = arith.constant 0 : i32
    %c0_i32_0 = arith.constant 0 : i32
    return %arg0, %arg1, %c0_i32 : i32, i32, i32
  }
  func.func @transform_1(%arg0: i32, %arg1: i32) -> (i32, i32) {
    %c0_i32 = arith.constant 0 : i32
    %c0_i32_0 = arith.constant 0 : i32
    %c0_i32_1 = arith.constant 0 : i32
    return %c0_i32, %c0_i32_0 : i32, i32
  }
  func.func @transform_2(%arg0: i32, %arg1: i32) -> (i32, i32) {
    %c0_i32 = arith.constant 0 : i32
    %c0_i32_0 = arith.constant 0 : i32
    %c0_i32_1 = arith.constant 0 : i32
    return %c0_i32, %c0_i32_0 : i32, i32
  }
  func.func @transform_3(%arg0: i32, %arg1: i32) -> (i32, i32) {
    %c0_i32 = arith.constant 0 : i32
    %c0_i32_0 = arith.constant 0 : i32
    %c0_i32_1 = arith.constant 0 : i32
    return %c0_i32, %c0_i32_0 : i32, i32
  }
  func.func @transform_4(%arg0: i32, %arg1: i32) -> (i32, i32) {
    %c0_i32 = arith.constant 0 : i32
    %c0_i32_0 = arith.constant 0 : i32
    %c0_i32_1 = arith.constant 0 : i32
    return %c0_i32, %c0_i32_0 : i32, i32
  }
  func.func @transform_5(%arg0: i32, %arg1: i32) -> (i32, i32) {
    %c0_i32 = arith.constant 0 : i32
    %c0_i32_0 = arith.constant 0 : i32
    %c0_i32_1 = arith.constant 0 : i32
    return %c0_i32, %c0_i32_0 : i32, i32
  }
  func.func @transform_6(%arg0: i32, %arg1: i32) -> (i32, i32) {
    %c0_i32 = arith.constant 0 : i32
    %c0_i32_0 = arith.constant 0 : i32
    %c0_i32_1 = arith.constant 0 : i32
    return %c0_i32, %c0_i32_0 : i32, i32
  }
  func.func @transform_7(%arg0: i32, %arg1: i32) -> (i32, i32, i32) {
    %c0_i32 = arith.constant 0 : i32
    %c0_i32_0 = arith.constant 0 : i32
    %c0_i32_1 = arith.constant 0 : i32
    return %arg0, %c0_i32, %c0_i32_0 : i32, i32, i32
  }
}

module attributes {stable_mosaic.version = 11 : i64} {
  func.func @kernel(%arg0: i32, %arg1: i32, %arg2: memref<1x128x128xbf16, #tpu.memory_space<vmem>>, %arg3: memref<128x2048xbf16, #tpu.memory_space<vmem>>, %arg4: memref<1x2048xf32, #tpu.memory_space<vmem>>, %arg5: memref<2048x128xbf16, #tpu.memory_space<vmem>>, %arg6: memref<1x128xf32, #tpu.memory_space<vmem>>, %arg7: memref<128x128xbf16, #tpu.memory_space<vmem>>, %arg8: memref<1x128xf32, #tpu.memory_space<vmem>>, %arg9: memref<1x1x128xf32, #tpu.memory_space<vmem>>, %arg10: memref<1x2048xf32, #tpu.memory_space<vmem>>) attributes {dimension_semantics = [#tpu.dimension_semantics<parallel>, #tpu.dimension_semantics<arbitrary>], iteration_bounds = array<i64: 2, 2>, scalar_prefetch = 0 : i64, scratch_operands = 1 : i64, tpu.core_type = #tpu.core_type<tc>, window_params = [{transform_indices = @transform_0, window_bounds = array<i64: 1, 128, 128>}, {pipeline_mode = #tpu.pipeline_mode<synchronous>, transform_indices = @transform_1, window_bounds = array<i64: 128, 2048>}, {pipeline_mode = #tpu.pipeline_mode<synchronous>, transform_indices = @transform_2, window_bounds = array<i64: 1, 2048>}, {pipeline_mode = #tpu.pipeline_mode<synchronous>, transform_indices = @transform_3, window_bounds = array<i64: 2048, 128>}, {pipeline_mode = #tpu.pipeline_mode<synchronous>, transform_indices = @transform_4, window_bounds = array<i64: 1, 128>}, {pipeline_mode = #tpu.pipeline_mode<synchronous>, transform_indices = @transform_5, window_bounds = array<i64: 128, 128>}, {pipeline_mode = #tpu.pipeline_mode<synchronous>, transform_indices = @transform_6, window_bounds = array<i64: 1, 128>}, {transform_indices = @transform_7, window_bounds = array<i64: 1, 1, 128>}]} {
    %c0_i32 = arith.constant 0 : i32
    %0 = arith.cmpi eq, %arg1, %c0_i32 : i32
    %1 = arith.extui %0 : i1 to i32
    %c0_i32_0 = arith.constant 0 : i32
    %2 = arith.cmpi ne, %1, %c0_i32_0 : i32
    scf.if %2 {
      %cst_15 = arith.constant 0.000000e+00 : f32
      %21 = vector.broadcast %cst_15 : f32 to vector<1x2048xf32>
      %c0_16 = arith.constant 0 : index
      %c0_17 = arith.constant 0 : index
      %22 = vector.load %arg10[%c0_16, %c0_17] : memref<1x2048xf32, #tpu.memory_space<vmem>>, vector<1x2048xf32>
      tpu.vector_store %arg10[%c0_16, %c0_17], %21 {strides = array<i32>} : memref<1x2048xf32, #tpu.memory_space<vmem>>, vector<1x2048xf32>,
    } else {
    }
    %c0 = arith.constant 0 : index
    %c0_1 = arith.constant 0 : index
    %c0_2 = arith.constant 0 : index
    %3 = vector.load %arg2[%c0, %c0_1, %c0_2] : memref<1x128x128xbf16, #tpu.memory_space<vmem>>, vector<1x128x128xbf16>
    %4 = vector.shape_cast %3 : vector<1x128x128xbf16> to vector<128x128xbf16>
    %c0_3 = arith.constant 0 : index
    %c0_4 = arith.constant 0 : index
    %5 = vector.load %arg3[%c0_3, %c0_4] : memref<128x2048xbf16, #tpu.memory_space<vmem>>, vector<128x2048xbf16>
    %cst = arith.constant dense<0.000000e+00> : vector<128x2048xf32>
    %6 = tpu.matmul %4, %5, %cst {dimension_numbers = #tpu.dot_dimension_numbers<[1], [0], [0], [1], [0, 0, 1, 1], [], []>} : vector<128x128xbf16>, vector<128x2048xbf16>, vector<128x2048xf32> -> vector<128x2048xf32>
    %c0_5 = arith.constant 0 : index
    %c0_6 = arith.constant 0 : index
    %7 = vector.load %arg4[%c0_5, %c0_6] : memref<1x2048xf32, #tpu.memory_space<vmem>>, vector<1x2048xf32>
    %8 = vector.broadcast %7 : vector<1x2048xf32> to vector<128x2048xf32>
    %9 = arith.addf %6, %8 : vector<128x2048xf32>
    %cst_7 = arith.constant 0.000000e+00 : f32
    %10 = vector.broadcast %cst_7 : f32 to vector<128x2048xf32>
    %11 = arith.maximumf %9, %10 : vector<128x2048xf32>
    %cst_8 = arith.constant 1.000000e+00 : bf16
    %12 = vector.broadcast %cst_8 : bf16 to vector<1x128xbf16>
    %c0_9 = arith.constant 0 : index
    %c0_10 = arith.constant 0 : index
    %13 = vector.load %arg10[%c0_9, %c0_10] : memref<1x2048xf32, #tpu.memory_space<vmem>>, vector<1x2048xf32>
    %14 = arith.truncf %11 : vector<128x2048xf32> to vector<128x2048xbf16>
    %cst_11 = arith.constant dense<0.000000e+00> : vector<1x2048xf32>
    %15 = tpu.matmul %12, %14, %cst_11 {dimension_numbers = #tpu.dot_dimension_numbers<[1], [0], [0], [1], [0, 0, 1, 1], [], []>} : vector<1x128xbf16>, vector<128x2048xbf16>, vector<1x2048xf32> -> vector<1x2048xf32>
    %16 = arith.addf %13, %15 : vector<1x2048xf32>
    %c0_12 = arith.constant 0 : index
    %c0_13 = arith.constant 0 : index
    %17 = vector.load %arg10[%c0_12, %c0_13] : memref<1x2048xf32, #tpu.memory_space<vmem>>, vector<1x2048xf32>
    tpu.vector_store %arg10[%c0_12, %c0_13], %16 {strides = array<i32>} : memref<1x2048xf32, #tpu.memory_space<vmem>>, vector<1x2048xf32>,
    %c1_i32 = arith.constant 1 : i32
    %18 = arith.cmpi eq, %arg1, %c1_i32 : i32
    %19 = arith.extui %18 : i1 to i32
    %c0_i32_14 = arith.constant 0 : i32
    %20 = arith.cmpi ne, %19, %c0_i32_14 : i32
    scf.if %20 {
      %c0_15 = arith.constant 0 : index
      %c0_16 = arith.constant 0 : index
      %21 = vector.load %arg10[%c0_15, %c0_16] : memref<1x2048xf32, #tpu.memory_space<vmem>>, vector<1x2048xf32>
      %cst_17 = arith.constant 3.906250e-03 : f32
      %22 = vector.broadcast %cst_17 : f32 to vector<1x2048xf32>
      %23 = arith.mulf %21, %22 : vector<1x2048xf32>
      %24 = arith.truncf %23 : vector<1x2048xf32> to vector<1x2048xbf16>
      %c0_18 = arith.constant 0 : index
      %c0_19 = arith.constant 0 : index
      %25 = vector.load %arg5[%c0_18, %c0_19] : memref<2048x128xbf16, #tpu.memory_space<vmem>>, vector<2048x128xbf16>
      %cst_20 = arith.constant dense<0.000000e+00> : vector<1x128xf32>
      %26 = tpu.matmul %24, %25, %cst_20 {dimension_numbers = #tpu.dot_dimension_numbers<[1], [0], [0], [1], [0, 0, 1, 1], [], []>} : vector<1x2048xbf16>, vector<2048x128xbf16>, vector<1x128xf32> -> vector<1x128xf32>
      %c0_21 = arith.constant 0 : index
      %c0_22 = arith.constant 0 : index
      %27 = vector.load %arg6[%c0_21, %c0_22] : memref<1x128xf32, #tpu.memory_space<vmem>>, vector<1x128xf32>
      %28 = arith.addf %26, %27 : vector<1x128xf32>
      %29 = arith.truncf %28 : vector<1x128xf32> to vector<1x128xbf16>
      %c0_23 = arith.constant 0 : index
      %c0_24 = arith.constant 0 : index
      %30 = vector.load %arg7[%c0_23, %c0_24] : memref<128x128xbf16, #tpu.memory_space<vmem>>, vector<128x128xbf16>
      %cst_25 = arith.constant dense<0.000000e+00> : vector<1x128xf32>
      %31 = tpu.matmul %29, %30, %cst_25 {dimension_numbers = #tpu.dot_dimension_numbers<[1], [0], [0], [1], [0, 0, 1, 1], [], []>} : vector<1x128xbf16>, vector<128x128xbf16>, vector<1x128xf32> -> vector<1x128xf32>
      %c0_26 = arith.constant 0 : index
      %c0_27 = arith.constant 0 : index
      %32 = vector.load %arg8[%c0_26, %c0_27] : memref<1x128xf32, #tpu.memory_space<vmem>>, vector<1x128xf32>
      %33 = arith.addf %31, %32 : vector<1x128xf32>
      %c0_28 = arith.constant 0 : index
      %c0_29 = arith.constant 0 : index
      %c0_30 = arith.constant 0 : index
      %34 = vector.load %arg9[%c0_28, %c0_29, %c0_30] : memref<1x1x128xf32, #tpu.memory_space<vmem>>, vector<1x1x128xf32>
      %35 = vector.shape_cast %34 : vector<1x1x128xf32> to vector<1x128xf32>
      %36 = vector.shape_cast %33 : vector<1x128xf32> to vector<1x1x128xf32>
      tpu.vector_store %arg9[%c0_28, %c0_29, %c0_30], %36 {strides = array<i32>} : memref<1x1x128xf32, #tpu.memory_space<vmem>>, vector<1x1x128xf32>,
    } else {
    }
    return
  }
  func.func @transform_0(%arg0: i32, %arg1: i32) -> (i32, i32, i32) {
    %c0_i32 = arith.constant 0 : i32
    %c0_i32_0 = arith.constant 0 : i32
    return %arg0, %arg1, %c0_i32 : i32, i32, i32
  }
  func.func @transform_1(%arg0: i32, %arg1: i32) -> (i32, i32) {
    %c0_i32 = arith.constant 0 : i32
    %c0_i32_0 = arith.constant 0 : i32
    %c0_i32_1 = arith.constant 0 : i32
    return %c0_i32, %c0_i32_0 : i32, i32
  }
  func.func @transform_2(%arg0: i32, %arg1: i32) -> (i32, i32) {
    %c0_i32 = arith.constant 0 : i32
    %c0_i32_0 = arith.constant 0 : i32
    %c0_i32_1 = arith.constant 0 : i32
    return %c0_i32, %c0_i32_0 : i32, i32
  }
  func.func @transform_3(%arg0: i32, %arg1: i32) -> (i32, i32) {
    %c0_i32 = arith.constant 0 : i32
    %c0_i32_0 = arith.constant 0 : i32
    %c0_i32_1 = arith.constant 0 : i32
    return %c0_i32, %c0_i32_0 : i32, i32
  }
  func.func @transform_4(%arg0: i32, %arg1: i32) -> (i32, i32) {
    %c0_i32 = arith.constant 0 : i32
    %c0_i32_0 = arith.constant 0 : i32
    %c0_i32_1 = arith.constant 0 : i32
    return %c0_i32, %c0_i32_0 : i32, i32
  }
  func.func @transform_5(%arg0: i32, %arg1: i32) -> (i32, i32) {
    %c0_i32 = arith.constant 0 : i32
    %c0_i32_0 = arith.constant 0 : i32
    %c0_i32_1 = arith.constant 0 : i32
    return %c0_i32, %c0_i32_0 : i32, i32
  }
  func.func @transform_6(%arg0: i32, %arg1: i32) -> (i32, i32) {
    %c0_i32 = arith.constant 0 : i32
    %c0_i32_0 = arith.constant 0 : i32
    %c0_i32_1 = arith.constant 0 : i32
    return %c0_i32, %c0_i32_0 : i32, i32
  }
  func.func @transform_7(%arg0: i32, %arg1: i32) -> (i32, i32, i32) {
    %c0_i32 = arith.constant 0 : i32
    %c0_i32_0 = arith.constant 0 : i32
    %c0_i32_1 = arith.constant 0 : i32
    return %arg0, %c0_i32, %c0_i32_0 : i32, i32, i32
  }
}

</mosaic_0001>

<bundles_post_ra>
// kernel: tpu_custom_call.1
= control target key start
LH: loop header
LB: loop body
LE: loop exit
PB: predicated region body
PF: predicated region fallthrough
CT: control target
= control target key end

     0   :  { %s7328_s0 = inlined_call_operand.hbm [shape: bf16[2,256,128], index: 0, kind: input, shape index: {}]   ;;  %s7329_s1 = inlined_call_operand.hbm [shape: bf16[128,2048], index: 1, kind: input, shape index: {}]   ;;  %s7330_s2 = inlined_call_operand.hbm [shape: f32[1,2048], index: 2, kind: input, shape index: {}]   ;;  %s7331_s3 = inlined_call_operand.hbm [shape: bf16[2048,128], index: 3, kind: input, shape index: {}]   ;;  %s7332_s4 = inlined_call_operand.vmem [shape: f32[1,128], index: 4, kind: input, shape index: {}]   ;;  %s7333_s5 = inlined_call_operand.hbm [shape: bf16[128,128], index: 5, kind: input, shape index: {}]   ;;  %s7334_s6 = inlined_call_operand.vmem [shape: f32[1,128], index: 6, kind: input, shape index: {}]   ;;  %s7335_s7 = inlined_call_operand.hbm [shape: f32[2,1,128], index: 7, kind: output, shape index: {}]  }
   0x1   :  { %7392 = sst [smem:[#allocation55_spill]] %s7329_s1 }
   0x2   :  { %7393 = sst [smem:[#allocation56_spill]] %s7330_s2 }
   0x3   :  { %7394 = sst [smem:[#allocation57_spill]] %s7331_s3 }
   0x4   :  { %7395 = sst [smem:[#allocation58_spill]] %s7333_s5 }
   0x5   :  { %7396 = sst [smem:[#allocation59_spill]] %s7334_s6 }
   0x6   :  { %7397 = sst [smem:[#allocation60_spill]] %s7335_s7 }
   0x7   :  { %12 = vsyncpa [#allocation4], 0 }
   0x8   :  { %14 = vsyncpa [#allocation4 + $0x1], 0 }
   0x9   :  { %15 = vsyncpa [#allocation7], 0 }
   0xa   :  { %16 = vsyncpa [#allocation10], 0 }
   0xb   :  { %17 = vsyncpa [#allocation5], 0 }
   0xc   :  { %19 = vsyncpa [#allocation5 + $0x1], 0  ;;  %s5833_s24 = smov 0   ;;  %s5835_s25 = smov 0  }
   0xd   :  { %s5837_s26 = smov 0   ;;  %s5839_s27 = smov 0  }
   0xe   :  { %s5841_s28 = smov 0   ;;  %s5843_s29 = smov 0  }
   0xf   :  { %s5845_s30 = smov 0   ;;  %s5847_s8 = smov 0  }
  0x10   :  { %s5849_s9 = smov 0   ;;  %s5851_s10 = smov 0  }
  0x11   :  { %s5853_s11 = smov 0  }
  0x12 LB: > { %7398 = sst [smem:[#allocation17_spill]] %s5736_s24  ;;  %s4720_s12 = sadd.s32 4294967295, %s5776_s11   ;;  %s5776_s11 = sphi %s5853_s11, %s25_s11   ;;  %s5772_s10 = sphi %s5851_s10, %s7643_s10   ;;  %s5768_s9 = sphi %s5849_s9, %s7642_s9   ;;  %s5764_s8 = sphi %s5847_s8, %s7641_s8   ;;  %s5760_s30 = sphi %s5845_s30, %s7640_s30   ;;  %s5756_s29 = sphi %s5843_s29, %s7639_s29   ;;  %s5752_s28 = sphi %s5841_s28, %s7638_s28   ;;  %s5748_s27 = sphi %s5839_s27, %s7637_s27   ;;  %s5744_s26 = sphi %s5837_s26, %s7636_s26   ;;  %s5740_s25 = sphi %s5835_s25, %s7635_s25   ;;  %s5736_s24 = sphi %s5833_s24, %s7634_s24  }
  0x13   : > { %7399 = sst [smem:[#allocation18_spill]] %s5764_s8  ;;  %s4721_s13 = sadd.s32 4294967294, %s5776_s11  }
  0x14   : > { %p59_p0 = scmp.ne.s32.totalorder %s5752_s28, %s5748_s27  ;;  %p5889_p1 = scmp.eq.s32.totalorder %s4720_s12, 0 }
  0x15   : > { %p208_p2 = scmp.ne.s32.totalorder %s5744_s26, %s5740_s25  ;;  %p209_p3 = scmp.eq.s32.totalorder %s4720_s12, 3 }
  0x16   : > { %s7400_s14 = scalar_select %p5889_p1, 1, 0 }
  0x17   : > { %p5897_p4 = por %p5889_p1, %p59_p0  ;;  %p214_p5 = scmp.ne.s32.totalorder %s5740_s25, %s5736_s24 }
  0x18   : > { %p5903_p6 = por %p209_p3, %p208_p2  ;;  %p215_p7 = scmp.eq.s32.totalorder %s4721_s13, 3 }
  0x19   : > { %s7401_s15 = scalar_select %p5897_p4, 1, 0 }
  0x1a   : > { %s7402_s16 = scalar_select %p5903_p6, 1, 0 }
  0x1b   : > { %p4722_p8 = scmp.ge.s32.totalorder %s5776_s11, 1  ;;  %p222_p9 = scmp.lt.s32.totalorder %s5776_s11, 5 }
  0x1c   : > { %7403 = sst [smem:[#allocation19_spill]] %s7402_s16  ;;  %p5909_p10 = por %p215_p7, %p214_p5 }
  0x1d   : > { %p5913_p11 = pnand %p4722_p8, %p222_p9  ;;  %s5778_s19 = smov [#allocation6]  }
  0x1e   : > { %s7404_s17 = scalar_select %p5909_p10, 1, 0 }
  0x1f   : > { %s7406_s18 = scalar_select %p5913_p11, 1, 0 }
  0x20   : > { %7405 = sst [smem:[#allocation20_spill]] %s7404_s17  ;;  %s234_s20 = sshll.u32 %s5778_s19, 4  ;;  %s235_s20 = int_to_ptr.vmem [resolvable:$true] %s234_s20 }
  0x21   : > { %p5240_p12 = pneg %p5913_p11  ;;  %s5779_s22 = smov [#allocation9]  }
  0x22   : > { %s258_s23 = sshll.u32 %s5779_s22, 4  ;;  %s5527_s27 = scalar_lea.vmem %s235_s20, 16384  ;;  %s259_s23 = int_to_ptr.vmem [resolvable:$true] %s258_s23 }
  0x23   : > { %p5921_p13 = pnand %p5240_p12, %p5889_p1  ;;  %p5528_p2 = scmp.ne.s32.totalorder %s235_s20, %s5527_s27 }
  0x24   : > { %p5535_p7 = scmp.lt.s32.totalorder %s235_s20, %s235_s20  ;;  %p5536_p8 = scmp.lt.s32.totalorder %s5527_s27, %s5527_s27 }
  0x25   : > { %p5518_p0 = pneg %p5921_p13 }
  0x26   : > { %p5537_p9 = por %p5536_p8, %p5535_p7 }
  0x27   : > { %p5530_p3 = pnand %p5528_p2, %p5518_p0 }
  0x29   : > { %p5531_p5 = pneg %p5530_p3 }
  0x2b   : > { %p5538_p12 = pnand %p5537_p9, %p5531_p5 }
  0x2d   : > { %5541 = shalt.err (!%p5538_p12)
}
  0x2e   : > { %s5780_s12 = smov 1024   ;;  %s7343_s13 = smov 64  }
  0x2f   : > { %s7408_s1 = sld [smem:[#allocation55_spill]]  ;;  %s5553_s17 = scalar_lea.vmem %s259_s23, 16384 }
  0x30   : > { %p5554_p10 = scmp.ne.s32.totalorder %s259_s23, %s5553_s17  ;;  %p5561_p6 = scmp.lt.s32.totalorder %s259_s23, %s259_s23 }
  0x31   : > { %p5562_p7 = scmp.lt.s32.totalorder %s5553_s17, %s5553_s17 }
  0x32   : > { %p5556_p2 = pnand %p5554_p10, %p5518_p0 }
  0x33   : > { %p5563_p5 = por %p5562_p7, %p5561_p6 }
  0x34   : > { %p5557_p3 = pneg %p5556_p2 }
  0x35   : > { %5243 = dma.hbm_to_vmem [thread:$0]  (!%p5921_p13), %s7408_s1, 16384, %s235_s20, [#allocation7], %s5780_s12, %s5780_s12, %s7343_s13  }
  0x36   : > { %p5564_p8 = pnand %p5563_p5, %p5557_p3 }
  0x38   : > { %5567 = shalt.err (!%p5564_p8)
}
  0x39   : > { %s7344_s27 = smov 4   ;;  %s7409_s3 = sld [smem:[#allocation57_spill]] }
  0x3a   : > { %s5783_s20 = smov [#allocation8]   ;;  %s5784_s22 = smov [#allocation11]  }
  0x3b   : > { %s248_s12 = sshll.u32 %s5783_s20, 4  ;;  %s274_s1 = sshll.u32 %s5784_s22, 4  ;;  %s249_s12 = int_to_ptr.vmem [resolvable:$true] %s248_s12  ;;  %s275_s1 = int_to_ptr.vmem [resolvable:$true] %s274_s1 }
  0x3c   : > { %s5579_s17 = scalar_lea.vmem %s249_s12, 256  ;;  %p5587_p12 = scmp.lt.s32.totalorder %s249_s12, %s249_s12 }
  0x3d   : > { %p5580_p6 = scmp.ne.s32.totalorder %s249_s12, %s5579_s17  ;;  %p5588_p2 = scmp.lt.s32.totalorder %s5579_s17, %s5579_s17 }
  0x3f   : > { %5249 = dma.hbm_to_vmem [thread:$0]  (!%p5921_p13), %s7409_s3, 16384, %s259_s23, [#allocation10], %s7343_s13, %s7343_s13, %s7344_s27  }
  0x40   : > { %p5582_p10 = pnand %p5580_p6, %p5518_p0  ;;  %p5589_p3 = por %p5588_p2, %p5587_p12 }
  0x42   : > { %p5583_p9 = pneg %p5582_p10 }
  0x44   : > { %p5590_p7 = pnand %p5589_p3, %p5583_p9 }
  0x46   : > { %5593 = shalt.err (!%p5590_p7)
}
  0x47   : > { %s7410_s2 = sld [smem:[#allocation56_spill]]  ;;  %s5605_s19 = scalar_lea.vmem %s275_s1, 1024 }
  0x48   : > { %p5606_p5 = scmp.ne.s32.totalorder %s275_s1, %s5605_s19  ;;  %p5613_p6 = scmp.lt.s32.totalorder %s275_s1, %s275_s1 }
  0x49   : > { %p5614_p10 = scmp.lt.s32.totalorder %s5605_s19, %s5605_s19 }
  0x4a   : > { %p5608_p8 = pnand %p5606_p5, %p5518_p0 }
  0x4b   : > { %p5615_p4 = por %p5614_p10, %p5613_p6 }
  0x4c   : > { %p5609_p1 = pneg %p5608_p8 }
  0x4d   : > { %5246 = dma.hbm_to_vmem [thread:$0]  (!%p5921_p13), %s7410_s2, 256, %s249_s12, [#allocation7]  }
  0x4e   : > { %p5616_p11 = pnand %p5615_p4, %p5609_p1 }
  0x50   : > { %5619 = shalt.err (!%p5616_p11)
}
  0x51   : > { %s7411_s5 = sld [smem:[#allocation58_spill]]  ;;  %s34_s12 = sadd.s32 1, %s5768_s9 }
  0x52   : > { %s37_s21 = sadd.s32 1, %s5772_s10  ;;  %p35_p1 = scmp.ge.s32.totalorder %s34_s12, 2 }
  0x53   : > { %s46_s17 = sadd.s32 1, %s5756_s29  ;;  %p53_p4 = scmp.ne.s32.totalorder %s5756_s29, %s5752_s28 }
  0x54   : > { %p54_p11 = scmp.eq.s32.totalorder %s5776_s11, 0  ;;  %s7645_s12 = smov (%p35_p1, %s34_s12), 0 }
  0x55   : > { %7412 = sst [smem:[#allocation21_spill]] %s7645_s12  ;;  %s7647_s21 = smov (!%p35_p1, %s37_s21), %s5772_s10 }
  0x56   : > { %s42_s24 = ssub.s32 %s5768_s9, %s7645_s12  ;;  %p5977_p0 = por %p54_p11, %p53_p4 }
  0x57   : > { %5252 = dma.hbm_to_vmem [thread:$0]  (!%p5921_p13), %s7411_s5, 1024, %s275_s1, [#allocation10], %s7343_s13, %s7343_s13, %s7344_s27  }
  0x58   : > { %p39_p13 = scmp.ge.s32.totalorder %s7647_s21, 2  ;;  %s198_s1 = sadd.s32 1, %s5744_s26 }
  0x59   : > { %p5265_p9 = scmp.lt.s32.totalorder %s5776_s11, 4  ;;  %s291_s19 = sand.u32 1, %s5756_s29  }
  0x5a   : > { %s7649_s21 = smov (%p39_p13, %s7647_s21), 0  ;;  %s4728_s20 = sshll.u32 %s291_s19, 6 }
  0x5b   : > { %s41_s22 = ssub.s32 %s5772_s10, %s7649_s21  ;;  %s4729_s27 = sshll.u32 %s5768_s9, 4 }
  0x5c   : > { %s43_s13 = sor.u32 %s42_s24, %s41_s22  ;;  %p196_p12 = scmp.eq.s32.totalorder %s41_s22, 0 }
  0x5d   : > { %p44_p2 = scmp.eq.s32.totalorder %s43_s13, 0  ;;  %s4730_s5 = sshll.u32 %s5772_s10, 5 }
  0x5e   : > { %s5990_s2 = scalar_select %p196_p12, %s5744_s26, %s198_s1  }
  0x5f   : > { %s5993_s3 = scalar_select %p44_p2, %s5756_s29, %s46_s17  }
  0x60   : > { %s295_s12 = scalar_lea.vmem [#allocation3], %s4728_s20  ;;  %s301_s16 = sadd.s32 %s4730_s5, %s4729_s27 }
  0x61   : > { %s304_s7 = sshll.u32 %s295_s12, 4  ;;  %s4731_s8 = sshll.u32 %s301_s16, 6  ;;  %s305_s7 = int_to_ptr.vmem [resolvable:$true] %s304_s7 }
  0x62   : > { %p6000_p3 = pnand %p5265_p9, %p5977_p0  ;;  %s303_s13 = scalar_lea.hbm %s7328_s0, %s4731_s8 }
  0x63   : > { %s292_s1 = scalar_lea.sflag [#allocation4], %s291_s19  ;;  %s5633_s17 = scalar_lea.vmem %s305_s7, 1024 }
  0x64   : > { %p5622_p7 = pneg %p6000_p3  ;;  %p5634_p5 = scmp.ne.s32.totalorder %s305_s7, %s5633_s17 }
  0x65   : > { %s5785_s5 = smov [#allocation3]  }
  0x66   : > { %p5636_p8 = pnand %p5634_p5, %p5622_p7  ;;  %s5638_s16 = sshll.u32 %s5785_s5, 4  ;;  %s5639_s16 = int_to_ptr.vmem [resolvable:$false] %s5638_s16 }
  0x67   : > { %s5640_s27 = scalar_lea.vmem %s5639_s16, 2048  ;;  %p5641_p10 = scmp.lt.s32.totalorder %s305_s7, %s5639_s16 }
  0x68   : > { %p5637_p6 = pneg %p5636_p8  ;;  %p5642_p1 = scmp.lt.s32.totalorder %s5640_s27, %s5633_s17 }
  0x6a   : > { %p5643_p4 = por %p5642_p1, %p5641_p10 }
  0x6c   : > { %p5644_p11 = pnand %p5643_p4, %p5637_p6 }
  0x6e   : > { %5647 = shalt.err (!%p5644_p11)
}
  0x6f   : > { %s7415_s12 = smov 4   ;;  %s7416_s8 = smov 64  }
  0x70   : > { %5256 = dma.hbm_to_vmem [thread:$0]  (!%p6000_p3), %s303_s13, 1024, %s305_s7, %s292_s1, %s7416_s8, %s7416_s8, %s7415_s12  }
  0x71   : > { %p7417_p0 = scmp.ne.s32.totalorder %s7406_s18, 0 }
  0x73   : > { %316 = sbr.rel (%p7417_p0) target bundleno = 1426 (0x592), region = 48 }
  0x78   : > { %s318_s23 = sand.u32 1, %s5752_s28   ;;  %p7418_p13 = scmp.ne.s32.totalorder %s7401_s15, 0 }
  0x79   : > { %s4733_s19 = sshll.u32 %s318_s23, 6  ;;  %s319_s20 = scalar_lea.sflag [#allocation4], %s318_s23 }
  0x7a   : > { %s6017_s24 = scalar_lea.vmem [#allocation3], %s4733_s19 }
  0x7b   : > { %5719 = dma.done.wait (%p7418_p13), %s319_s20, 1024  }
  0x7c   : > { %5721 = vsyncadd (%p7418_p13), %s319_s20, 4294966272  ;;  %p7419_p9 = scmp.ne.s32.totalorder %s7400_s14, 0 }
  0x7e   : > { %5723 = dma.done.wait (%p7419_p9), [#allocation7], 16640  }
  0x7f   : > { %5725 = vsyncadd (%p7419_p9), [#allocation7], 4294950656 }
  0x80   : > { %5727 = dma.done.wait (%p7419_p9), [#allocation10], 17408  }
  0x81   : > { %5729 = vsyncadd (%p7419_p9), [#allocation10], 4294949888  ;;  %s366_s6 = sand.u32 1, %s5740_s25   ;;  %p4738_p12 = scmp.ne.s32.totalorder %s5760_s30, 0 }
  0x82   : > { %s6034_s7 = scalar_lea.vmem [#allocation12], %s366_s6 }
  0x83   : > { %374 = sbr.rel (%p4738_p12) target bundleno = 138 (0x8a), region = 72 }
  0x88   : > { %v5786_v0 = vmov 0.0  }
  0x89   : > { %375 = vst [vmem:[#allocation2] sm:$0xff] %v5786_v0  ;;  %376 = vst [vmem:[#allocation2 + $0x8] sm:$0xff] %v5786_v0 }
  0x8a PF: > { %v505_v1 = vld [vmem:[#allocation6 + $0x380] sm:$0xff]  ;;  %v506_v3 = vld [vmem:[#allocation6 + $0x388] sm:$0xff]  ;;  %v7349_v9 = vmov 0   ;;  %v507_v0 = vld [vmem:[#allocation6 + $0x390] sm:$0xff]  ;;  %p4875_p2 = scmp.ne.s32.totalorder %s5760_s30, 1 }
  0x8b   : > { %v513_v2 = vld [vmem:[#allocation6 + $0x3c0] sm:$0xff]  ;;  %v514_v5 = vld [vmem:[#allocation6 + $0x3c8] sm:$0xff]  ;;  %1325 = vmatprep.mubr.bf16.mxu0 %v7349_v9  ;;  %1438 = vmatprep.mubr.bf16.mxu1 %v7349_v9  ;;  %s7624_s22 = sld [smem:[#allocation59_spill]] (!%p4875_p2) }
  0x8c   : > { %v4860_v4 = vcombine.high %v505_v1, %v513_v2  ;;  %v4859_v6 = vcombine.low %v505_v1, %v513_v2  ;;  %v489_v7 = vld [vmem:[#allocation6 + $0x300] sm:$0xff]  ;;  %v4862_v10 = vcombine.high %v506_v3, %v514_v5  ;;  %v4861_v11 = vcombine.low %v506_v3, %v514_v5  ;;  %v490_v13 = vld [vmem:[#allocation6 + $0x308] sm:$0xff]  ;;  %v515_v1 = vld [vmem:[#allocation6 + $0x3d0] sm:$0xff] }
  0x8d   : > { %v497_v8 = vld [vmem:[#allocation6 + $0x340] sm:$0xff]  ;;  %v498_v14 = vld [vmem:[#allocation6 + $0x348] sm:$0xff]  ;;  %v508_v2 = vld [vmem:[#allocation6 + $0x398] sm:$0xff] }
  0x8e   : > { %v4844_v12 = vcombine.high %v489_v7, %v497_v8  ;;  %v473_v15 = vld [vmem:[#allocation6 + $0x280] sm:$0xff]  ;;  %1293 = vmatprep.subr.bf16.mxu0 %v4860_v4  ;;  %v4846_v16 = vcombine.high %v490_v13, %v498_v14  ;;  %v474_v18 = vld [vmem:[#allocation6 + $0x288] sm:$0xff]  ;;  %1406 = vmatprep.subr.bf16.mxu1 %v4862_v10  ;;  %v4843_v20 = vcombine.low %v489_v7, %v497_v8  ;;  %v516_v3 = vld [vmem:[#allocation6 + $0x3d8] sm:$0xff] }
  0x8f   : > { %v481_v17 = vld [vmem:[#allocation6 + $0x2c0] sm:$0xff]  ;;  %v482_v19 = vld [vmem:[#allocation6 + $0x2c8] sm:$0xff]  ;;  %1294 = vmatpush1.bf16.msra.mxu0 %v4859_v6  ;;  %1407 = vmatpush1.bf16.msra.mxu1 %v4861_v11  ;;  %v4845_v21 = vcombine.low %v490_v13, %v498_v14  ;;  %v4864_v6 = vcombine.high %v507_v0, %v515_v1  ;;  %v4866_v7 = vcombine.high %v508_v2, %v516_v3  ;;  %v491_v10 = vld [vmem:[#allocation6 + $0x310] sm:$0xff] }
  0x90   : > { %1295 = vmatprep.subr.bf16.mxu0 %v4844_v12  ;;  %v4828_v22 = vcombine.high %v473_v15, %v481_v17  ;;  %1408 = vmatprep.subr.bf16.mxu1 %v4846_v16  ;;  %v4830_v23 = vcombine.high %v474_v18, %v482_v19  ;;  %v457_v24 = vld [vmem:[#allocation6 + $0x200] sm:$0xff]  ;;  %v458_v26 = vld [vmem:[#allocation6 + $0x208] sm:$0xff]  ;;  %v4827_v28 = vcombine.low %v473_v15, %v481_v17  ;;  %v499_v11 = vld [vmem:[#allocation6 + $0x350] sm:$0xff] }
  0x91   : > { %v465_v25 = vld [vmem:[#allocation6 + $0x240] sm:$0xff]  ;;  %v466_v27 = vld [vmem:[#allocation6 + $0x248] sm:$0xff]  ;;  %v4829_v29 = vcombine.low %v474_v18, %v482_v19  ;;  %v4863_v12 = vcombine.low %v507_v0, %v515_v1  ;;  %v492_v13 = vld [vmem:[#allocation6 + $0x318] sm:$0xff]  ;;  %v4865_v15 = vcombine.low %v508_v2, %v516_v3  ;;  %v4848_v16 = vcombine.high %v491_v10, %v499_v11 }
  0x92   : > { %v4812_v30 = vcombine.high %v457_v24, %v465_v25  ;;  %v4814_v31 = vcombine.high %v458_v26, %v466_v27  ;;  %v441_v32 = vld [vmem:[#allocation6 + $0x180] sm:$0xff]  ;;  %v442_v34 = vld [vmem:[#allocation6 + $0x188] sm:$0xff]  ;;  %v4811_v36 = vcombine.low %v457_v24, %v465_v25  ;;  %v4813_v37 = vcombine.low %v458_v26, %v466_v27  ;;  %v500_v14 = vld [vmem:[#allocation6 + $0x358] sm:$0xff] }
  0x93   : > { %1296 = vmatpush1.bf16.msra.mxu0 %v4843_v20  ;;  %1409 = vmatpush1.bf16.msra.mxu1 %v4845_v21  ;;  %v449_v33 = vld [vmem:[#allocation6 + $0x1c0] sm:$0xff]  ;;  %v450_v35 = vld [vmem:[#allocation6 + $0x1c8] sm:$0xff]  ;;  %v475_v17 = vld [vmem:[#allocation6 + $0x290] sm:$0xff]  ;;  %v4850_v19 = vcombine.high %v492_v13, %v500_v14 }
  0x94   : > { %1297 = vmatprep.subr.bf16.mxu0 %v4828_v22  ;;  %1410 = vmatprep.subr.bf16.mxu1 %v4830_v23  ;;  %v4796_v38 = vcombine.high %v441_v32, %v449_v33  ;;  %v4798_v39 = vcombine.high %v442_v34, %v450_v35  ;;  %v425_v40 = vld [vmem:[#allocation6 + $0x100] sm:$0xff]  ;;  %v426_v42 = vld [vmem:[#allocation6 + $0x108] sm:$0xff]  ;;  %v4795_v44 = vcombine.low %v441_v32, %v449_v33  ;;  %v483_v18 = vld [vmem:[#allocation6 + $0x2d0] sm:$0xff] }
  0x95   : > { %v433_v41 = vld [vmem:[#allocation6 + $0x140] sm:$0xff]  ;;  %v434_v43 = vld [vmem:[#allocation6 + $0x148] sm:$0xff]  ;;  %v4797_v45 = vcombine.low %v442_v34, %v450_v35  ;;  %v476_v20 = vld [vmem:[#allocation6 + $0x298] sm:$0xff]  ;;  %v4847_v22 = vcombine.low %v491_v10, %v499_v11  ;;  %v4849_v23 = vcombine.low %v492_v13, %v500_v14  ;;  %v4832_v24 = vcombine.high %v475_v17, %v483_v18 }
  0x96   : > { %v4780_v46 = vcombine.high %v425_v40, %v433_v41  ;;  %v4782_v47 = vcombine.high %v426_v42, %v434_v43  ;;  %v409_v48 = vld [vmem:[#allocation6 + $0x80] sm:$0xff]  ;;  %v410_v50 = vld [vmem:[#allocation6 + $0x88] sm:$0xff]  ;;  %v4779_v52 = vcombine.low %v425_v40, %v433_v41  ;;  %v4781_v53 = vcombine.low %v426_v42, %v434_v43  ;;  %v484_v21 = vld [vmem:[#allocation6 + $0x2d8] sm:$0xff] }
  0x97   : > { %1298 = vmatpush1.bf16.msra.mxu0 %v4827_v28  ;;  %1411 = vmatpush1.bf16.msra.mxu1 %v4829_v29  ;;  %v417_v49 = vld [vmem:[#allocation6 + $0xc0] sm:$0xff]  ;;  %v418_v51 = vld [vmem:[#allocation6 + $0xc8] sm:$0xff]  ;;  %v4834_v25 = vcombine.high %v476_v20, %v484_v21  ;;  %v459_v27 = vld [vmem:[#allocation6 + $0x210] sm:$0xff]  ;;  %v4833_v32 = vcombine.low %v476_v20, %v484_v21 }
  0x98   : > { %1299 = vmatprep.subr.bf16.mxu0 %v4812_v30  ;;  %1412 = vmatprep.subr.bf16.mxu1 %v4814_v31  ;;  %v4764_v54 = vcombine.high %v409_v48, %v417_v49  ;;  %v393_v55 = vld [vmem:[#allocation6] sm:$0xff]  ;;  %v4766_v56 = vcombine.high %v410_v50, %v418_v51  ;;  %v394_v58 = vld [vmem:[#allocation6 + $0x8] sm:$0xff]  ;;  %v4763_v60 = vcombine.low %v409_v48, %v417_v49  ;;  %v467_v28 = vld [vmem:[#allocation6 + $0x250] sm:$0xff] }
  0x99   : > { %v401_v57 = vld [vmem:[#allocation6 + $0x40] sm:$0xff]  ;;  %v402_v59 = vld [vmem:[#allocation6 + $0x48] sm:$0xff]  ;;  %v4765_v61 = vcombine.low %v410_v50, %v418_v51  ;;  %v460_v29 = vld [vmem:[#allocation6 + $0x218] sm:$0xff]  ;;  %v4831_v31 = vcombine.low %v475_v17, %v483_v18  ;;  %v4816_v33 = vcombine.high %v459_v27, %v467_v28 }
  0x9a   : > { %v4748_v62 = vcombine.high %v393_v55, %v401_v57  ;;  %v4750_v63 = vcombine.high %v394_v58, %v402_v59  ;;  %v4747_v4 = vcombine.low %v393_v55, %v401_v57  ;;  %v4749_v5 = vcombine.low %v394_v58, %v402_v59  ;;  %v6040_v8 = vld [vmem:[%s6017_s24] sm:$0xff]   ;;  %v6047_v26 = vld [vmem:[%s6017_s24 + $0x8] sm:$0xff]   ;;  %v468_v30 = vld [vmem:[#allocation6 + $0x258] sm:$0xff] }
  0x9b   : > { %1300 = vmatpush1.bf16.msra.mxu0 %v4811_v36  ;;  %1413 = vmatpush1.bf16.msra.mxu1 %v4813_v37  ;;  %v4818_v34 = vcombine.high %v460_v29, %v468_v30  ;;  %v443_v35 = vld [vmem:[#allocation6 + $0x190] sm:$0xff]  ;;  %v444_v37 = vld [vmem:[#allocation6 + $0x198] sm:$0xff]  ;;  %v4817_v40 = vcombine.low %v460_v29, %v468_v30  ;;  %v518_v10 = vld [vmem:[#allocation6 + $0x3e8] sm:$0xff] }
  0x9c   : > { %1301 = vmatprep.subr.bf16.mxu0 %v4796_v38  ;;  %1414 = vmatprep.subr.bf16.mxu1 %v4798_v39  ;;  %v451_v36 = vld [vmem:[#allocation6 + $0x1d0] sm:$0xff]  ;;  %v452_v38 = vld [vmem:[#allocation6 + $0x1d8] sm:$0xff]  ;;  %v4815_v39 = vcombine.low %v459_v27, %v467_v28  ;;  %v6068_v14 = vld [vmem:[%s6017_s24 + $0x20] sm:$0xff]  }
  0x9d   : > { %v4800_v41 = vcombine.high %v443_v35, %v451_v36  ;;  %v6054_v42 = vld [vmem:[%s6017_s24 + $0x10] sm:$0xff]   ;;  %v4802_v43 = vcombine.high %v444_v37, %v452_v38  ;;  %v4799_v48 = vcombine.low %v443_v35, %v451_v36  ;;  %v4801_v49 = vcombine.low %v444_v37, %v452_v38  ;;  %v420_v55 = vld [vmem:[#allocation6 + $0xd8] sm:$0xff]  ;;  %v501_v20 = vld [vmem:[#allocation6 + $0x360] sm:$0xff] }
  0x9e   : > { %v6061_v59 = vld [vmem:[%s6017_s24 + $0x18] sm:$0xff]   ;;  %v6082_v17 = vld [vmem:[%s6017_s24 + $0x30] sm:$0xff]   ;;  %v477_v27 = vld [vmem:[#allocation6 + $0x2a0] sm:$0xff] }
  0x9f   : > { %1302 = vmatpush1.bf16.msra.mxu0 %v4795_v44  ;;  %1415 = vmatpush1.bf16.msra.mxu1 %v4797_v45  ;;  %v427_v44 = vld [vmem:[#allocation6 + $0x110] sm:$0xff]  ;;  %v404_v0 = vld [vmem:[#allocation6 + $0x58] sm:$0xff]  ;;  %v485_v28 = vld [vmem:[#allocation6 + $0x2e0] sm:$0xff] }
  0xa0   : > { %1303 = vmatprep.subr.bf16.mxu0 %v4780_v46  ;;  %1416 = vmatprep.subr.bf16.mxu1 %v4782_v47  ;;  %v435_v45 = vld [vmem:[#allocation6 + $0x150] sm:$0xff]  ;;  %v428_v46 = vld [vmem:[#allocation6 + $0x118] sm:$0xff]  ;;  %v478_v30 = vld [vmem:[#allocation6 + $0x2a8] sm:$0xff] }
  0xa1   : > { %v436_v47 = vld [vmem:[#allocation6 + $0x158] sm:$0xff]  ;;  %v4784_v50 = vcombine.high %v427_v44, %v435_v45  ;;  %v461_v36 = vld [vmem:[#allocation6 + $0x220] sm:$0xff]  ;;  %v462_v38 = vld [vmem:[#allocation6 + $0x228] sm:$0xff] }
  0xa2   : > { %v4786_v51 = vcombine.high %v428_v46, %v436_v47  ;;  %v4785_v57 = vcombine.low %v428_v46, %v436_v47  ;;  %v6089_v18 = vld [vmem:[%s6017_s24 + $0x38] sm:$0xff]   ;;  %v469_v37 = vld [vmem:[#allocation6 + $0x260] sm:$0xff]  ;;  %v446_v47 = vld [vmem:[#allocation6 + $0x1a8] sm:$0xff] }
  0xa3   : > { %1304 = vmatpush1.bf16.msra.mxu0 %v4779_v52  ;;  %1417 = vmatpush1.bf16.msra.mxu1 %v4781_v53  ;;  %v411_v52 = vld [vmem:[#allocation6 + $0x90] sm:$0xff]  ;;  %v453_v46 = vld [vmem:[#allocation6 + $0x1e0] sm:$0xff] }
  0xa4   : > { %1305 = vmatprep.subr.bf16.mxu0 %v4764_v54  ;;  %1418 = vmatprep.subr.bf16.mxu1 %v4766_v56  ;;  %v419_v53 = vld [vmem:[#allocation6 + $0xd0] sm:$0xff]  ;;  %v412_v54 = vld [vmem:[#allocation6 + $0x98] sm:$0xff]  ;;  %v4783_v56 = vcombine.low %v427_v44, %v435_v45  ;;  %v445_v45 = vld [vmem:[#allocation6 + $0x1a0] sm:$0xff] }
  0xa5   : > { %v4768_v58 = vcombine.high %v411_v52, %v419_v53  ;;  %v4767_v1 = vcombine.low %v411_v52, %v419_v53  ;;  %v4769_v2 = vcombine.low %v412_v54, %v420_v55  ;;  %v429_v53 = vld [vmem:[#allocation6 + $0x120] sm:$0xff] }
  0xa7   : > { %1306 = vmatpush1.bf16.msra.mxu0 %v4763_v60  ;;  %1419 = vmatpush1.bf16.msra.mxu1 %v4765_v61  ;;  %v4770_v60 = vcombine.high %v412_v54, %v420_v55  ;;  %v395_v61 = vld [vmem:[#allocation6 + $0x10] sm:$0xff]  ;;  %v437_v54 = vld [vmem:[#allocation6 + $0x160] sm:$0xff]  ;;  %v430_v55 = vld [vmem:[#allocation6 + $0x128] sm:$0xff] }
  0xa8   : > { %1307 = vmatprep.subr.bf16.mxu0 %v4748_v62  ;;  %1420 = vmatprep.subr.bf16.mxu1 %v4750_v63  ;;  %v403_v62 = vld [vmem:[#allocation6 + $0x50] sm:$0xff]  ;;  %v396_v63 = vld [vmem:[#allocation6 + $0x18] sm:$0xff] }
  0xa9   : > { %v4752_v3 = vcombine.high %v395_v61, %v403_v62  ;;  %v4751_v11 = vcombine.low %v395_v61, %v403_v62  ;;  %v413_v62 = vld [vmem:[#allocation6 + $0xa0] sm:$0xff] }
  0xab   : > { %1308 = vmatpush1.bf16.msra.mxu0 %v4747_v4  ;;  %1421 = vmatpush1.bf16.msra.mxu1 %v4749_v5  ;;  %v4754_v4 = vcombine.high %v396_v63, %v404_v0  ;;  %v509_v5 = vld [vmem:[#allocation6 + $0x3a0] sm:$0xff] }
  0xac   : > { %1519 = vmatprep.subr.bf16.mxu0 %v4864_v6  ;;  %1632 = vmatprep.subr.bf16.mxu1 %v4866_v7  ;;  %v517_v6 = vld [vmem:[#allocation6 + $0x3e0] sm:$0xff]  ;;  %v510_v7 = vld [vmem:[#allocation6 + $0x3a8] sm:$0xff] }
  0xad   : > { %v4868_v13 = vcombine.high %v509_v5, %v517_v6  ;;  %v4867_v21 = vcombine.low %v509_v5, %v517_v6  ;;  %v397_v6 = vld [vmem:[#allocation6 + $0x20] sm:$0xff] }
  0xae   : > { %1326 = vmatmul.mubr.bf16.vlgmr.msra.gmra.mxu0 %v6040_v8  ;;  %1439 = vmatmul.mubr.bf16.vlgmr.msra.gmra.mxu1 %v6040_v8 }
  0xaf   : > { %1520 = vmatpush1.bf16.msra.mxu0 %v4863_v12  ;;  %1633 = vmatpush1.bf16.msra.mxu1 %v4865_v15  ;;  %v4753_v12 = vcombine.low %v396_v63, %v404_v0  ;;  %v4870_v15 = vcombine.high %v510_v7, %v518_v10  ;;  %v421_v63 = vld [vmem:[#allocation6 + $0xe0] sm:$0xff]  ;;  %v414_v0 = vld [vmem:[#allocation6 + $0xa8] sm:$0xff] }
  0xb0   : > { %1335 = vmatprep.mubr.bf16.mxu0 %v7349_v9  ;;  %1448 = vmatprep.mubr.bf16.mxu1 %v7349_v9 }
  0xb1   : > { %1521 = vmatprep.subr.bf16.mxu0 %v4848_v16  ;;  %1634 = vmatprep.subr.bf16.mxu1 %v4850_v19  ;;  %v6075_v16 = vld [vmem:[%s6017_s24 + $0x28] sm:$0xff]   ;;  %v493_v19 = vld [vmem:[#allocation6 + $0x320] sm:$0xff] }
  0xb3   : > { %1522 = vmatpush1.bf16.msra.mxu0 %v4847_v22  ;;  %1635 = vmatpush1.bf16.msra.mxu1 %v4849_v23  ;;  %v494_v22 = vld [vmem:[#allocation6 + $0x328] sm:$0xff] }
  0xb4   : > { %1523 = vmatprep.subr.bf16.mxu0 %v4832_v24  ;;  %1636 = vmatprep.subr.bf16.mxu1 %v4834_v25  ;;  %v502_v23 = vld [vmem:[#allocation6 + $0x368] sm:$0xff]  ;;  %v4869_v24 = vcombine.low %v510_v7, %v518_v10  ;;  %v4852_v25 = vcombine.high %v493_v19, %v501_v20  ;;  %v405_v7 = vld [vmem:[#allocation6 + $0x60] sm:$0xff] }
  0xb5   : > { %v4854_v29 = vcombine.high %v494_v22, %v502_v23  ;;  %v398_v10 = vld [vmem:[#allocation6 + $0x28] sm:$0xff] }
  0xb6   : > { %1336 = vmatmul.mubr.bf16.gmra.mxu0 %v6047_v26  ;;  %1449 = vmatmul.mubr.bf16.gmra.mxu1 %v6047_v26 }
  0xb7   : > { %1345 = vmatprep.mubr.bf16.mxu0 %v7349_v9  ;;  %1458 = vmatprep.mubr.bf16.mxu1 %v7349_v9 }
  0xb8   : > { %1524 = vmatpush1.bf16.msra.mxu0 %v4831_v31  ;;  %1637 = vmatpush1.bf16.msra.mxu1 %v4833_v32  ;;  %v486_v31 = vld [vmem:[#allocation6 + $0x2e8] sm:$0xff]  ;;  %v4851_v32 = vcombine.low %v493_v19, %v501_v20  ;;  %v511_v20 = vld [vmem:[#allocation6 + $0x3b0] sm:$0xff] }
  0xb9   : > { %1525 = vmatprep.subr.bf16.mxu0 %v4816_v33  ;;  %1638 = vmatprep.subr.bf16.mxu1 %v4818_v34  ;;  %v4853_v33 = vcombine.low %v494_v22, %v502_v23  ;;  %v4836_v34 = vcombine.high %v477_v27, %v485_v28  ;;  %v4838_v35 = vcombine.high %v478_v30, %v486_v31  ;;  %v512_v22 = vld [vmem:[#allocation6 + $0x3b8] sm:$0xff] }
  0xba   : > { %v520_v23 = vld [vmem:[#allocation6 + $0x3f8] sm:$0xff] }
  0xbc   : > { %1526 = vmatpush1.bf16.msra.mxu0 %v4815_v39  ;;  %1639 = vmatpush1.bf16.msra.mxu1 %v4817_v40  ;;  %v470_v39 = vld [vmem:[#allocation6 + $0x268] sm:$0xff]  ;;  %v4835_v40 = vcombine.low %v477_v27, %v485_v28  ;;  %v4874_v28 = vcombine.high %v512_v22, %v520_v23 }
  0xbd   : > { %1527 = vmatprep.subr.bf16.mxu0 %v4800_v41  ;;  %1640 = vmatprep.subr.bf16.mxu1 %v4802_v43  ;;  %v4837_v41 = vcombine.low %v478_v30, %v486_v31  ;;  %v4820_v43 = vcombine.high %v461_v36, %v469_v37  ;;  %v4822_v44 = vcombine.high %v462_v38, %v470_v39  ;;  %v503_v30 = vld [vmem:[#allocation6 + $0x370] sm:$0xff] }
  0xbe   : > { %1346 = vmatmul.mubr.bf16.gmra.mxu0 %v6054_v42  ;;  %1459 = vmatmul.mubr.bf16.gmra.mxu1 %v6054_v42 }
  0xbf   : > { %1355 = vmatprep.mubr.bf16.mxu0 %v7349_v9  ;;  %1468 = vmatprep.mubr.bf16.mxu1 %v7349_v9 }
  0xc0   : > { %1528 = vmatpush1.bf16.msra.mxu0 %v4799_v48  ;;  %1641 = vmatpush1.bf16.msra.mxu1 %v4801_v49  ;;  %v454_v48 = vld [vmem:[#allocation6 + $0x1e8] sm:$0xff]  ;;  %v4819_v49 = vcombine.low %v461_v36, %v469_v37  ;;  %v479_v36 = vld [vmem:[#allocation6 + $0x2b0] sm:$0xff] }
  0xc1   : > { %1529 = vmatprep.subr.bf16.mxu0 %v4784_v50  ;;  %1642 = vmatprep.subr.bf16.mxu1 %v4786_v51  ;;  %v4821_v50 = vcombine.low %v462_v38, %v470_v39  ;;  %v4804_v51 = vcombine.high %v445_v45, %v453_v46  ;;  %v4806_v52 = vcombine.high %v446_v47, %v454_v48  ;;  %v487_v37 = vld [vmem:[#allocation6 + $0x2f0] sm:$0xff]  ;;  %v480_v39 = vld [vmem:[#allocation6 + $0x2b8] sm:$0xff] }
  0xc4   : > { %1530 = vmatpush1.bf16.msra.mxu0 %v4783_v56  ;;  %1643 = vmatpush1.bf16.msra.mxu1 %v4785_v57  ;;  %v438_v56 = vld [vmem:[#allocation6 + $0x168] sm:$0xff]  ;;  %v4803_v57 = vcombine.low %v445_v45, %v453_v46  ;;  %v463_v46 = vld [vmem:[#allocation6 + $0x230] sm:$0xff] }
  0xc5   : > { %1531 = vmatprep.subr.bf16.mxu0 %v4768_v58  ;;  %1644 = vmatprep.subr.bf16.mxu1 %v4770_v60  ;;  %v4805_v58 = vcombine.low %v446_v47, %v454_v48  ;;  %v4788_v60 = vcombine.high %v429_v53, %v437_v54  ;;  %v4790_v61 = vcombine.high %v430_v55, %v438_v56  ;;  %v471_v47 = vld [vmem:[#allocation6 + $0x270] sm:$0xff]  ;;  %v464_v48 = vld [vmem:[#allocation6 + $0x238] sm:$0xff] }
  0xc6   : > { %1356 = vmatmul.mubr.bf16.gmra.mxu0 %v6061_v59  ;;  %1469 = vmatmul.mubr.bf16.gmra.mxu1 %v6061_v59 }
  0xc7   : > { %1365 = vmatprep.mubr.bf16.mxu0 %v7349_v9  ;;  %1478 = vmatprep.mubr.bf16.mxu1 %v7349_v9 }
  0xc8   : > { %1532 = vmatpush1.bf16.msra.mxu0 %v4767_v1  ;;  %1645 = vmatpush1.bf16.msra.mxu1 %v4769_v2  ;;  %v422_v1 = vld [vmem:[#allocation6 + $0xe8] sm:$0xff]  ;;  %v4787_v2 = vcombine.low %v429_v53, %v437_v54  ;;  %v447_v54 = vld [vmem:[#allocation6 + $0x1b0] sm:$0xff] }
  0xc9   : > { %1533 = vmatprep.subr.bf16.mxu0 %v4752_v3  ;;  %1646 = vmatprep.subr.bf16.mxu1 %v4754_v4  ;;  %v4789_v3 = vcombine.low %v430_v55, %v438_v56  ;;  %v4772_v4 = vcombine.high %v413_v62, %v421_v63  ;;  %v4774_v5 = vcombine.high %v414_v0, %v422_v1  ;;  %v455_v55 = vld [vmem:[#allocation6 + $0x1f0] sm:$0xff]  ;;  %v448_v56 = vld [vmem:[#allocation6 + $0x1b8] sm:$0xff] }
  0xcc   : > { %1534 = vmatpush1.bf16.msra.mxu0 %v4751_v11  ;;  %1647 = vmatpush1.bf16.msra.mxu1 %v4753_v12  ;;  %v406_v11 = vld [vmem:[#allocation6 + $0x68] sm:$0xff]  ;;  %v4771_v12 = vcombine.low %v413_v62, %v421_v63  ;;  %v431_v63 = vld [vmem:[#allocation6 + $0x130] sm:$0xff] }
  0xcd   : > { %1745 = vmatprep.subr.bf16.mxu0 %v4868_v13  ;;  %1858 = vmatprep.subr.bf16.mxu1 %v4870_v15  ;;  %v4773_v13 = vcombine.low %v414_v0, %v422_v1  ;;  %v4756_v15 = vcombine.high %v397_v6, %v405_v7  ;;  %v4758_v19 = vcombine.high %v398_v10, %v406_v11  ;;  %v439_v0 = vld [vmem:[#allocation6 + $0x170] sm:$0xff]  ;;  %v432_v1 = vld [vmem:[#allocation6 + $0x138] sm:$0xff] }
  0xce   : > { %1366 = vmatmul.mubr.bf16.gmra.mxu0 %v6068_v14  ;;  %1479 = vmatmul.mubr.bf16.gmra.mxu1 %v6068_v14 }
  0xcf   : > { %1375 = vmatprep.mubr.bf16.mxu0 %v7349_v9  ;;  %1488 = vmatprep.mubr.bf16.mxu1 %v7349_v9 }
  0xd6   : > { %1376 = vmatmul.mubr.bf16.gmra.mxu0 %v6075_v16  ;;  %1489 = vmatmul.mubr.bf16.gmra.mxu1 %v6075_v16 }
  0xd7   : > { %1385 = vmatprep.mubr.bf16.mxu0 %v7349_v9  ;;  %1498 = vmatprep.mubr.bf16.mxu1 %v7349_v9 }
  0xde   : > { %1386 = vmatmul.mubr.bf16.gmra.mxu0 %v6082_v17  ;;  %1499 = vmatmul.mubr.bf16.gmra.mxu1 %v6082_v17 }
  0xdf   : > { %1395 = vmatprep.mubr.bf16.mxu0 %v7349_v9  ;;  %1508 = vmatprep.mubr.bf16.mxu1 %v7349_v9 }
  0xe6   : > { %1396 = vmatmul.mubr.bf16.gmra.mxu0 %v6089_v18  ;;  %1509 = vmatmul.mubr.bf16.gmra.mxu1 %v6089_v18 }
  0xe7   : > { %1551 = vmatprep.mubr.bf16.mxu0 %v7349_v9  ;;  %1664 = vmatprep.mubr.bf16.mxu1 %v7349_v9 }
  0xee   : > { %1552 = vmatmul.mubr.bf16.vlgmr.msra.gmra.mxu0 %v6040_v8  ;;  %1665 = vmatmul.mubr.bf16.vlgmr.msra.gmra.mxu1 %v6040_v8 }
  0xef   : > { %1746 = vmatpush1.bf16.msra.mxu0 %v4867_v21  ;;  %1859 = vmatpush1.bf16.msra.mxu1 %v4869_v24  ;;  %v519_v21 = vld [vmem:[#allocation6 + $0x3f0] sm:$0xff]  ;;  %v4755_v24 = vcombine.low %v397_v6, %v405_v7 }
  0xf0   : > { %1561 = vmatprep.mubr.bf16.mxu0 %v7349_v9  ;;  %1674 = vmatprep.mubr.bf16.mxu1 %v7349_v9  ;;  %v4872_v27 = vcombine.high %v511_v20, %v519_v21  ;;  %v4871_v31 = vcombine.low %v511_v20, %v519_v21  ;;  %v415_v7 = vld [vmem:[#allocation6 + $0xb0] sm:$0xff] }
  0xf1   : > { %1747 = vmatprep.subr.bf16.mxu0 %v4852_v25  ;;  %1860 = vmatprep.subr.bf16.mxu1 %v4854_v29  ;;  %v4757_v25 = vcombine.low %v398_v10, %v406_v11  ;;  %v495_v29 = vld [vmem:[#allocation6 + $0x330] sm:$0xff]  ;;  %v416_v11 = vld [vmem:[#allocation6 + $0xb8] sm:$0xff] }
  0xf2   : > { %v423_v10 = vld [vmem:[#allocation6 + $0xf0] sm:$0xff] }
  0xf3   : > { %1748 = vmatpush1.bf16.msra.mxu0 %v4851_v32  ;;  %1861 = vmatpush1.bf16.msra.mxu1 %v4853_v33  ;;  %v496_v32 = vld [vmem:[#allocation6 + $0x338] sm:$0xff]  ;;  %v399_v21 = vld [vmem:[#allocation6 + $0x30] sm:$0xff] }
  0xf4   : > { %1749 = vmatprep.subr.bf16.mxu0 %v4836_v34  ;;  %1862 = vmatprep.subr.bf16.mxu1 %v4838_v35  ;;  %v504_v33 = vld [vmem:[#allocation6 + $0x378] sm:$0xff]  ;;  %v4873_v34 = vcombine.low %v512_v22, %v520_v23  ;;  %v4856_v35 = vcombine.high %v495_v29, %v503_v30  ;;  %v407_v22 = vld [vmem:[#allocation6 + $0x70] sm:$0xff] }
  0xf5   : > { %v4858_v38 = vcombine.high %v496_v32, %v504_v33  ;;  %v400_v23 = vld [vmem:[#allocation6 + $0x38] sm:$0xff] }
  0xf6   : > { %1562 = vmatmul.mubr.bf16.gmra.mxu0 %v6047_v26  ;;  %1675 = vmatmul.mubr.bf16.gmra.mxu1 %v6047_v26 }
  0xf7   : > { %1571 = vmatprep.mubr.bf16.mxu0 %v7349_v9  ;;  %1684 = vmatprep.mubr.bf16.mxu1 %v7349_v9 }
  0xf8   : > { %1750 = vmatpush1.bf16.msra.mxu0 %v4835_v40  ;;  %1863 = vmatpush1.bf16.msra.mxu1 %v4837_v41  ;;  %v488_v40 = vld [vmem:[#allocation6 + $0x2f8] sm:$0xff]  ;;  %v4855_v41 = vcombine.low %v495_v29, %v503_v30  ;;  %v4759_v30 = vcombine.low %v399_v21, %v407_v22 }
  0xf9   : > { %1751 = vmatprep.subr.bf16.mxu0 %v4820_v43  ;;  %1864 = vmatprep.subr.bf16.mxu1 %v4822_v44  ;;  %v4857_v43 = vcombine.low %v496_v32, %v504_v33  ;;  %v4840_v44 = vcombine.high %v479_v36, %v487_v37  ;;  %v4842_v45 = vcombine.high %v480_v39, %v488_v40  ;;  %v525_v32 = vlaneseq }
  0xfb   : > { %v6155_v33 = vshrl.u32 %v525_v32, 7 }
  0xfc   : > { %1752 = vmatpush1.bf16.msra.mxu0 %v4819_v49  ;;  %1865 = vmatpush1.bf16.msra.mxu1 %v4821_v50  ;;  %v472_v49 = vld [vmem:[#allocation6 + $0x278] sm:$0xff]  ;;  %v4839_v50 = vcombine.low %v479_v36, %v487_v37 }
  0xfd   : > { %1753 = vmatprep.subr.bf16.mxu0 %v4804_v51  ;;  %1866 = vmatprep.subr.bf16.mxu1 %v4806_v52  ;;  %v4841_v51 = vcombine.low %v480_v39, %v488_v40  ;;  %v4824_v52 = vcombine.high %v463_v46, %v471_v47  ;;  %v4826_v53 = vcombine.high %v464_v48, %v472_v49  ;;  %v6167_v36 = vsub.s32 2, %v6155_v33 }
  0xfe   : > { %1572 = vmatmul.mubr.bf16.gmra.mxu0 %v6054_v42  ;;  %1685 = vmatmul.mubr.bf16.gmra.mxu1 %v6054_v42  ;;  %7420 = vst [vmem:[#allocation22_spill] sm:$0xff] %v6155_v33  ;;  %v6170_v37 = vsub.s32 1, %v6155_v33 }
  0xff   : > { %1581 = vmatprep.mubr.bf16.mxu0 %v7349_v9  ;;  %1694 = vmatprep.mubr.bf16.mxu1 %v7349_v9  ;;  %7422 = vst [vmem:[#allocation24_spill] sm:$0xff] %v6167_v36 }
 0x100   : > { %1754 = vmatpush1.bf16.msra.mxu0 %v4803_v57  ;;  %1867 = vmatpush1.bf16.msra.mxu1 %v4805_v58  ;;  %v456_v57 = vld [vmem:[#allocation6 + $0x1f8] sm:$0xff]  ;;  %v4823_v58 = vcombine.low %v463_v46, %v471_v47  ;;  %7423 = vst [vmem:[#allocation25_spill] sm:$0xff] %v6170_v37 }
 0x101   : > { %1755 = vmatprep.subr.bf16.mxu0 %v4788_v60  ;;  %1868 = vmatprep.subr.bf16.mxu1 %v4790_v61  ;;  %v4825_v60 = vcombine.low %v464_v48, %v472_v49  ;;  %v4808_v61 = vcombine.high %v447_v54, %v455_v55  ;;  %v4810_v62 = vcombine.high %v448_v56, %v456_v57 }
 0x104   : > { %1756 = vmatpush1.bf16.msra.mxu0 %v4787_v2  ;;  %1869 = vmatpush1.bf16.msra.mxu1 %v4789_v3  ;;  %v440_v2 = vld [vmem:[#allocation6 + $0x178] sm:$0xff]  ;;  %v4807_v3 = vcombine.low %v447_v54, %v455_v55 }
 0x105   : > { %1757 = vmatprep.subr.bf16.mxu0 %v4772_v4  ;;  %1870 = vmatprep.subr.bf16.mxu1 %v4774_v5  ;;  %v4809_v4 = vcombine.low %v448_v56, %v456_v57  ;;  %v4792_v5 = vcombine.high %v431_v63, %v439_v0  ;;  %v4794_v6 = vcombine.high %v432_v1, %v440_v2 }
 0x106   : > { %1582 = vmatmul.mubr.bf16.gmra.mxu0 %v6061_v59  ;;  %1695 = vmatmul.mubr.bf16.gmra.mxu1 %v6061_v59 }
 0x107   : > { %1591 = vmatprep.mubr.bf16.mxu0 %v7349_v9  ;;  %1704 = vmatprep.mubr.bf16.mxu1 %v7349_v9 }
 0x108   : > { %1758 = vmatpush1.bf16.msra.mxu0 %v4771_v12  ;;  %1871 = vmatpush1.bf16.msra.mxu1 %v4773_v13  ;;  %v424_v12 = vld [vmem:[#allocation6 + $0xf8] sm:$0xff]  ;;  %v4791_v13 = vcombine.low %v431_v63, %v439_v0 }
 0x109   : > { %1759 = vmatprep.subr.bf16.mxu0 %v4756_v15  ;;  %1872 = vmatprep.subr.bf16.mxu1 %v4758_v19  ;;  %v4793_v15 = vcombine.low %v432_v1, %v440_v2  ;;  %v4776_v19 = vcombine.high %v415_v7, %v423_v10  ;;  %v4778_v20 = vcombine.high %v416_v11, %v424_v12 }
 0x10c   : > { %1760 = vmatpush1.bf16.msra.mxu0 %v4755_v24  ;;  %1873 = vmatpush1.bf16.msra.mxu1 %v4757_v25  ;;  %v408_v24 = vld [vmem:[#allocation6 + $0x78] sm:$0xff]  ;;  %v4775_v25 = vcombine.low %v415_v7, %v423_v10 }
 0x10d   : > { %1971 = vmatprep.subr.bf16.mxu0 %v4872_v27  ;;  %2084 = vmatprep.subr.bf16.mxu1 %v4874_v28  ;;  %v4777_v27 = vcombine.low %v416_v11, %v424_v12  ;;  %v4760_v28 = vcombine.high %v399_v21, %v407_v22  ;;  %v4762_v29 = vcombine.high %v400_v23, %v408_v24 }
 0x10e   : > { %1592 = vmatmul.mubr.bf16.gmra.mxu0 %v6068_v14  ;;  %1705 = vmatmul.mubr.bf16.gmra.mxu1 %v6068_v14 }
 0x10f   : > { %1601 = vmatprep.mubr.bf16.mxu0 %v7349_v9  ;;  %1714 = vmatprep.mubr.bf16.mxu1 %v7349_v9 }
 0x116   : > { %1602 = vmatmul.mubr.bf16.gmra.mxu0 %v6075_v16  ;;  %1715 = vmatmul.mubr.bf16.gmra.mxu1 %v6075_v16 }
 0x117   : > { %1611 = vmatprep.mubr.bf16.mxu0 %v7349_v9  ;;  %1724 = vmatprep.mubr.bf16.mxu1 %v7349_v9 }
 0x11e   : > { %1612 = vmatmul.mubr.bf16.gmra.mxu0 %v6082_v17  ;;  %1725 = vmatmul.mubr.bf16.gmra.mxu1 %v6082_v17 }
 0x11f   : > { %1621 = vmatprep.mubr.bf16.mxu0 %v7349_v9  ;;  %1734 = vmatprep.mubr.bf16.mxu1 %v7349_v9 }
 0x126   : > { %1622 = vmatmul.mubr.bf16.gmra.mxu0 %v6089_v18  ;;  %1735 = vmatmul.mubr.bf16.gmra.mxu1 %v6089_v18 }
 0x127   : > { %1777 = vmatprep.mubr.bf16.mxu0 %v7349_v9  ;;  %1890 = vmatprep.mubr.bf16.mxu1 %v7349_v9 }
 0x12e   : > { %1778 = vmatmul.mubr.bf16.vlgmr.msra.gmra.mxu0 %v6040_v8  ;;  %1891 = vmatmul.mubr.bf16.vlgmr.msra.gmra.mxu1 %v6040_v8 }
 0x12f   : > { %1972 = vmatpush1.bf16.msra.mxu0 %v4871_v31  ;;  %2085 = vmatpush1.bf16.msra.mxu1 %v4873_v34  ;;  %v4761_v31 = vcombine.low %v400_v23, %v408_v24  ;;  %v6162_v34 = vsub.s32 0, %v6155_v33 }
 0x130   : > { %1787 = vmatprep.mubr.bf16.mxu0 %v7349_v9  ;;  %1900 = vmatprep.mubr.bf16.mxu1 %v7349_v9 }
 0x131   : > { %1973 = vmatprep.subr.bf16.mxu0 %v4856_v35  ;;  %2086 = vmatprep.subr.bf16.mxu1 %v4858_v38  ;;  %7421 = vst [vmem:[#allocation23_spill] sm:$0xff] %v6162_v34  ;;  %v6164_v35 = vld [vmem:[#allocation8] sm:$0xff]  ;;  %v6173_v38 = vsub.s32 3, %v6155_v33 }
 0x132   : > { %v6177_v39 = vrot.slane %v6164_v35, %v6162_v34 }
 0x133   : > { %1974 = vmatpush1.bf16.msra.mxu0 %v4855_v41  ;;  %2087 = vmatpush1.bf16.msra.mxu1 %v4857_v43  ;;  %7424 = vst [vmem:[#allocation26_spill] sm:$0xff] %v6173_v38  ;;  %v6181_v41 = vrot.slane %v6164_v35, %v6167_v36  ;;  %v6192_v46 = vrot.slane %v6164_v35, %v6173_v38 }
 0x134   : > { %1975 = vmatprep.subr.bf16.mxu0 %v4840_v44  ;;  %2088 = vmatprep.subr.bf16.mxu1 %v4842_v45  ;;  %v6187_v44 = vrot.slane %v6164_v35, %v6170_v37 }
 0x136   : > { %1788 = vmatmul.mubr.bf16.gmra.mxu0 %v6047_v26  ;;  %1901 = vmatmul.mubr.bf16.gmra.mxu1 %v6047_v26 }
 0x137   : > { %1797 = vmatprep.mubr.bf16.mxu0 %v7349_v9  ;;  %1910 = vmatprep.mubr.bf16.mxu1 %v7349_v9 }
 0x138   : > { %1976 = vmatpush1.bf16.msra.mxu0 %v4839_v50  ;;  %2089 = vmatpush1.bf16.msra.mxu1 %v4841_v51 }
 0x139   : > { %1977 = vmatprep.subr.bf16.mxu0 %v4824_v52  ;;  %2090 = vmatprep.subr.bf16.mxu1 %v4826_v53 }
 0x13c   : > { %1978 = vmatpush1.bf16.msra.mxu0 %v4823_v58  ;;  %2091 = vmatpush1.bf16.msra.mxu1 %v4825_v60 }
 0x13d   : > { %1979 = vmatprep.subr.bf16.mxu0 %v4808_v61  ;;  %2092 = vmatprep.subr.bf16.mxu1 %v4810_v62 }
 0x13e   : > { %1798 = vmatmul.mubr.bf16.gmra.mxu0 %v6054_v42  ;;  %1911 = vmatmul.mubr.bf16.gmra.mxu1 %v6054_v42 }
 0x13f   : > { %1807 = vmatprep.mubr.bf16.mxu0 %v7349_v9  ;;  %1920 = vmatprep.mubr.bf16.mxu1 %v7349_v9 }
 0x140   : > { %1980 = vmatpush1.bf16.msra.mxu0 %v4807_v3  ;;  %2093 = vmatpush1.bf16.msra.mxu1 %v4809_v4 }
 0x141   : > { %1981 = vmatprep.subr.bf16.mxu0 %v4792_v5  ;;  %2094 = vmatprep.subr.bf16.mxu1 %v4794_v6 }
 0x144   : > { %1982 = vmatpush1.bf16.msra.mxu0 %v4791_v13  ;;  %2095 = vmatpush1.bf16.msra.mxu1 %v4793_v15 }
 0x145   : > { %1983 = vmatprep.subr.bf16.mxu0 %v4776_v19  ;;  %2096 = vmatprep.subr.bf16.mxu1 %v4778_v20 }
 0x146   : > { %1808 = vmatmul.mubr.bf16.gmra.mxu0 %v6061_v59  ;;  %1921 = vmatmul.mubr.bf16.gmra.mxu1 %v6061_v59 }
 0x147   : > { %1817 = vmatprep.mubr.bf16.mxu0 %v7349_v9  ;;  %1930 = vmatprep.mubr.bf16.mxu1 %v7349_v9 }
 0x148   : > { %1984 = vmatpush1.bf16.msra.mxu0 %v4775_v25  ;;  %2097 = vmatpush1.bf16.msra.mxu1 %v4777_v27 }
 0x149   : > { %1985 = vmatprep.subr.bf16.mxu0 %v4760_v28  ;;  %2098 = vmatprep.subr.bf16.mxu1 %v4762_v29 }
 0x14c   : > { %1986 = vmatpush1.bf16.msra.mxu0 %v4759_v30  ;;  %2099 = vmatpush1.bf16.msra.mxu1 %v4761_v31 }
 0x14e   : > { %1818 = vmatmul.mubr.bf16.gmra.mxu0 %v6068_v14  ;;  %1931 = vmatmul.mubr.bf16.gmra.mxu1 %v6068_v14 }
 0x14f   : > { %1827 = vmatprep.mubr.bf16.mxu0 %v7349_v9  ;;  %1940 = vmatprep.mubr.bf16.mxu1 %v7349_v9 }
 0x156   : > { %1828 = vmatmul.mubr.bf16.gmra.mxu0 %v6075_v16  ;;  %1941 = vmatmul.mubr.bf16.gmra.mxu1 %v6075_v16 }
 0x157   : > { %1837 = vmatprep.mubr.bf16.mxu0 %v7349_v9  ;;  %1950 = vmatprep.mubr.bf16.mxu1 %v7349_v9 }
 0x15e   : > { %1838 = vmatmul.mubr.bf16.gmra.mxu0 %v6082_v17  ;;  %1951 = vmatmul.mubr.bf16.gmra.mxu1 %v6082_v17 }
 0x15f   : > { %1847 = vmatprep.mubr.bf16.mxu0 %v7349_v9  ;;  %1960 = vmatprep.mubr.bf16.mxu1 %v7349_v9 }
 0x166   : > { %1848 = vmatmul.mubr.bf16.gmra.mxu0 %v6089_v18  ;;  %1961 = vmatmul.mubr.bf16.gmra.mxu1 %v6089_v18 }
 0x167   : > { %2003 = vmatprep.mubr.bf16.mxu0 %v7349_v9  ;;  %2116 = vmatprep.mubr.bf16.mxu1 %v7349_v9 }
 0x16e   : > { %v1327_v40 = vpop.f32.mrf.mxu0  ;;  %2004 = vmatmul.mubr.bf16.vlgmr.msra.gmra.mxu0 %v6040_v8  ;;  %v1440_v43 = vpop.f32.mrf.mxu1  ;;  %2117 = vmatmul.mubr.bf16.vlgmr.msra.gmra.mxu1 %v6040_v8 }
 0x16f   : > { %2013 = vmatprep.mubr.bf16.mxu0 %v7349_v9  ;;  %2126 = vmatprep.mubr.bf16.mxu1 %v7349_v9  ;;  %v1328_v47 = vadd.f32 %v1327_v40, %v6177_v39  ;;  %v1441_v49 = vadd.f32 %v1440_v43, %v6181_v41 }
 0x170   : > { %v1329_v45 = vpop.f32.mrf.mxu0  ;;  %v1442_v48 = vpop.f32.mrf.mxu1 }
 0x171   : > { %v1330_v8 = vadd.f32 %v1329_v45, %v6187_v44  ;;  %v1443_v53 = vadd.f32 %v1442_v48, %v6192_v46  ;;  %v2197_v56 = vmax.f32 %v1328_v47, 0.0  ;;  %v2199_v61 = vmax.f32 %v1441_v49, 0.0 }
 0x172   : > { %v1331_v50 = vpop.f32.mrf.mxu0  ;;  %v1444_v52 = vpop.f32.mrf.mxu1 }
 0x173   : > { %v1332_v51 = vadd.f32 %v1331_v50, %v6177_v39  ;;  %v1445_v54 = vadd.f32 %v1444_v52, %v6181_v41  ;;  %v2198_v1 = vmax.f32 %v1330_v8, 0.0  ;;  %v2200_v5 = vmax.f32 %v1443_v53, 0.0 }
 0x174   : > { %v1333_v55 = vpop.f32.mrf.mxu0  ;;  %v1446_v60 = vpop.f32.mrf.mxu1 }
 0x175   : > { %v2213_v57 = vmax.f32 %v1332_v51, 0.0  ;;  %v1334_v58 = vadd.f32 %v1333_v55, %v6187_v44  ;;  %v2215_v62 = vmax.f32 %v1445_v54, 0.0  ;;  %v1447_v63 = vadd.f32 %v1446_v60, %v6192_v46 }
 0x176   : > { %v1337_v0 = vpop.f32.mrf.mxu0  ;;  %2014 = vmatmul.mubr.bf16.gmra.mxu0 %v6047_v26  ;;  %v1450_v4 = vpop.f32.mrf.mxu1  ;;  %2127 = vmatmul.mubr.bf16.gmra.mxu1 %v6047_v26 }
 0x177   : > { %v6204_v2 = vpack.c.bf16 %v2213_v57, %v2197_v56  ;;  %v2214_v3 = vmax.f32 %v1334_v58, 0.0  ;;  %2023 = vmatprep.mubr.bf16.mxu0 %v7349_v9  ;;  %v6208_v6 = vpack.c.bf16 %v2215_v62, %v2199_v61  ;;  %v2216_v7 = vmax.f32 %v1447_v63, 0.0  ;;  %2136 = vmatprep.mubr.bf16.mxu1 %v7349_v9 }
 0x178   : > { %v1339_v10 = vpop.f32.mrf.mxu0  ;;  %v1338_v11 = vadd.f32 %v1337_v0, %v6177_v39  ;;  %v1452_v12 = vpop.f32.mrf.mxu1  ;;  %v1451_v15 = vadd.f32 %v1450_v4, %v6181_v41 }
 0x179   : > { %7425 = vst [vmem:[#allocation27_spill] sm:$0xff] %v6204_v2  ;;  %7426 = vst [vmem:[#allocation28_spill] sm:$0xff] %v6208_v6  ;;  %v6212_v13 = vpack.c.bf16 %v2214_v3, %v2198_v1  ;;  %v6215_v20 = vpack.c.bf16 %v2216_v7, %v2200_v5  ;;  %v1340_v26 = vadd.f32 %v1339_v10, %v6187_v44 }
 0x17a   : > { %v1341_v19 = vpop.f32.mrf.mxu0  ;;  %v1454_v22 = vpop.f32.mrf.mxu1  ;;  %v1453_v23 = vadd.f32 %v1452_v12, %v6192_v46  ;;  %v2229_v27 = vmax.f32 %v1338_v11, 0.0  ;;  %v2231_v31 = vmax.f32 %v1451_v15, 0.0 }
 0x17b   : > { %7427 = vst [vmem:[#allocation29_spill] sm:$0xff] %v6212_v13  ;;  %7428 = vst [vmem:[#allocation30_spill] sm:$0xff] %v6215_v20  ;;  %v1342_v21 = vadd.f32 %v1341_v19, %v6177_v39  ;;  %v1455_v24 = vadd.f32 %v1454_v22, %v6181_v41  ;;  %v2230_v45 = vmax.f32 %v1340_v26, 0.0 }
 0x17c   : > { %v1343_v25 = vpop.f32.mrf.mxu0  ;;  %v1456_v30 = vpop.f32.mrf.mxu1  ;;  %v2232_v50 = vmax.f32 %v1453_v23, 0.0  ;;  %v6267_v23 = vsub.s32 6, %v6155_v33 }
 0x17d   : > { %v2245_v28 = vmax.f32 %v1342_v21, 0.0  ;;  %v1344_v29 = vadd.f32 %v1343_v25, %v6187_v44  ;;  %v2247_v32 = vmax.f32 %v1455_v24, 0.0  ;;  %v1457_v40 = vadd.f32 %v1456_v30, %v6192_v46 }
 0x17e   : > { %v6223_v43 = vpop.f32.mrf.mxu0  ;;  %2024 = vmatmul.mubr.bf16.gmra.mxu0 %v6054_v42  ;;  %v6228_v49 = vpop.f32.mrf.mxu1  ;;  %2137 = vmatmul.mubr.bf16.gmra.mxu1 %v6054_v42  ;;  %7434 = vst [vmem:[#allocation36_spill] sm:$0xff] %v6267_v23  ;;  %v6270_v24 = vsub.s32 5, %v6155_v33 }
 0x17f   : > { %v6226_v47 = vpack.c.bf16 %v2245_v28, %v2229_v27  ;;  %v2246_v48 = vmax.f32 %v1344_v29, 0.0  ;;  %2033 = vmatprep.mubr.bf16.mxu0 %v7349_v9  ;;  %v6232_v8 = vpack.c.bf16 %v2247_v32, %v2231_v31  ;;  %v2248_v51 = vmax.f32 %v1457_v40, 0.0  ;;  %2146 = vmatprep.mubr.bf16.mxu1 %v7349_v9 }
 0x180   : > { %v1349_v52 = vpop.f32.mrf.mxu0  ;;  %v1462_v53 = vpop.f32.mrf.mxu1  ;;  %7435 = vst [vmem:[#allocation37_spill] sm:$0xff] %v6270_v24  ;;  %v6273_v27 = vsub.s32 7, %v6155_v33  ;;  %v6287_v40 = vrot.slane %v6164_v35, %v6267_v23 }
 0x181   : > { %7429 = vst [vmem:[#allocation31_spill] sm:$0xff] %v6226_v47  ;;  %7430 = vst [vmem:[#allocation32_spill] sm:$0xff] %v6232_v8  ;;  %v6235_v54 = vpack.c.bf16 %v2246_v48, %v2230_v45  ;;  %v6237_v56 = vpack.c.bf16 %v2248_v51, %v2232_v50  ;;  %v6291_v45 = vrot.slane %v6164_v35, %v6270_v24 }
 0x182   : > { %v1351_v55 = vpop.f32.mrf.mxu0  ;;  %v6239_v57 = vpop.f32.mrf.mxu1  ;;  %7436 = vst [vmem:[#allocation38_spill] sm:$0xff] %v6273_v27 }
 0x183   : > { %7431 = vst [vmem:[#allocation33_spill] sm:$0xff] %v6235_v54  ;;  %7432 = vst [vmem:[#allocation34_spill] sm:$0xff] %v6237_v56 }
 0x184   : > { %v1353_v58 = vpop.f32.mrf.mxu0  ;;  %v1466_v60 = vpop.f32.mrf.mxu1 }
 0x185   : > { %v6280_v30 = vadd.f32 %v1353_v58, %v6187_v44  ;;  %v6283_v31 = vadd.f32 %v1466_v60, %v6192_v46  ;;  %v6304_v60 = vrot.slane %v6164_v35, %v6273_v27  ;;  %v6326_v27 = vadd.f32 %v1351_v55, %v6177_v39 }
 0x186   : > { %v1357_v42 = vpop.f32.mrf.mxu0  ;;  %2034 = vmatmul.mubr.bf16.gmra.mxu0 %v6061_v59  ;;  %v6242_v61 = vpop.f32.mrf.mxu1  ;;  %2147 = vmatmul.mubr.bf16.gmra.mxu1 %v6061_v59 }
 0x187   : > { %2043 = vmatprep.mubr.bf16.mxu0 %v7349_v9  ;;  %2156 = vmatprep.mubr.bf16.mxu1 %v7349_v9  ;;  %7437 = vst [vmem:[#allocation39_spill] sm:$0xff] %v6280_v30  ;;  %7438 = vst [vmem:[#allocation40_spill] sm:$0xff] %v6283_v31  ;;  %v6294_v48 = vadd.f32 %v1357_v42, %v6177_v39 }
 0x188   : > { %v1359_v62 = vpop.f32.mrf.mxu0  ;;  %v1472_v63 = vpop.f32.mrf.mxu1  ;;  %7443 = vst [vmem:[#allocation45_spill] sm:$0xff] %v6326_v27 }
 0x189   : > { %7439 = vst [vmem:[#allocation41_spill] sm:$0xff] %v6294_v48  ;;  %v6297_v50 = vadd.f32 %v1359_v62, %v6187_v44  ;;  %v6300_v51 = vadd.f32 %v1472_v63, %v6192_v46 }
 0x18a   : > { %v1361_v0 = vpop.f32.mrf.mxu0  ;;  %v1474_v1 = vpop.f32.mrf.mxu1 }
 0x18b   : > { %v6314_v42 = vadd.f32 %v1361_v0, %v6177_v39  ;;  %v6317_v62 = vadd.f32 %v1474_v1, %v6181_v41  ;;  %v7444_v0 = vmov 0   ;;  %v6335_v1 = vadd.f32 %v6239_v57, %v6181_v41 }
 0x18c   : > { %v1363_v3 = vpop.f32.mrf.mxu0  ;;  %v1476_v4 = vpop.f32.mrf.mxu1 }
 0x18d   : > { %7441 = vst [vmem:[#allocation43_spill] sm:$0xff] %v6314_v42  ;;  %7442 = vst [vmem:[#allocation44_spill] sm:$0xff] %v6317_v62  ;;  %v6340_v23 = vadd.f32 %v1476_v4, %v6192_v46 }
 0x18e   : > { %v1367_v5 = vpop.f32.mrf.mxu0  ;;  %2044 = vmatmul.mubr.bf16.gmra.mxu0 %v6068_v14  ;;  %v6248_v7 = vpop.f32.mrf.mxu1  ;;  %2157 = vmatmul.mubr.bf16.gmra.mxu1 %v6068_v14  ;;  %v6263_v14 = vsub.s32 4, %v6155_v33  ;;  %v6311_v33 = vadd.f32 %v1349_v52, %v6187_v44  ;;  %7445 = vst [vmem:[#allocation46_spill] sm:$0xff] %v6335_v1 }
 0x18f   : > { %2053 = vmatprep.mubr.bf16.mxu0 %v7349_v9  ;;  %2166 = vmatprep.mubr.bf16.mxu1 %v7349_v9  ;;  %v6353_v4 = vadd.f32 %v1367_v5, %v6177_v39 }
 0x190   : > { %v1369_v59 = vpop.f32.mrf.mxu0  ;;  %v1482_v10 = vpop.f32.mrf.mxu1  ;;  %7433 = vst [vmem:[#allocation35_spill] sm:$0xff] %v6263_v14  ;;  %v6277_v29 = vrot.slane %v6164_v35, %v6263_v14  ;;  %v6323_v35 = vadd.f32 %v1462_v53, %v6192_v46 }
 0x191   : > { %v6356_v37 = vadd.f32 %v1369_v59, %v6187_v44 }
 0x192   : > { %v6253_v11 = vpop.f32.mrf.mxu0  ;;  %v6255_v12 = vpop.f32.mrf.mxu1 }
 0x194   : > { %v1373_v15 = vpop.f32.mrf.mxu0  ;;  %v1486_v19 = vpop.f32.mrf.mxu1 }
 0x195   : > { %v6363_v14 = vadd.f32 %v1373_v15, %v6187_v44  ;;  %v6368_v5 = vadd.f32 %v1486_v19, %v6192_v46 }
 0x196   : > { %v1377_v26 = vpop.f32.mrf.mxu0  ;;  %2054 = vmatmul.mubr.bf16.gmra.mxu0 %v6075_v16  ;;  %v6258_v21 = vpop.f32.mrf.mxu1  ;;  %2167 = vmatmul.mubr.bf16.gmra.mxu1 %v6075_v16 }
 0x197   : > { %2063 = vmatprep.mubr.bf16.mxu0 %v7349_v9  ;;  %2176 = vmatprep.mubr.bf16.mxu1 %v7349_v9  ;;  %v6308_v9 = vadd.f32 %v6223_v43, %v6177_v39  ;;  %v6329_v43 = vadd.f32 %v1363_v3, %v6187_v44  ;;  %v6371_v59 = vadd.f32 %v1377_v26, %v6177_v39 }
 0x198   : > { %v1379_v22 = vpop.f32.mrf.mxu0  ;;  %v1492_v25 = vpop.f32.mrf.mxu1  ;;  %v6409_v20 = vadd.f32 %v6258_v21, %v6181_v41 }
 0x199   : > { %7440 = vst [vmem:[#allocation42_spill] sm:$0xff] %v6308_v9  ;;  %v1380_v34 = vadd.f32 %v1379_v22, %v6187_v44  ;;  %v6379_v15 = vadd.f32 %v1492_v25, %v6192_v46  ;;  %v6391_v22 = vadd.f32 %v6253_v11, %v6177_v39 }
 0x19a   : > { %v1381_v28 = vpop.f32.mrf.mxu0  ;;  %v1494_v16 = vpop.f32.mrf.mxu1 }
 0x19b   : > { %v6385_v53 = vadd.f32 %v1494_v16, %v6181_v41  ;;  %v6400_v16 = vadd.f32 %v6255_v12, %v6181_v41 }
 0x19c   : > { %v1383_v32 = vpop.f32.mrf.mxu0  ;;  %v1496_v58 = vpop.f32.mrf.mxu1 }
 0x19d   : > { %v1384_v57 = vadd.f32 %v1383_v32, %v6187_v44  ;;  %v6382_v32 = vadd.f32 %v1381_v28, %v6177_v39  ;;  %v2358_v28 = vmax.f32 %v1380_v34, 0.0 }
 0x19e   : > { %v6319_v63 = vpop.f32.mrf.mxu0  ;;  %2064 = vmatmul.mubr.bf16.gmra.mxu0 %v6082_v17  ;;  %v1500_v52 = vpop.f32.mrf.mxu1  ;;  %2177 = vmatmul.mubr.bf16.gmra.mxu1 %v6082_v17  ;;  %v6346_v17 = vadd.f32 %v6242_v61, %v6181_v41  ;;  %v6360_v61 = vadd.f32 %v1482_v10, %v6192_v46  ;;  %v6376_v10 = vadd.f32 %v6248_v7, %v6181_v41 }
 0x19f   : > { %2073 = vmatprep.mubr.bf16.mxu0 %v7444_v0  ;;  %2186 = vmatprep.mubr.bf16.mxu1 %v7444_v0  ;;  %v6394_v7 = vadd.f32 %v1496_v58, %v6192_v46  ;;  %v2374_v2 = vmax.f32 %v1384_v57, 0.0  ;;  %v6419_v58 = vadd.f32 %v6319_v63, %v6177_v39  ;;  %v6422_v34 = vadd.f32 %v1500_v52, %v6181_v41 }
 0x1a0   : > { %v1389_v55 = vpop.f32.mrf.mxu0  ;;  %v1502_v38 = vpop.f32.mrf.mxu1 }
 0x1a1   : > { %v1390_v26 = vadd.f32 %v1389_v55, %v6187_v44  ;;  %v1503_v21 = vadd.f32 %v1502_v38, %v6192_v46  ;;  %v6428_v47 = vpack.c.bf16 %v2374_v2, %v2358_v28 }
 0x1a2   : > { %v1391_v3 = vpop.f32.mrf.mxu0  ;;  %v1504_v24 = vpop.f32.mrf.mxu1 }
 0x1a3   : > { %v2390_v38 = vmax.f32 %v1390_v26, 0.0  ;;  %v1392_v31 = vadd.f32 %v1391_v3, %v6177_v39  ;;  %v2392_v9 = vmax.f32 %v1503_v21, 0.0  ;;  %v1505_v2 = vadd.f32 %v1504_v24, %v6181_v41 }
 0x1a4   : > { %v1393_v36 = vpop.f32.mrf.mxu0  ;;  %v1506_v19 = vpop.f32.mrf.mxu1 }
 0x1a5   : > { %v1394_v12 = vadd.f32 %v1393_v36, %v6187_v44  ;;  %v1507_v11 = vadd.f32 %v1506_v19, %v6192_v46  ;;  %v2405_v48 = vmax.f32 %v1392_v31, 0.0  ;;  %v2389_v31 = vmax.f32 %v6419_v58, 0.0 }
 0x1a6   : > { %v1397_v25 = vpop.f32.mrf.mxu0  ;;  %2074 = vmatmul.mubr.bf16.gmra.mxu0 %v6089_v18  ;;  %v1510_v6 = vpop.f32.mrf.mxu1  ;;  %2187 = vmatmul.mubr.bf16.gmra.mxu1 %v6089_v18 }
 0x1a7   : > { %2615 = vmatprep.mubr.bf16.mxu0 %v7444_v0  ;;  %2656 = vmatprep.mubr.bf16.mxu1 %v7444_v0  ;;  %v1398_v63 = vadd.f32 %v1397_v25, %v6177_v39  ;;  %v1511_v36 = vadd.f32 %v1510_v6, %v6181_v41  ;;  %v2406_v30 = vmax.f32 %v1394_v12, 0.0  ;;  %v2408_v26 = vmax.f32 %v1507_v11, 0.0 }
 0x1a8   : > { %v1399_v13 = vpop.f32.mrf.mxu0  ;;  %v1512_v8 = vpop.f32.mrf.mxu1 }
 0x1a9   : > { %v1400_v57 = vadd.f32 %v1399_v13, %v6187_v44  ;;  %v1513_v56 = vadd.f32 %v1512_v8, %v6192_v46  ;;  %v2421_v42 = vmax.f32 %v1398_v63, 0.0  ;;  %v2552_v63 = vpack.c.bf16 %v2406_v30, %v2390_v38 }
 0x1aa   : > { %v1401_v0 = vpop.f32.mrf.mxu0  ;;  %v1514_v55 = vpop.f32.mrf.mxu1  ;;  %v2551_v30 = vpack.c.bf16 %v2405_v48, %v2389_v31  ;;  %v7448_v48 = vmax.f32 %v6379_v15, 0.0  ;;  %v7452_v15 = vmax.f32 %v6382_v32, 0.0 }
 0x1ab   : > { %v1402_v18 = vadd.f32 %v1401_v0, %v6177_v39  ;;  %v1515_v52 = vadd.f32 %v1514_v55, %v6181_v41  ;;  %v2422_v8 = vmax.f32 %v1400_v57, 0.0  ;;  %v2424_v39 = vmax.f32 %v1513_v56, 0.0 }
 0x1ac   : > { %v1403_v54 = vpop.f32.mrf.mxu0  ;;  %v1516_v0 = vpop.f32.mrf.mxu1 }
 0x1ad   : > { %v1404_v13 = vadd.f32 %v1403_v54, %v6187_v44  ;;  %v2437_v28 = vmax.f32 %v1402_v18, 0.0  ;;  %v1517_v19 = vadd.f32 %v1516_v0, %v6192_v46  ;;  %v2439_v62 = vmax.f32 %v1515_v52, 0.0 }
 0x1ae   : > { %v1553_v25 = vpop.f32.mrf.mxu0  ;;  %v1666_v1 = vpop.f32.mrf.mxu1  ;;  %v2423_v44 = vmax.f32 %v1511_v36, 0.0  ;;  %v2407_v18 = vmax.f32 %v1505_v2, 0.0  ;;  %v2391_v2 = vmax.f32 %v6422_v34, 0.0 }
 0x1af   : > { %v2438_v55 = vmax.f32 %v1404_v13, 0.0  ;;  %v2440_v3 = vmax.f32 %v1517_v19, 0.0  ;;  %v1554_v54 = vadd.f32 %v1553_v25, %v6277_v29  ;;  %v2567_v27 = vpack.c.bf16 %v2437_v28, %v2421_v42 }
 0x1b0   : > { %v1555_v6 = vpop.f32.mrf.mxu0  ;;  %v1668_v21 = vpop.f32.mrf.mxu1  ;;  %v1667_v46 = vadd.f32 %v1666_v1, %v6287_v40  ;;  %v2569_v52 = vpack.c.bf16 %v2439_v62, %v2423_v44  ;;  %v2554_v1 = vpack.c.bf16 %v2408_v26, %v2392_v9 }
 0x1b1   : > { %v2568_v24 = vpack.c.bf16 %v2438_v55, %v2422_v8  ;;  %v2570_v57 = vpack.c.bf16 %v2440_v3, %v2424_v39  ;;  %v1556_v13 = vadd.f32 %v1555_v6, %v6291_v45  ;;  %v1669_v36 = vadd.f32 %v1668_v21, %v6304_v60 }
 0x1b2   : > { %v1557_v12 = vpop.f32.mrf.mxu0  ;;  %v1670_v56 = vpop.f32.mrf.mxu1  ;;  %v2201_v62 = vmax.f32 %v1554_v54, 0.0  ;;  %v2203_v38 = vmax.f32 %v1667_v46, 0.0  ;;  %v2553_v39 = vpack.c.bf16 %v2407_v18, %v2391_v2  ;;  %v7449_v21 = vmax.f32 %v6394_v7, 0.0 }
 0x1b3   : > { %v1558_v11 = vadd.f32 %v1557_v12, %v6277_v29  ;;  %2583 = vmatprep.subr.bf16.mxu0 %v2568_v24  ;;  %v1671_v0 = vadd.f32 %v1670_v56, %v6287_v40  ;;  %2624 = vmatprep.subr.bf16.mxu1 %v2570_v57  ;;  %v2202_v3 = vmax.f32 %v1556_v13, 0.0  ;;  %v2204_v26 = vmax.f32 %v1669_v36, 0.0 }
 0x1b4   : > { %v1559_v42 = vpop.f32.mrf.mxu0  ;;  %2584 = vmatpush1.bf16.msra.mxu0 %v2567_v27  ;;  %v1672_v25 = vpop.f32.mrf.mxu1  ;;  %2625 = vmatpush1.bf16.msra.mxu1 %v2569_v52  ;;  %v2538_v24 = vpack.c.bf16 %v7449_v21, %v7448_v48  ;;  %v2341_v46 = vmax.f32 %v6391_v22, 0.0  ;;  %v2359_v18 = vmax.f32 %v6409_v20, 0.0  ;;  %v2343_v13 = vmax.f32 %v6400_v16, 0.0 }
 0x1b5   : > { %v2217_v28 = vmax.f32 %v1558_v11, 0.0  ;;  %v1560_v19 = vadd.f32 %v1559_v42, %v6291_v45  ;;  %2585 = vmatprep.subr.bf16.mxu0 %v2552_v63  ;;  %v2219_v58 = vmax.f32 %v1671_v0, 0.0  ;;  %v1673_v8 = vadd.f32 %v1672_v25, %v6304_v60  ;;  %2626 = vmatprep.subr.bf16.mxu1 %v2554_v1 }
 0x1b6   : > { %v1563_v55 = vpop.f32.mrf.mxu0  ;;  %v1676_v34 = vpop.f32.mrf.mxu1  ;;  %v7451_v11 = vmax.f32 %v6371_v59, 0.0  ;;  %v7454_v63 = vmax.f32 %v6385_v53, 0.0  ;;  %v7455_v16 = vmax.f32 %v6356_v37, 0.0  ;;  %v7456_v59 = vmax.f32 %v6363_v14, 0.0 }
 0x1b7   : > { %v6449_v27 = vpack.c.bf16 %v2217_v28, %v2201_v62  ;;  %v2218_v9 = vmax.f32 %v1560_v19, 0.0  ;;  %v6451_v6 = vpack.c.bf16 %v2219_v58, %v2203_v38  ;;  %v2220_v44 = vmax.f32 %v1673_v8, 0.0 }
 0x1b8   : > { %v1565_v54 = vpop.f32.mrf.mxu0  ;;  %2586 = vmatpush1.bf16.msra.mxu0 %v2551_v30  ;;  %v1564_v57 = vadd.f32 %v1563_v55, %v6277_v29  ;;  %v1678_v52 = vpop.f32.mrf.mxu1  ;;  %2627 = vmatpush1.bf16.msra.mxu1 %v2553_v39  ;;  %v2535_v7 = vpack.c.bf16 %v7452_v15, %v7451_v11  ;;  %v1677_v22 = vadd.f32 %v1676_v34, %v6287_v40  ;;  %v7457_v62 = vmax.f32 %v6360_v61, 0.0 }
 0x1b9   : > { %7446 = vst [vmem:[#allocation47_spill] sm:$0xff] %v6449_v27  ;;  %7447 = vst [vmem:[#allocation48_spill] sm:$0xff] %v6451_v6  ;;  %v6459_v12 = vpack.c.bf16 %v2218_v9, %v2202_v3  ;;  %2587 = vmatprep.subr.bf16.mxu0 %v6428_v47  ;;  %v6468_v56 = vpack.c.bf16 %v2220_v44, %v2204_v26  ;;  %2628 = vmatprep.subr.bf16.mxu1 %v2538_v24  ;;  %v7458_v53 = vmax.f32 %v6368_v5, 0.0 }
 0x1ba   : > { %v1567_v20 = vpop.f32.mrf.mxu0  ;;  %v2537_v31 = vpack.c.bf16 %v7454_v63, %v2359_v18  ;;  %v1566_v36 = vadd.f32 %v1565_v54, %v6291_v45  ;;  %v1680_v0 = vpop.f32.mrf.mxu1  ;;  %v2520_v32 = vpack.c.bf16 %v7456_v59, %v7455_v16  ;;  %v1679_v42 = vadd.f32 %v1678_v52, %v6304_v60 }
 0x1bb   : > { %7450 = vst [vmem:[#allocation49_spill] sm:$0xff] %v6459_v12  ;;  %7453 = vst [vmem:[#allocation50_spill] sm:$0xff] %v6468_v56  ;;  %v1568_v47 = vadd.f32 %v1567_v20, %v6277_v29  ;;  %v1681_v1 = vadd.f32 %v1680_v0, %v6287_v40  ;;  %v2522_v28 = vpack.c.bf16 %v7458_v53, %v7457_v62  ;;  %v7459_v19 = vmax.f32 %v6297_v50, 0.0  ;;  %v7470_v20 = vld [vmem:[#allocation43_spill] sm:$0xff]  ;;  %v7479_v62 = vld [vmem:[#allocation40_spill] sm:$0xff] }
 0x1bc   : > { %v1569_v2 = vpop.f32.mrf.mxu0  ;;  %2588 = vmatpush1.bf16.msra.mxu0 %v2535_v7  ;;  %v7460_v25 = vmax.f32 %v6329_v43, 0.0  ;;  %v2327_v37 = vmax.f32 %v6376_v10, 0.0  ;;  %v2233_v14 = vmax.f32 %v1564_v57, 0.0  ;;  %v1682_v8 = vpop.f32.mrf.mxu1  ;;  %2629 = vmatpush1.bf16.msra.mxu1 %v2537_v31  ;;  %v7461_v55 = vmax.f32 %v6353_v4, 0.0  ;;  %v7467_v7 = vld [vmem:[#allocation45_spill] sm:$0xff] }
 0x1bd   : > { %v2249_v38 = vmax.f32 %v1568_v47, 0.0  ;;  %v1570_v58 = vadd.f32 %v1569_v2, %v6291_v45  ;;  %2589 = vmatprep.subr.bf16.mxu0 %v2520_v32  ;;  %v2235_v39 = vmax.f32 %v1677_v22, 0.0  ;;  %v2251_v5 = vmax.f32 %v1681_v1, 0.0  ;;  %2630 = vmatprep.subr.bf16.mxu1 %v2522_v28  ;;  %v7468_v22 = vld [vmem:[#allocation41_spill] sm:$0xff] }
 0x1be   : > { %v2504_v30 = vpack.c.bf16 %v7460_v25, %v7459_v19  ;;  %v2519_v61 = vpack.c.bf16 %v2341_v46, %v7461_v55  ;;  %v1683_v3 = vadd.f32 %v1682_v8, %v6304_v60  ;;  %v6494_v50 = vpop.f32.mrf.mxu0  ;;  %v2521_v43 = vpack.c.bf16 %v2343_v13, %v2327_v37  ;;  %v6498_v26 = vpop.f32.mrf.mxu1  ;;  %v7481_v55 = vld [vmem:[#allocation33_spill] sm:$0xff] }
 0x1bf   : > { %v2234_v9 = vmax.f32 %v1566_v36, 0.0  ;;  %v6496_v10 = vpack.c.bf16 %v2249_v38, %v2233_v14  ;;  %v2250_v34 = vmax.f32 %v1570_v58, 0.0  ;;  %v2236_v44 = vmax.f32 %v1679_v42, 0.0  ;;  %v7474_v36 = vld [vmem:[#allocation44_spill] sm:$0xff]  ;;  %v7478_v42 = vld [vmem:[#allocation42_spill] sm:$0xff] }
 0x1c0   : > { %v6500_v54 = vpack.c.bf16 %v2251_v5, %v2235_v39  ;;  %v2252_v48 = vmax.f32 %v1683_v3, 0.0  ;;  %v6502_v4 = vpop.f32.mrf.mxu0  ;;  %2590 = vmatpush1.bf16.msra.mxu0 %v2519_v61  ;;  %v7464_v21 = vmax.f32 %v6300_v51, 0.0  ;;  %v7465_v24 = vmax.f32 %v6340_v23, 0.0  ;;  %v6514_v11 = vpop.f32.mrf.mxu1  ;;  %2631 = vmatpush1.bf16.msra.mxu1 %v2521_v43  ;;  %v7482_v61 = vld [vmem:[#allocation34_spill] sm:$0xff]  ;;  %v7483_v43 = vld [vmem:[#allocation31_spill] sm:$0xff] }
 0x1c1   : > { %7462 = vst [vmem:[#allocation51_spill] sm:$0xff] %v6496_v10  ;;  %v1461_v18 = vadd.f32 %v6228_v49, %v6181_v41  ;;  %v2262_v57 = vmax.f32 %v6311_v33, 0.0  ;;  %v2295_v52 = vmax.f32 %v6346_v17, 0.0  ;;  %v6512_v13 = vpack.c.bf16 %v2250_v34, %v2234_v9  ;;  %2591 = vmatprep.subr.bf16.mxu0 %v2504_v30  ;;  %v7473_v49 = vld [vmem:[#allocation46_spill] sm:$0xff]  ;;  %v7484_v34 = vld [vmem:[#allocation32_spill] sm:$0xff] }
 0x1c2   : > { %7463 = vst [vmem:[#allocation52_spill] sm:$0xff] %v6500_v54  ;;  %v2506_v46 = vpack.c.bf16 %v7465_v24, %v7464_v21  ;;  %v2264_v15 = vmax.f32 %v6323_v35, 0.0  ;;  %v2277_v51 = vmax.f32 %v7467_v7, 0.0  ;;  %v7469_v23 = vmax.f32 %v7468_v22, 0.0  ;;  %v6524_v33 = vpop.f32.mrf.mxu0  ;;  %v6529_v16 = vpop.f32.mrf.mxu1  ;;  %v7476_v35 = vld [vmem:[#allocation39_spill] sm:$0xff] }
 0x1c3   : > { %7466 = vst [vmem:[#allocation53_spill] sm:$0xff] %v6512_v13  ;;  %v7471_v63 = vmax.f32 %v7470_v20, 0.0  ;;  %v6522_v41 = vpack.c.bf16 %v2252_v48, %v2236_v44  ;;  %v2279_v17 = vmax.f32 %v7473_v49, 0.0  ;;  %v7475_v47 = vmax.f32 %v7474_v36, 0.0  ;;  %v7485_v44 = vld [vmem:[#allocation29_spill] sm:$0xff]  ;;  %v7486_v48 = vld [vmem:[#allocation30_spill] sm:$0xff] }
 0x1c4   : > { %2632 = vmatprep.subr.bf16.mxu1 %v2506_v46  ;;  %v7477_v59 = vmax.f32 %v7476_v35, 0.0  ;;  %v2261_v1 = vmax.f32 %v7478_v42, 0.0  ;;  %v1579_v2 = vpop.f32.mrf.mxu0  ;;  %v7480_v53 = vmax.f32 %v7479_v62, 0.0  ;;  %v2263_v19 = vmax.f32 %v1461_v18, 0.0  ;;  %v1692_v25 = vpop.f32.mrf.mxu1  ;;  %v7487_v18 = vld [vmem:[#allocation27_spill] sm:$0xff]  ;;  %v6558_v36 = vld [vmem:[#allocation8 + $0x8] sm:$0xff] }
 0x1c5   : > { %v2503_v31 = vpack.c.bf16 %v7471_v63, %v7469_v23  ;;  %7472 = vst [vmem:[#allocation45_spill] sm:$0xff] %v6522_v41  ;;  %v2505_v0 = vpack.c.bf16 %v7475_v47, %v2295_v52  ;;  %v7488_v52 = vld [vmem:[#allocation28_spill] sm:$0xff]  ;;  %v7489_v23 = vmov 0   ;;  %7490 = vst [vmem:[#allocation41_spill] sm:$0xff] %v6558_v36  ;;  %v6561_v35 = vadd.f32 %v1579_v2, %v6291_v45  ;;  %v7493_v42 = vld [vmem:[#allocation23_spill] sm:$0xff] }
 0x1c6   : > { %v2488_v32 = vpack.c.bf16 %v7477_v59, %v2262_v57  ;;  %v2490_v28 = vpack.c.bf16 %v7480_v53, %v2264_v15  ;;  %v2487_v30 = vpack.c.bf16 %v2277_v51, %v2261_v1  ;;  %v1583_v37 = vpop.f32.mrf.mxu0  ;;  %v2489_v14 = vpack.c.bf16 %v2279_v17, %v2263_v19  ;;  %v6536_v38 = vpop.f32.mrf.mxu1  ;;  %v7494_v62 = vld [vmem:[#allocation24_spill] sm:$0xff] }
 0x1c7   : > { %2592 = vmatpush1.bf16.msra.mxu0 %v2503_v31  ;;  %2633 = vmatpush1.bf16.msra.mxu1 %v2505_v0  ;;  %v7374_v51 = vmov 1065369472   ;;  %7491 = vst [vmem:[#allocation43_spill] sm:$0xff] %v6561_v35  ;;  %v6564_v59 = vadd.f32 %v1692_v25, %v6304_v60  ;;  %v6568_v1 = vrot.slane %v6558_v36, %v7493_v42  ;;  %v7496_v25 = vld [vmem:[#allocation25_spill] sm:$0xff] }
 0x1c8   : > { %2593 = vmatprep.subr.bf16.mxu0 %v2488_v32  ;;  %2634 = vmatprep.subr.bf16.mxu1 %v2490_v28  ;;  %v1585_v58 = vpop.f32.mrf.mxu0  ;;  %v1698_v8 = vpop.f32.mrf.mxu1  ;;  %v6572_v53 = vrot.slane %v6558_v36, %v7494_v62  ;;  %v6575_v28 = vadd.f32 %v1583_v37, %v6277_v29  ;;  %v6624_v42 = vadd.f32 %v6536_v38, %v6287_v40 }
 0x1c9   : > { %7492 = vst [vmem:[#allocation46_spill] sm:$0xff] %v6564_v59  ;;  %v1586_v19 = vadd.f32 %v1585_v58, %v6291_v45  ;;  %v6579_v2 = vadd.f32 %v1698_v8, %v6304_v60  ;;  %v6598_v8 = vadd.f32 %v6494_v50, %v6277_v29 }
 0x1ca   : > { %v1587_v39 = vpop.f32.mrf.mxu0  ;;  %v1700_v5 = vpop.f32.mrf.mxu1  ;;  %7495 = vst [vmem:[#allocation44_spill] sm:$0xff] %v6575_v28 }
 0x1cb   : > { %2594 = vmatpush1.bf16.msra.mxu0 %v2487_v30  ;;  %2635 = vmatpush1.bf16.msra.mxu1 %v2489_v14  ;;  %v6583_v14 = vrot.slane %v6558_v36, %v7496_v25  ;;  %7500 = vst [vmem:[#allocation40_spill] sm:$0xff] %v6598_v8 }
 0x1cc   : > { %2595 = vmatprep.subr.bf16.mxu0 %v7481_v55  ;;  %2636 = vmatprep.subr.bf16.mxu1 %v7482_v61  ;;  %v1589_v3 = vpop.f32.mrf.mxu0  ;;  %v1702_v9 = vpop.f32.mrf.mxu1  ;;  %v6586_v55 = vadd.f32 %v1587_v39, %v6277_v29  ;;  %v6589_v61 = vadd.f32 %v1700_v5, %v6287_v40  ;;  %v6606_v39 = vadd.f32 %v6514_v11, %v6304_v60 }
 0x1cd   : > { %v6610_v5 = vadd.f32 %v6524_v33, %v6277_v29  ;;  %v2298_v33 = vmax.f32 %v1586_v19, 0.0 }
 0x1ce   : > { %v1593_v21 = vpop.f32.mrf.mxu0  ;;  %v6544_v24 = vpop.f32.mrf.mxu1  ;;  %7497 = vst [vmem:[#allocation39_spill] sm:$0xff] %v6586_v55  ;;  %7498 = vst [vmem:[#allocation42_spill] sm:$0xff] %v6589_v61 }
 0x1cf   : > { %2596 = vmatpush1.bf16.msra.mxu0 %v7483_v43  ;;  %2637 = vmatpush1.bf16.msra.mxu1 %v7484_v34  ;;  %v1590_v43 = vadd.f32 %v1589_v3, %v6291_v45  ;;  %v7499_v34 = vld [vmem:[#allocation26_spill] sm:$0xff]  ;;  %v6633_v50 = vadd.f32 %v1593_v21, %v6277_v29 }
 0x1d0   : > { %2597 = vmatprep.subr.bf16.mxu0 %v7485_v44  ;;  %2638 = vmatprep.subr.bf16.mxu1 %v7486_v48  ;;  %v1595_v46 = vpop.f32.mrf.mxu0  ;;  %v1708_v57 = vpop.f32.mrf.mxu1  ;;  %v6594_v58 = vrot.slane %v6558_v36, %v7499_v34  ;;  %v6602_v44 = vadd.f32 %v6502_v4, %v6291_v45  ;;  %v6614_v48 = vadd.f32 %v6529_v16, %v6287_v40 }
 0x1d1   : > { %v6619_v4 = vadd.f32 %v1702_v9, %v6304_v60  ;;  %v6636_v11 = vadd.f32 %v1708_v57, %v6304_v60  ;;  %v6652_v57 = vadd.f32 %v6544_v24, %v6287_v40 }
 0x1d2   : > { %v6548_v15 = vpop.f32.mrf.mxu0  ;;  %v6550_v7 = vpop.f32.mrf.mxu1  ;;  %7501 = vst [vmem:[#allocation33_spill] sm:$0xff] %v6614_v48 }
 0x1d3   : > { %2598 = vmatpush1.bf16.msra.mxu0 %v7487_v18  ;;  %2639 = vmatpush1.bf16.msra.mxu1 %v7488_v52  ;;  %v6630_v18 = vadd.f32 %v1595_v46, %v6291_v45 }
 0x1d4   : > { %v1599_v22 = vpop.f32.mrf.mxu0  ;;  %v1712_v20 = vpop.f32.mrf.mxu1 }
 0x1d5   : > { %v6639_v38 = vadd.f32 %v1599_v22, %v6291_v45 }
 0x1d6   : > { %2616 = vmatmul.mubr.bf16.vlgmr.msra.gmra.mxu0 %v7374_v51  ;;  %2657 = vmatmul.mubr.bf16.vlgmr.msra.gmra.mxu1 %v7374_v51  ;;  %v1603_v63 = vpop.f32.mrf.mxu0  ;;  %v6556_v31 = vpop.f32.mrf.mxu1  ;;  %v2314_v51 = vmax.f32 %v1590_v43, 0.0  ;;  %v6644_v43 = vadd.f32 %v1712_v20, %v6304_v60 }
 0x1d7   : > { %2697 = vmatprep.mubr.bf16.mxu0 %v7489_v23  ;;  %2738 = vmatprep.mubr.bf16.mxu1 %v7489_v23  ;;  %v6647_v46 = vadd.f32 %v1603_v63, %v6277_v29 }
 0x1d8   : > { %v1605_v49 = vpop.f32.mrf.mxu0  ;;  %v1718_v17 = vpop.f32.mrf.mxu1  ;;  %v6663_v36 = vpack.c.bf16 %v2314_v51, %v2298_v33 }
 0x1d9   : > { %v1606_v21 = vadd.f32 %v1605_v49, %v6291_v45  ;;  %v6655_v22 = vadd.f32 %v1718_v17, %v6304_v60  ;;  %v6668_v49 = vadd.f32 %v6548_v15, %v6277_v29  ;;  %v6683_v15 = vadd.f32 %v6556_v31, %v6287_v40 }
 0x1da   : > { %v1607_v47 = vpop.f32.mrf.mxu0  ;;  %v1720_v0 = vpop.f32.mrf.mxu1 }
 0x1db   : > { %v6661_v16 = vadd.f32 %v1720_v0, %v6287_v40 }
 0x1dc   : > { %v1609_v32 = vpop.f32.mrf.mxu0  ;;  %v1722_v30 = vpop.f32.mrf.mxu1 }
 0x1dd   : > { %v1610_v19 = vadd.f32 %v1609_v32, %v6291_v45  ;;  %v6658_v32 = vadd.f32 %v1607_v47, %v6277_v29  ;;  %v6671_v24 = vadd.f32 %v1722_v30, %v6304_v60  ;;  %v6676_v47 = vadd.f32 %v6550_v7, %v6287_v40 }
 0x1de   : > { %v1613_v37 = vpop.f32.mrf.mxu0  ;;  %v1726_v3 = vpop.f32.mrf.mxu1  ;;  %v2362_v30 = vmax.f32 %v1606_v21, 0.0 }
 0x1df   : > { %v2378_v51 = vmax.f32 %v1610_v19, 0.0  ;;  %v6691_v63 = vadd.f32 %v1613_v37, %v6277_v29  ;;  %v6694_v6 = vadd.f32 %v1726_v3, %v6287_v40 }
 0x1e0   : > { %v1615_v52 = vpop.f32.mrf.mxu0  ;;  %v1728_v25 = vpop.f32.mrf.mxu1 }
 0x1e1   : > { %v1616_v0 = vadd.f32 %v1615_v52, %v6291_v45  ;;  %v1729_v31 = vadd.f32 %v1728_v25, %v6304_v60  ;;  %v6697_v54 = vpack.c.bf16 %v2378_v51, %v2362_v30 }
 0x1e2   : > { %v1617_v9 = vpop.f32.mrf.mxu0  ;;  %v1730_v62 = vpop.f32.mrf.mxu1 }
 0x1e3   : > { %v2394_v25 = vmax.f32 %v1616_v0, 0.0  ;;  %v1618_v51 = vadd.f32 %v1617_v9, %v6277_v29  ;;  %v2396_v13 = vmax.f32 %v1729_v31, 0.0 }
 0x1e4   : > { %v1619_v34 = vpop.f32.mrf.mxu0  ;;  %v1732_v20 = vpop.f32.mrf.mxu1 }
 0x1e5   : > { %v1620_v56 = vadd.f32 %v1619_v34, %v6291_v45  ;;  %v1733_v12 = vadd.f32 %v1732_v20, %v6304_v60  ;;  %v2409_v55 = vmax.f32 %v1618_v51, 0.0  ;;  %v2393_v51 = vmax.f32 %v6691_v63, 0.0 }
 0x1e6   : > { %v1623_v17 = vpop.f32.mrf.mxu0  ;;  %v1736_v33 = vpop.f32.mrf.mxu1 }
 0x1e7   : > { %v1624_v37 = vadd.f32 %v1623_v17, %v6277_v29  ;;  %v1737_v30 = vadd.f32 %v1736_v33, %v6287_v40  ;;  %v2410_v8 = vmax.f32 %v1620_v56, 0.0  ;;  %v2412_v0 = vmax.f32 %v1733_v12, 0.0 }
 0x1e8   : > { %v1625_v27 = vpop.f32.mrf.mxu0  ;;  %v1738_v19 = vpop.f32.mrf.mxu1 }
 0x1e9   : > { %v1626_v7 = vadd.f32 %v1625_v27, %v6291_v45  ;;  %v1739_v10 = vadd.f32 %v1738_v19, %v6304_v60  ;;  %v2425_v48 = vmax.f32 %v1624_v37, 0.0 }
 0x1ea   : > { %v1627_v21 = vpop.f32.mrf.mxu0  ;;  %v1740_v23 = vpop.f32.mrf.mxu1 }
 0x1eb   : > { %v1628_v52 = vadd.f32 %v1627_v21, %v6277_v29  ;;  %v1741_v3 = vadd.f32 %v1740_v23, %v6287_v40  ;;  %v1731_v21 = vadd.f32 %v1730_v62, %v6287_v40  ;;  %v2426_v19 = vmax.f32 %v1626_v7, 0.0 }
 0x1ec   : > { %v1629_v41 = vpop.f32.mrf.mxu0  ;;  %v1742_v27 = vpop.f32.mrf.mxu1  ;;  %v2428_v29 = vmax.f32 %v1739_v10, 0.0 }
 0x1ed   : > { %v1630_v34 = vadd.f32 %v1629_v41, %v6291_v45  ;;  %v2441_v59 = vmax.f32 %v1628_v52, 0.0  ;;  %v1743_v20 = vadd.f32 %v1742_v27, %v6304_v60  ;;  %v2443_v61 = vmax.f32 %v1741_v3, 0.0 }
 0x1ee   : > { %v1779_v17 = vpop.f32.mrf.mxu0  ;;  %v1892_v35 = vpop.f32.mrf.mxu1  ;;  %v2427_v45 = vmax.f32 %v1737_v30, 0.0  ;;  %v2411_v52 = vmax.f32 %v1731_v21, 0.0  ;;  %v2556_v3 = vpack.c.bf16 %v2410_v8, %v2394_v25  ;;  %v2558_v30 = vpack.c.bf16 %v2412_v0, %v2396_v13 }
 0x1ef   : > { %v2442_v23 = vmax.f32 %v1630_v34, 0.0  ;;  %v2444_v9 = vmax.f32 %v1743_v20, 0.0  ;;  %v1780_v31 = vadd.f32 %v1779_v17, %v6568_v1  ;;  %v2571_v28 = vpack.c.bf16 %v2441_v59, %v2425_v48 }
 0x1f0   : > { %v1781_v33 = vpop.f32.mrf.mxu0  ;;  %v1894_v62 = vpop.f32.mrf.mxu1  ;;  %v1893_v56 = vadd.f32 %v1892_v35, %v6572_v53  ;;  %v2573_v34 = vpack.c.bf16 %v2443_v61, %v2427_v45  ;;  %v2395_v35 = vmax.f32 %v6694_v6, 0.0  ;;  %v2555_v20 = vpack.c.bf16 %v2409_v55, %v2393_v51 }
 0x1f1   : > { %v2572_v41 = vpack.c.bf16 %v2442_v23, %v2426_v19  ;;  %v2574_v60 = vpack.c.bf16 %v2444_v9, %v2428_v29  ;;  %v1782_v12 = vadd.f32 %v1781_v33, %v6583_v14  ;;  %v1895_v27 = vadd.f32 %v1894_v62, %v6594_v58 }
 0x1f2   : > { %v1783_v7 = vpop.f32.mrf.mxu0  ;;  %v1896_v37 = vpop.f32.mrf.mxu1  ;;  %v2205_v8 = vmax.f32 %v1780_v31, 0.0  ;;  %v2207_v17 = vmax.f32 %v1893_v56, 0.0  ;;  %v2557_v23 = vpack.c.bf16 %v2411_v52, %v2395_v35  ;;  %v7503_v9 = vmax.f32 %v6655_v22, 0.0 }
 0x1f3   : > { %v1784_v10 = vadd.f32 %v1783_v7, %v6568_v1  ;;  %2665 = vmatprep.subr.bf16.mxu0 %v2572_v41  ;;  %v1897_v21 = vadd.f32 %v1896_v37, %v6572_v53  ;;  %2706 = vmatprep.subr.bf16.mxu1 %v2574_v60  ;;  %v2206_v0 = vmax.f32 %v1782_v12, 0.0  ;;  %v7504_v33 = vmax.f32 %v6671_v24, 0.0 }
 0x1f4   : > { %v1785_v59 = vpop.f32.mrf.mxu0  ;;  %2666 = vmatpush1.bf16.msra.mxu0 %v2571_v28  ;;  %v1898_v25 = vpop.f32.mrf.mxu1  ;;  %2707 = vmatpush1.bf16.msra.mxu1 %v2573_v34  ;;  %v2208_v41 = vmax.f32 %v1895_v27, 0.0  ;;  %v2345_v60 = vmax.f32 %v6668_v49, 0.0  ;;  %v2363_v52 = vmax.f32 %v6683_v15, 0.0  ;;  %v2347_v22 = vmax.f32 %v6676_v47, 0.0 }
 0x1f5   : > { %v2221_v61 = vmax.f32 %v1784_v10, 0.0  ;;  %v1786_v48 = vadd.f32 %v1785_v59, %v6583_v14  ;;  %2667 = vmatprep.subr.bf16.mxu0 %v2556_v3  ;;  %v2223_v63 = vmax.f32 %v1897_v21, 0.0  ;;  %v1899_v13 = vadd.f32 %v1898_v25, %v6594_v58  ;;  %2708 = vmatprep.subr.bf16.mxu1 %v2558_v30 }
 0x1f6   : > { %v1789_v19 = vpop.f32.mrf.mxu0  ;;  %v1902_v6 = vpop.f32.mrf.mxu1  ;;  %v2542_v45 = vpack.c.bf16 %v7504_v33, %v7503_v9  ;;  %v7507_v24 = vmax.f32 %v6647_v46, 0.0  ;;  %v7508_v34 = vmax.f32 %v6658_v32, 0.0  ;;  %v7510_v37 = vmax.f32 %v6630_v18, 0.0 }
 0x1f7   : > { %v6721_v29 = vpack.c.bf16 %v2221_v61, %v2205_v8  ;;  %v2222_v28 = vmax.f32 %v1786_v48, 0.0  ;;  %v6727_v31 = vpack.c.bf16 %v2223_v63, %v2207_v17  ;;  %v2224_v55 = vmax.f32 %v1899_v13, 0.0 }
 0x1f8   : > { %v1791_v62 = vpop.f32.mrf.mxu0  ;;  %2668 = vmatpush1.bf16.msra.mxu0 %v2555_v20  ;;  %v1790_v7 = vadd.f32 %v1789_v19, %v6568_v1  ;;  %v1904_v3 = vpop.f32.mrf.mxu1  ;;  %2709 = vmatpush1.bf16.msra.mxu1 %v2557_v23  ;;  %v2539_v12 = vpack.c.bf16 %v7508_v34, %v7507_v24  ;;  %v1903_v49 = vadd.f32 %v1902_v6, %v6572_v53  ;;  %v7511_v51 = vmax.f32 %v6639_v38, 0.0  ;;  %v7520_v24 = vld [vmem:[#allocation44_spill] sm:$0xff] }
 0x1f9   : > { %7502 = vst [vmem:[#allocation34_spill] sm:$0xff] %v6721_v29  ;;  %7505 = vst [vmem:[#allocation31_spill] sm:$0xff] %v6727_v31  ;;  %v6731_v56 = vpack.c.bf16 %v2222_v28, %v2206_v0  ;;  %2669 = vmatprep.subr.bf16.mxu0 %v6697_v54  ;;  %v6740_v10 = vpack.c.bf16 %v2224_v55, %v2208_v41  ;;  %2710 = vmatprep.subr.bf16.mxu1 %v2542_v45  ;;  %v7512_v54 = vmax.f32 %v6661_v16, 0.0 }
 0x1fa   : > { %v1793_v15 = vpop.f32.mrf.mxu0  ;;  %v2524_v30 = vpack.c.bf16 %v7511_v51, %v7510_v37  ;;  %v1792_v47 = vadd.f32 %v1791_v62, %v6583_v14  ;;  %v1906_v32 = vpop.f32.mrf.mxu1  ;;  %v2329_v21 = vmax.f32 %v6633_v50, 0.0  ;;  %v7513_v59 = vmax.f32 %v6636_v11, 0.0  ;;  %v7526_v37 = vld [vmem:[#allocation43_spill] sm:$0xff] }
 0x1fb   : > { %7506 = vst [vmem:[#allocation32_spill] sm:$0xff] %v6731_v56  ;;  %7509 = vst [vmem:[#allocation29_spill] sm:$0xff] %v6740_v10  ;;  %v2541_v27 = vpack.c.bf16 %v7512_v54, %v2363_v52  ;;  %v1794_v46 = vadd.f32 %v1793_v15, %v6568_v1  ;;  %v7514_v35 = vmax.f32 %v6644_v43, 0.0  ;;  %v1905_v18 = vadd.f32 %v1904_v3, %v6594_v58 }
 0x1fc   : > { %v1907_v38 = vadd.f32 %v1906_v32, %v6572_v53  ;;  %v1795_v61 = vpop.f32.mrf.mxu0  ;;  %2670 = vmatpush1.bf16.msra.mxu0 %v2539_v12  ;;  %v2331_v16 = vmax.f32 %v6652_v57, 0.0  ;;  %v2237_v48 = vmax.f32 %v1790_v7, 0.0  ;;  %v1908_v17 = vpop.f32.mrf.mxu1  ;;  %v2523_v50 = vpack.c.bf16 %v2345_v60, %v2329_v21  ;;  %v7522_v12 = vld [vmem:[#allocation39_spill] sm:$0xff] }
 0x1fd   : > { %v2526_v8 = vpack.c.bf16 %v7514_v35, %v7513_v59  ;;  %v2253_v25 = vmax.f32 %v1794_v46, 0.0  ;;  %v1796_v20 = vadd.f32 %v1795_v61, %v6583_v14  ;;  %2711 = vmatpush1.bf16.msra.mxu1 %v2541_v27  ;;  %2671 = vmatprep.subr.bf16.mxu0 %v2524_v30  ;;  %v2239_v11 = vmax.f32 %v1903_v49, 0.0  ;;  %v7531_v46 = vld [vmem:[#allocation46_spill] sm:$0xff] }
 0x1fe   : > { %v2255_v63 = vmax.f32 %v1907_v38, 0.0  ;;  %v1909_v43 = vadd.f32 %v1908_v17, %v6594_v58  ;;  %v6761_v13 = vpop.f32.mrf.mxu0  ;;  %v2525_v19 = vpack.c.bf16 %v2347_v22, %v2331_v16  ;;  %v2238_v23 = vmax.f32 %v1792_v47, 0.0  ;;  %v6765_v28 = vpop.f32.mrf.mxu1  ;;  %v7534_v17 = vld [vmem:[#allocation45_spill] sm:$0xff] }
 0x1ff   : > { %2712 = vmatprep.subr.bf16.mxu1 %v2526_v8  ;;  %v6763_v0 = vpack.c.bf16 %v2253_v25, %v2237_v48  ;;  %v2254_v57 = vmax.f32 %v1796_v20, 0.0  ;;  %v7516_v6 = vmax.f32 %v6579_v2, 0.0  ;;  %v7517_v9 = vmax.f32 %v6619_v4, 0.0  ;;  %v7533_v20 = vld [vmem:[#allocation53_spill] sm:$0xff] }
 0x200   : > { %v2240_v45 = vmax.f32 %v1905_v18, 0.0  ;;  %v6771_v41 = vpack.c.bf16 %v2255_v63, %v2239_v11  ;;  %v2256_v55 = vmax.f32 %v1909_v43, 0.0  ;;  %v6773_v62 = vpop.f32.mrf.mxu0  ;;  %2672 = vmatpush1.bf16.msra.mxu0 %v2523_v50  ;;  %v1687_v60 = vadd.f32 %v6498_v26, %v6287_v40  ;;  %v6781_v2 = vpop.f32.mrf.mxu1  ;;  %v7535_v43 = vld [vmem:[#allocation51_spill] sm:$0xff] }
 0x201   : > { %7515 = vst [vmem:[#allocation30_spill] sm:$0xff] %v6763_v0  ;;  %v2510_v33 = vpack.c.bf16 %v7517_v9, %v7516_v6  ;;  %v2266_v52 = vmax.f32 %v6602_v44, 0.0  ;;  %v2299_v7 = vmax.f32 %v6624_v42, 0.0  ;;  %v6779_v3 = vpack.c.bf16 %v2254_v57, %v2238_v23  ;;  %2713 = vmatpush1.bf16.msra.mxu1 %v2525_v19  ;;  %2673 = vmatprep.subr.bf16.mxu0 %v6663_v36  ;;  %v7525_v42 = vld [vmem:[#allocation33_spill] sm:$0xff]  ;;  %v7528_v36 = vld [vmem:[#allocation42_spill] sm:$0xff]  ;;  %v7536_v23 = vld [vmem:[#allocation52_spill] sm:$0xff] }
 0x202   : > { %7518 = vst [vmem:[#allocation27_spill] sm:$0xff] %v6771_v41  ;;  %v2268_v4 = vmax.f32 %v6606_v39, 0.0  ;;  %v2281_v22 = vmax.f32 %v6610_v5, 0.0  ;;  %v7521_v34 = vmax.f32 %v7520_v24, 0.0  ;;  %v7523_v49 = vmax.f32 %v7522_v12, 0.0  ;;  %v6792_v44 = vpop.f32.mrf.mxu0  ;;  %v6799_v27 = vpop.f32.mrf.mxu1  ;;  %v7530_v5 = vld [vmem:[#allocation40_spill] sm:$0xff] }
 0x203   : > { %7519 = vst [vmem:[#allocation28_spill] sm:$0xff] %v6779_v3  ;;  %v6790_v26 = vpack.c.bf16 %v2256_v55, %v2240_v45  ;;  %2714 = vmatprep.subr.bf16.mxu1 %v2510_v33  ;;  %v2283_v15 = vmax.f32 %v7525_v42, 0.0  ;;  %v7527_v51 = vmax.f32 %v7526_v37, 0.0  ;;  %v7529_v54 = vmax.f32 %v7528_v36, 0.0  ;;  %v7537_v57 = vld [vmem:[#allocation49_spill] sm:$0xff]  ;;  %v7538_v6 = vld [vmem:[#allocation50_spill] sm:$0xff] }
 0x204   : > { %v2507_v40 = vpack.c.bf16 %v7523_v49, %v7521_v34  ;;  %v2265_v47 = vmax.f32 %v7530_v5, 0.0  ;;  %v7532_v32 = vmax.f32 %v7531_v46, 0.0  ;;  %v1805_v59 = vpop.f32.mrf.mxu0  ;;  %v2267_v35 = vmax.f32 %v1687_v60, 0.0  ;;  %v1918_v8 = vpop.f32.mrf.mxu1  ;;  %v7539_v55 = vld [vmem:[#allocation47_spill] sm:$0xff]  ;;  %v7546_v5 = vld [vmem:[#allocation41_spill] sm:$0xff]  ;;  %v7547_v46 = vld [vmem:[#allocation36_spill] sm:$0xff] }
 0x205   : > { %7524 = vst [vmem:[#allocation44_spill] sm:$0xff] %v6790_v26  ;;  %v2492_v30 = vpack.c.bf16 %v7527_v51, %v2266_v52  ;;  %v2509_v39 = vpack.c.bf16 %v7529_v54, %v2299_v7  ;;  %v7540_v52 = vld [vmem:[#allocation48_spill] sm:$0xff]  ;;  %v7542_v34 = vmov 0   ;;  %v6828_v36 = vadd.f32 %v1918_v8, %v6594_v58  ;;  %v7549_v8 = vld [vmem:[#allocation37_spill] sm:$0xff] }
 0x206   : > { %v2494_v21 = vpack.c.bf16 %v7532_v32, %v2268_v4  ;;  %2674 = vmatpush1.bf16.msra.mxu0 %v2507_v40  ;;  %v2491_v18 = vpack.c.bf16 %v2281_v22, %v2265_v47  ;;  %v1809_v38 = vpop.f32.mrf.mxu0  ;;  %v2493_v61 = vpack.c.bf16 %v2283_v15, %v2267_v35  ;;  %v1922_v16 = vpop.f32.mrf.mxu1  ;;  %v7541_v22 = vmov 1065369472  }
 0x207   : > { %2715 = vmatpush1.bf16.msra.mxu1 %v2509_v39  ;;  %2675 = vmatprep.subr.bf16.mxu0 %v2492_v30  ;;  %v6825_v30 = vadd.f32 %v1805_v59, %v6583_v14  ;;  %7544 = vst [vmem:[#allocation33_spill] sm:$0xff] %v6828_v36  ;;  %v7545_v39 = vld [vmem:[#allocation35_spill] sm:$0xff]  ;;  %v6836_v32 = vrot.slane %v7546_v5, %v7547_v46 }
 0x208   : > { %2716 = vmatprep.subr.bf16.mxu1 %v2494_v21  ;;  %v1811_v48 = vpop.f32.mrf.mxu0  ;;  %v1924_v25 = vpop.f32.mrf.mxu1  ;;  %v6832_v47 = vrot.slane %v7546_v5, %v7545_v39  ;;  %v6839_v21 = vadd.f32 %v1809_v38, %v6568_v1  ;;  %v6887_v39 = vadd.f32 %v1922_v16, %v6572_v53 }
 0x209   : > { %7543 = vst [vmem:[#allocation39_spill] sm:$0xff] %v6825_v30  ;;  %v1812_v35 = vadd.f32 %v1811_v48, %v6583_v14  ;;  %v6843_v59 = vadd.f32 %v1924_v25, %v6594_v58  ;;  %v6862_v25 = vadd.f32 %v6761_v13, %v6568_v1 }
 0x20a   : > { %2676 = vmatpush1.bf16.msra.mxu0 %v2491_v18  ;;  %v1813_v50 = vpop.f32.mrf.mxu0  ;;  %v1926_v11 = vpop.f32.mrf.mxu1  ;;  %7548 = vst [vmem:[#allocation43_spill] sm:$0xff] %v6839_v21 }
 0x20b   : > { %2717 = vmatpush1.bf16.msra.mxu1 %v2493_v61  ;;  %2677 = vmatprep.subr.bf16.mxu0 %v7533_v20  ;;  %v6847_v61 = vrot.slane %v7546_v5, %v7549_v8  ;;  %v6850_v20 = vadd.f32 %v1813_v50, %v6568_v1  ;;  %7553 = vst [vmem:[#allocation46_spill] sm:$0xff] %v6862_v25 }
 0x20c   : > { %2718 = vmatprep.subr.bf16.mxu1 %v7534_v17  ;;  %v1815_v63 = vpop.f32.mrf.mxu0  ;;  %v1928_v19 = vpop.f32.mrf.mxu1  ;;  %v6853_v17 = vadd.f32 %v1926_v11, %v6572_v53  ;;  %v6870_v50 = vadd.f32 %v6781_v2, %v6594_v58  ;;  %v6874_v11 = vadd.f32 %v6792_v44, %v6568_v1  ;;  %v2302_v44 = vmax.f32 %v1812_v35, 0.0 }
 0x20d   : > { %7550 = vst [vmem:[#allocation42_spill] sm:$0xff] %v6850_v20 }
 0x20e   : > { %2678 = vmatpush1.bf16.msra.mxu0 %v7535_v43  ;;  %v1819_v9 = vpop.f32.mrf.mxu0  ;;  %v6810_v33 = vpop.f32.mrf.mxu1  ;;  %7551 = vst [vmem:[#allocation40_spill] sm:$0xff] %v6853_v17  ;;  %v1816_v43 = vadd.f32 %v1815_v63, %v6583_v14 }
 0x20f   : > { %2719 = vmatpush1.bf16.msra.mxu1 %v7536_v23  ;;  %2679 = vmatprep.subr.bf16.mxu0 %v7537_v57  ;;  %v7552_v23 = vld [vmem:[#allocation38_spill] sm:$0xff]  ;;  %v6866_v57 = vadd.f32 %v6773_v62, %v6583_v14  ;;  %v6883_v62 = vadd.f32 %v1928_v19, %v6594_v58  ;;  %v6896_v13 = vadd.f32 %v1819_v9, %v6568_v1 }
 0x210   : > { %2720 = vmatprep.subr.bf16.mxu1 %v7538_v6  ;;  %v1821_v45 = vpop.f32.mrf.mxu0  ;;  %v1934_v60 = vpop.f32.mrf.mxu1  ;;  %v6858_v48 = vrot.slane %v7546_v5, %v7552_v23  ;;  %v6878_v6 = vadd.f32 %v6799_v27, %v6572_v53  ;;  %v2318_v23 = vmax.f32 %v1816_v43, 0.0 }
 0x211   : > { %v6899_v2 = vadd.f32 %v1934_v60, %v6594_v58  ;;  %v6915_v60 = vadd.f32 %v6810_v33, %v6572_v53 }
 0x212   : > { %2680 = vmatpush1.bf16.msra.mxu0 %v7539_v55  ;;  %v6814_v7 = vpop.f32.mrf.mxu0  ;;  %v6816_v4 = vpop.f32.mrf.mxu1  ;;  %7554 = vst [vmem:[#allocation53_spill] sm:$0xff] %v6878_v6  ;;  %v6893_v55 = vadd.f32 %v1821_v45, %v6583_v14 }
 0x213   : > { %2721 = vmatpush1.bf16.msra.mxu1 %v7540_v52 }
 0x214   : > { %v1825_v24 = vpop.f32.mrf.mxu0  ;;  %v1938_v12 = vpop.f32.mrf.mxu1 }
 0x215   : > { %2698 = vmatmul.mubr.bf16.vlgmr.msra.gmra.mxu0 %v7541_v22  ;;  %v6902_v16 = vadd.f32 %v1825_v24, %v6583_v14  ;;  %v6907_v43 = vadd.f32 %v1938_v12, %v6594_v58 }
 0x216   : > { %2739 = vmatmul.mubr.bf16.vlgmr.msra.gmra.mxu1 %v7541_v22  ;;  %2779 = vmatprep.mubr.bf16.mxu0 %v7542_v34  ;;  %v1829_v49 = vpop.f32.mrf.mxu0  ;;  %v6822_v40 = vpop.f32.mrf.mxu1 }
 0x217   : > { %2820 = vmatprep.mubr.bf16.mxu1 %v7542_v34  ;;  %v6910_v45 = vadd.f32 %v1829_v49, %v6568_v1  ;;  %v6926_v34 = vpack.c.bf16 %v2318_v23, %v2302_v44 }
 0x218   : > { %v1831_v42 = vpop.f32.mrf.mxu0  ;;  %v1944_v15 = vpop.f32.mrf.mxu1 }
 0x219   : > { %v1832_v9 = vadd.f32 %v1831_v42, %v6583_v14  ;;  %v6918_v24 = vadd.f32 %v1944_v15, %v6594_v58  ;;  %v6931_v42 = vadd.f32 %v6814_v7, %v6568_v1  ;;  %v6946_v7 = vadd.f32 %v6822_v40, %v6572_v53 }
 0x21a   : > { %v1833_v37 = vpop.f32.mrf.mxu0  ;;  %v1946_v51 = vpop.f32.mrf.mxu1 }
 0x21b   : > { %v6924_v27 = vadd.f32 %v1946_v51, %v6572_v53 }
 0x21c   : > { %v1835_v54 = vpop.f32.mrf.mxu0  ;;  %v1948_v18 = vpop.f32.mrf.mxu1 }
 0x21d   : > { %v1836_v35 = vadd.f32 %v1835_v54, %v6583_v14  ;;  %v6921_v54 = vadd.f32 %v1833_v37, %v6568_v1  ;;  %v6934_v33 = vadd.f32 %v1948_v18, %v6594_v58  ;;  %v6939_v37 = vadd.f32 %v6816_v4, %v6572_v53 }
 0x21e   : > { %v1839_v38 = vpop.f32.mrf.mxu0  ;;  %v1952_v63 = vpop.f32.mrf.mxu1  ;;  %v2366_v18 = vmax.f32 %v1832_v9, 0.0 }
 0x21f   : > { %v2382_v44 = vmax.f32 %v1836_v35, 0.0  ;;  %v6954_v49 = vadd.f32 %v1839_v38, %v6568_v1  ;;  %v6957_v31 = vadd.f32 %v1952_v63, %v6572_v53 }
 0x220   : > { %v1841_v52 = vpop.f32.mrf.mxu0  ;;  %v1954_v46 = vpop.f32.mrf.mxu1 }
 0x221   : > { %v1842_v51 = vadd.f32 %v1841_v52, %v6583_v14  ;;  %v1955_v40 = vadd.f32 %v1954_v46, %v6594_v58  ;;  %v6960_v41 = vpack.c.bf16 %v2382_v44, %v2366_v18 }
 0x222   : > { %v1843_v19 = vpop.f32.mrf.mxu0  ;;  %v1956_v5 = vpop.f32.mrf.mxu1 }
 0x223   : > { %v2398_v46 = vmax.f32 %v1842_v51, 0.0  ;;  %v1844_v44 = vadd.f32 %v1843_v19, %v6568_v1  ;;  %v2400_v3 = vmax.f32 %v1955_v40, 0.0 }
 0x224   : > { %v1845_v8 = vpop.f32.mrf.mxu0  ;;  %v1958_v12 = vpop.f32.mrf.mxu1 }
 0x225   : > { %v1846_v10 = vadd.f32 %v1845_v8, %v6583_v14  ;;  %v1959_v56 = vadd.f32 %v1958_v12, %v6594_v58  ;;  %v2413_v20 = vmax.f32 %v1844_v44, 0.0  ;;  %v2397_v44 = vmax.f32 %v6954_v49, 0.0 }
 0x226   : > { %v1849_v15 = vpop.f32.mrf.mxu0  ;;  %v1962_v23 = vpop.f32.mrf.mxu1 }
 0x227   : > { %v1850_v38 = vadd.f32 %v1849_v15, %v6568_v1  ;;  %v1963_v18 = vadd.f32 %v1962_v23, %v6572_v53  ;;  %v2414_v25 = vmax.f32 %v1846_v10, 0.0  ;;  %v2416_v51 = vmax.f32 %v1959_v56, 0.0 }
 0x228   : > { %v1851_v29 = vpop.f32.mrf.mxu0  ;;  %v1964_v35 = vpop.f32.mrf.mxu1 }
 0x229   : > { %v1852_v4 = vadd.f32 %v1851_v29, %v6583_v14  ;;  %v1965_v0 = vadd.f32 %v1964_v35, %v6594_v58  ;;  %v2429_v6 = vmax.f32 %v1850_v38, 0.0 }
 0x22a   : > { %v1853_v9 = vpop.f32.mrf.mxu0  ;;  %v1966_v22 = vpop.f32.mrf.mxu1 }
 0x22b   : > { %v1854_v52 = vadd.f32 %v1853_v9, %v6568_v1  ;;  %v1967_v63 = vadd.f32 %v1966_v22, %v6572_v53  ;;  %v1957_v9 = vadd.f32 %v1956_v5, %v6572_v53  ;;  %v2430_v35 = vmax.f32 %v1852_v4, 0.0 }
 0x22c   : > { %v1855_v26 = vpop.f32.mrf.mxu0  ;;  %v1968_v29 = vpop.f32.mrf.mxu1  ;;  %v2432_v1 = vmax.f32 %v1965_v0, 0.0 }
 0x22d   : > { %v1856_v8 = vadd.f32 %v1855_v26, %v6583_v14  ;;  %v2445_v36 = vmax.f32 %v1854_v52, 0.0  ;;  %v1969_v12 = vadd.f32 %v1968_v29, %v6594_v58  ;;  %v2447_v17 = vmax.f32 %v1967_v63, 0.0 }
 0x22e   : > { %v2005_v15 = vpop.f32.mrf.mxu0  ;;  %v2118_v30 = vpop.f32.mrf.mxu1  ;;  %v2431_v14 = vmax.f32 %v1963_v18, 0.0  ;;  %v2415_v52 = vmax.f32 %v1957_v9, 0.0  ;;  %v2560_v63 = vpack.c.bf16 %v2414_v25, %v2398_v46  ;;  %v2562_v18 = vpack.c.bf16 %v2416_v51, %v2400_v3 }
 0x22f   : > { %v2446_v22 = vmax.f32 %v1856_v8, 0.0  ;;  %v2448_v19 = vmax.f32 %v1969_v12, 0.0  ;;  %v2006_v40 = vadd.f32 %v2005_v15, %v6832_v47  ;;  %v2575_v21 = vpack.c.bf16 %v2445_v36, %v2429_v6 }
 0x230   : > { %v2007_v23 = vpop.f32.mrf.mxu0  ;;  %v2120_v5 = vpop.f32.mrf.mxu1  ;;  %v2119_v10 = vadd.f32 %v2118_v30, %v6836_v32  ;;  %v2577_v8 = vpack.c.bf16 %v2447_v17, %v2431_v14  ;;  %v2399_v30 = vmax.f32 %v6957_v31, 0.0  ;;  %v2559_v12 = vpack.c.bf16 %v2413_v20, %v2397_v44 }
 0x231   : > { %v2576_v26 = vpack.c.bf16 %v2446_v22, %v2430_v35  ;;  %v2578_v58 = vpack.c.bf16 %v2448_v19, %v2432_v1  ;;  %v2008_v56 = vadd.f32 %v2007_v23, %v6847_v61  ;;  %v2121_v29 = vadd.f32 %v2120_v5, %v6858_v48 }
 0x232   : > { %v2009_v4 = vpop.f32.mrf.mxu0  ;;  %v2122_v38 = vpop.f32.mrf.mxu1  ;;  %v2209_v25 = vmax.f32 %v2006_v40, 0.0  ;;  %v2211_v15 = vmax.f32 %v2119_v10, 0.0  ;;  %v2561_v22 = vpack.c.bf16 %v2415_v52, %v2399_v30  ;;  %v7556_v19 = vmax.f32 %v6918_v24, 0.0 }
 0x233   : > { %v2010_v0 = vadd.f32 %v2009_v4, %v6832_v47  ;;  %2747 = vmatprep.subr.bf16.mxu0 %v2576_v26  ;;  %v2123_v9 = vadd.f32 %v2122_v38, %v6836_v32  ;;  %2788 = vmatprep.subr.bf16.mxu1 %v2578_v58  ;;  %v2210_v51 = vmax.f32 %v2008_v56, 0.0  ;;  %v7557_v23 = vmax.f32 %v6934_v33, 0.0 }
 0x234   : > { %v2011_v36 = vpop.f32.mrf.mxu0  ;;  %2748 = vmatpush1.bf16.msra.mxu0 %v2575_v21  ;;  %v2124_v46 = vpop.f32.mrf.mxu1  ;;  %2789 = vmatpush1.bf16.msra.mxu1 %v2577_v8  ;;  %v2212_v26 = vmax.f32 %v2121_v29, 0.0  ;;  %v2349_v58 = vmax.f32 %v6931_v42, 0.0  ;;  %v2367_v52 = vmax.f32 %v6946_v7, 0.0  ;;  %v2351_v24 = vmax.f32 %v6939_v37, 0.0 }
 0x235   : > { %v2225_v17 = vmax.f32 %v2010_v0, 0.0  ;;  %v2012_v6 = vadd.f32 %v2011_v36, %v6847_v61  ;;  %2749 = vmatprep.subr.bf16.mxu0 %v2560_v63  ;;  %v2227_v49 = vmax.f32 %v2123_v9, 0.0  ;;  %v2125_v3 = vadd.f32 %v2124_v46, %v6858_v48  ;;  %2790 = vmatprep.subr.bf16.mxu1 %v2562_v18 }
 0x236   : > { %v2015_v35 = vpop.f32.mrf.mxu0  ;;  %v2128_v31 = vpop.f32.mrf.mxu1  ;;  %v2546_v14 = vpack.c.bf16 %v7557_v23, %v7556_v19  ;;  %v7560_v33 = vmax.f32 %v6910_v45, 0.0  ;;  %v7561_v8 = vmax.f32 %v6921_v54, 0.0  ;;  %v7563_v38 = vmax.f32 %v6893_v55, 0.0 }
 0x237   : > { %v6984_v1 = vpack.c.bf16 %v2225_v17, %v2209_v25  ;;  %v2226_v21 = vmax.f32 %v2012_v6, 0.0  ;;  %v6990_v40 = vpack.c.bf16 %v2227_v49, %v2211_v15  ;;  %v2228_v20 = vmax.f32 %v2125_v3, 0.0 }
 0x238   : > { %v2017_v5 = vpop.f32.mrf.mxu0  ;;  %2750 = vmatpush1.bf16.msra.mxu0 %v2559_v12  ;;  %v2016_v4 = vadd.f32 %v2015_v35, %v6832_v47  ;;  %v2130_v63 = vpop.f32.mrf.mxu1  ;;  %2791 = vmatpush1.bf16.msra.mxu1 %v2561_v22  ;;  %v2543_v56 = vpack.c.bf16 %v7561_v8, %v7560_v33  ;;  %v2129_v42 = vadd.f32 %v2128_v31, %v6836_v32  ;;  %v7564_v44 = vmax.f32 %v6902_v16, 0.0  ;;  %v7575_v33 = vld [vmem:[#allocation43_spill] sm:$0xff] }
 0x239   : > { %7555 = vst [vmem:[#allocation45_spill] sm:$0xff] %v6984_v1  ;;  %7558 = vst [vmem:[#allocation51_spill] sm:$0xff] %v6990_v40  ;;  %v6994_v10 = vpack.c.bf16 %v2226_v21, %v2210_v51  ;;  %2751 = vmatprep.subr.bf16.mxu0 %v6960_v41  ;;  %v7003_v0 = vpack.c.bf16 %v2228_v20, %v2212_v26  ;;  %2792 = vmatprep.subr.bf16.mxu1 %v2546_v14  ;;  %v7565_v41 = vmax.f32 %v6924_v27, 0.0 }
 0x23a   : > { %v2019_v7 = vpop.f32.mrf.mxu0  ;;  %v2528_v18 = vpack.c.bf16 %v7564_v44, %v7563_v38  ;;  %v2018_v37 = vadd.f32 %v2017_v5, %v6847_v61  ;;  %v2132_v54 = vpop.f32.mrf.mxu1  ;;  %v2333_v9 = vmax.f32 %v6896_v13, 0.0  ;;  %v7566_v36 = vmax.f32 %v6899_v2, 0.0  ;;  %v7581_v38 = vld [vmem:[#allocation39_spill] sm:$0xff] }
 0x23b   : > { %7559 = vst [vmem:[#allocation52_spill] sm:$0xff] %v6994_v10  ;;  %7562 = vst [vmem:[#allocation49_spill] sm:$0xff] %v7003_v0  ;;  %v2545_v29 = vpack.c.bf16 %v7565_v41, %v2367_v52  ;;  %v2020_v45 = vadd.f32 %v2019_v7, %v6832_v47  ;;  %v7567_v30 = vmax.f32 %v6907_v43, 0.0  ;;  %v2131_v55 = vadd.f32 %v2130_v63, %v6858_v48 }
 0x23c   : > { %v2133_v16 = vadd.f32 %v2132_v54, %v6836_v32  ;;  %v2021_v17 = vpop.f32.mrf.mxu0  ;;  %2752 = vmatpush1.bf16.msra.mxu0 %v2543_v56  ;;  %v2335_v27 = vmax.f32 %v6915_v60, 0.0  ;;  %v2241_v6 = vmax.f32 %v2016_v4, 0.0  ;;  %v2134_v15 = vpop.f32.mrf.mxu1  ;;  %v2527_v13 = vpack.c.bf16 %v2349_v58, %v2333_v9  ;;  %v7577_v56 = vld [vmem:[#allocation42_spill] sm:$0xff] }
 0x23d   : > { %v2530_v25 = vpack.c.bf16 %v7567_v30, %v7566_v36  ;;  %v2257_v46 = vmax.f32 %v2020_v45, 0.0  ;;  %v2022_v12 = vadd.f32 %v2021_v17, %v6847_v61  ;;  %2793 = vmatpush1.bf16.msra.mxu1 %v2545_v29  ;;  %2753 = vmatprep.subr.bf16.mxu0 %v2528_v18  ;;  %v2243_v2 = vmax.f32 %v2129_v42, 0.0  ;;  %v7586_v45 = vld [vmem:[#allocation33_spill] sm:$0xff] }
 0x23e   : > { %v2259_v49 = vmax.f32 %v2133_v16, 0.0  ;;  %v2135_v43 = vadd.f32 %v2134_v15, %v6858_v48  ;;  %v7024_v3 = vpop.f32.mrf.mxu0  ;;  %v2529_v35 = vpack.c.bf16 %v2351_v24, %v2335_v27  ;;  %v2242_v22 = vmax.f32 %v2018_v37, 0.0  ;;  %v7028_v21 = vpop.f32.mrf.mxu1  ;;  %v7589_v15 = vld [vmem:[#allocation44_spill] sm:$0xff] }
 0x23f   : > { %2794 = vmatprep.subr.bf16.mxu1 %v2530_v25  ;;  %7568 = vst [vmem:[#allocation50_spill] sm:$0xff] %v7024_v3  ;;  %v7026_v51 = vpack.c.bf16 %v2257_v46, %v2241_v6  ;;  %v2258_v60 = vmax.f32 %v2022_v12, 0.0  ;;  %7570 = vst [vmem:[#allocation48_spill] sm:$0xff] %v7028_v21  ;;  %v7571_v31 = vmax.f32 %v6843_v59, 0.0  ;;  %v7572_v19 = vmax.f32 %v6883_v62, 0.0  ;;  %v7588_v12 = vld [vmem:[#allocation28_spill] sm:$0xff] }
 0x240   : > { %v2244_v14 = vmax.f32 %v2131_v55, 0.0  ;;  %v7034_v26 = vpack.c.bf16 %v2259_v49, %v2243_v2  ;;  %v2260_v20 = vmax.f32 %v2135_v43, 0.0  ;;  %v7036_v5 = vpop.f32.mrf.mxu0  ;;  %2754 = vmatpush1.bf16.msra.mxu0 %v2527_v13  ;;  %v1913_v58 = vadd.f32 %v6765_v28, %v6572_v53  ;;  %v7044_v59 = vpop.f32.mrf.mxu1  ;;  %v7590_v43 = vld [vmem:[#allocation30_spill] sm:$0xff] }
 0x241   : > { %7569 = vst [vmem:[#allocation47_spill] sm:$0xff] %v7026_v51  ;;  %v2514_v23 = vpack.c.bf16 %v7572_v19, %v7571_v31  ;;  %v2270_v52 = vmax.f32 %v6866_v57, 0.0  ;;  %v2303_v4 = vmax.f32 %v6887_v39, 0.0  ;;  %v7042_v63 = vpack.c.bf16 %v2258_v60, %v2242_v22  ;;  %2795 = vmatpush1.bf16.msra.mxu1 %v2529_v35  ;;  %2755 = vmatprep.subr.bf16.mxu0 %v6926_v34  ;;  %v7580_v39 = vld [vmem:[#allocation53_spill] sm:$0xff]  ;;  %v7583_v34 = vld [vmem:[#allocation40_spill] sm:$0xff]  ;;  %v7591_v22 = vld [vmem:[#allocation27_spill] sm:$0xff] }
 0x242   : > { %7573 = vst [vmem:[#allocation41_spill] sm:$0xff] %v7034_v26  ;;  %v2272_v62 = vmax.f32 %v6870_v50, 0.0  ;;  %v2285_v24 = vmax.f32 %v6874_v11, 0.0  ;;  %v7576_v8 = vmax.f32 %v7575_v33, 0.0  ;;  %v7578_v42 = vmax.f32 %v7577_v56, 0.0  ;;  %v7055_v57 = vpop.f32.mrf.mxu0  ;;  %v7062_v29 = vpop.f32.mrf.mxu1  ;;  %v7585_v11 = vld [vmem:[#allocation46_spill] sm:$0xff] }
 0x243   : > { %7574 = vst [vmem:[#allocation54_spill] sm:$0xff] %v7042_v63  ;;  %v7053_v28 = vpack.c.bf16 %v2260_v20, %v2244_v14  ;;  %2796 = vmatprep.subr.bf16.mxu1 %v2514_v23  ;;  %v2287_v7 = vmax.f32 %v7580_v39, 0.0  ;;  %v7582_v44 = vmax.f32 %v7581_v38, 0.0  ;;  %v7584_v41 = vmax.f32 %v7583_v34, 0.0  ;;  %v7592_v60 = vld [vmem:[#allocation32_spill] sm:$0xff]  ;;  %v7593_v31 = vld [vmem:[#allocation29_spill] sm:$0xff] }
 0x244   : > { %v2511_v53 = vpack.c.bf16 %v7578_v42, %v7576_v8  ;;  %v2269_v37 = vmax.f32 %v7585_v11, 0.0  ;;  %v7587_v54 = vmax.f32 %v7586_v45, 0.0  ;;  %v2031_v36 = vpop.f32.mrf.mxu0  ;;  %v2271_v30 = vmax.f32 %v1913_v58, 0.0  ;;  %v2144_v25 = vpop.f32.mrf.mxu1  ;;  %v7594_v20 = vld [vmem:[#allocation34_spill] sm:$0xff] }
 0x245   : > { %7579 = vst [vmem:[#allocation43_spill] sm:$0xff] %v7053_v28  ;;  %v2496_v18 = vpack.c.bf16 %v7582_v44, %v2270_v52  ;;  %v2513_v50 = vpack.c.bf16 %v7584_v41, %v2303_v4  ;;  %v7595_v52 = vld [vmem:[#allocation31_spill] sm:$0xff]  ;;  %v7597_v8 = vmov 0  }
 0x246   : > { %v2498_v9 = vpack.c.bf16 %v7587_v54, %v2272_v62  ;;  %2756 = vmatpush1.bf16.msra.mxu0 %v2511_v53  ;;  %v2495_v55 = vpack.c.bf16 %v2285_v24, %v2269_v37  ;;  %v7067_v16 = vpop.f32.mrf.mxu0  ;;  %v2497_v17 = vpack.c.bf16 %v2287_v7, %v2271_v30  ;;  %v7069_v27 = vpop.f32.mrf.mxu1  ;;  %v7596_v24 = vmov 1065369472  }
 0x247   : > { %2797 = vmatpush1.bf16.msra.mxu1 %v2513_v50  ;;  %2757 = vmatprep.subr.bf16.mxu0 %v2496_v18 }
 0x248   : > { %2798 = vmatprep.subr.bf16.mxu1 %v2498_v9  ;;  %v2037_v6 = vpop.f32.mrf.mxu0  ;;  %v2150_v46 = vpop.f32.mrf.mxu1 }
 0x24a   : > { %2758 = vmatpush1.bf16.msra.mxu0 %v2495_v55  ;;  %v7073_v13 = vpop.f32.mrf.mxu0  ;;  %v7075_v2 = vpop.f32.mrf.mxu1  ;;  %v7101_v55 = vadd.f32 %v7036_v5, %v6847_v61 }
 0x24b   : > { %2799 = vmatpush1.bf16.msra.mxu1 %v2497_v17  ;;  %2759 = vmatprep.subr.bf16.mxu0 %v7588_v12  ;;  %v7105_v17 = vadd.f32 %v7044_v59, %v6858_v48 }
 0x24c   : > { %2800 = vmatprep.subr.bf16.mxu1 %v7589_v15  ;;  %v2041_v49 = vpop.f32.mrf.mxu0  ;;  %v2154_v35 = vpop.f32.mrf.mxu1  ;;  %7598 = vst [vmem:[#allocation42_spill] sm:$0xff] %v7101_v55  ;;  %v7108_v15 = vadd.f32 %v2031_v36, %v6847_v61 }
 0x24d   : > { %7599 = vst [vmem:[#allocation53_spill] sm:$0xff] %v7105_v17  ;;  %v7120_v5 = vadd.f32 %v2041_v49, %v6847_v61  ;;  %v7123_v59 = vadd.f32 %v2154_v35, %v6858_v48 }
 0x24e   : > { %2760 = vmatpush1.bf16.msra.mxu0 %v7590_v43  ;;  %v7081_v19 = vpop.f32.mrf.mxu0  ;;  %v7083_v23 = vpop.f32.mrf.mxu1  ;;  %v7111_v43 = vadd.f32 %v2144_v25, %v6858_v48 }
 0x24f   : > { %2801 = vmatpush1.bf16.msra.mxu1 %v7591_v22  ;;  %2761 = vmatprep.subr.bf16.mxu0 %v7592_v60  ;;  %v7114_v22 = vadd.f32 %v2037_v6, %v6847_v61  ;;  %v7117_v60 = vadd.f32 %v2150_v46, %v6858_v48 }
 0x250   : > { %2802 = vmatprep.subr.bf16.mxu1 %v7593_v31  ;;  %v2047_v14 = vpop.f32.mrf.mxu0  ;;  %v2160_v58 = vpop.f32.mrf.mxu1  ;;  %7600 = vst [vmem:[#allocation39_spill] sm:$0xff] %v7111_v43 }
 0x251   : > { %v7129_v36 = vadd.f32 %v2160_v58, %v6858_v48 }
 0x252   : > { %2762 = vmatpush1.bf16.msra.mxu0 %v7594_v20  ;;  %v7087_v4 = vpop.f32.mrf.mxu0  ;;  %v7089_v62 = vpop.f32.mrf.mxu1  ;;  %v7126_v20 = vadd.f32 %v2047_v14, %v6847_v61 }
 0x253   : > { %2803 = vmatpush1.bf16.msra.mxu1 %v7595_v52 }
 0x254   : > { %v2051_v33 = vpop.f32.mrf.mxu0  ;;  %v2164_v56 = vpop.f32.mrf.mxu1 }
 0x255   : > { %2780 = vmatmul.mubr.bf16.vlgmr.msra.gmra.mxu0 %v7596_v24  ;;  %v7132_v6 = vadd.f32 %v2051_v33, %v6847_v61  ;;  %v7135_v46 = vadd.f32 %v2164_v56, %v6858_v48 }
 0x256   : > { %2821 = vmatmul.mubr.bf16.vlgmr.msra.gmra.mxu1 %v7596_v24  ;;  %2861 = vmatprep.mubr.bf16.mxu0 %v7597_v8  ;;  %v7095_v42 = vpop.f32.mrf.mxu0  ;;  %v7097_v53 = vpop.f32.mrf.mxu1 }
 0x257   : > { %2902 = vmatprep.mubr.bf16.mxu1 %v7597_v8 }
 0x258   : > { %v2057_v39 = vpop.f32.mrf.mxu0  ;;  %v2170_v7 = vpop.f32.mrf.mxu1 }
 0x259   : > { %v7138_v52 = vadd.f32 %v2057_v39, %v6847_v61  ;;  %v7141_v49 = vadd.f32 %v2170_v7, %v6858_v48 }
 0x25a   : > { %v2059_v38 = vpop.f32.mrf.mxu0  ;;  %v2172_v44 = vpop.f32.mrf.mxu1 }
 0x25b   : > { %v7144_v14 = vadd.f32 %v2059_v38, %v6832_v47  ;;  %v7147_v58 = vadd.f32 %v2172_v44, %v6836_v32 }
 0x25c   : > { %v2061_v18 = vpop.f32.mrf.mxu0  ;;  %v2174_v34 = vpop.f32.mrf.mxu1 }
 0x25d   : > { %v7150_v8 = vadd.f32 %v2061_v18, %v6847_v61  ;;  %v7153_v33 = vadd.f32 %v2174_v34, %v6858_v48 }
 0x25e   : > { %v2065_v41 = vpop.f32.mrf.mxu0  ;;  %v2178_v50 = vpop.f32.mrf.mxu1 }
 0x25f   : > { %v2066_v39 = vadd.f32 %v2065_v41, %v6832_v47 }
 0x260   : > { %v2067_v11 = vpop.f32.mrf.mxu0  ;;  %v2180_v37 = vpop.f32.mrf.mxu1 }
 0x261   : > { %v2068_v10 = vadd.f32 %v2067_v11, %v6847_v61  ;;  %v2181_v41 = vadd.f32 %v2180_v37, %v6858_v48 }
 0x262   : > { %v2069_v45 = vpop.f32.mrf.mxu0  ;;  %v2182_v54 = vpop.f32.mrf.mxu1 }
 0x263   : > { %v2402_v21 = vmax.f32 %v2068_v10, 0.0  ;;  %v2404_v43 = vmax.f32 %v2181_v41, 0.0  ;;  %v2050_v10 = vadd.f32 %v7087_v4, %v6832_v47  ;;  %v2387_v4 = vmax.f32 %v7147_v58, 0.0 }
 0x264   : > { %v2071_v9 = vpop.f32.mrf.mxu0  ;;  %v2184_v30 = vpop.f32.mrf.mxu1  ;;  %v2153_v58 = vadd.f32 %v7075_v2, %v6836_v32  ;;  %v2030_v2 = vadd.f32 %v7055_v57, %v6832_v47 }
 0x265   : > { %v2072_v24 = vadd.f32 %v2071_v9, %v6847_v61  ;;  %v2185_v1 = vadd.f32 %v2184_v30, %v6858_v48  ;;  %v2183_v30 = vadd.f32 %v2182_v54, %v6836_v32 }
 0x266   : > { %v2075_v12 = vpop.f32.mrf.mxu0  ;;  %v2188_v31 = vpop.f32.mrf.mxu1 }
 0x267   : > { %v2076_v44 = vadd.f32 %v2075_v12, %v6832_v47  ;;  %v2189_v9 = vadd.f32 %v2188_v31, %v6836_v32  ;;  %v2420_v17 = vmax.f32 %v2185_v1, 0.0  ;;  %v2179_v31 = vadd.f32 %v2178_v50, %v6836_v32 }
 0x268   : > { %v2077_v25 = vpop.f32.mrf.mxu0  ;;  %v2190_v35 = vpop.f32.mrf.mxu1  ;;  %v2056_v1 = vadd.f32 %v7095_v42, %v6832_v47  ;;  %v2372_v42 = vmax.f32 %v7141_v49, 0.0  ;;  %v2159_v49 = vadd.f32 %v7083_v23, %v6836_v32  ;;  %v2036_v23 = vadd.f32 %v7067_v16, %v6832_v47 }
 0x269   : > { %v2078_v7 = vadd.f32 %v2077_v25, %v6847_v61  ;;  %v2191_v18 = vadd.f32 %v2190_v35, %v6858_v48  ;;  %v2418_v35 = vmax.f32 %v2072_v24, 0.0  ;;  %v2433_v11 = vmax.f32 %v2076_v44, 0.0 }
 0x26a   : > { %v2079_v56 = vpop.f32.mrf.mxu0  ;;  %v2192_v38 = vpop.f32.mrf.mxu1  ;;  %v2566_v50 = vpack.c.bf16 %v2420_v17, %v2404_v43  ;;  %v2308_v16 = vmax.f32 %v7117_v60, 0.0  ;;  %v7604_v60 = vld [vmem:[#allocation42_spill] sm:$0xff] }
 0x26b   : > { %v2080_v40 = vadd.f32 %v2079_v56, %v6832_v47  ;;  %v2193_v0 = vadd.f32 %v2192_v38, %v6836_v32  ;;  %v2070_v56 = vadd.f32 %v2069_v45, %v6832_v47  ;;  %v2434_v28 = vmax.f32 %v2078_v7, 0.0 }
 0x26c   : > { %v2081_v34 = vpop.f32.mrf.mxu0  ;;  %v2194_v26 = vpop.f32.mrf.mxu1  ;;  %v2436_v55 = vmax.f32 %v2191_v18, 0.0  ;;  %v2401_v7 = vmax.f32 %v2066_v39, 0.0  ;;  %v2322_v18 = vmax.f32 %v7120_v5, 0.0  ;;  %v2339_v5 = vmax.f32 %v2159_v49, 0.0  ;;  %v7615_v49 = vld [vmem:[#allocation22_spill] sm:$0xff] }
 0x26d   : > { %v2082_v25 = vadd.f32 %v2081_v34, %v6847_v61  ;;  %v2449_v51 = vmax.f32 %v2080_v40, 0.0  ;;  %v2195_v12 = vadd.f32 %v2194_v26, %v6858_v48  ;;  %v2451_v38 = vmax.f32 %v2193_v0, 0.0 }
 0x26e   : > { %v2435_v61 = vmax.f32 %v2189_v9, 0.0  ;;  %v2417_v45 = vmax.f32 %v2070_v56, 0.0  ;;  %v2386_v40 = vmax.f32 %v7150_v8, 0.0  ;;  %v2419_v48 = vmax.f32 %v2183_v30, 0.0 }
 0x26f   : > { %v2450_v63 = vmax.f32 %v2082_v25, 0.0  ;;  %v2452_v37 = vmax.f32 %v2195_v12, 0.0  ;;  %v2579_v3 = vpack.c.bf16 %v2449_v51, %v2433_v11  ;;  %v2564_v26 = vpack.c.bf16 %v2418_v35, %v2402_v21 }
 0x270   : > { %v2581_v24 = vpack.c.bf16 %v2451_v38, %v2435_v61  ;;  %v2388_v0 = vmax.f32 %v7153_v33, 0.0  ;;  %v2169_v51 = vadd.f32 %v7097_v53, %v6836_v32  ;;  %v2403_v21 = vmax.f32 %v2179_v31, 0.0 }
 0x271   : > { %v2580_v34 = vpack.c.bf16 %v2450_v63, %v2434_v28  ;;  %v2582_v54 = vpack.c.bf16 %v2452_v37, %v2436_v55  ;;  %v2370_v63 = vmax.f32 %v7138_v52, 0.0  ;;  %v2163_v28 = vadd.f32 %v7089_v62, %v6836_v32 }
 0x272   : > { %v2385_v55 = vmax.f32 %v7144_v14, 0.0  ;;  %v2563_v17 = vpack.c.bf16 %v2417_v45, %v2401_v7  ;;  %v2565_v53 = vpack.c.bf16 %v2419_v48, %v2403_v21  ;;  %v2046_v52 = vadd.f32 %v7081_v19, %v6832_v47  ;;  %v7606_v21 = vld [vmem:[#allocation54_spill] sm:$0xff] }
 0x273   : > { %2829 = vmatprep.subr.bf16.mxu0 %v2580_v34  ;;  %2870 = vmatprep.subr.bf16.mxu1 %v2582_v54  ;;  %v2548_v43 = vpack.c.bf16 %v2386_v40, %v2370_v63  ;;  %v2356_v8 = vmax.f32 %v7135_v46, 0.0  ;;  %v2369_v33 = vmax.f32 %v2056_v1, 0.0  ;;  %v2550_v39 = vpack.c.bf16 %v2388_v0, %v2372_v42  ;;  %v7608_v42 = vld [vmem:[#allocation47_spill] sm:$0xff] }
 0x274   : > { %2830 = vmatpush1.bf16.msra.mxu0 %v2579_v3  ;;  %2871 = vmatpush1.bf16.msra.mxu1 %v2581_v24  ;;  %v2354_v3 = vmax.f32 %v7132_v6, 0.0  ;;  %v2040_v62 = vadd.f32 %v7073_v13, %v6832_v47  ;;  %v2338_v6 = vmax.f32 %v7126_v20, 0.0  ;;  %v2371_v14 = vmax.f32 %v2169_v51, 0.0 }
 0x275   : > { %2831 = vmatprep.subr.bf16.mxu0 %v2564_v26  ;;  %2872 = vmatprep.subr.bf16.mxu1 %v2566_v50  ;;  %v2340_v19 = vmax.f32 %v7129_v36, 0.0  ;;  %v2353_v46 = vmax.f32 %v2050_v10, 0.0  ;;  %v2547_v44 = vpack.c.bf16 %v2385_v55, %v2369_v33  ;;  %v2355_v41 = vmax.f32 %v2163_v28, 0.0  ;;  %v7607_v28 = vld [vmem:[#allocation43_spill] sm:$0xff] }
 0x276   : > { %v2532_v13 = vpack.c.bf16 %v2354_v3, %v2338_v6  ;;  %v2549_v9 = vpack.c.bf16 %v2387_v4, %v2371_v14  ;;  %v2324_v20 = vmax.f32 %v7123_v59, 0.0  ;;  %v2337_v25 = vmax.f32 %v2046_v52, 0.0  ;;  %v7609_v3 = vld [vmem:[#allocation41_spill] sm:$0xff]  ;;  %v7610_v4 = vld [vmem:[#allocation52_spill] sm:$0xff] }
 0x277   : > { %v2534_v56 = vpack.c.bf16 %v2356_v8, %v2340_v19  ;;  %v2149_v36 = vadd.f32 %v7069_v27, %v6836_v32  ;;  %v2306_v30 = vmax.f32 %v7114_v22, 0.0  ;;  %v2143_v12 = vadd.f32 %v7062_v29, %v6836_v32  ;;  %v7601_v27 = vld [vmem:[#allocation50_spill] sm:$0xff]  ;;  %v7602_v22 = vld [vmem:[#allocation39_spill] sm:$0xff]  ;;  %v7603_v29 = vld [vmem:[#allocation48_spill] sm:$0xff] }
 0x278   : > { %2832 = vmatpush1.bf16.msra.mxu0 %v2563_v17  ;;  %2873 = vmatpush1.bf16.msra.mxu1 %v2565_v53  ;;  %v2321_v59 = vmax.f32 %v2040_v62, 0.0  ;;  %v2531_v35 = vpack.c.bf16 %v2353_v46, %v2337_v25  ;;  %v2290_v38 = vmax.f32 %v7108_v15, 0.0  ;;  %v2323_v11 = vmax.f32 %v2153_v58, 0.0  ;;  %v7605_v15 = vld [vmem:[#allocation53_spill] sm:$0xff]  ;;  %v7613_v8 = vld [vmem:[#allocation51_spill] sm:$0xff] }
 0x279   : > { %2833 = vmatprep.subr.bf16.mxu0 %v2548_v43  ;;  %2874 = vmatprep.subr.bf16.mxu1 %v2550_v39  ;;  %v2516_v57 = vpack.c.bf16 %v2322_v18, %v2306_v30  ;;  %v2533_v37 = vpack.c.bf16 %v2355_v41, %v2339_v5  ;;  %v2026_v31 = vadd.f32 %v7601_v27, %v6832_v47  ;;  %v2292_v61 = vmax.f32 %v7602_v22, 0.0  ;;  %v7611_v43 = vld [vmem:[#allocation49_spill] sm:$0xff] }
 0x27a   : > { %v2305_v34 = vmax.f32 %v2036_v23, 0.0  ;;  %v2518_v45 = vpack.c.bf16 %v2324_v20, %v2308_v16  ;;  %v2139_v54 = vadd.f32 %v7603_v29, %v6836_v32  ;;  %v2274_v40 = vmax.f32 %v7604_v60, 0.0  ;;  %v7612_v53 = vld [vmem:[#allocation45_spill] sm:$0xff] }
 0x27b   : > { %v2307_v48 = vmax.f32 %v2149_v36, 0.0  ;;  %v2276_v26 = vmax.f32 %v7605_v15, 0.0  ;;  %v2289_v24 = vmax.f32 %v2030_v2, 0.0  ;;  %v2291_v0 = vmax.f32 %v2143_v12, 0.0 }
 0x27c   : > { %2834 = vmatpush1.bf16.msra.mxu0 %v2547_v44  ;;  %2875 = vmatpush1.bf16.msra.mxu1 %v2549_v9  ;;  %v2515_v1 = vpack.c.bf16 %v2321_v59, %v2305_v34  ;;  %v2500_v47 = vpack.c.bf16 %v2290_v38, %v2274_v40  ;;  %v2273_v50 = vmax.f32 %v2026_v31, 0.0  ;;  %v2275_v51 = vmax.f32 %v2139_v54, 0.0  ;;  %v2453_v31 = vld [vmem:[#allocation2] sm:$0xff] }
 0x27d   : > { %2835 = vmatprep.subr.bf16.mxu0 %v2532_v13  ;;  %2876 = vmatprep.subr.bf16.mxu1 %v2534_v56  ;;  %v2517_v7 = vpack.c.bf16 %v2323_v11, %v2307_v48  ;;  %v2502_v10 = vpack.c.bf16 %v2292_v61, %v2276_v26  ;;  %v5789_v55 = vmov 1966171168   ;;  %v7614_v33 = vmov 1065369472  }
 0x27e   : > { %v2499_v32 = vpack.c.bf16 %v2289_v24, %v2273_v50  ;;  %v2501_v63 = vpack.c.bf16 %v2291_v0, %v2275_v51  ;;  %v2932_v17 = vunpack.c.l.s4 %v5789_v55 }
 0x280   : > { %2836 = vmatpush1.bf16.msra.mxu0 %v2531_v35  ;;  %2877 = vmatpush1.bf16.msra.mxu1 %v2533_v37  ;;  %v2933_v52 = vunpack.c.0.s8 %v2932_v17 }
 0x281   : > { %2837 = vmatprep.subr.bf16.mxu0 %v2516_v57  ;;  %2878 = vmatprep.subr.bf16.mxu1 %v2518_v45 }
 0x282   : > { %v2936_v6 = vsub.s32 %v2933_v52, %v7615_v49  ;;  %v2454_v52 = vld [vmem:[#allocation2 + $0x8] sm:$0xff] }
 0x284   : > { %2838 = vmatpush1.bf16.msra.mxu0 %v2515_v1  ;;  %2879 = vmatpush1.bf16.msra.mxu1 %v2517_v7 }
 0x285   : > { %2839 = vmatprep.subr.bf16.mxu0 %v2500_v47  ;;  %2880 = vmatprep.subr.bf16.mxu1 %v2502_v10 }
 0x288   : > { %2840 = vmatpush1.bf16.msra.mxu0 %v2499_v32  ;;  %2881 = vmatpush1.bf16.msra.mxu1 %v2501_v63 }
 0x289   : > { %2841 = vmatprep.subr.bf16.mxu0 %v7606_v21  ;;  %2882 = vmatprep.subr.bf16.mxu1 %v7607_v28 }
 0x28c   : > { %2842 = vmatpush1.bf16.msra.mxu0 %v7608_v42  ;;  %2883 = vmatpush1.bf16.msra.mxu1 %v7609_v3 }
 0x28d   : > { %2843 = vmatprep.subr.bf16.mxu0 %v7610_v4  ;;  %2884 = vmatprep.subr.bf16.mxu1 %v7611_v43 }
 0x290   : > { %2844 = vmatpush1.bf16.msra.mxu0 %v7612_v53  ;;  %2885 = vmatpush1.bf16.msra.mxu1 %v7613_v8 }
 0x293   : > { %2862 = vmatmul.mubr.bf16.vlgmr.msra.gmra.mxu0 %v7614_v33  ;;  %2903 = vmatmul.mubr.bf16.vlgmr.msra.gmra.mxu1 %v7614_v33 }
 0x296   : > { %v2617_v39 = vpop.f32.mrf.mxu0  ;;  %v2658_v62 = vpop.f32.mrf.mxu1 }
 0x298   : > { %v2619_v14 = vpop.f32.mrf.mxu0  ;;  %v2660_v19 = vpop.f32.mrf.mxu1 }
 0x299   : > { %v2927_v58 = vcombine.low %v2617_v39, %v2619_v14  ;;  %v2928_v46 = vcombine.low %v2658_v62, %v2660_v19 }
 0x29a   : > { %v2621_v44 = vpop.f32.mrf.mxu0  ;;  %v2662_v41 = vpop.f32.mrf.mxu1 }
 0x29b   : > { %v2937_v18 = vrot.slane %v2927_v58, %v2936_v6  ;;  %v2944_v13 = vrot.slane %v2928_v46, %v2936_v6 }
 0x29c   : > { %v2622_v9 = vpop.f32.mrf.mxu0  ;;  %v2663_v23 = vpop.f32.mrf.mxu1 }
 0x29d   : > { %v2959_v20 = vcombine.low %v2937_v18, %v2944_v13 }
 0x29f   : > { %v2967_v57 = vrot.slane %v2959_v20, %v2936_v6 }
 0x2d5   : > { %v2699_v25 = vpop.f32.mrf.mxu0 }
 0x2d6   : > { %v2740_v56 = vpop.f32.mrf.mxu1 }
 0x2d7   : > { %v2701_v2 = vpop.f32.mrf.mxu0 }
 0x2d8   : > { %v2929_v36 = vcombine.low %v2699_v25, %v2701_v2  ;;  %v2742_v30 = vpop.f32.mrf.mxu1 }
 0x2d9   : > { %v2930_v5 = vcombine.low %v2740_v56, %v2742_v30  ;;  %v2703_v12 = vpop.f32.mrf.mxu0 }
 0x2da   : > { %v2951_v16 = vrot.slane %v2929_v36, %v2936_v6  ;;  %v2744_v59 = vpop.f32.mrf.mxu1 }
 0x2db   : > { %v2958_v35 = vrot.slane %v2930_v5, %v2936_v6  ;;  %v2704_v38 = vpop.f32.mrf.mxu0 }
 0x2dc   : > { %v2745_v11 = vpop.f32.mrf.mxu1 }
 0x2dd   : > { %v2960_v37 = vcombine.low %v2951_v16, %v2958_v35 }
 0x2df   : > { %v2974_v27 = vrot.slane %v2960_v37, %v2936_v6 }
 0x2e1   : > { %v2975_v22 = vcombine.low %v2967_v57, %v2974_v27 }
 0x2e3   : > { %v3027_v61 = vadd.f32 %v2975_v22, %v2453_v31 }
 0x2e5   : > { %3029 = vst [vmem:[#allocation2] sm:$0xff] %v3027_v61 }
 0x315   : > { %v2781_v34 = vpop.f32.mrf.mxu0 }
 0x316   : > { %v2822_v45 = vpop.f32.mrf.mxu1 }
 0x317   : > { %v2783_v29 = vpop.f32.mrf.mxu0 }
 0x318   : > { %v2976_v54 = vcombine.low %v2781_v34, %v2783_v29  ;;  %v2824_v60 = vpop.f32.mrf.mxu1 }
 0x319   : > { %v2977_v40 = vcombine.low %v2822_v45, %v2824_v60  ;;  %v2785_v48 = vpop.f32.mrf.mxu0 }
 0x31a   : > { %v2986_v15 = vrot.slane %v2976_v54, %v2936_v6  ;;  %v2826_v26 = vpop.f32.mrf.mxu1 }
 0x31b   : > { %v2993_v24 = vrot.slane %v2977_v40, %v2936_v6  ;;  %v2786_v1 = vpop.f32.mrf.mxu0 }
 0x31c   : > { %v2827_v0 = vpop.f32.mrf.mxu1 }
 0x31d   : > { %v3008_v47 = vcombine.low %v2986_v15, %v2993_v24 }
 0x31f   : > { %v3016_v43 = vrot.slane %v3008_v47, %v2936_v6 }
 0x353   : > { %v2863_v7 = vpop.f32.mrf.mxu0  ;;  %v2904_v50 = vpop.f32.mrf.mxu1 }
 0x355   : > { %v2865_v10 = vpop.f32.mrf.mxu0  ;;  %v2906_v32 = vpop.f32.mrf.mxu1 }
 0x356   : > { %v2978_v51 = vcombine.low %v2863_v7, %v2865_v10  ;;  %v2979_v63 = vcombine.low %v2904_v50, %v2906_v32 }
 0x357   : > { %v2867_v21 = vpop.f32.mrf.mxu0  ;;  %v2908_v42 = vpop.f32.mrf.mxu1 }
 0x358   : > { %v3000_v28 = vrot.slane %v2978_v51, %v2936_v6  ;;  %v3007_v55 = vrot.slane %v2979_v63, %v2936_v6 }
 0x359   : > { %v2868_v17 = vpop.f32.mrf.mxu0  ;;  %v2909_v3 = vpop.f32.mrf.mxu1 }
 0x35a   : > { %v3009_v4 = vcombine.low %v3000_v28, %v3007_v55 }
 0x35c   : > { %v3023_v53 = vrot.slane %v3009_v4, %v2936_v6 }
 0x35e   : > { %v3024_v8 = vcombine.low %v3016_v43, %v3023_v53  ;;  %3034 = sbr.rel (%p4875_p2) target bundleno = 1399 (0x577), region = 76 }
 0x360   : > { %v3028_v33 = vadd.f32 %v3024_v8, %v2454_v52 }
 0x362   : > { %3030 = vst [vmem:[#allocation2 + $0x8] sm:$0xff] %v3028_v33 }
 0x363   : > { %v5380_v39 = vld [vmem:[#allocation9 + $0x78] sm:$0xff]   ;;  %v5384_v58 = vld [vmem:[#allocation9 + $0x70] sm:$0xff]   ;;  %v5388_v44 = vld [vmem:[#allocation9 + $0x68] sm:$0xff]   ;;  %vm5791_vm0 = vmmov 0  }
 0x364   : > { %v5381_v62 = vld [vmem:[#allocation9 + $0xf8] sm:$0xff]   ;;  %5015 = vmatprep.subr.bf16.mxu0 %v5380_v39  ;;  %v5385_v19 = vld [vmem:[#allocation9 + $0xf0] sm:$0xff]   ;;  %v5389_v18 = vld [vmem:[#allocation9 + $0xe8] sm:$0xff]  }
 0x365   : > { %v5382_v49 = vld [vmem:[#allocation9 + $0x38] sm:$0xff]   ;;  %5037 = vmatprep.subr.bf16.mxu1 %v5381_v62  ;;  %v5386_v46 = vld [vmem:[#allocation9 + $0x30] sm:$0xff]   ;;  %v5390_v41 = vld [vmem:[#allocation9 + $0x28] sm:$0xff]  }
 0x366   : > { %v5383_v14 = vld [vmem:[#allocation9 + $0xb8] sm:$0xff]   ;;  %5016 = vmatpush3.bf16.msra.mxu0 %v5382_v49  ;;  %v5387_v6 = vld [vmem:[#allocation9 + $0xb0] sm:$0xff]   ;;  %v5391_v13 = vld [vmem:[#allocation9 + $0xa8] sm:$0xff]  }
 0x367   : > { %5038 = vmatpush3.bf16.msra.mxu1 %v5383_v14  ;;  %5017 = vmatprep.subr.bf16.mxu0 %v5384_v58  ;;  %v5392_v9 = vld [vmem:[#allocation9 + $0x60] sm:$0xff]   ;;  %v5396_v56 = vld [vmem:[#allocation9 + $0x58] sm:$0xff]   ;;  %v5400_v5 = vld [vmem:[#allocation9 + $0x50] sm:$0xff]  }
 0x368   : > { %5039 = vmatprep.subr.bf16.mxu1 %v5385_v19  ;;  %v5393_v23 = vld [vmem:[#allocation9 + $0xe0] sm:$0xff]   ;;  %v5397_v2 = vld [vmem:[#allocation9 + $0xd8] sm:$0xff]   ;;  %v5401_v12 = vld [vmem:[#allocation9 + $0xd0] sm:$0xff]  }
 0x369   : > { %v5394_v20 = vld [vmem:[#allocation9 + $0x20] sm:$0xff]   ;;  %v5398_v36 = vld [vmem:[#allocation9 + $0x18] sm:$0xff]   ;;  %v5402_v16 = vld [vmem:[#allocation9 + $0x10] sm:$0xff]  }
 0x36a   : > { %5018 = vmatpush3.bf16.msra.mxu0 %v5386_v46  ;;  %v5395_v25 = vld [vmem:[#allocation9 + $0xa0] sm:$0xff]   ;;  %v5399_v30 = vld [vmem:[#allocation9 + $0x98] sm:$0xff]   ;;  %v5403_v59 = vld [vmem:[#allocation9 + $0x90] sm:$0xff]  }
 0x36b   : > { %5040 = vmatpush3.bf16.msra.mxu1 %v5387_v6  ;;  %5019 = vmatprep.subr.bf16.mxu0 %v5388_v44  ;;  %v5404_v35 = vld [vmem:[#allocation9 + $0x48] sm:$0xff]   ;;  %v5408_v37 = vld [vmem:[#allocation9 + $0x40] sm:$0xff]   ;;  %v5412_v45 = vld [vmem:[#allocation9 + $0x178] sm:$0xff]  }
 0x36c   : > { %5041 = vmatprep.subr.bf16.mxu1 %v5389_v18  ;;  %v5405_v38 = vld [vmem:[#allocation9 + $0xc8] sm:$0xff]   ;;  %v5409_v27 = vld [vmem:[#allocation9 + $0xc0] sm:$0xff]   ;;  %v5413_v29 = vld [vmem:[#allocation9 + $0x1f8] sm:$0xff]  }
 0x36d   : > { %v5406_v11 = vld [vmem:[#allocation9 + $0x8] sm:$0xff]   ;;  %v5410_v31 = vld [vmem:[#allocation9] sm:$0xff]   ;;  %v7619_v24 = vld [vmem:[#allocation24_spill] sm:$0xff] }
 0x36e   : > { %5020 = vmatpush3.bf16.msra.mxu0 %v5390_v41  ;;  %v5407_v57 = vld [vmem:[#allocation9 + $0x88] sm:$0xff]   ;;  %v5411_v22 = vld [vmem:[#allocation9 + $0x80] sm:$0xff]   ;;  %v5414_v0 = vld [vmem:[#allocation9 + $0x138] sm:$0xff]  }
 0x36f   : > { %5042 = vmatpush3.bf16.msra.mxu1 %v5391_v13  ;;  %5021 = vmatprep.subr.bf16.mxu0 %v5392_v9  ;;  %v3035_v61 = vld [vmem:[#allocation2] sm:$0xff]  ;;  %v7618_v15 = vld [vmem:[#allocation23_spill] sm:$0xff]  ;;  %v5415_v47 = vld [vmem:[#allocation9 + $0x1b8] sm:$0xff]  }
 0x370   : > { %5043 = vmatprep.subr.bf16.mxu1 %v5393_v23  ;;  %v7229_v34 = vmul.f32 0.00390625, %v3035_v61  ;;  %v7616_v54 = vld [vmem:[#allocation25_spill] sm:$0xff]  ;;  %v7617_v40 = vld [vmem:[#allocation26_spill] sm:$0xff]  ;;  %v5416_v42 = vld [vmem:[#allocation9 + $0x170] sm:$0xff]  }
 0x371   : > { %v7620_v7 = vld [vmem:[#allocation37_spill] sm:$0xff]  ;;  %v7621_v10 = vld [vmem:[#allocation38_spill] sm:$0xff]  ;;  %v5417_v55 = vld [vmem:[#allocation9 + $0x1f0] sm:$0xff]  }
 0x372   : > { %5022 = vmatpush3.bf16.msra.mxu0 %v5394_v20  ;;  %v3048_v60 = vrot.slane %v7229_v34, %v7616_v54  ;;  %v3056_v48 = vrot.slane %v7229_v34, %v7617_v40  ;;  %v3044_v26 = vrot.slane %v7229_v34, %v7618_v15  ;;  %v3052_v1 = vrot.slane %v7229_v34, %v7619_v24  ;;  %v5418_v17 = vld [vmem:[#allocation9 + $0x130] sm:$0xff]   ;;  %v5420_v53 = vld [vmem:[#allocation9 + $0x168] sm:$0xff]   ;;  %v5424_v39 = vld [vmem:[#allocation9 + $0x160] sm:$0xff]  }
 0x373   : > { %5044 = vmatpush3.bf16.msra.mxu1 %v5395_v25  ;;  %5023 = vmatprep.subr.bf16.mxu0 %v5396_v56  ;;  %v3064_v50 = vrot.slane %v7229_v34, %v7620_v7  ;;  %v3072_v51 = vrot.slane %v7229_v34, %v7621_v10  ;;  %v5419_v43 = vld [vmem:[#allocation9 + $0x1b0] sm:$0xff]   ;;  %v5421_v52 = vld [vmem:[#allocation9 + $0x1e8] sm:$0xff]   ;;  %v5425_v62 = vld [vmem:[#allocation9 + $0x1e0] sm:$0xff]  }
 0x374   : > { %5045 = vmatprep.subr.bf16.mxu1 %v5397_v2  ;;  %v3122_v32 = vpack.c.bf16 %v3048_v60, %v3048_v60  ;;  %v3124_v63 = vpack.c.bf16 %v3056_v48, %v3056_v48  ;;  %v3121_v21 = vpack.c.bf16 %v3044_v26, %v3044_v26  ;;  %v3123_v28 = vpack.c.bf16 %v3052_v1, %v3052_v1  ;;  %v5422_v8 = vld [vmem:[#allocation9 + $0x128] sm:$0xff]   ;;  %v5426_v49 = vld [vmem:[#allocation9 + $0x120] sm:$0xff]   ;;  %v5428_v58 = vld [vmem:[#allocation9 + $0x158] sm:$0xff]  }
 0x375   : > { %v3126_v3 = vpack.c.bf16 %v3064_v50, %v3064_v50  ;;  %v3128_v4 = vpack.c.bf16 %v3072_v51, %v3072_v51  ;;  %v5423_v33 = vld [vmem:[#allocation9 + $0x1a8] sm:$0xff]   ;;  %v5427_v14 = vld [vmem:[#allocation9 + $0x1a0] sm:$0xff]   ;;  %v5429_v19 = vld [vmem:[#allocation9 + $0x1d8] sm:$0xff]  }
 0x376   : > { %5024 = vmatpush3.bf16.msra.mxu0 %v5398_v36  ;;  %4194 = vmatprep.mubr.bf16.mxu0 %v3122_v32  ;;  %v5430_v46 = vld [vmem:[#allocation9 + $0x118] sm:$0xff]   ;;  %v5432_v44 = vld [vmem:[#allocation9 + $0x150] sm:$0xff]   ;;  %v5436_v9 = vld [vmem:[#allocation9 + $0x148] sm:$0xff]  }
 0x377   : > { %5046 = vmatpush3.bf16.msra.mxu1 %v5399_v30  ;;  %5025 = vmatprep.subr.bf16.mxu0 %v5400_v5  ;;  %v5431_v6 = vld [vmem:[#allocation9 + $0x198] sm:$0xff]   ;;  %v5433_v18 = vld [vmem:[#allocation9 + $0x1d0] sm:$0xff]   ;;  %v5437_v23 = vld [vmem:[#allocation9 + $0x1c8] sm:$0xff]  }
 0x378   : > { %5047 = vmatprep.subr.bf16.mxu1 %v5401_v12  ;;  %4234 = vmatprep.mubr.bf16.mxu1 %v3124_v63  ;;  %v5434_v41 = vld [vmem:[#allocation9 + $0x110] sm:$0xff]   ;;  %v5438_v20 = vld [vmem:[#allocation9 + $0x108] sm:$0xff]   ;;  %v5440_v56 = vld [vmem:[#allocation9 + $0x140] sm:$0xff]  }
 0x379   : > { %v5435_v13 = vld [vmem:[#allocation9 + $0x190] sm:$0xff]   ;;  %v5439_v25 = vld [vmem:[#allocation9 + $0x188] sm:$0xff]   ;;  %v5441_v2 = vld [vmem:[#allocation9 + $0x1c0] sm:$0xff]  }
 0x37a   : > { %5026 = vmatpush3.bf16.msra.mxu0 %v5402_v16  ;;  %v5442_v36 = vld [vmem:[#allocation9 + $0x100] sm:$0xff]   ;;  %v7622_v5 = vld [vmem:[#allocation35_spill] sm:$0xff]  ;;  %v7623_v16 = vld [vmem:[#allocation36_spill] sm:$0xff] }
 0x37b   : > { %5048 = vmatpush3.bf16.msra.mxu1 %v5403_v59  ;;  %5027 = vmatprep.subr.bf16.mxu0 %v5404_v35  ;;  %v5443_v30 = vld [vmem:[#allocation9 + $0x180] sm:$0xff]   ;;  %v3060_v12 = vrot.slane %v7229_v34, %v7622_v5  ;;  %v3068_v59 = vrot.slane %v7229_v34, %v7623_v16  ;;  %v5444_v35 = vld [vmem:[#allocation9 + $0x278] sm:$0xff]   ;;  %v5450_v61 = vld [vmem:[#allocation9 + $0x230] sm:$0xff]  }
 0x37c   : > { %5049 = vmatprep.subr.bf16.mxu1 %v5405_v38  ;;  %v5445_v38 = vld [vmem:[#allocation9 + $0x2f8] sm:$0xff]   ;;  %v5451_v34 = vld [vmem:[#allocation9 + $0x2b0] sm:$0xff]   ;;  %v5454_v60 = vld [vmem:[#allocation9 + $0x228] sm:$0xff]  }
 0x37d   : > { %v5455_v48 = vld [vmem:[#allocation9 + $0x2a8] sm:$0xff]   ;;  %v5456_v26 = vld [vmem:[#allocation9 + $0x260] sm:$0xff]   ;;  %v5460_v50 = vld [vmem:[#allocation9 + $0x258] sm:$0xff]  }
 0x37e   : > { %5028 = vmatpush3.bf16.msra.mxu0 %v5406_v11  ;;  %v5446_v11 = vld [vmem:[#allocation9 + $0x238] sm:$0xff]   ;;  %v5457_v1 = vld [vmem:[#allocation9 + $0x2e0] sm:$0xff]  }
 0x37f   : > { %5050 = vmatpush3.bf16.msra.mxu1 %v5407_v57  ;;  %5029 = vmatprep.subr.bf16.mxu0 %v5408_v37  ;;  %v3125_v57 = vpack.c.bf16 %v3060_v12, %v3060_v12  ;;  %v3127_v37 = vpack.c.bf16 %v3068_v59, %v3068_v59  ;;  %v5461_v51 = vld [vmem:[#allocation9 + $0x2d8] sm:$0xff]   ;;  %v5488_v12 = vld [vmem:[#allocation9 + $0x360] sm:$0xff]  }
 0x380   : > { %5051 = vmatprep.subr.bf16.mxu1 %v5409_v27  ;;  %v5447_v27 = vld [vmem:[#allocation9 + $0x2b8] sm:$0xff]   ;;  %v5489_v59 = vld [vmem:[#allocation9 + $0x3e0] sm:$0xff]  }
 0x381   : > { %v5462_v32 = vld [vmem:[#allocation9 + $0x218] sm:$0xff]  }
 0x382   : > { %5030 = vmatpush3.bf16.msra.mxu0 %v5410_v31  ;;  %v5448_v31 = vld [vmem:[#allocation9 + $0x270] sm:$0xff]   ;;  %v5463_v63 = vld [vmem:[#allocation9 + $0x298] sm:$0xff]  }
 0x383   : > { %5052 = vmatpush3.bf16.msra.mxu1 %v5411_v22  ;;  %5059 = vmatprep.subr.bf16.mxu0 %v5412_v45  ;;  %v5449_v22 = vld [vmem:[#allocation9 + $0x2f0] sm:$0xff]   ;;  %v5452_v45 = vld [vmem:[#allocation9 + $0x268] sm:$0xff]  }
 0x384   : > { %5081 = vmatprep.subr.bf16.mxu1 %v5413_v29  ;;  %v5453_v29 = vld [vmem:[#allocation9 + $0x2e8] sm:$0xff]  }
 0x385   : > { %4195 = vmatmul.mubr.bf16.vlgmr.msra.gmra.mxu0 %v3121_v21  ;;  %v5464_v21 = vld [vmem:[#allocation9 + $0x250] sm:$0xff]  }
 0x386   : > { %4235 = vmatmul.mubr.bf16.vlgmr.msra.gmra.mxu1 %v3123_v28  ;;  %5060 = vmatpush3.bf16.msra.mxu0 %v5414_v0  ;;  %v5458_v0 = vld [vmem:[#allocation9 + $0x220] sm:$0xff]   ;;  %v5465_v28 = vld [vmem:[#allocation9 + $0x2d0] sm:$0xff]  }
 0x387   : > { %5082 = vmatpush3.bf16.msra.mxu1 %v5415_v47  ;;  %5061 = vmatprep.subr.bf16.mxu0 %v5416_v42  ;;  %v5459_v47 = vld [vmem:[#allocation9 + $0x2a0] sm:$0xff]   ;;  %v5466_v42 = vld [vmem:[#allocation9 + $0x210] sm:$0xff]  }
 0x388   : > { %5083 = vmatprep.subr.bf16.mxu1 %v5417_v55  ;;  %4274 = vmatprep.mubr.bf16.mxu0 %v3126_v3  ;;  %v5467_v55 = vld [vmem:[#allocation9 + $0x290] sm:$0xff]   ;;  %v5469_v3 = vld [vmem:[#allocation9 + $0x2c8] sm:$0xff]  }
 0x389   : > { %4314 = vmatprep.mubr.bf16.mxu1 %v3128_v4  ;;  %v5470_v4 = vld [vmem:[#allocation9 + $0x208] sm:$0xff]  }
 0x38a   : > { %5062 = vmatpush3.bf16.msra.mxu0 %v5418_v17  ;;  %v5468_v17 = vld [vmem:[#allocation9 + $0x248] sm:$0xff]  }
 0x38b   : > { %5084 = vmatpush3.bf16.msra.mxu1 %v5419_v43  ;;  %5063 = vmatprep.subr.bf16.mxu0 %v5420_v53  ;;  %v5471_v43 = vld [vmem:[#allocation9 + $0x288] sm:$0xff]   ;;  %v5472_v53 = vld [vmem:[#allocation9 + $0x240] sm:$0xff]  }
 0x38c   : > { %5085 = vmatprep.subr.bf16.mxu1 %v5421_v52  ;;  %v5473_v52 = vld [vmem:[#allocation9 + $0x2c0] sm:$0xff]  }
 0x38e   : > { %5064 = vmatpush3.bf16.msra.mxu0 %v5422_v8  ;;  %v5474_v8 = vld [vmem:[#allocation9 + $0x200] sm:$0xff]  }
 0x38f   : > { %5086 = vmatpush3.bf16.msra.mxu1 %v5423_v33  ;;  %5065 = vmatprep.subr.bf16.mxu0 %v5424_v39  ;;  %v5475_v33 = vld [vmem:[#allocation9 + $0x280] sm:$0xff]   ;;  %v3036_v39 = vld [vmem:[#allocation2 + $0x8] sm:$0xff] }
 0x390   : > { %5087 = vmatprep.subr.bf16.mxu1 %v5425_v62  ;;  %v7247_v62 = vmul.f32 0.00390625, %v3036_v39 }
 0x392   : > { %5066 = vmatpush3.bf16.msra.mxu0 %v5426_v49  ;;  %v5476_v49 = vld [vmem:[#allocation9 + $0x378] sm:$0xff]  }
 0x393   : > { %5088 = vmatpush3.bf16.msra.mxu1 %v5427_v14  ;;  %5067 = vmatprep.subr.bf16.mxu0 %v5428_v58  ;;  %v5477_v14 = vld [vmem:[#allocation9 + $0x3f8] sm:$0xff]   ;;  %v3080_v58 = vrot.slane %v7247_v62, %v7616_v54 }
 0x394   : > { %5089 = vmatprep.subr.bf16.mxu1 %v5429_v19  ;;  %v3088_v19 = vrot.slane %v7247_v62, %v7617_v40  ;;  %v5480_v40 = vld [vmem:[#allocation9 + $0x370] sm:$0xff]  }
 0x395   : > { %v3130_v54 = vpack.c.bf16 %v3080_v58, %v3080_v58 }
 0x396   : > { %5068 = vmatpush3.bf16.msra.mxu0 %v5430_v46  ;;  %v3076_v46 = vrot.slane %v7247_v62, %v7618_v15  ;;  %v5481_v15 = vld [vmem:[#allocation9 + $0x3f0] sm:$0xff]  }
 0x397   : > { %5090 = vmatpush3.bf16.msra.mxu1 %v5431_v6  ;;  %5069 = vmatprep.subr.bf16.mxu0 %v5432_v44  ;;  %v3084_v6 = vrot.slane %v7247_v62, %v7619_v24  ;;  %v5478_v44 = vld [vmem:[#allocation9 + $0x338] sm:$0xff]   ;;  %v5482_v24 = vld [vmem:[#allocation9 + $0x330] sm:$0xff]  }
 0x398   : > { %5091 = vmatprep.subr.bf16.mxu1 %v5433_v18  ;;  %v5479_v18 = vld [vmem:[#allocation9 + $0x3b8] sm:$0xff]  }
 0x39a   : > { %5070 = vmatpush3.bf16.msra.mxu0 %v5434_v41  ;;  %v3096_v41 = vrot.slane %v7247_v62, %v7620_v7  ;;  %v5483_v7 = vld [vmem:[#allocation9 + $0x3b0] sm:$0xff]  }
 0x39b   : > { %5092 = vmatpush3.bf16.msra.mxu1 %v5435_v13  ;;  %5071 = vmatprep.subr.bf16.mxu0 %v5436_v9  ;;  %v3104_v13 = vrot.slane %v7247_v62, %v7621_v10  ;;  %v3132_v9 = vpack.c.bf16 %v3088_v19, %v3088_v19  ;;  %v5484_v10 = vld [vmem:[#allocation9 + $0x368] sm:$0xff]  }
 0x39c   : > { %5093 = vmatprep.subr.bf16.mxu1 %v5437_v23  ;;  %v3129_v23 = vpack.c.bf16 %v3076_v46, %v3076_v46 }
 0x39e   : > { %5072 = vmatpush3.bf16.msra.mxu0 %v5438_v20  ;;  %v3131_v20 = vpack.c.bf16 %v3084_v6, %v3084_v6 }
 0x39f   : > { %5094 = vmatpush3.bf16.msra.mxu1 %v5439_v25  ;;  %5073 = vmatprep.subr.bf16.mxu0 %v5440_v56  ;;  %v3134_v25 = vpack.c.bf16 %v3096_v41, %v3096_v41  ;;  %v3136_v56 = vpack.c.bf16 %v3104_v13, %v3104_v13 }
 0x3a0   : > { %5095 = vmatprep.subr.bf16.mxu1 %v5441_v2  ;;  %v5485_v2 = vld [vmem:[#allocation9 + $0x3e8] sm:$0xff]  }
 0x3a2   : > { %5074 = vmatpush3.bf16.msra.mxu0 %v5442_v36  ;;  %v5486_v36 = vld [vmem:[#allocation9 + $0x328] sm:$0xff]  }
 0x3a3   : > { %5096 = vmatpush3.bf16.msra.mxu1 %v5443_v30  ;;  %5103 = vmatprep.subr.bf16.mxu0 %v5444_v35  ;;  %v5487_v30 = vld [vmem:[#allocation9 + $0x3a8] sm:$0xff]   ;;  %v5490_v35 = vld [vmem:[#allocation9 + $0x320] sm:$0xff]  }
 0x3a4   : > { %5125 = vmatprep.subr.bf16.mxu1 %v5445_v38  ;;  %v5491_v38 = vld [vmem:[#allocation9 + $0x3a0] sm:$0xff]  }
 0x3a5   : > { %4275 = vmatmul.mubr.bf16.vlgmr.msra.gmra.mxu0 %v3125_v57  ;;  %v5493_v57 = vld [vmem:[#allocation9 + $0x3d8] sm:$0xff]  }
 0x3a6   : > { %4315 = vmatmul.mubr.bf16.vlgmr.msra.gmra.mxu1 %v3127_v37  ;;  %5104 = vmatpush3.bf16.msra.mxu0 %v5446_v11  ;;  %v5492_v11 = vld [vmem:[#allocation9 + $0x358] sm:$0xff]  }
 0x3a7   : > { %5126 = vmatpush3.bf16.msra.mxu1 %v5447_v27  ;;  %5105 = vmatprep.subr.bf16.mxu0 %v5448_v31  ;;  %v5494_v37 = vld [vmem:[#allocation9 + $0x318] sm:$0xff]   ;;  %v5496_v31 = vld [vmem:[#allocation9 + $0x350] sm:$0xff]  }
 0x3a8   : > { %5127 = vmatprep.subr.bf16.mxu1 %v5449_v22  ;;  %4354 = vmatprep.mubr.bf16.mxu0 %v3130_v54  ;;  %v5495_v27 = vld [vmem:[#allocation9 + $0x398] sm:$0xff]   ;;  %v5497_v22 = vld [vmem:[#allocation9 + $0x3d0] sm:$0xff]  }
 0x3a9   : > { %4394 = vmatprep.mubr.bf16.mxu1 %v3132_v9 }
 0x3aa   : > { %5106 = vmatpush3.bf16.msra.mxu0 %v5450_v61  ;;  %v5498_v61 = vld [vmem:[#allocation9 + $0x310] sm:$0xff]  }
 0x3ab   : > { %5128 = vmatpush3.bf16.msra.mxu1 %v5451_v34  ;;  %5107 = vmatprep.subr.bf16.mxu0 %v5452_v45  ;;  %v5499_v34 = vld [vmem:[#allocation9 + $0x390] sm:$0xff]   ;;  %v5500_v45 = vld [vmem:[#allocation9 + $0x348] sm:$0xff]  }
 0x3ac   : > { %5129 = vmatprep.subr.bf16.mxu1 %v5453_v29  ;;  %v5501_v29 = vld [vmem:[#allocation9 + $0x3c8] sm:$0xff]  }
 0x3ae   : > { %5108 = vmatpush3.bf16.msra.mxu0 %v5454_v60  ;;  %v5502_v60 = vld [vmem:[#allocation9 + $0x308] sm:$0xff]  }
 0x3af   : > { %5130 = vmatpush3.bf16.msra.mxu1 %v5455_v48  ;;  %5109 = vmatprep.subr.bf16.mxu0 %v5456_v26  ;;  %v5503_v48 = vld [vmem:[#allocation9 + $0x388] sm:$0xff]   ;;  %v5504_v26 = vld [vmem:[#allocation9 + $0x340] sm:$0xff]  }
 0x3b0   : > { %5131 = vmatprep.subr.bf16.mxu1 %v5457_v1  ;;  %v5505_v1 = vld [vmem:[#allocation9 + $0x3c0] sm:$0xff]  }
 0x3b2   : > { %5110 = vmatpush3.bf16.msra.mxu0 %v5458_v0  ;;  %v5506_v0 = vld [vmem:[#allocation9 + $0x300] sm:$0xff]  }
 0x3b3   : > { %5132 = vmatpush3.bf16.msra.mxu1 %v5459_v47  ;;  %5111 = vmatprep.subr.bf16.mxu0 %v5460_v50  ;;  %v5507_v47 = vld [vmem:[#allocation9 + $0x380] sm:$0xff]   ;;  %v3092_v50 = vrot.slane %v7247_v62, %v7622_v5  ;;  %v5510_v5 = vld [vmem:[#allocation11 + $0x28] sm:$0xff]  }
 0x3b4   : > { %5133 = vmatprep.subr.bf16.mxu1 %v5461_v51  ;;  %v3100_v51 = vrot.slane %v7247_v62, %v7623_v16  ;;  %v5511_v16 = vld [vmem:[#allocation11 + $0x20] sm:$0xff]  }
 0x3b6   : > { %5112 = vmatpush3.bf16.msra.mxu0 %v5462_v32  ;;  %v3133_v32 = vpack.c.bf16 %v3092_v50, %v3092_v50 }
 0x3b7   : > { %5134 = vmatpush3.bf16.msra.mxu1 %v5463_v63  ;;  %5113 = vmatprep.subr.bf16.mxu0 %v5464_v21  ;;  %v3135_v63 = vpack.c.bf16 %v3100_v51, %v3100_v51  ;;  %v5508_v21 = vld [vmem:[#allocation11 + $0x38] sm:$0xff]  }
 0x3b8   : > { %5135 = vmatprep.subr.bf16.mxu1 %v5465_v28  ;;  %v5790_v28 = vmov 0.0  }
 0x3ba   : > { %5114 = vmatpush3.bf16.msra.mxu0 %v5466_v42  ;;  %v5509_v42 = vld [vmem:[#allocation11 + $0x30] sm:$0xff]  }
 0x3bb   : > { %5136 = vmatpush3.bf16.msra.mxu1 %v5467_v55  ;;  %5115 = vmatprep.subr.bf16.mxu0 %v5468_v17  ;;  %v5512_v55 = vld [vmem:[#allocation11 + $0x18] sm:$0xff]   ;;  %v5513_v17 = vld [vmem:[#allocation11 + $0x10] sm:$0xff]  }
 0x3bc   : > { %5137 = vmatprep.subr.bf16.mxu1 %v5469_v3  ;;  %v5514_v3 = vld [vmem:[#allocation11 + $0x8] sm:$0xff]  }
 0x3be   : > { %5116 = vmatpush3.bf16.msra.mxu0 %v5470_v4  ;;  %v5515_v4 = vld [vmem:[#allocation11] sm:$0xff]  }
 0x3bf   : > { %5138 = vmatpush3.bf16.msra.mxu1 %v5471_v43  ;;  %5117 = vmatprep.subr.bf16.mxu0 %v5472_v53 }
 0x3c0   : > { %5139 = vmatprep.subr.bf16.mxu1 %v5473_v52  ;;  %v3393_v52 = vld [vmem:[%s7332_s4] sm:$0x1] }
 0x3c2   : > { %5118 = vmatpush3.bf16.msra.mxu0 %v5474_v8 }
 0x3c3   : > { %5140 = vmatpush3.bf16.msra.mxu1 %v5475_v33  ;;  %5147 = vmatprep.subr.bf16.mxu0 %v5476_v49 }
 0x3c4   : > { %5169 = vmatprep.subr.bf16.mxu1 %v5477_v14 }
 0x3c5   : > { %4355 = vmatmul.mubr.bf16.vlgmr.msra.gmra.mxu0 %v3129_v23 }
 0x3c6   : > { %4395 = vmatmul.mubr.bf16.vlgmr.msra.gmra.mxu1 %v3131_v20  ;;  %5148 = vmatpush3.bf16.msra.mxu0 %v5478_v44 }
 0x3c7   : > { %5170 = vmatpush3.bf16.msra.mxu1 %v5479_v18  ;;  %5149 = vmatprep.subr.bf16.mxu0 %v5480_v40 }
 0x3c8   : > { %5171 = vmatprep.subr.bf16.mxu1 %v5481_v15  ;;  %4434 = vmatprep.mubr.bf16.mxu0 %v3134_v25 }
 0x3c9   : > { %4474 = vmatprep.mubr.bf16.mxu1 %v3136_v56 }
 0x3ca   : > { %5150 = vmatpush3.bf16.msra.mxu0 %v5482_v24 }
 0x3cb   : > { %5172 = vmatpush3.bf16.msra.mxu1 %v5483_v7  ;;  %5151 = vmatprep.subr.bf16.mxu0 %v5484_v10 }
 0x3cc   : > { %5173 = vmatprep.subr.bf16.mxu1 %v5485_v2 }
 0x3ce   : > { %5152 = vmatpush3.bf16.msra.mxu0 %v5486_v36 }
 0x3cf   : > { %5174 = vmatpush3.bf16.msra.mxu1 %v5487_v30  ;;  %5153 = vmatprep.subr.bf16.mxu0 %v5488_v12 }
 0x3d0   : > { %5175 = vmatprep.subr.bf16.mxu1 %v5489_v59 }
 0x3d2   : > { %5154 = vmatpush3.bf16.msra.mxu0 %v5490_v35 }
 0x3d3   : > { %5176 = vmatpush3.bf16.msra.mxu1 %v5491_v38  ;;  %5155 = vmatprep.subr.bf16.mxu0 %v5492_v11 }
 0x3d4   : > { %5177 = vmatprep.subr.bf16.mxu1 %v5493_v57 }
 0x3d6   : > { %5156 = vmatpush3.bf16.msra.mxu0 %v5494_v37 }
 0x3d7   : > { %5178 = vmatpush3.bf16.msra.mxu1 %v5495_v27  ;;  %5157 = vmatprep.subr.bf16.mxu0 %v5496_v31 }
 0x3d8   : > { %5179 = vmatprep.subr.bf16.mxu1 %v5497_v22 }
 0x3da   : > { %5158 = vmatpush3.bf16.msra.mxu0 %v5498_v61 }
 0x3db   : > { %5180 = vmatpush3.bf16.msra.mxu1 %v5499_v34  ;;  %5159 = vmatprep.subr.bf16.mxu0 %v5500_v45 }
 0x3dc   : > { %5181 = vmatprep.subr.bf16.mxu1 %v5501_v29 }
 0x3de   : > { %5160 = vmatpush3.bf16.msra.mxu0 %v5502_v60 }
 0x3df   : > { %5182 = vmatpush3.bf16.msra.mxu1 %v5503_v48  ;;  %5161 = vmatprep.subr.bf16.mxu0 %v5504_v26 }
 0x3e0   : > { %5183 = vmatprep.subr.bf16.mxu1 %v5505_v1 }
 0x3e2   : > { %5162 = vmatpush3.bf16.msra.mxu0 %v5506_v0 }
 0x3e3   : > { %5184 = vmatpush3.bf16.msra.mxu1 %v5507_v47  ;;  %5200 = vmatprep.subr.bf16.mxu0 %v5790_v28  ;;  %v4499_v47 = vld [vmem:[%s7624_s22] sm:$0x1] }
 0x3e5   : > { %4435 = vmatmul.mubr.bf16.vlgmr.msra.gmra.mxu0 %v3133_v32 }
 0x3e6   : > { %4475 = vmatmul.mubr.bf16.vlgmr.msra.gmra.mxu1 %v3135_v63  ;;  %5201 = vmatpush3.bf16.msra.mxu0 %v5508_v21 }
 0x3e7   : > { %5202 = vmatprep.subr.bf16.mxu0 %v5790_v28  ;;  %5216 = vmatprep.mubr.msk.bf16.mxu0 %vm5791_vm0, %v5790_v28 }
 0x3ea   : > { %5203 = vmatpush3.bf16.msra.mxu0 %v5509_v42 }
 0x3eb   : > { %5204 = vmatprep.subr.bf16.mxu0 %v5790_v28 }
 0x3ee   : > { %5205 = vmatpush3.bf16.msra.mxu0 %v5510_v5 }
 0x3ef   : > { %5206 = vmatprep.subr.bf16.mxu0 %v5790_v28 }
 0x3f2   : > { %5207 = vmatpush3.bf16.msra.mxu0 %v5511_v16 }
 0x3f3   : > { %5208 = vmatprep.subr.bf16.mxu0 %v5790_v28 }
 0x3f6   : > { %5209 = vmatpush3.bf16.msra.mxu0 %v5512_v55 }
 0x3f7   : > { %5210 = vmatprep.subr.bf16.mxu0 %v5790_v28 }
 0x3fa   : > { %5211 = vmatpush3.bf16.msra.mxu0 %v5513_v17 }
 0x3fb   : > { %5212 = vmatprep.subr.bf16.mxu0 %v5790_v28 }
 0x3fe   : > { %5213 = vmatpush3.bf16.msra.mxu0 %v5514_v3 }
 0x3ff   : > { %5214 = vmatprep.subr.bf16.mxu0 %v5790_v28 }
 0x402   : > { %5215 = vmatpush3.bf16.msra.mxu0 %v5515_v4 }
 0x445   : > { %v5031_v43 = vpop.f32.mrf.mxu0 }
 0x446   : > { %v5053_v53 = vpop.f32.mrf.mxu1 }
 0x447   : > { %v5032_v8 = vpop.f32.mrf.mxu0 }
 0x448   : > { %v5054_v33 = vpop.f32.mrf.mxu1  ;;  %v5033_v39 = vadd.f32 %v5032_v8, %v5031_v43 }
 0x449   : > { %v5055_v62 = vadd.f32 %v5054_v33, %v5053_v53  ;;  %v5034_v49 = vpop.f32.mrf.mxu0 }
 0x44a   : > { %v5056_v14 = vpop.f32.mrf.mxu1  ;;  %v4197_v58 = vadd.f32 %v5033_v39, %v3393_v52 }
 0x44b   : > { %v5035_v19 = vpop.f32.mrf.mxu0 }
 0x44c   : > { %v5057_v46 = vpop.f32.mrf.mxu1  ;;  %v4237_v6 = vadd.f32 %v5055_v62, %v4197_v58 }
 0x465   : > { %v5075_v44 = vpop.f32.mrf.mxu0 }
 0x466   : > { %v5097_v18 = vpop.f32.mrf.mxu1 }
 0x467   : > { %v5076_v41 = vpop.f32.mrf.mxu0 }
 0x468   : > { %v5098_v13 = vpop.f32.mrf.mxu1  ;;  %v5077_v36 = vadd.f32 %v5076_v41, %v5075_v44 }
 0x469   : > { %v5078_v54 = vpop.f32.mrf.mxu0  ;;  %v5099_v12 = vadd.f32 %v5098_v13, %v5097_v18 }
 0x46a   : > { %v5100_v9 = vpop.f32.mrf.mxu1  ;;  %v4277_v30 = vadd.f32 %v5077_v36, %v4237_v6 }
 0x46b   : > { %v5079_v23 = vpop.f32.mrf.mxu0 }
 0x46c   : > { %v5101_v40 = vpop.f32.mrf.mxu1  ;;  %v4317_v35 = vadd.f32 %v5099_v12, %v4277_v30 }
 0x485   : > { %v5119_v20 = vpop.f32.mrf.mxu0 }
 0x486   : > { %v5141_v15 = vpop.f32.mrf.mxu1 }
 0x487   : > { %v5120_v24 = vpop.f32.mrf.mxu0 }
 0x488   : > { %v5142_v25 = vpop.f32.mrf.mxu1  ;;  %v5121_v59 = vadd.f32 %v5120_v24, %v5119_v20 }
 0x489   : > { %v5122_v56 = vpop.f32.mrf.mxu0  ;;  %v5143_v11 = vadd.f32 %v5142_v25, %v5141_v15 }
 0x48a   : > { %v5144_v7 = vpop.f32.mrf.mxu1  ;;  %v4357_v38 = vadd.f32 %v5121_v59, %v4317_v35 }
 0x48b   : > { %v5123_v10 = vpop.f32.mrf.mxu0 }
 0x48c   : > { %v5145_v2 = vpop.f32.mrf.mxu1  ;;  %v4397_v22 = vadd.f32 %v5143_v11, %v4357_v38 }
 0x4a5   : > { %v5163_v57 = vpop.f32.mrf.mxu0 }
 0x4a6   : > { %v5185_v37 = vpop.f32.mrf.mxu1 }
 0x4a7   : > { %v5164_v27 = vpop.f32.mrf.mxu0 }
 0x4a8   : > { %v5186_v31 = vpop.f32.mrf.mxu1  ;;  %v5165_v61 = vadd.f32 %v5164_v27, %v5163_v57 }
 0x4a9   : > { %v5166_v34 = vpop.f32.mrf.mxu0  ;;  %v5187_v60 = vadd.f32 %v5186_v31, %v5185_v37 }
 0x4aa   : > { %v5188_v45 = vpop.f32.mrf.mxu1  ;;  %v4437_v29 = vadd.f32 %v5165_v61, %v4397_v22 }
 0x4ab   : > { %v5167_v48 = vpop.f32.mrf.mxu0 }
 0x4ac   : > { %v5189_v26 = vpop.f32.mrf.mxu1  ;;  %v4477_v1 = vadd.f32 %v5187_v60, %v4437_v29 }
 0x4ae   : > { %v4482_v0 = vpack.c.bf16 %v4477_v1, %v4477_v1 }
 0x4b0   : > { %5217 = vmatmul.mubr.bf16.vlgmr.msra.gmra.mxu0 %v4482_v0 }
 0x570   : > { %v4582_v50 = vpop.f32.mrf.mxu0 }
 0x571   : > { %v4583_v51 = vadd.f32 %v4582_v50, %v4499_v47 }
 0x572   : > { %v5218_v32 = vpop.f32.mrf.mxu0 }
 0x573   : > { %4588 = vst [vmem:[%s6034_s7] sm:$0x1] %v4583_v51 }
 0x574   : > { %v4585_v63 = vpop.f32.mrf.mxu0 }
 0x576   : > { %v5219_v21 = vpop.f32.mrf.mxu0 }
 0x577 PF: > { %s7625_s13 = sld [smem:[#allocation18_spill]]  ;;  %s4602_s23 = sshll.u32 %s6034_s7, 4  ;;  %s4603_s23 = int_to_ptr.vmem [resolvable:$true] %s4602_s23 }
 0x578   : > { %s7626_s1 = sld [smem:[#allocation19_spill]]  ;;  %s4590_s19 = scalar_lea.sflag [#allocation5], %s366_s6 }
 0x579   : > { %s7627_s27 = sld [smem:[#allocation60_spill]]  ;;  %s5648_s20 = scalar_lea.vmem %s4603_s23, 16 }
 0x57a   : > { %p5649_p3 = scmp.ne.s32.totalorder %s4603_s23, %s5648_s20  ;;  %s5792_s24 = smov [#allocation12]  }
 0x57b   : > { %s5652_s30 = sshll.u32 %s5792_s24, 4  ;;  %s5653_s30 = int_to_ptr.vmem [resolvable:$false] %s5652_s30 }
 0x57c   : > { %s5654_s14 = scalar_lea.vmem %s5653_s30, 32  ;;  %p5655_p6 = scmp.lt.s32.totalorder %s4603_s23, %s5653_s30 }
 0x57d   : > { %s5012_s17 = sshll.u32 %s7625_s13, 4  ;;  %p5656_p10 = scmp.lt.s32.totalorder %s5654_s14, %s5648_s20 }
 0x57e   : > { %p7629_p7 = scmp.ne.s32.totalorder %s7626_s1, 0 }
 0x57f   : > { %s7628_s12 = smov %s7627_s27  ;;  %s4600_s8 = scalar_lea.hbm %s7627_s27, %s5012_s17 }
 0x580   : > { %p5650_p5 = pnand %p5649_p3, %p7629_p7  ;;  %p5657_p1 = por %p5656_p10, %p5655_p6 }
 0x582   : > { %p5651_p8 = pneg %p5650_p5 }
 0x584   : > { %p5658_p4 = pnand %p5657_p1, %p5651_p8 }
 0x586   : > { %5661 = shalt.err (!%p5658_p4)
}
 0x587   : > { %s5662_s15 = scalar_lea.hbm %s4600_s8, 16  ;;  %s5666_s18 = scalar_lea.hbm %s7628_s12, 32 }
 0x588   : > { %p5663_p11 = scmp.ne.s32.totalorder %s4600_s8, %s5662_s15  ;;  %p5667_p9 = scmp.lt.s32.totalorder %s4600_s8, %s7628_s12 }
 0x589   : > { %p5668_p12 = scmp.lt.s32.totalorder %s5666_s18, %s5662_s15 }
 0x58a   : > { %p5664_p0 = pnand %p5663_p11, %p7629_p7 }
 0x58b   : > { %p5669_p2 = por %p5668_p12, %p5667_p9 }
 0x58c   : > { %p5665_p13 = pneg %p5664_p0 }
 0x58e   : > { %p5670_p3 = pnand %p5669_p2, %p5665_p13 }
 0x590   : > { %5673 = shalt.err (!%p5670_p3)
}
 0x591   : > { %5238 = dma.vmem_to_hbm [thread:$0]  (%p7629_p7), %s4603_s23, 16, %s4600_s8, %s4590_s19  }
 0x592 PF: > { %s7630_s17 = sld [smem:[#allocation17_spill]]  ;;  %p5270_p5 = scmp.ge.s32.totalorder %s5776_s11, 2 }
 0x593   : > { %s7631_s5 = sld [smem:[#allocation20_spill]] }
 0x598   : > { %s4614_s16 = sand.u32 1, %s7630_s17  }
 0x599   : > { %p7632_p8 = scmp.ne.s32.totalorder %s7631_s5, 0  ;;  %s4615_s27 = scalar_lea.sflag [#allocation5], %s4614_s16 }
 0x59b   : > { %p5258_p6 = pnand %p5270_p5, %p7632_p8 }
 0x59d   : > { %p5259_p10 = pneg %p5258_p6 }
 0x59f   : > { %5731 = dma.done.wait (%p5259_p10), %s4615_s27, 16  }
 0x5a0   : > { %5733 = vsyncadd (%p5259_p10), %s4615_s27, 4294967280  ;;  %s25_s11 = sadd.s32 1, %s5776_s11   ;;  %s7633_s1 = sld [smem:[#allocation21_spill]] }
 0x5a1   : > { %p22_p1 = scmp.ge.s32.totalorder %s25_s11, 6   ;;  %s7634_s24 = smov %s5740_s25 }
 0x5a2   : > { %s7635_s25 = smov %s5744_s26  ;;  %s7636_s26 = smov %s5990_s2 }
 0x5a3   : > { %s7637_s27 = smov %s5752_s28  ;;  %s7638_s28 = smov %s5756_s29 }
 0x5a4   : > { %s7639_s29 = smov %s5993_s3  ;;  %s7640_s30 = smov %s5768_s9 }
 0x5a5   : > { %s7641_s8 = smov %s5772_s10  ;;  %s7643_s10 = smov %s7649_s21 }
 0x5a6   : > { %s7642_s9 = smov %s7633_s1  ;;  %24 = sbr.rel (!%p22_p1) target bundleno = 18 (0x12), region = 117 }
 0x5ab   :  { %4619 = vsyncpa [#allocation4], 1 }
 0x5ac   :  { %4621 = vsyncpa [#allocation4 + $0x1], 1 }
 0x5ad   :  { %4622 = vsyncpa [#allocation7], 1 }
 0x5ae   :  { %4623 = vsyncpa [#allocation10], 1 }
 0x5af   :  { %4624 = vsyncpa [#allocation5], 1 }
 0x5b0   :  { %4626 = vsyncpa [#allocation5 + $0x1], 1 }

// kernel: tpu_custom_call.1
= control target key start
LH: loop header
LB: loop body
LE: loop exit
PB: predicated region body
PF: predicated region fallthrough
CT: control target
= control target key end

     0   :  { %s7328_s0 = inlined_call_operand.hbm [shape: bf16[2,256,128], index: 0, kind: input, shape index: {}]   ;;  %s7329_s1 = inlined_call_operand.hbm [shape: bf16[128,2048], index: 1, kind: input, shape index: {}]   ;;  %s7330_s2 = inlined_call_operand.hbm [shape: f32[1,2048], index: 2, kind: input, shape index: {}]   ;;  %s7331_s3 = inlined_call_operand.hbm [shape: bf16[2048,128], index: 3, kind: input, shape index: {}]   ;;  %s7332_s4 = inlined_call_operand.vmem [shape: f32[1,128], index: 4, kind: input, shape index: {}]   ;;  %s7333_s5 = inlined_call_operand.hbm [shape: bf16[128,128], index: 5, kind: input, shape index: {}]   ;;  %s7334_s6 = inlined_call_operand.vmem [shape: f32[1,128], index: 6, kind: input, shape index: {}]   ;;  %s7335_s7 = inlined_call_operand.hbm [shape: f32[2,1,128], index: 7, kind: output, shape index: {}]  }
   0x1   :  { %7392 = sst [smem:[#allocation55_spill]] %s7329_s1 }
   0x2   :  { %7393 = sst [smem:[#allocation56_spill]] %s7330_s2 }
   0x3   :  { %7394 = sst [smem:[#allocation57_spill]] %s7331_s3 }
   0x4   :  { %7395 = sst [smem:[#allocation58_spill]] %s7333_s5 }
   0x5   :  { %7396 = sst [smem:[#allocation59_spill]] %s7334_s6 }
   0x6   :  { %7397 = sst [smem:[#allocation60_spill]] %s7335_s7 }
   0x7   :  { %12 = vsyncpa [#allocation4], 0 }
   0x8   :  { %14 = vsyncpa [#allocation4 + $0x1], 0 }
   0x9   :  { %15 = vsyncpa [#allocation7], 0 }
   0xa   :  { %16 = vsyncpa [#allocation10], 0 }
   0xb   :  { %17 = vsyncpa [#allocation5], 0 }
   0xc   :  { %19 = vsyncpa [#allocation5 + $0x1], 0  ;;  %s5833_s24 = smov 0   ;;  %s5835_s25 = smov 0  }
   0xd   :  { %s5837_s26 = smov 0   ;;  %s5839_s27 = smov 0  }
   0xe   :  { %s5841_s28 = smov 0   ;;  %s5843_s29 = smov 0  }
   0xf   :  { %s5845_s30 = smov 0   ;;  %s5847_s8 = smov 0  }
  0x10   :  { %s5849_s9 = smov 0   ;;  %s5851_s10 = smov 0  }
  0x11   :  { %s5853_s11 = smov 0  }
  0x12 LB: > { %7398 = sst [smem:[#allocation17_spill]] %s5736_s24  ;;  %s4720_s12 = sadd.s32 4294967295, %s5776_s11   ;;  %s5776_s11 = sphi %s5853_s11, %s25_s11   ;;  %s5772_s10 = sphi %s5851_s10, %s7643_s10   ;;  %s5768_s9 = sphi %s5849_s9, %s7642_s9   ;;  %s5764_s8 = sphi %s5847_s8, %s7641_s8   ;;  %s5760_s30 = sphi %s5845_s30, %s7640_s30   ;;  %s5756_s29 = sphi %s5843_s29, %s7639_s29   ;;  %s5752_s28 = sphi %s5841_s28, %s7638_s28   ;;  %s5748_s27 = sphi %s5839_s27, %s7637_s27   ;;  %s5744_s26 = sphi %s5837_s26, %s7636_s26   ;;  %s5740_s25 = sphi %s5835_s25, %s7635_s25   ;;  %s5736_s24 = sphi %s5833_s24, %s7634_s24  }
  0x13   : > { %7399 = sst [smem:[#allocation18_spill]] %s5764_s8  ;;  %s4721_s13 = sadd.s32 4294967294, %s5776_s11  }
  0x14   : > { %p59_p0 = scmp.ne.s32.totalorder %s5752_s28, %s5748_s27  ;;  %p5889_p1 = scmp.eq.s32.totalorder %s4720_s12, 0 }
  0x15   : > { %p208_p2 = scmp.ne.s32.totalorder %s5744_s26, %s5740_s25  ;;  %p209_p3 = scmp.eq.s32.totalorder %s4720_s12, 3 }
  0x16   : > { %s7400_s14 = scalar_select %p5889_p1, 1, 0 }
  0x17   : > { %p5897_p4 = por %p5889_p1, %p59_p0  ;;  %p214_p5 = scmp.ne.s32.totalorder %s5740_s25, %s5736_s24 }
  0x18   : > { %p5903_p6 = por %p209_p3, %p208_p2  ;;  %p215_p7 = scmp.eq.s32.totalorder %s4721_s13, 3 }
  0x19   : > { %s7401_s15 = scalar_select %p5897_p4, 1, 0 }
  0x1a   : > { %s7402_s16 = scalar_select %p5903_p6, 1, 0 }
  0x1b   : > { %p4722_p8 = scmp.ge.s32.totalorder %s5776_s11, 1  ;;  %p222_p9 = scmp.lt.s32.totalorder %s5776_s11, 5 }
  0x1c   : > { %7403 = sst [smem:[#allocation19_spill]] %s7402_s16  ;;  %p5909_p10 = por %p215_p7, %p214_p5 }
  0x1d   : > { %p5913_p11 = pnand %p4722_p8, %p222_p9  ;;  %s5778_s19 = smov [#allocation6]  }
  0x1e   : > { %s7404_s17 = scalar_select %p5909_p10, 1, 0 }
  0x1f   : > { %s7406_s18 = scalar_select %p5913_p11, 1, 0 }
  0x20   : > { %7405 = sst [smem:[#allocation20_spill]] %s7404_s17  ;;  %s234_s20 = sshll.u32 %s5778_s19, 4  ;;  %s235_s20 = int_to_ptr.vmem [resolvable:$true] %s234_s20 }
  0x21   : > { %p5240_p12 = pneg %p5913_p11  ;;  %s5779_s22 = smov [#allocation9]  }
  0x22   : > { %s258_s23 = sshll.u32 %s5779_s22, 4  ;;  %s5527_s27 = scalar_lea.vmem %s235_s20, 16384  ;;  %s259_s23 = int_to_ptr.vmem [resolvable:$true] %s258_s23 }
  0x23   : > { %p5921_p13 = pnand %p5240_p12, %p5889_p1  ;;  %p5528_p2 = scmp.ne.s32.totalorder %s235_s20, %s5527_s27 }
  0x24   : > { %p5535_p7 = scmp.lt.s32.totalorder %s235_s20, %s235_s20  ;;  %p5536_p8 = scmp.lt.s32.totalorder %s5527_s27, %s5527_s27 }
  0x25   : > { %p5518_p0 = pneg %p5921_p13 }
  0x26   : > { %p5537_p9 = por %p5536_p8, %p5535_p7 }
  0x27   : > { %p5530_p3 = pnand %p5528_p2, %p5518_p0 }
  0x29   : > { %p5531_p5 = pneg %p5530_p3 }
  0x2b   : > { %p5538_p12 = pnand %p5537_p9, %p5531_p5 }
  0x2d   : > { %5541 = shalt.err (!%p5538_p12)
}
  0x2e   : > { %s5780_s12 = smov 1024   ;;  %s7343_s13 = smov 64  }
  0x2f   : > { %s7408_s1 = sld [smem:[#allocation55_spill]]  ;;  %s5553_s17 = scalar_lea.vmem %s259_s23, 16384 }
  0x30   : > { %p5554_p10 = scmp.ne.s32.totalorder %s259_s23, %s5553_s17  ;;  %p5561_p6 = scmp.lt.s32.totalorder %s259_s23, %s259_s23 }
  0x31   : > { %p5562_p7 = scmp.lt.s32.totalorder %s5553_s17, %s5553_s17 }
  0x32   : > { %p5556_p2 = pnand %p5554_p10, %p5518_p0 }
  0x33   : > { %p5563_p5 = por %p5562_p7, %p5561_p6 }
  0x34   : > { %p5557_p3 = pneg %p5556_p2 }
  0x35   : > { %5243 = dma.hbm_to_vmem [thread:$0]  (!%p5921_p13), %s7408_s1, 16384, %s235_s20, [#allocation7], %s5780_s12, %s5780_s12, %s7343_s13  }
  0x36   : > { %p5564_p8 = pnand %p5563_p5, %p5557_p3 }
  0x38   : > { %5567 = shalt.err (!%p5564_p8)
}
  0x39   : > { %s7344_s27 = smov 4   ;;  %s7409_s3 = sld [smem:[#allocation57_spill]] }
  0x3a   : > { %s5783_s20 = smov [#allocation8]   ;;  %s5784_s22 = smov [#allocation11]  }
  0x3b   : > { %s248_s12 = sshll.u32 %s5783_s20, 4  ;;  %s274_s1 = sshll.u32 %s5784_s22, 4  ;;  %s249_s12 = int_to_ptr.vmem [resolvable:$true] %s248_s12  ;;  %s275_s1 = int_to_ptr.vmem [resolvable:$true] %s274_s1 }
  0x3c   : > { %s5579_s17 = scalar_lea.vmem %s249_s12, 256  ;;  %p5587_p12 = scmp.lt.s32.totalorder %s249_s12, %s249_s12 }
  0x3d   : > { %p5580_p6 = scmp.ne.s32.totalorder %s249_s12, %s5579_s17  ;;  %p5588_p2 = scmp.lt.s32.totalorder %s5579_s17, %s5579_s17 }
  0x3f   : > { %5249 = dma.hbm_to_vmem [thread:$0]  (!%p5921_p13), %s7409_s3, 16384, %s259_s23, [#allocation10], %s7343_s13, %s7343_s13, %s7344_s27  }
  0x40   : > { %p5582_p10 = pnand %p5580_p6, %p5518_p0  ;;  %p5589_p3 = por %p5588_p2, %p5587_p12 }
  0x42   : > { %p5583_p9 = pneg %p5582_p10 }
  0x44   : > { %p5590_p7 = pnand %p5589_p3, %p5583_p9 }
  0x46   : > { %5593 = shalt.err (!%p5590_p7)
}
  0x47   : > { %s7410_s2 = sld [smem:[#allocation56_spill]]  ;;  %s5605_s19 = scalar_lea.vmem %s275_s1, 1024 }
  0x48   : > { %p5606_p5 = scmp.ne.s32.totalorder %s275_s1, %s5605_s19  ;;  %p5613_p6 = scmp.lt.s32.totalorder %s275_s1, %s275_s1 }
  0x49   : > { %p5614_p10 = scmp.lt.s32.totalorder %s5605_s19, %s5605_s19 }
  0x4a   : > { %p5608_p8 = pnand %p5606_p5, %p5518_p0 }
  0x4b   : > { %p5615_p4 = por %p5614_p10, %p5613_p6 }
  0x4c   : > { %p5609_p1 = pneg %p5608_p8 }
  0x4d   : > { %5246 = dma.hbm_to_vmem [thread:$0]  (!%p5921_p13), %s7410_s2, 256, %s249_s12, [#allocation7]  }
  0x4e   : > { %p5616_p11 = pnand %p5615_p4, %p5609_p1 }
  0x50   : > { %5619 = shalt.err (!%p5616_p11)
}
  0x51   : > { %s7411_s5 = sld [smem:[#allocation58_spill]]  ;;  %s34_s12 = sadd.s32 1, %s5768_s9 }
  0x52   : > { %s37_s21 = sadd.s32 1, %s5772_s10  ;;  %p35_p1 = scmp.ge.s32.totalorder %s34_s12, 2 }
  0x53   : > { %s46_s17 = sadd.s32 1, %s5756_s29  ;;  %p53_p4 = scmp.ne.s32.totalorder %s5756_s29, %s5752_s28 }
  0x54   : > { %p54_p11 = scmp.eq.s32.totalorder %s5776_s11, 0  ;;  %s7645_s12 = smov (%p35_p1, %s34_s12), 0 }
  0x55   : > { %7412 = sst [smem:[#allocation21_spill]] %s7645_s12  ;;  %s7647_s21 = smov (!%p35_p1, %s37_s21), %s5772_s10 }
  0x56   : > { %s42_s24 = ssub.s32 %s5768_s9, %s7645_s12  ;;  %p5977_p0 = por %p54_p11, %p53_p4 }
  0x57   : > { %5252 = dma.hbm_to_vmem [thread:$0]  (!%p5921_p13), %s7411_s5, 1024, %s275_s1, [#allocation10], %s7343_s13, %s7343_s13, %s7344_s27  }
  0x58   : > { %p39_p13 = scmp.ge.s32.totalorder %s7647_s21, 2  ;;  %s198_s1 = sadd.s32 1, %s5744_s26 }
  0x59   : > { %p5265_p9 = scmp.lt.s32.totalorder %s5776_s11, 4  ;;  %s291_s19 = sand.u32 1, %s5756_s29  }
  0x5a   : > { %s7649_s21 = smov (%p39_p13, %s7647_s21), 0  ;;  %s4728_s20 = sshll.u32 %s291_s19, 6 }
  0x5b   : > { %s41_s22 = ssub.s32 %s5772_s10, %s7649_s21  ;;  %s4729_s27 = sshll.u32 %s5768_s9, 4 }
  0x5c   : > { %s43_s13 = sor.u32 %s42_s24, %s41_s22  ;;  %p196_p12 = scmp.eq.s32.totalorder %s41_s22, 0 }
  0x5d   : > { %p44_p2 = scmp.eq.s32.totalorder %s43_s13, 0  ;;  %s4730_s5 = sshll.u32 %s5772_s10, 5 }
  0x5e   : > { %s5990_s2 = scalar_select %p196_p12, %s5744_s26, %s198_s1  }
  0x5f   : > { %s5993_s3 = scalar_select %p44_p2, %s5756_s29, %s46_s17  }
  0x60   : > { %s295_s12 = scalar_lea.vmem [#allocation3], %s4728_s20  ;;  %s301_s16 = sadd.s32 %s4730_s5, %s4729_s27 }
  0x61   : > { %s304_s7 = sshll.u32 %s295_s12, 4  ;;  %s4731_s8 = sshll.u32 %s301_s16, 6  ;;  %s305_s7 = int_to_ptr.vmem [resolvable:$true] %s304_s7 }
  0x62   : > { %p6000_p3 = pnand %p5265_p9, %p5977_p0  ;;  %s303_s13 = scalar_lea.hbm %s7328_s0, %s4731_s8 }
  0x63   : > { %s292_s1 = scalar_lea.sflag [#allocation4], %s291_s19  ;;  %s5633_s17 = scalar_lea.vmem %s305_s7, 1024 }
  0x64   : > { %p5622_p7 = pneg %p6000_p3  ;;  %p5634_p5 = scmp.ne.s32.totalorder %s305_s7, %s5633_s17 }
  0x65   : > { %s5785_s5 = smov [#allocation3]  }
  0x66   : > { %p5636_p8 = pnand %p5634_p5, %p5622_p7  ;;  %s5638_s16 = sshll.u32 %s5785_s5, 4  ;;  %s5639_s16 = int_to_ptr.vmem [resolvable:$false] %s5638_s16 }
  0x67   : > { %s5640_s27 = scalar_lea.vmem %s5639_s16, 2048  ;;  %p5641_p10 = scmp.lt.s32.totalorder %s305_s7, %s5639_s16 }
  0x68   : > { %p5637_p6 = pneg %p5636_p8  ;;  %p5642_p1 = scmp.lt.s32.totalorder %s5640_s27, %s5633_s17 }
  0x6a   : > { %p5643_p4 = por %p5642_p1, %p5641_p10 }
  0x6c   : > { %p5644_p11 = pnand %p5643_p4, %p5637_p6 }
  0x6e   : > { %5647 = shalt.err (!%p5644_p11)
}
  0x6f   : > { %s7415_s12 = smov 4   ;;  %s7416_s8 = smov 64  }
  0x70   : > { %5256 = dma.hbm_to_vmem [thread:$0]  (!%p6000_p3), %s303_s13, 1024, %s305_s7, %s292_s1, %s7416_s8, %s7416_s8, %s7415_s12  }
  0x71   : > { %p7417_p0 = scmp.ne.s32.totalorder %s7406_s18, 0 }
  0x73   : > { %316 = sbr.rel (%p7417_p0) target bundleno = 1426 (0x592), region = 48 }
  0x78   : > { %s318_s23 = sand.u32 1, %s5752_s28   ;;  %p7418_p13 = scmp.ne.s32.totalorder %s7401_s15, 0 }
  0x79   : > { %s4733_s19 = sshll.u32 %s318_s23, 6  ;;  %s319_s20 = scalar_lea.sflag [#allocation4], %s318_s23 }
  0x7a   : > { %s6017_s24 = scalar_lea.vmem [#allocation3], %s4733_s19 }
  0x7b   : > { %5719 = dma.done.wait (%p7418_p13), %s319_s20, 1024  }
  0x7c   : > { %5721 = vsyncadd (%p7418_p13), %s319_s20, 4294966272  ;;  %p7419_p9 = scmp.ne.s32.totalorder %s7400_s14, 0 }
  0x7e   : > { %5723 = dma.done.wait (%p7419_p9), [#allocation7], 16640  }
  0x7f   : > { %5725 = vsyncadd (%p7419_p9), [#allocation7], 4294950656 }
  0x80   : > { %5727 = dma.done.wait (%p7419_p9), [#allocation10], 17408  }
  0x81   : > { %5729 = vsyncadd (%p7419_p9), [#allocation10], 4294949888  ;;  %s366_s6 = sand.u32 1, %s5740_s25   ;;  %p4738_p12 = scmp.ne.s32.totalorder %s5760_s30, 0 }
  0x82   : > { %s6034_s7 = scalar_lea.vmem [#allocation12], %s366_s6 }
  0x83   : > { %374 = sbr.rel (%p4738_p12) target bundleno = 138 (0x8a), region = 72 }
  0x88   : > { %v5786_v0 = vmov 0.0  }
  0x89   : > { %375 = vst [vmem:[#allocation2] sm:$0xff] %v5786_v0  ;;  %376 = vst [vmem:[#allocation2 + $0x8] sm:$0xff] %v5786_v0 }
  0x8a PF: > { %v505_v1 = vld [vmem:[#allocation6 + $0x380] sm:$0xff]  ;;  %v506_v3 = vld [vmem:[#allocation6 + $0x388] sm:$0xff]  ;;  %v7349_v9 = vmov 0   ;;  %v507_v0 = vld [vmem:[#allocation6 + $0x390] sm:$0xff]  ;;  %p4875_p2 = scmp.ne.s32.totalorder %s5760_s30, 1 }
  0x8b   : > { %v513_v2 = vld [vmem:[#allocation6 + $0x3c0] sm:$0xff]  ;;  %v514_v5 = vld [vmem:[#allocation6 + $0x3c8] sm:$0xff]  ;;  %1325 = vmatprep.mubr.bf16.mxu0 %v7349_v9  ;;  %1438 = vmatprep.mubr.bf16.mxu1 %v7349_v9  ;;  %s7624_s22 = sld [smem:[#allocation59_spill]] (!%p4875_p2) }
  0x8c   : > { %v4860_v4 = vcombine.high %v505_v1, %v513_v2  ;;  %v4859_v6 = vcombine.low %v505_v1, %v513_v2  ;;  %v489_v7 = vld [vmem:[#allocation6 + $0x300] sm:$0xff]  ;;  %v4862_v10 = vcombine.high %v506_v3, %v514_v5  ;;  %v4861_v11 = vcombine.low %v506_v3, %v514_v5  ;;  %v490_v13 = vld [vmem:[#allocation6 + $0x308] sm:$0xff]  ;;  %v515_v1 = vld [vmem:[#allocation6 + $0x3d0] sm:$0xff] }
  0x8d   : > { %v497_v8 = vld [vmem:[#allocation6 + $0x340] sm:$0xff]  ;;  %v498_v14 = vld [vmem:[#allocation6 + $0x348] sm:$0xff]  ;;  %v508_v2 = vld [vmem:[#allocation6 + $0x398] sm:$0xff] }
  0x8e   : > { %v4844_v12 = vcombine.high %v489_v7, %v497_v8  ;;  %v473_v15 = vld [vmem:[#allocation6 + $0x280] sm:$0xff]  ;;  %1293 = vmatprep.subr.bf16.mxu0 %v4860_v4  ;;  %v4846_v16 = vcombine.high %v490_v13, %v498_v14  ;;  %v474_v18 = vld [vmem:[#allocation6 + $0x288] sm:$0xff]  ;;  %1406 = vmatprep.subr.bf16.mxu1 %v4862_v10  ;;  %v4843_v20 = vcombine.low %v489_v7, %v497_v8  ;;  %v516_v3 = vld [vmem:[#allocation6 + $0x3d8] sm:$0xff] }
  0x8f   : > { %v481_v17 = vld [vmem:[#allocation6 + $0x2c0] sm:$0xff]  ;;  %v482_v19 = vld [vmem:[#allocation6 + $0x2c8] sm:$0xff]  ;;  %1294 = vmatpush1.bf16.msra.mxu0 %v4859_v6  ;;  %1407 = vmatpush1.bf16.msra.mxu1 %v4861_v11  ;;  %v4845_v21 = vcombine.low %v490_v13, %v498_v14  ;;  %v4864_v6 = vcombine.high %v507_v0, %v515_v1  ;;  %v4866_v7 = vcombine.high %v508_v2, %v516_v3  ;;  %v491_v10 = vld [vmem:[#allocation6 + $0x310] sm:$0xff] }
  0x90   : > { %1295 = vmatprep.subr.bf16.mxu0 %v4844_v12  ;;  %v4828_v22 = vcombine.high %v473_v15, %v481_v17  ;;  %1408 = vmatprep.subr.bf16.mxu1 %v4846_v16  ;;  %v4830_v23 = vcombine.high %v474_v18, %v482_v19  ;;  %v457_v24 = vld [vmem:[#allocation6 + $0x200] sm:$0xff]  ;;  %v458_v26 = vld [vmem:[#allocation6 + $0x208] sm:$0xff]  ;;  %v4827_v28 = vcombine.low %v473_v15, %v481_v17  ;;  %v499_v11 = vld [vmem:[#allocation6 + $0x350] sm:$0xff] }
  0x91   : > { %v465_v25 = vld [vmem:[#allocation6 + $0x240] sm:$0xff]  ;;  %v466_v27 = vld [vmem:[#allocation6 + $0x248] sm:$0xff]  ;;  %v4829_v29 = vcombine.low %v474_v18, %v482_v19  ;;  %v4863_v12 = vcombine.low %v507_v0, %v515_v1  ;;  %v492_v13 = vld [vmem:[#allocation6 + $0x318] sm:$0xff]  ;;  %v4865_v15 = vcombine.low %v508_v2, %v516_v3  ;;  %v4848_v16 = vcombine.high %v491_v10, %v499_v11 }
  0x92   : > { %v4812_v30 = vcombine.high %v457_v24, %v465_v25  ;;  %v4814_v31 = vcombine.high %v458_v26, %v466_v27  ;;  %v441_v32 = vld [vmem:[#allocation6 + $0x180] sm:$0xff]  ;;  %v442_v34 = vld [vmem:[#allocation6 + $0x188] sm:$0xff]  ;;  %v4811_v36 = vcombine.low %v457_v24, %v465_v25  ;;  %v4813_v37 = vcombine.low %v458_v26, %v466_v27  ;;  %v500_v14 = vld [vmem:[#allocation6 + $0x358] sm:$0xff] }
  0x93   : > { %1296 = vmatpush1.bf16.msra.mxu0 %v4843_v20  ;;  %1409 = vmatpush1.bf16.msra.mxu1 %v4845_v21  ;;  %v449_v33 = vld [vmem:[#allocation6 + $0x1c0] sm:$0xff]  ;;  %v450_v35 = vld [vmem:[#allocation6 + $0x1c8] sm:$0xff]  ;;  %v475_v17 = vld [vmem:[#allocation6 + $0x290] sm:$0xff]  ;;  %v4850_v19 = vcombine.high %v492_v13, %v500_v14 }
  0x94   : > { %1297 = vmatprep.subr.bf16.mxu0 %v4828_v22  ;;  %1410 = vmatprep.subr.bf16.mxu1 %v4830_v23  ;;  %v4796_v38 = vcombine.high %v441_v32, %v449_v33  ;;  %v4798_v39 = vcombine.high %v442_v34, %v450_v35  ;;  %v425_v40 = vld [vmem:[#allocation6 + $0x100] sm:$0xff]  ;;  %v426_v42 = vld [vmem:[#allocation6 + $0x108] sm:$0xff]  ;;  %v4795_v44 = vcombine.low %v441_v32, %v449_v33  ;;  %v483_v18 = vld [vmem:[#allocation6 + $0x2d0] sm:$0xff] }
  0x95   : > { %v433_v41 = vld [vmem:[#allocation6 + $0x140] sm:$0xff]  ;;  %v434_v43 = vld [vmem:[#allocation6 + $0x148] sm:$0xff]  ;;  %v4797_v45 = vcombine.low %v442_v34, %v450_v35  ;;  %v476_v20 = vld [vmem:[#allocation6 + $0x298] sm:$0xff]  ;;  %v4847_v22 = vcombine.low %v491_v10, %v499_v11  ;;  %v4849_v23 = vcombine.low %v492_v13, %v500_v14  ;;  %v4832_v24 = vcombine.high %v475_v17, %v483_v18 }
  0x96   : > { %v4780_v46 = vcombine.high %v425_v40, %v433_v41  ;;  %v4782_v47 = vcombine.high %v426_v42, %v434_v43  ;;  %v409_v48 = vld [vmem:[#allocation6 + $0x80] sm:$0xff]  ;;  %v410_v50 = vld [vmem:[#allocation6 + $0x88] sm:$0xff]  ;;  %v4779_v52 = vcombine.low %v425_v40, %v433_v41  ;;  %v4781_v53 = vcombine.low %v426_v42, %v434_v43  ;;  %v484_v21 = vld [vmem:[#allocation6 + $0x2d8] sm:$0xff] }
  0x97   : > { %1298 = vmatpush1.bf16.msra.mxu0 %v4827_v28  ;;  %1411 = vmatpush1.bf16.msra.mxu1 %v4829_v29  ;;  %v417_v49 = vld [vmem:[#allocation6 + $0xc0] sm:$0xff]  ;;  %v418_v51 = vld [vmem:[#allocation6 + $0xc8] sm:$0xff]  ;;  %v4834_v25 = vcombine.high %v476_v20, %v484_v21  ;;  %v459_v27 = vld [vmem:[#allocation6 + $0x210] sm:$0xff]  ;;  %v4833_v32 = vcombine.low %v476_v20, %v484_v21 }
  0x98   : > { %1299 = vmatprep.subr.bf16.mxu0 %v4812_v30  ;;  %1412 = vmatprep.subr.bf16.mxu1 %v4814_v31  ;;  %v4764_v54 = vcombine.high %v409_v48, %v417_v49  ;;  %v393_v55 = vld [vmem:[#allocation6] sm:$0xff]  ;;  %v4766_v56 = vcombine.high %v410_v50, %v418_v51  ;;  %v394_v58 = vld [vmem:[#allocation6 + $0x8] sm:$0xff]  ;;  %v4763_v60 = vcombine.low %v409_v48, %v417_v49  ;;  %v467_v28 = vld [vmem:[#allocation6 + $0x250] sm:$0xff] }
  0x99   : > { %v401_v57 = vld [vmem:[#allocation6 + $0x40] sm:$0xff]  ;;  %v402_v59 = vld [vmem:[#allocation6 + $0x48] sm:$0xff]  ;;  %v4765_v61 = vcombine.low %v410_v50, %v418_v51  ;;  %v460_v29 = vld [vmem:[#allocation6 + $0x218] sm:$0xff]  ;;  %v4831_v31 = vcombine.low %v475_v17, %v483_v18  ;;  %v4816_v33 = vcombine.high %v459_v27, %v467_v28 }
  0x9a   : > { %v4748_v62 = vcombine.high %v393_v55, %v401_v57  ;;  %v4750_v63 = vcombine.high %v394_v58, %v402_v59  ;;  %v4747_v4 = vcombine.low %v393_v55, %v401_v57  ;;  %v4749_v5 = vcombine.low %v394_v58, %v402_v59  ;;  %v6040_v8 = vld [vmem:[%s6017_s24] sm:$0xff]   ;;  %v6047_v26 = vld [vmem:[%s6017_s24 + $0x8] sm:$0xff]   ;;  %v468_v30 = vld [vmem:[#allocation6 + $0x258] sm:$0xff] }
  0x9b   : > { %1300 = vmatpush1.bf16.msra.mxu0 %v4811_v36  ;;  %1413 = vmatpush1.bf16.msra.mxu1 %v4813_v37  ;;  %v4818_v34 = vcombine.high %v460_v29, %v468_v30  ;;  %v443_v35 = vld [vmem:[#allocation6 + $0x190] sm:$0xff]  ;;  %v444_v37 = vld [vmem:[#allocation6 + $0x198] sm:$0xff]  ;;  %v4817_v40 = vcombine.low %v460_v29, %v468_v30  ;;  %v518_v10 = vld [vmem:[#allocation6 + $0x3e8] sm:$0xff] }
  0x9c   : > { %1301 = vmatprep.subr.bf16.mxu0 %v4796_v38  ;;  %1414 = vmatprep.subr.bf16.mxu1 %v4798_v39  ;;  %v451_v36 = vld [vmem:[#allocation6 + $0x1d0] sm:$0xff]  ;;  %v452_v38 = vld [vmem:[#allocation6 + $0x1d8] sm:$0xff]  ;;  %v4815_v39 = vcombine.low %v459_v27, %v467_v28  ;;  %v6068_v14 = vld [vmem:[%s6017_s24 + $0x20] sm:$0xff]  }
  0x9d   : > { %v4800_v41 = vcombine.high %v443_v35, %v451_v36  ;;  %v6054_v42 = vld [vmem:[%s6017_s24 + $0x10] sm:$0xff]   ;;  %v4802_v43 = vcombine.high %v444_v37, %v452_v38  ;;  %v4799_v48 = vcombine.low %v443_v35, %v451_v36  ;;  %v4801_v49 = vcombine.low %v444_v37, %v452_v38  ;;  %v420_v55 = vld [vmem:[#allocation6 + $0xd8] sm:$0xff]  ;;  %v501_v20 = vld [vmem:[#allocation6 + $0x360] sm:$0xff] }
  0x9e   : > { %v6061_v59 = vld [vmem:[%s6017_s24 + $0x18] sm:$0xff]   ;;  %v6082_v17 = vld [vmem:[%s6017_s24 + $0x30] sm:$0xff]   ;;  %v477_v27 = vld [vmem:[#allocation6 + $0x2a0] sm:$0xff] }
  0x9f   : > { %1302 = vmatpush1.bf16.msra.mxu0 %v4795_v44  ;;  %1415 = vmatpush1.bf16.msra.mxu1 %v4797_v45  ;;  %v427_v44 = vld [vmem:[#allocation6 + $0x110] sm:$0xff]  ;;  %v404_v0 = vld [vmem:[#allocation6 + $0x58] sm:$0xff]  ;;  %v485_v28 = vld [vmem:[#allocation6 + $0x2e0] sm:$0xff] }
  0xa0   : > { %1303 = vmatprep.subr.bf16.mxu0 %v4780_v46  ;;  %1416 = vmatprep.subr.bf16.mxu1 %v4782_v47  ;;  %v435_v45 = vld [vmem:[#allocation6 + $0x150] sm:$0xff]  ;;  %v428_v46 = vld [vmem:[#allocation6 + $0x118] sm:$0xff]  ;;  %v478_v30 = vld [vmem:[#allocation6 + $0x2a8] sm:$0xff] }
  0xa1   : > { %v436_v47 = vld [vmem:[#allocation6 + $0x158] sm:$0xff]  ;;  %v4784_v50 = vcombine.high %v427_v44, %v435_v45  ;;  %v461_v36 = vld [vmem:[#allocation6 + $0x220] sm:$0xff]  ;;  %v462_v38 = vld [vmem:[#allocation6 + $0x228] sm:$0xff] }
  0xa2   : > { %v4786_v51 = vcombine.high %v428_v46, %v436_v47  ;;  %v4785_v57 = vcombine.low %v428_v46, %v436_v47  ;;  %v6089_v18 = vld [vmem:[%s6017_s24 + $0x38] sm:$0xff]   ;;  %v469_v37 = vld [vmem:[#allocation6 + $0x260] sm:$0xff]  ;;  %v446_v47 = vld [vmem:[#allocation6 + $0x1a8] sm:$0xff] }
  0xa3   : > { %1304 = vmatpush1.bf16.msra.mxu0 %v4779_v52  ;;  %1417 = vmatpush1.bf16.msra.mxu1 %v4781_v53  ;;  %v411_v52 = vld [vmem:[#allocation6 + $0x90] sm:$0xff]  ;;  %v453_v46 = vld [vmem:[#allocation6 + $0x1e0] sm:$0xff] }
  0xa4   : > { %1305 = vmatprep.subr.bf16.mxu0 %v4764_v54  ;;  %1418 = vmatprep.subr.bf16.mxu1 %v4766_v56  ;;  %v419_v53 = vld [vmem:[#allocation6 + $0xd0] sm:$0xff]  ;;  %v412_v54 = vld [vmem:[#allocation6 + $0x98] sm:$0xff]  ;;  %v4783_v56 = vcombine.low %v427_v44, %v435_v45  ;;  %v445_v45 = vld [vmem:[#allocation6 + $0x1a0] sm:$0xff] }
  0xa5   : > { %v4768_v58 = vcombine.high %v411_v52, %v419_v53  ;;  %v4767_v1 = vcombine.low %v411_v52, %v419_v53  ;;  %v4769_v2 = vcombine.low %v412_v54, %v420_v55  ;;  %v429_v53 = vld [vmem:[#allocation6 + $0x120] sm:$0xff] }
  0xa7   : > { %1306 = vmatpush1.bf16.msra.mxu0 %v4763_v60  ;;  %1419 = vmatpush1.bf16.msra.mxu1 %v4765_v61  ;;  %v4770_v60 = vcombine.high %v412_v54, %v420_v55  ;;  %v395_v61 = vld [vmem:[#allocation6 + $0x10] sm:$0xff]  ;;  %v437_v54 = vld [vmem:[#allocation6 + $0x160] sm:$0xff]  ;;  %v430_v55 = vld [vmem:[#allocation6 + $0x128] sm:$0xff] }
  0xa8   : > { %1307 = vmatprep.subr.bf16.mxu0 %v4748_v62  ;;  %1420 = vmatprep.subr.bf16.mxu1 %v4750_v63  ;;  %v403_v62 = vld [vmem:[#allocation6 + $0x50] sm:$0xff]  ;;  %v396_v63 = vld [vmem:[#allocation6 + $0x18] sm:$0xff] }
  0xa9   : > { %v4752_v3 = vcombine.high %v395_v61, %v403_v62  ;;  %v4751_v11 = vcombine.low %v395_v61, %v403_v62  ;;  %v413_v62 = vld [vmem:[#allocation6 + $0xa0] sm:$0xff] }
  0xab   : > { %1308 = vmatpush1.bf16.msra.mxu0 %v4747_v4  ;;  %1421 = vmatpush1.bf16.msra.mxu1 %v4749_v5  ;;  %v4754_v4 = vcombine.high %v396_v63, %v404_v0  ;;  %v509_v5 = vld [vmem:[#allocation6 + $0x3a0] sm:$0xff] }
  0xac   : > { %1519 = vmatprep.subr.bf16.mxu0 %v4864_v6  ;;  %1632 = vmatprep.subr.bf16.mxu1 %v4866_v7  ;;  %v517_v6 = vld [vmem:[#allocation6 + $0x3e0] sm:$0xff]  ;;  %v510_v7 = vld [vmem:[#allocation6 + $0x3a8] sm:$0xff] }
  0xad   : > { %v4868_v13 = vcombine.high %v509_v5, %v517_v6  ;;  %v4867_v21 = vcombine.low %v509_v5, %v517_v6  ;;  %v397_v6 = vld [vmem:[#allocation6 + $0x20] sm:$0xff] }
  0xae   : > { %1326 = vmatmul.mubr.bf16.vlgmr.msra.gmra.mxu0 %v6040_v8  ;;  %1439 = vmatmul.mubr.bf16.vlgmr.msra.gmra.mxu1 %v6040_v8 }
  0xaf   : > { %1520 = vmatpush1.bf16.msra.mxu0 %v4863_v12  ;;  %1633 = vmatpush1.bf16.msra.mxu1 %v4865_v15  ;;  %v4753_v12 = vcombine.low %v396_v63, %v404_v0  ;;  %v4870_v15 = vcombine.high %v510_v7, %v518_v10  ;;  %v421_v63 = vld [vmem:[#allocation6 + $0xe0] sm:$0xff]  ;;  %v414_v0 = vld [vmem:[#allocation6 + $0xa8] sm:$0xff] }
  0xb0   : > { %1335 = vmatprep.mubr.bf16.mxu0 %v7349_v9  ;;  %1448 = vmatprep.mubr.bf16.mxu1 %v7349_v9 }
  0xb1   : > { %1521 = vmatprep.subr.bf16.mxu0 %v4848_v16  ;;  %1634 = vmatprep.subr.bf16.mxu1 %v4850_v19  ;;  %v6075_v16 = vld [vmem:[%s6017_s24 + $0x28] sm:$0xff]   ;;  %v493_v19 = vld [vmem:[#allocation6 + $0x320] sm:$0xff] }
  0xb3   : > { %1522 = vmatpush1.bf16.msra.mxu0 %v4847_v22  ;;  %1635 = vmatpush1.bf16.msra.mxu1 %v4849_v23  ;;  %v494_v22 = vld [vmem:[#allocation6 + $0x328] sm:$0xff] }
  0xb4   : > { %1523 = vmatprep.subr.bf16.mxu0 %v4832_v24  ;;  %1636 = vmatprep.subr.bf16.mxu1 %v4834_v25  ;;  %v502_v23 = vld [vmem:[#allocation6 + $0x368] sm:$0xff]  ;;  %v4869_v24 = vcombine.low %v510_v7, %v518_v10  ;;  %v4852_v25 = vcombine.high %v493_v19, %v501_v20  ;;  %v405_v7 = vld [vmem:[#allocation6 + $0x60] sm:$0xff] }
  0xb5   : > { %v4854_v29 = vcombine.high %v494_v22, %v502_v23  ;;  %v398_v10 = vld [vmem:[#allocation6 + $0x28] sm:$0xff] }
  0xb6   : > { %1336 = vmatmul.mubr.bf16.gmra.mxu0 %v6047_v26  ;;  %1449 = vmatmul.mubr.bf16.gmra.mxu1 %v6047_v26 }
  0xb7   : > { %1345 = vmatprep.mubr.bf16.mxu0 %v7349_v9  ;;  %1458 = vmatprep.mubr.bf16.mxu1 %v7349_v9 }
  0xb8   : > { %1524 = vmatpush1.bf16.msra.mxu0 %v4831_v31  ;;  %1637 = vmatpush1.bf16.msra.mxu1 %v4833_v32  ;;  %v486_v31 = vld [vmem:[#allocation6 + $0x2e8] sm:$0xff]  ;;  %v4851_v32 = vcombine.low %v493_v19, %v501_v20  ;;  %v511_v20 = vld [vmem:[#allocation6 + $0x3b0] sm:$0xff] }
  0xb9   : > { %1525 = vmatprep.subr.bf16.mxu0 %v4816_v33  ;;  %1638 = vmatprep.subr.bf16.mxu1 %v4818_v34  ;;  %v4853_v33 = vcombine.low %v494_v22, %v502_v23  ;;  %v4836_v34 = vcombine.high %v477_v27, %v485_v28  ;;  %v4838_v35 = vcombine.high %v478_v30, %v486_v31  ;;  %v512_v22 = vld [vmem:[#allocation6 + $0x3b8] sm:$0xff] }
  0xba   : > { %v520_v23 = vld [vmem:[#allocation6 + $0x3f8] sm:$0xff] }
  0xbc   : > { %1526 = vmatpush1.bf16.msra.mxu0 %v4815_v39  ;;  %1639 = vmatpush1.bf16.msra.mxu1 %v4817_v40  ;;  %v470_v39 = vld [vmem:[#allocation6 + $0x268] sm:$0xff]  ;;  %v4835_v40 = vcombine.low %v477_v27, %v485_v28  ;;  %v4874_v28 = vcombine.high %v512_v22, %v520_v23 }
  0xbd   : > { %1527 = vmatprep.subr.bf16.mxu0 %v4800_v41  ;;  %1640 = vmatprep.subr.bf16.mxu1 %v4802_v43  ;;  %v4837_v41 = vcombine.low %v478_v30, %v486_v31  ;;  %v4820_v43 = vcombine.high %v461_v36, %v469_v37  ;;  %v4822_v44 = vcombine.high %v462_v38, %v470_v39  ;;  %v503_v30 = vld [vmem:[#allocation6 + $0x370] sm:$0xff] }
  0xbe   : > { %1346 = vmatmul.mubr.bf16.gmra.mxu0 %v6054_v42  ;;  %1459 = vmatmul.mubr.bf16.gmra.mxu1 %v6054_v42 }
  0xbf   : > { %1355 = vmatprep.mubr.bf16.mxu0 %v7349_v9  ;;  %1468 = vmatprep.mubr.bf16.mxu1 %v7349_v9 }
  0xc0   : > { %1528 = vmatpush1.bf16.msra.mxu0 %v4799_v48  ;;  %1641 = vmatpush1.bf16.msra.mxu1 %v4801_v49  ;;  %v454_v48 = vld [vmem:[#allocation6 + $0x1e8] sm:$0xff]  ;;  %v4819_v49 = vcombine.low %v461_v36, %v469_v37  ;;  %v479_v36 = vld [vmem:[#allocation6 + $0x2b0] sm:$0xff] }
  0xc1   : > { %1529 = vmatprep.subr.bf16.mxu0 %v4784_v50  ;;  %1642 = vmatprep.subr.bf16.mxu1 %v4786_v51  ;;  %v4821_v50 = vcombine.low %v462_v38, %v470_v39  ;;  %v4804_v51 = vcombine.high %v445_v45, %v453_v46  ;;  %v4806_v52 = vcombine.high %v446_v47, %v454_v48  ;;  %v487_v37 = vld [vmem:[#allocation6 + $0x2f0] sm:$0xff]  ;;  %v480_v39 = vld [vmem:[#allocation6 + $0x2b8] sm:$0xff] }
  0xc4   : > { %1530 = vmatpush1.bf16.msra.mxu0 %v4783_v56  ;;  %1643 = vmatpush1.bf16.msra.mxu1 %v4785_v57  ;;  %v438_v56 = vld [vmem:[#allocation6 + $0x168] sm:$0xff]  ;;  %v4803_v57 = vcombine.low %v445_v45, %v453_v46  ;;  %v463_v46 = vld [vmem:[#allocation6 + $0x230] sm:$0xff] }
  0xc5   : > { %1531 = vmatprep.subr.bf16.mxu0 %v4768_v58  ;;  %1644 = vmatprep.subr.bf16.mxu1 %v4770_v60  ;;  %v4805_v58 = vcombine.low %v446_v47, %v454_v48  ;;  %v4788_v60 = vcombine.high %v429_v53, %v437_v54  ;;  %v4790_v61 = vcombine.high %v430_v55, %v438_v56  ;;  %v471_v47 = vld [vmem:[#allocation6 + $0x270] sm:$0xff]  ;;  %v464_v48 = vld [vmem:[#allocation6 + $0x238] sm:$0xff] }
  0xc6   : > { %1356 = vmatmul.mubr.bf16.gmra.mxu0 %v6061_v59  ;;  %1469 = vmatmul.mubr.bf16.gmra.mxu1 %v6061_v59 }
  0xc7   : > { %1365 = vmatprep.mubr.bf16.mxu0 %v7349_v9  ;;  %1478 = vmatprep.mubr.bf16.mxu1 %v7349_v9 }
  0xc8   : > { %1532 = vmatpush1.bf16.msra.mxu0 %v4767_v1  ;;  %1645 = vmatpush1.bf16.msra.mxu1 %v4769_v2  ;;  %v422_v1 = vld [vmem:[#allocation6 + $0xe8] sm:$0xff]  ;;  %v4787_v2 = vcombine.low %v429_v53, %v437_v54  ;;  %v447_v54 = vld [vmem:[#allocation6 + $0x1b0] sm:$0xff] }
  0xc9   : > { %1533 = vmatprep.subr.bf16.mxu0 %v4752_v3  ;;  %1646 = vmatprep.subr.bf16.mxu1 %v4754_v4  ;;  %v4789_v3 = vcombine.low %v430_v55, %v438_v56  ;;  %v4772_v4 = vcombine.high %v413_v62, %v421_v63  ;;  %v4774_v5 = vcombine.high %v414_v0, %v422_v1  ;;  %v455_v55 = vld [vmem:[#allocation6 + $0x1f0] sm:$0xff]  ;;  %v448_v56 = vld [vmem:[#allocation6 + $0x1b8] sm:$0xff] }
  0xcc   : > { %1534 = vmatpush1.bf16.msra.mxu0 %v4751_v11  ;;  %1647 = vmatpush1.bf16.msra.mxu1 %v4753_v12  ;;  %v406_v11 = vld [vmem:[#allocation6 + $0x68] sm:$0xff]  ;;  %v4771_v12 = vcombine.low %v413_v62, %v421_v63  ;;  %v431_v63 = vld [vmem:[#allocation6 + $0x130] sm:$0xff] }
  0xcd   : > { %1745 = vmatprep.subr.bf16.mxu0 %v4868_v13  ;;  %1858 = vmatprep.subr.bf16.mxu1 %v4870_v15  ;;  %v4773_v13 = vcombine.low %v414_v0, %v422_v1  ;;  %v4756_v15 = vcombine.high %v397_v6, %v405_v7  ;;  %v4758_v19 = vcombine.high %v398_v10, %v406_v11  ;;  %v439_v0 = vld [vmem:[#allocation6 + $0x170] sm:$0xff]  ;;  %v432_v1 = vld [vmem:[#allocation6 + $0x138] sm:$0xff] }
  0xce   : > { %1366 = vmatmul.mubr.bf16.gmra.mxu0 %v6068_v14  ;;  %1479 = vmatmul.mubr.bf16.gmra.mxu1 %v6068_v14 }
  0xcf   : > { %1375 = vmatprep.mubr.bf16.mxu0 %v7349_v9  ;;  %1488 = vmatprep.mubr.bf16.mxu1 %v7349_v9 }
  0xd6   : > { %1376 = vmatmul.mubr.bf16.gmra.mxu0 %v6075_v16  ;;  %1489 = vmatmul.mubr.bf16.gmra.mxu1 %v6075_v16 }
  0xd7   : > { %1385 = vmatprep.mubr.bf16.mxu0 %v7349_v9  ;;  %1498 = vmatprep.mubr.bf16.mxu1 %v7349_v9 }
  0xde   : > { %1386 = vmatmul.mubr.bf16.gmra.mxu0 %v6082_v17  ;;  %1499 = vmatmul.mubr.bf16.gmra.mxu1 %v6082_v17 }
  0xdf   : > { %1395 = vmatprep.mubr.bf16.mxu0 %v7349_v9  ;;  %1508 = vmatprep.mubr.bf16.mxu1 %v7349_v9 }
  0xe6   : > { %1396 = vmatmul.mubr.bf16.gmra.mxu0 %v6089_v18  ;;  %1509 = vmatmul.mubr.bf16.gmra.mxu1 %v6089_v18 }
  0xe7   : > { %1551 = vmatprep.mubr.bf16.mxu0 %v7349_v9  ;;  %1664 = vmatprep.mubr.bf16.mxu1 %v7349_v9 }
  0xee   : > { %1552 = vmatmul.mubr.bf16.vlgmr.msra.gmra.mxu0 %v6040_v8  ;;  %1665 = vmatmul.mubr.bf16.vlgmr.msra.gmra.mxu1 %v6040_v8 }
  0xef   : > { %1746 = vmatpush1.bf16.msra.mxu0 %v4867_v21  ;;  %1859 = vmatpush1.bf16.msra.mxu1 %v4869_v24  ;;  %v519_v21 = vld [vmem:[#allocation6 + $0x3f0] sm:$0xff]  ;;  %v4755_v24 = vcombine.low %v397_v6, %v405_v7 }
  0xf0   : > { %1561 = vmatprep.mubr.bf16.mxu0 %v7349_v9  ;;  %1674 = vmatprep.mubr.bf16.mxu1 %v7349_v9  ;;  %v4872_v27 = vcombine.high %v511_v20, %v519_v21  ;;  %v4871_v31 = vcombine.low %v511_v20, %v519_v21  ;;  %v415_v7 = vld [vmem:[#allocation6 + $0xb0] sm:$0xff] }
  0xf1   : > { %1747 = vmatprep.subr.bf16.mxu0 %v4852_v25  ;;  %1860 = vmatprep.subr.bf16.mxu1 %v4854_v29  ;;  %v4757_v25 = vcombine.low %v398_v10, %v406_v11  ;;  %v495_v29 = vld [vmem:[#allocation6 + $0x330] sm:$0xff]  ;;  %v416_v11 = vld [vmem:[#allocation6 + $0xb8] sm:$0xff] }
  0xf2   : > { %v423_v10 = vld [vmem:[#allocation6 + $0xf0] sm:$0xff] }
  0xf3   : > { %1748 = vmatpush1.bf16.msra.mxu0 %v4851_v32  ;;  %1861 = vmatpush1.bf16.msra.mxu1 %v4853_v33  ;;  %v496_v32 = vld [vmem:[#allocation6 + $0x338] sm:$0xff]  ;;  %v399_v21 = vld [vmem:[#allocation6 + $0x30] sm:$0xff] }
  0xf4   : > { %1749 = vmatprep.subr.bf16.mxu0 %v4836_v34  ;;  %1862 = vmatprep.subr.bf16.mxu1 %v4838_v35  ;;  %v504_v33 = vld [vmem:[#allocation6 + $0x378] sm:$0xff]  ;;  %v4873_v34 = vcombine.low %v512_v22, %v520_v23  ;;  %v4856_v35 = vcombine.high %v495_v29, %v503_v30  ;;  %v407_v22 = vld [vmem:[#allocation6 + $0x70] sm:$0xff] }
  0xf5   : > { %v4858_v38 = vcombine.high %v496_v32, %v504_v33  ;;  %v400_v23 = vld [vmem:[#allocation6 + $0x38] sm:$0xff] }
  0xf6   : > { %1562 = vmatmul.mubr.bf16.gmra.mxu0 %v6047_v26  ;;  %1675 = vmatmul.mubr.bf16.gmra.mxu1 %v6047_v26 }
  0xf7   : > { %1571 = vmatprep.mubr.bf16.mxu0 %v7349_v9  ;;  %1684 = vmatprep.mubr.bf16.mxu1 %v7349_v9 }
  0xf8   : > { %1750 = vmatpush1.bf16.msra.mxu0 %v4835_v40  ;;  %1863 = vmatpush1.bf16.msra.mxu1 %v4837_v41  ;;  %v488_v40 = vld [vmem:[#allocation6 + $0x2f8] sm:$0xff]  ;;  %v4855_v41 = vcombine.low %v495_v29, %v503_v30  ;;  %v4759_v30 = vcombine.low %v399_v21, %v407_v22 }
  0xf9   : > { %1751 = vmatprep.subr.bf16.mxu0 %v4820_v43  ;;  %1864 = vmatprep.subr.bf16.mxu1 %v4822_v44  ;;  %v4857_v43 = vcombine.low %v496_v32, %v504_v33  ;;  %v4840_v44 = vcombine.high %v479_v36, %v487_v37  ;;  %v4842_v45 = vcombine.high %v480_v39, %v488_v40  ;;  %v525_v32 = vlaneseq }
  0xfb   : > { %v6155_v33 = vshrl.u32 %v525_v32, 7 }
  0xfc   : > { %1752 = vmatpush1.bf16.msra.mxu0 %v4819_v49  ;;  %1865 = vmatpush1.bf16.msra.mxu1 %v4821_v50  ;;  %v472_v49 = vld [vmem:[#allocation6 + $0x278] sm:$0xff]  ;;  %v4839_v50 = vcombine.low %v479_v36, %v487_v37 }
  0xfd   : > { %1753 = vmatprep.subr.bf16.mxu0 %v4804_v51  ;;  %1866 = vmatprep.subr.bf16.mxu1 %v4806_v52  ;;  %v4841_v51 = vcombine.low %v480_v39, %v488_v40  ;;  %v4824_v52 = vcombine.high %v463_v46, %v471_v47  ;;  %v4826_v53 = vcombine.high %v464_v48, %v472_v49  ;;  %v6167_v36 = vsub.s32 2, %v6155_v33 }
  0xfe   : > { %1572 = vmatmul.mubr.bf16.gmra.mxu0 %v6054_v42  ;;  %1685 = vmatmul.mubr.bf16.gmra.mxu1 %v6054_v42  ;;  %7420 = vst [vmem:[#allocation22_spill] sm:$0xff] %v6155_v33  ;;  %v6170_v37 = vsub.s32 1, %v6155_v33 }
  0xff   : > { %1581 = vmatprep.mubr.bf16.mxu0 %v7349_v9  ;;  %1694 = vmatprep.mubr.bf16.mxu1 %v7349_v9  ;;  %7422 = vst [vmem:[#allocation24_spill] sm:$0xff] %v6167_v36 }
 0x100   : > { %1754 = vmatpush1.bf16.msra.mxu0 %v4803_v57  ;;  %1867 = vmatpush1.bf16.msra.mxu1 %v4805_v58  ;;  %v456_v57 = vld [vmem:[#allocation6 + $0x1f8] sm:$0xff]  ;;  %v4823_v58 = vcombine.low %v463_v46, %v471_v47  ;;  %7423 = vst [vmem:[#allocation25_spill] sm:$0xff] %v6170_v37 }
 0x101   : > { %1755 = vmatprep.subr.bf16.mxu0 %v4788_v60  ;;  %1868 = vmatprep.subr.bf16.mxu1 %v4790_v61  ;;  %v4825_v60 = vcombine.low %v464_v48, %v472_v49  ;;  %v4808_v61 = vcombine.high %v447_v54, %v455_v55  ;;  %v4810_v62 = vcombine.high %v448_v56, %v456_v57 }
 0x104   : > { %1756 = vmatpush1.bf16.msra.mxu0 %v4787_v2  ;;  %1869 = vmatpush1.bf16.msra.mxu1 %v4789_v3  ;;  %v440_v2 = vld [vmem:[#allocation6 + $0x178] sm:$0xff]  ;;  %v4807_v3 = vcombine.low %v447_v54, %v455_v55 }
 0x105   : > { %1757 = vmatprep.subr.bf16.mxu0 %v4772_v4  ;;  %1870 = vmatprep.subr.bf16.mxu1 %v4774_v5  ;;  %v4809_v4 = vcombine.low %v448_v56, %v456_v57  ;;  %v4792_v5 = vcombine.high %v431_v63, %v439_v0  ;;  %v4794_v6 = vcombine.high %v432_v1, %v440_v2 }
 0x106   : > { %1582 = vmatmul.mubr.bf16.gmra.mxu0 %v6061_v59  ;;  %1695 = vmatmul.mubr.bf16.gmra.mxu1 %v6061_v59 }
 0x107   : > { %1591 = vmatprep.mubr.bf16.mxu0 %v7349_v9  ;;  %1704 = vmatprep.mubr.bf16.mxu1 %v7349_v9 }
 0x108   : > { %1758 = vmatpush1.bf16.msra.mxu0 %v4771_v12  ;;  %1871 = vmatpush1.bf16.msra.mxu1 %v4773_v13  ;;  %v424_v12 = vld [vmem:[#allocation6 + $0xf8] sm:$0xff]  ;;  %v4791_v13 = vcombine.low %v431_v63, %v439_v0 }
 0x109   : > { %1759 = vmatprep.subr.bf16.mxu0 %v4756_v15  ;;  %1872 = vmatprep.subr.bf16.mxu1 %v4758_v19  ;;  %v4793_v15 = vcombine.low %v432_v1, %v440_v2  ;;  %v4776_v19 = vcombine.high %v415_v7, %v423_v10  ;;  %v4778_v20 = vcombine.high %v416_v11, %v424_v12 }
 0x10c   : > { %1760 = vmatpush1.bf16.msra.mxu0 %v4755_v24  ;;  %1873 = vmatpush1.bf16.msra.mxu1 %v4757_v25  ;;  %v408_v24 = vld [vmem:[#allocation6 + $0x78] sm:$0xff]  ;;  %v4775_v25 = vcombine.low %v415_v7, %v423_v10 }
 0x10d   : > { %1971 = vmatprep.subr.bf16.mxu0 %v4872_v27  ;;  %2084 = vmatprep.subr.bf16.mxu1 %v4874_v28  ;;  %v4777_v27 = vcombine.low %v416_v11, %v424_v12  ;;  %v4760_v28 = vcombine.high %v399_v21, %v407_v22  ;;  %v4762_v29 = vcombine.high %v400_v23, %v408_v24 }
 0x10e   : > { %1592 = vmatmul.mubr.bf16.gmra.mxu0 %v6068_v14  ;;  %1705 = vmatmul.mubr.bf16.gmra.mxu1 %v6068_v14 }
 0x10f   : > { %1601 = vmatprep.mubr.bf16.mxu0 %v7349_v9  ;;  %1714 = vmatprep.mubr.bf16.mxu1 %v7349_v9 }
 0x116   : > { %1602 = vmatmul.mubr.bf16.gmra.mxu0 %v6075_v16  ;;  %1715 = vmatmul.mubr.bf16.gmra.mxu1 %v6075_v16 }
 0x117   : > { %1611 = vmatprep.mubr.bf16.mxu0 %v7349_v9  ;;  %1724 = vmatprep.mubr.bf16.mxu1 %v7349_v9 }
 0x11e   : > { %1612 = vmatmul.mubr.bf16.gmra.mxu0 %v6082_v17  ;;  %1725 = vmatmul.mubr.bf16.gmra.mxu1 %v6082_v17 }
 0x11f   : > { %1621 = vmatprep.mubr.bf16.mxu0 %v7349_v9  ;;  %1734 = vmatprep.mubr.bf16.mxu1 %v7349_v9 }
 0x126   : > { %1622 = vmatmul.mubr.bf16.gmra.mxu0 %v6089_v18  ;;  %1735 = vmatmul.mubr.bf16.gmra.mxu1 %v6089_v18 }
 0x127   : > { %1777 = vmatprep.mubr.bf16.mxu0 %v7349_v9  ;;  %1890 = vmatprep.mubr.bf16.mxu1 %v7349_v9 }
 0x12e   : > { %1778 = vmatmul.mubr.bf16.vlgmr.msra.gmra.mxu0 %v6040_v8  ;;  %1891 = vmatmul.mubr.bf16.vlgmr.msra.gmra.mxu1 %v6040_v8 }
 0x12f   : > { %1972 = vmatpush1.bf16.msra.mxu0 %v4871_v31  ;;  %2085 = vmatpush1.bf16.msra.mxu1 %v4873_v34  ;;  %v4761_v31 = vcombine.low %v400_v23, %v408_v24  ;;  %v6162_v34 = vsub.s32 0, %v6155_v33 }
 0x130   : > { %1787 = vmatprep.mubr.bf16.mxu0 %v7349_v9  ;;  %1900 = vmatprep.mubr.bf16.mxu1 %v7349_v9 }
 0x131   : > { %1973 = vmatprep.subr.bf16.mxu0 %v4856_v35  ;;  %2086 = vmatprep.subr.bf16.mxu1 %v4858_v38  ;;  %7421 = vst [vmem:[#allocation23_spill] sm:$0xff] %v6162_v34  ;;  %v6164_v35 = vld [vmem:[#allocation8] sm:$0xff]  ;;  %v6173_v38 = vsub.s32 3, %v6155_v33 }
 0x132   : > { %v6177_v39 = vrot.slane %v6164_v35, %v6162_v34 }
 0x133   : > { %1974 = vmatpush1.bf16.msra.mxu0 %v4855_v41  ;;  %2087 = vmatpush1.bf16.msra.mxu1 %v4857_v43  ;;  %7424 = vst [vmem:[#allocation26_spill] sm:$0xff] %v6173_v38  ;;  %v6181_v41 = vrot.slane %v6164_v35, %v6167_v36  ;;  %v6192_v46 = vrot.slane %v6164_v35, %v6173_v38 }
 0x134   : > { %1975 = vmatprep.subr.bf16.mxu0 %v4840_v44  ;;  %2088 = vmatprep.subr.bf16.mxu1 %v4842_v45  ;;  %v6187_v44 = vrot.slane %v6164_v35, %v6170_v37 }
 0x136   : > { %1788 = vmatmul.mubr.bf16.gmra.mxu0 %v6047_v26  ;;  %1901 = vmatmul.mubr.bf16.gmra.mxu1 %v6047_v26 }
 0x137   : > { %1797 = vmatprep.mubr.bf16.mxu0 %v7349_v9  ;;  %1910 = vmatprep.mubr.bf16.mxu1 %v7349_v9 }
 0x138   : > { %1976 = vmatpush1.bf16.msra.mxu0 %v4839_v50  ;;  %2089 = vmatpush1.bf16.msra.mxu1 %v4841_v51 }
 0x139   : > { %1977 = vmatprep.subr.bf16.mxu0 %v4824_v52  ;;  %2090 = vmatprep.subr.bf16.mxu1 %v4826_v53 }
 0x13c   : > { %1978 = vmatpush1.bf16.msra.mxu0 %v4823_v58  ;;  %2091 = vmatpush1.bf16.msra.mxu1 %v4825_v60 }
 0x13d   : > { %1979 = vmatprep.subr.bf16.mxu0 %v4808_v61  ;;  %2092 = vmatprep.subr.bf16.mxu1 %v4810_v62 }
 0x13e   : > { %1798 = vmatmul.mubr.bf16.gmra.mxu0 %v6054_v42  ;;  %1911 = vmatmul.mubr.bf16.gmra.mxu1 %v6054_v42 }
 0x13f   : > { %1807 = vmatprep.mubr.bf16.mxu0 %v7349_v9  ;;  %1920 = vmatprep.mubr.bf16.mxu1 %v7349_v9 }
 0x140   : > { %1980 = vmatpush1.bf16.msra.mxu0 %v4807_v3  ;;  %2093 = vmatpush1.bf16.msra.mxu1 %v4809_v4 }
 0x141   : > { %1981 = vmatprep.subr.bf16.mxu0 %v4792_v5  ;;  %2094 = vmatprep.subr.bf16.mxu1 %v4794_v6 }
 0x144   : > { %1982 = vmatpush1.bf16.msra.mxu0 %v4791_v13  ;;  %2095 = vmatpush1.bf16.msra.mxu1 %v4793_v15 }
 0x145   : > { %1983 = vmatprep.subr.bf16.mxu0 %v4776_v19  ;;  %2096 = vmatprep.subr.bf16.mxu1 %v4778_v20 }
 0x146   : > { %1808 = vmatmul.mubr.bf16.gmra.mxu0 %v6061_v59  ;;  %1921 = vmatmul.mubr.bf16.gmra.mxu1 %v6061_v59 }
 0x147   : > { %1817 = vmatprep.mubr.bf16.mxu0 %v7349_v9  ;;  %1930 = vmatprep.mubr.bf16.mxu1 %v7349_v9 }
 0x148   : > { %1984 = vmatpush1.bf16.msra.mxu0 %v4775_v25  ;;  %2097 = vmatpush1.bf16.msra.mxu1 %v4777_v27 }
 0x149   : > { %1985 = vmatprep.subr.bf16.mxu0 %v4760_v28  ;;  %2098 = vmatprep.subr.bf16.mxu1 %v4762_v29 }
 0x14c   : > { %1986 = vmatpush1.bf16.msra.mxu0 %v4759_v30  ;;  %2099 = vmatpush1.bf16.msra.mxu1 %v4761_v31 }
 0x14e   : > { %1818 = vmatmul.mubr.bf16.gmra.mxu0 %v6068_v14  ;;  %1931 = vmatmul.mubr.bf16.gmra.mxu1 %v6068_v14 }
 0x14f   : > { %1827 = vmatprep.mubr.bf16.mxu0 %v7349_v9  ;;  %1940 = vmatprep.mubr.bf16.mxu1 %v7349_v9 }
 0x156   : > { %1828 = vmatmul.mubr.bf16.gmra.mxu0 %v6075_v16  ;;  %1941 = vmatmul.mubr.bf16.gmra.mxu1 %v6075_v16 }
 0x157   : > { %1837 = vmatprep.mubr.bf16.mxu0 %v7349_v9  ;;  %1950 = vmatprep.mubr.bf16.mxu1 %v7349_v9 }
 0x15e   : > { %1838 = vmatmul.mubr.bf16.gmra.mxu0 %v6082_v17  ;;  %1951 = vmatmul.mubr.bf16.gmra.mxu1 %v6082_v17 }
 0x15f   : > { %1847 = vmatprep.mubr.bf16.mxu0 %v7349_v9  ;;  %1960 = vmatprep.mubr.bf16.mxu1 %v7349_v9 }
 0x166   : > { %1848 = vmatmul.mubr.bf16.gmra.mxu0 %v6089_v18  ;;  %1961 = vmatmul.mubr.bf16.gmra.mxu1 %v6089_v18 }
 0x167   : > { %2003 = vmatprep.mubr.bf16.mxu0 %v7349_v9  ;;  %2116 = vmatprep.mubr.bf16.mxu1 %v7349_v9 }
 0x16e   : > { %v1327_v40 = vpop.f32.mrf.mxu0  ;;  %2004 = vmatmul.mubr.bf16.vlgmr.msra.gmra.mxu0 %v6040_v8  ;;  %v1440_v43 = vpop.f32.mrf.mxu1  ;;  %2117 = vmatmul.mubr.bf16.vlgmr.msra.gmra.mxu1 %v6040_v8 }
 0x16f   : > { %2013 = vmatprep.mubr.bf16.mxu0 %v7349_v9  ;;  %2126 = vmatprep.mubr.bf16.mxu1 %v7349_v9  ;;  %v1328_v47 = vadd.f32 %v1327_v40, %v6177_v39  ;;  %v1441_v49 = vadd.f32 %v1440_v43, %v6181_v41 }
 0x170   : > { %v1329_v45 = vpop.f32.mrf.mxu0  ;;  %v1442_v48 = vpop.f32.mrf.mxu1 }
 0x171   : > { %v1330_v8 = vadd.f32 %v1329_v45, %v6187_v44  ;;  %v1443_v53 = vadd.f32 %v1442_v48, %v6192_v46  ;;  %v2197_v56 = vmax.f32 %v1328_v47, 0.0  ;;  %v2199_v61 = vmax.f32 %v1441_v49, 0.0 }
 0x172   : > { %v1331_v50 = vpop.f32.mrf.mxu0  ;;  %v1444_v52 = vpop.f32.mrf.mxu1 }
 0x173   : > { %v1332_v51 = vadd.f32 %v1331_v50, %v6177_v39  ;;  %v1445_v54 = vadd.f32 %v1444_v52, %v6181_v41  ;;  %v2198_v1 = vmax.f32 %v1330_v8, 0.0  ;;  %v2200_v5 = vmax.f32 %v1443_v53, 0.0 }
 0x174   : > { %v1333_v55 = vpop.f32.mrf.mxu0  ;;  %v1446_v60 = vpop.f32.mrf.mxu1 }
 0x175   : > { %v2213_v57 = vmax.f32 %v1332_v51, 0.0  ;;  %v1334_v58 = vadd.f32 %v1333_v55, %v6187_v44  ;;  %v2215_v62 = vmax.f32 %v1445_v54, 0.0  ;;  %v1447_v63 = vadd.f32 %v1446_v60, %v6192_v46 }
 0x176   : > { %v1337_v0 = vpop.f32.mrf.mxu0  ;;  %2014 = vmatmul.mubr.bf16.gmra.mxu0 %v6047_v26  ;;  %v1450_v4 = vpop.f32.mrf.mxu1  ;;  %2127 = vmatmul.mubr.bf16.gmra.mxu1 %v6047_v26 }
 0x177   : > { %v6204_v2 = vpack.c.bf16 %v2213_v57, %v2197_v56  ;;  %v2214_v3 = vmax.f32 %v1334_v58, 0.0  ;;  %2023 = vmatprep.mubr.bf16.mxu0 %v7349_v9  ;;  %v6208_v6 = vpack.c.bf16 %v2215_v62, %v2199_v61  ;;  %v2216_v7 = vmax.f32 %v1447_v63, 0.0  ;;  %2136 = vmatprep.mubr.bf16.mxu1 %v7349_v9 }
 0x178   : > { %v1339_v10 = vpop.f32.mrf.mxu0  ;;  %v1338_v11 = vadd.f32 %v1337_v0, %v6177_v39  ;;  %v1452_v12 = vpop.f32.mrf.mxu1  ;;  %v1451_v15 = vadd.f32 %v1450_v4, %v6181_v41 }
 0x179   : > { %7425 = vst [vmem:[#allocation27_spill] sm:$0xff] %v6204_v2  ;;  %7426 = vst [vmem:[#allocation28_spill] sm:$0xff] %v6208_v6  ;;  %v6212_v13 = vpack.c.bf16 %v2214_v3, %v2198_v1  ;;  %v6215_v20 = vpack.c.bf16 %v2216_v7, %v2200_v5  ;;  %v1340_v26 = vadd.f32 %v1339_v10, %v6187_v44 }
 0x17a   : > { %v1341_v19 = vpop.f32.mrf.mxu0  ;;  %v1454_v22 = vpop.f32.mrf.mxu1  ;;  %v1453_v23 = vadd.f32 %v1452_v12, %v6192_v46  ;;  %v2229_v27 = vmax.f32 %v1338_v11, 0.0  ;;  %v2231_v31 = vmax.f32 %v1451_v15, 0.0 }
 0x17b   : > { %7427 = vst [vmem:[#allocation29_spill] sm:$0xff] %v6212_v13  ;;  %7428 = vst [vmem:[#allocation30_spill] sm:$0xff] %v6215_v20  ;;  %v1342_v21 = vadd.f32 %v1341_v19, %v6177_v39  ;;  %v1455_v24 = vadd.f32 %v1454_v22, %v6181_v41  ;;  %v2230_v45 = vmax.f32 %v1340_v26, 0.0 }
 0x17c   : > { %v1343_v25 = vpop.f32.mrf.mxu0  ;;  %v1456_v30 = vpop.f32.mrf.mxu1  ;;  %v2232_v50 = vmax.f32 %v1453_v23, 0.0  ;;  %v6267_v23 = vsub.s32 6, %v6155_v33 }
 0x17d   : > { %v2245_v28 = vmax.f32 %v1342_v21, 0.0  ;;  %v1344_v29 = vadd.f32 %v1343_v25, %v6187_v44  ;;  %v2247_v32 = vmax.f32 %v1455_v24, 0.0  ;;  %v1457_v40 = vadd.f32 %v1456_v30, %v6192_v46 }
 0x17e   : > { %v6223_v43 = vpop.f32.mrf.mxu0  ;;  %2024 = vmatmul.mubr.bf16.gmra.mxu0 %v6054_v42  ;;  %v6228_v49 = vpop.f32.mrf.mxu1  ;;  %2137 = vmatmul.mubr.bf16.gmra.mxu1 %v6054_v42  ;;  %7434 = vst [vmem:[#allocation36_spill] sm:$0xff] %v6267_v23  ;;  %v6270_v24 = vsub.s32 5, %v6155_v33 }
 0x17f   : > { %v6226_v47 = vpack.c.bf16 %v2245_v28, %v2229_v27  ;;  %v2246_v48 = vmax.f32 %v1344_v29, 0.0  ;;  %2033 = vmatprep.mubr.bf16.mxu0 %v7349_v9  ;;  %v6232_v8 = vpack.c.bf16 %v2247_v32, %v2231_v31  ;;  %v2248_v51 = vmax.f32 %v1457_v40, 0.0  ;;  %2146 = vmatprep.mubr.bf16.mxu1 %v7349_v9 }
 0x180   : > { %v1349_v52 = vpop.f32.mrf.mxu0  ;;  %v1462_v53 = vpop.f32.mrf.mxu1  ;;  %7435 = vst [vmem:[#allocation37_spill] sm:$0xff] %v6270_v24  ;;  %v6273_v27 = vsub.s32 7, %v6155_v33  ;;  %v6287_v40 = vrot.slane %v6164_v35, %v6267_v23 }
 0x181   : > { %7429 = vst [vmem:[#allocation31_spill] sm:$0xff] %v6226_v47  ;;  %7430 = vst [vmem:[#allocation32_spill] sm:$0xff] %v6232_v8  ;;  %v6235_v54 = vpack.c.bf16 %v2246_v48, %v2230_v45  ;;  %v6237_v56 = vpack.c.bf16 %v2248_v51, %v2232_v50  ;;  %v6291_v45 = vrot.slane %v6164_v35, %v6270_v24 }
 0x182   : > { %v1351_v55 = vpop.f32.mrf.mxu0  ;;  %v6239_v57 = vpop.f32.mrf.mxu1  ;;  %7436 = vst [vmem:[#allocation38_spill] sm:$0xff] %v6273_v27 }
 0x183   : > { %7431 = vst [vmem:[#allocation33_spill] sm:$0xff] %v6235_v54  ;;  %7432 = vst [vmem:[#allocation34_spill] sm:$0xff] %v6237_v56 }
 0x184   : > { %v1353_v58 = vpop.f32.mrf.mxu0  ;;  %v1466_v60 = vpop.f32.mrf.mxu1 }
 0x185   : > { %v6280_v30 = vadd.f32 %v1353_v58, %v6187_v44  ;;  %v6283_v31 = vadd.f32 %v1466_v60, %v6192_v46  ;;  %v6304_v60 = vrot.slane %v6164_v35, %v6273_v27  ;;  %v6326_v27 = vadd.f32 %v1351_v55, %v6177_v39 }
 0x186   : > { %v1357_v42 = vpop.f32.mrf.mxu0  ;;  %2034 = vmatmul.mubr.bf16.gmra.mxu0 %v6061_v59  ;;  %v6242_v61 = vpop.f32.mrf.mxu1  ;;  %2147 = vmatmul.mubr.bf16.gmra.mxu1 %v6061_v59 }
 0x187   : > { %2043 = vmatprep.mubr.bf16.mxu0 %v7349_v9  ;;  %2156 = vmatprep.mubr.bf16.mxu1 %v7349_v9  ;;  %7437 = vst [vmem:[#allocation39_spill] sm:$0xff] %v6280_v30  ;;  %7438 = vst [vmem:[#allocation40_spill] sm:$0xff] %v6283_v31  ;;  %v6294_v48 = vadd.f32 %v1357_v42, %v6177_v39 }
 0x188   : > { %v1359_v62 = vpop.f32.mrf.mxu0  ;;  %v1472_v63 = vpop.f32.mrf.mxu1  ;;  %7443 = vst [vmem:[#allocation45_spill] sm:$0xff] %v6326_v27 }
 0x189   : > { %7439 = vst [vmem:[#allocation41_spill] sm:$0xff] %v6294_v48  ;;  %v6297_v50 = vadd.f32 %v1359_v62, %v6187_v44  ;;  %v6300_v51 = vadd.f32 %v1472_v63, %v6192_v46 }
 0x18a   : > { %v1361_v0 = vpop.f32.mrf.mxu0  ;;  %v1474_v1 = vpop.f32.mrf.mxu1 }
 0x18b   : > { %v6314_v42 = vadd.f32 %v1361_v0, %v6177_v39  ;;  %v6317_v62 = vadd.f32 %v1474_v1, %v6181_v41  ;;  %v7444_v0 = vmov 0   ;;  %v6335_v1 = vadd.f32 %v6239_v57, %v6181_v41 }
 0x18c   : > { %v1363_v3 = vpop.f32.mrf.mxu0  ;;  %v1476_v4 = vpop.f32.mrf.mxu1 }
 0x18d   : > { %7441 = vst [vmem:[#allocation43_spill] sm:$0xff] %v6314_v42  ;;  %7442 = vst [vmem:[#allocation44_spill] sm:$0xff] %v6317_v62  ;;  %v6340_v23 = vadd.f32 %v1476_v4, %v6192_v46 }
 0x18e   : > { %v1367_v5 = vpop.f32.mrf.mxu0  ;;  %2044 = vmatmul.mubr.bf16.gmra.mxu0 %v6068_v14  ;;  %v6248_v7 = vpop.f32.mrf.mxu1  ;;  %2157 = vmatmul.mubr.bf16.gmra.mxu1 %v6068_v14  ;;  %v6263_v14 = vsub.s32 4, %v6155_v33  ;;  %v6311_v33 = vadd.f32 %v1349_v52, %v6187_v44  ;;  %7445 = vst [vmem:[#allocation46_spill] sm:$0xff] %v6335_v1 }
 0x18f   : > { %2053 = vmatprep.mubr.bf16.mxu0 %v7349_v9  ;;  %2166 = vmatprep.mubr.bf16.mxu1 %v7349_v9  ;;  %v6353_v4 = vadd.f32 %v1367_v5, %v6177_v39 }
 0x190   : > { %v1369_v59 = vpop.f32.mrf.mxu0  ;;  %v1482_v10 = vpop.f32.mrf.mxu1  ;;  %7433 = vst [vmem:[#allocation35_spill] sm:$0xff] %v6263_v14  ;;  %v6277_v29 = vrot.slane %v6164_v35, %v6263_v14  ;;  %v6323_v35 = vadd.f32 %v1462_v53, %v6192_v46 }
 0x191   : > { %v6356_v37 = vadd.f32 %v1369_v59, %v6187_v44 }
 0x192   : > { %v6253_v11 = vpop.f32.mrf.mxu0  ;;  %v6255_v12 = vpop.f32.mrf.mxu1 }
 0x194   : > { %v1373_v15 = vpop.f32.mrf.mxu0  ;;  %v1486_v19 = vpop.f32.mrf.mxu1 }
 0x195   : > { %v6363_v14 = vadd.f32 %v1373_v15, %v6187_v44  ;;  %v6368_v5 = vadd.f32 %v1486_v19, %v6192_v46 }
 0x196   : > { %v1377_v26 = vpop.f32.mrf.mxu0  ;;  %2054 = vmatmul.mubr.bf16.gmra.mxu0 %v6075_v16  ;;  %v6258_v21 = vpop.f32.mrf.mxu1  ;;  %2167 = vmatmul.mubr.bf16.gmra.mxu1 %v6075_v16 }
 0x197   : > { %2063 = vmatprep.mubr.bf16.mxu0 %v7349_v9  ;;  %2176 = vmatprep.mubr.bf16.mxu1 %v7349_v9  ;;  %v6308_v9 = vadd.f32 %v6223_v43, %v6177_v39  ;;  %v6329_v43 = vadd.f32 %v1363_v3, %v6187_v44  ;;  %v6371_v59 = vadd.f32 %v1377_v26, %v6177_v39 }
 0x198   : > { %v1379_v22 = vpop.f32.mrf.mxu0  ;;  %v1492_v25 = vpop.f32.mrf.mxu1  ;;  %v6409_v20 = vadd.f32 %v6258_v21, %v6181_v41 }
 0x199   : > { %7440 = vst [vmem:[#allocation42_spill] sm:$0xff] %v6308_v9  ;;  %v1380_v34 = vadd.f32 %v1379_v22, %v6187_v44  ;;  %v6379_v15 = vadd.f32 %v1492_v25, %v6192_v46  ;;  %v6391_v22 = vadd.f32 %v6253_v11, %v6177_v39 }
 0x19a   : > { %v1381_v28 = vpop.f32.mrf.mxu0  ;;  %v1494_v16 = vpop.f32.mrf.mxu1 }
 0x19b   : > { %v6385_v53 = vadd.f32 %v1494_v16, %v6181_v41  ;;  %v6400_v16 = vadd.f32 %v6255_v12, %v6181_v41 }
 0x19c   : > { %v1383_v32 = vpop.f32.mrf.mxu0  ;;  %v1496_v58 = vpop.f32.mrf.mxu1 }
 0x19d   : > { %v1384_v57 = vadd.f32 %v1383_v32, %v6187_v44  ;;  %v6382_v32 = vadd.f32 %v1381_v28, %v6177_v39  ;;  %v2358_v28 = vmax.f32 %v1380_v34, 0.0 }
 0x19e   : > { %v6319_v63 = vpop.f32.mrf.mxu0  ;;  %2064 = vmatmul.mubr.bf16.gmra.mxu0 %v6082_v17  ;;  %v1500_v52 = vpop.f32.mrf.mxu1  ;;  %2177 = vmatmul.mubr.bf16.gmra.mxu1 %v6082_v17  ;;  %v6346_v17 = vadd.f32 %v6242_v61, %v6181_v41  ;;  %v6360_v61 = vadd.f32 %v1482_v10, %v6192_v46  ;;  %v6376_v10 = vadd.f32 %v6248_v7, %v6181_v41 }
 0x19f   : > { %2073 = vmatprep.mubr.bf16.mxu0 %v7444_v0  ;;  %2186 = vmatprep.mubr.bf16.mxu1 %v7444_v0  ;;  %v6394_v7 = vadd.f32 %v1496_v58, %v6192_v46  ;;  %v2374_v2 = vmax.f32 %v1384_v57, 0.0  ;;  %v6419_v58 = vadd.f32 %v6319_v63, %v6177_v39  ;;  %v6422_v34 = vadd.f32 %v1500_v52, %v6181_v41 }
 0x1a0   : > { %v1389_v55 = vpop.f32.mrf.mxu0  ;;  %v1502_v38 = vpop.f32.mrf.mxu1 }
 0x1a1   : > { %v1390_v26 = vadd.f32 %v1389_v55, %v6187_v44  ;;  %v1503_v21 = vadd.f32 %v1502_v38, %v6192_v46  ;;  %v6428_v47 = vpack.c.bf16 %v2374_v2, %v2358_v28 }
 0x1a2   : > { %v1391_v3 = vpop.f32.mrf.mxu0  ;;  %v1504_v24 = vpop.f32.mrf.mxu1 }
 0x1a3   : > { %v2390_v38 = vmax.f32 %v1390_v26, 0.0  ;;  %v1392_v31 = vadd.f32 %v1391_v3, %v6177_v39  ;;  %v2392_v9 = vmax.f32 %v1503_v21, 0.0  ;;  %v1505_v2 = vadd.f32 %v1504_v24, %v6181_v41 }
 0x1a4   : > { %v1393_v36 = vpop.f32.mrf.mxu0  ;;  %v1506_v19 = vpop.f32.mrf.mxu1 }
 0x1a5   : > { %v1394_v12 = vadd.f32 %v1393_v36, %v6187_v44  ;;  %v1507_v11 = vadd.f32 %v1506_v19, %v6192_v46  ;;  %v2405_v48 = vmax.f32 %v1392_v31, 0.0  ;;  %v2389_v31 = vmax.f32 %v6419_v58, 0.0 }
 0x1a6   : > { %v1397_v25 = vpop.f32.mrf.mxu0  ;;  %2074 = vmatmul.mubr.bf16.gmra.mxu0 %v6089_v18  ;;  %v1510_v6 = vpop.f32.mrf.mxu1  ;;  %2187 = vmatmul.mubr.bf16.gmra.mxu1 %v6089_v18 }
 0x1a7   : > { %2615 = vmatprep.mubr.bf16.mxu0 %v7444_v0  ;;  %2656 = vmatprep.mubr.bf16.mxu1 %v7444_v0  ;;  %v1398_v63 = vadd.f32 %v1397_v25, %v6177_v39  ;;  %v1511_v36 = vadd.f32 %v1510_v6, %v6181_v41  ;;  %v2406_v30 = vmax.f32 %v1394_v12, 0.0  ;;  %v2408_v26 = vmax.f32 %v1507_v11, 0.0 }
 0x1a8   : > { %v1399_v13 = vpop.f32.mrf.mxu0  ;;  %v1512_v8 = vpop.f32.mrf.mxu1 }
 0x1a9   : > { %v1400_v57 = vadd.f32 %v1399_v13, %v6187_v44  ;;  %v1513_v56 = vadd.f32 %v1512_v8, %v6192_v46  ;;  %v2421_v42 = vmax.f32 %v1398_v63, 0.0  ;;  %v2552_v63 = vpack.c.bf16 %v2406_v30, %v2390_v38 }
 0x1aa   : > { %v1401_v0 = vpop.f32.mrf.mxu0  ;;  %v1514_v55 = vpop.f32.mrf.mxu1  ;;  %v2551_v30 = vpack.c.bf16 %v2405_v48, %v2389_v31  ;;  %v7448_v48 = vmax.f32 %v6379_v15, 0.0  ;;  %v7452_v15 = vmax.f32 %v6382_v32, 0.0 }
 0x1ab   : > { %v1402_v18 = vadd.f32 %v1401_v0, %v6177_v39  ;;  %v1515_v52 = vadd.f32 %v1514_v55, %v6181_v41  ;;  %v2422_v8 = vmax.f32 %v1400_v57, 0.0  ;;  %v2424_v39 = vmax.f32 %v1513_v56, 0.0 }
 0x1ac   : > { %v1403_v54 = vpop.f32.mrf.mxu0  ;;  %v1516_v0 = vpop.f32.mrf.mxu1 }
 0x1ad   : > { %v1404_v13 = vadd.f32 %v1403_v54, %v6187_v44  ;;  %v2437_v28 = vmax.f32 %v1402_v18, 0.0  ;;  %v1517_v19 = vadd.f32 %v1516_v0, %v6192_v46  ;;  %v2439_v62 = vmax.f32 %v1515_v52, 0.0 }
 0x1ae   : > { %v1553_v25 = vpop.f32.mrf.mxu0  ;;  %v1666_v1 = vpop.f32.mrf.mxu1  ;;  %v2423_v44 = vmax.f32 %v1511_v36, 0.0  ;;  %v2407_v18 = vmax.f32 %v1505_v2, 0.0  ;;  %v2391_v2 = vmax.f32 %v6422_v34, 0.0 }
 0x1af   : > { %v2438_v55 = vmax.f32 %v1404_v13, 0.0  ;;  %v2440_v3 = vmax.f32 %v1517_v19, 0.0  ;;  %v1554_v54 = vadd.f32 %v1553_v25, %v6277_v29  ;;  %v2567_v27 = vpack.c.bf16 %v2437_v28, %v2421_v42 }
 0x1b0   : > { %v1555_v6 = vpop.f32.mrf.mxu0  ;;  %v1668_v21 = vpop.f32.mrf.mxu1  ;;  %v1667_v46 = vadd.f32 %v1666_v1, %v6287_v40  ;;  %v2569_v52 = vpack.c.bf16 %v2439_v62, %v2423_v44  ;;  %v2554_v1 = vpack.c.bf16 %v2408_v26, %v2392_v9 }
 0x1b1   : > { %v2568_v24 = vpack.c.bf16 %v2438_v55, %v2422_v8  ;;  %v2570_v57 = vpack.c.bf16 %v2440_v3, %v2424_v39  ;;  %v1556_v13 = vadd.f32 %v1555_v6, %v6291_v45  ;;  %v1669_v36 = vadd.f32 %v1668_v21, %v6304_v60 }
 0x1b2   : > { %v1557_v12 = vpop.f32.mrf.mxu0  ;;  %v1670_v56 = vpop.f32.mrf.mxu1  ;;  %v2201_v62 = vmax.f32 %v1554_v54, 0.0  ;;  %v2203_v38 = vmax.f32 %v1667_v46, 0.0  ;;  %v2553_v39 = vpack.c.bf16 %v2407_v18, %v2391_v2  ;;  %v7449_v21 = vmax.f32 %v6394_v7, 0.0 }
 0x1b3   : > { %v1558_v11 = vadd.f32 %v1557_v12, %v6277_v29  ;;  %2583 = vmatprep.subr.bf16.mxu0 %v2568_v24  ;;  %v1671_v0 = vadd.f32 %v1670_v56, %v6287_v40  ;;  %2624 = vmatprep.subr.bf16.mxu1 %v2570_v57  ;;  %v2202_v3 = vmax.f32 %v1556_v13, 0.0  ;;  %v2204_v26 = vmax.f32 %v1669_v36, 0.0 }
 0x1b4   : > { %v1559_v42 = vpop.f32.mrf.mxu0  ;;  %2584 = vmatpush1.bf16.msra.mxu0 %v2567_v27  ;;  %v1672_v25 = vpop.f32.mrf.mxu1  ;;  %2625 = vmatpush1.bf16.msra.mxu1 %v2569_v52  ;;  %v2538_v24 = vpack.c.bf16 %v7449_v21, %v7448_v48  ;;  %v2341_v46 = vmax.f32 %v6391_v22, 0.0  ;;  %v2359_v18 = vmax.f32 %v6409_v20, 0.0  ;;  %v2343_v13 = vmax.f32 %v6400_v16, 0.0 }
 0x1b5   : > { %v2217_v28 = vmax.f32 %v1558_v11, 0.0  ;;  %v1560_v19 = vadd.f32 %v1559_v42, %v6291_v45  ;;  %2585 = vmatprep.subr.bf16.mxu0 %v2552_v63  ;;  %v2219_v58 = vmax.f32 %v1671_v0, 0.0  ;;  %v1673_v8 = vadd.f32 %v1672_v25, %v6304_v60  ;;  %2626 = vmatprep.subr.bf16.mxu1 %v2554_v1 }
 0x1b6   : > { %v1563_v55 = vpop.f32.mrf.mxu0  ;;  %v1676_v34 = vpop.f32.mrf.mxu1  ;;  %v7451_v11 = vmax.f32 %v6371_v59, 0.0  ;;  %v7454_v63 = vmax.f32 %v6385_v53, 0.0  ;;  %v7455_v16 = vmax.f32 %v6356_v37, 0.0  ;;  %v7456_v59 = vmax.f32 %v6363_v14, 0.0 }
 0x1b7   : > { %v6449_v27 = vpack.c.bf16 %v2217_v28, %v2201_v62  ;;  %v2218_v9 = vmax.f32 %v1560_v19, 0.0  ;;  %v6451_v6 = vpack.c.bf16 %v2219_v58, %v2203_v38  ;;  %v2220_v44 = vmax.f32 %v1673_v8, 0.0 }
 0x1b8   : > { %v1565_v54 = vpop.f32.mrf.mxu0  ;;  %2586 = vmatpush1.bf16.msra.mxu0 %v2551_v30  ;;  %v1564_v57 = vadd.f32 %v1563_v55, %v6277_v29  ;;  %v1678_v52 = vpop.f32.mrf.mxu1  ;;  %2627 = vmatpush1.bf16.msra.mxu1 %v2553_v39  ;;  %v2535_v7 = vpack.c.bf16 %v7452_v15, %v7451_v11  ;;  %v1677_v22 = vadd.f32 %v1676_v34, %v6287_v40  ;;  %v7457_v62 = vmax.f32 %v6360_v61, 0.0 }
 0x1b9   : > { %7446 = vst [vmem:[#allocation47_spill] sm:$0xff] %v6449_v27  ;;  %7447 = vst [vmem:[#allocation48_spill] sm:$0xff] %v6451_v6  ;;  %v6459_v12 = vpack.c.bf16 %v2218_v9, %v2202_v3  ;;  %2587 = vmatprep.subr.bf16.mxu0 %v6428_v47  ;;  %v6468_v56 = vpack.c.bf16 %v2220_v44, %v2204_v26  ;;  %2628 = vmatprep.subr.bf16.mxu1 %v2538_v24  ;;  %v7458_v53 = vmax.f32 %v6368_v5, 0.0 }
 0x1ba   : > { %v1567_v20 = vpop.f32.mrf.mxu0  ;;  %v2537_v31 = vpack.c.bf16 %v7454_v63, %v2359_v18  ;;  %v1566_v36 = vadd.f32 %v1565_v54, %v6291_v45  ;;  %v1680_v0 = vpop.f32.mrf.mxu1  ;;  %v2520_v32 = vpack.c.bf16 %v7456_v59, %v7455_v16  ;;  %v1679_v42 = vadd.f32 %v1678_v52, %v6304_v60 }
 0x1bb   : > { %7450 = vst [vmem:[#allocation49_spill] sm:$0xff] %v6459_v12  ;;  %7453 = vst [vmem:[#allocation50_spill] sm:$0xff] %v6468_v56  ;;  %v1568_v47 = vadd.f32 %v1567_v20, %v6277_v29  ;;  %v1681_v1 = vadd.f32 %v1680_v0, %v6287_v40  ;;  %v2522_v28 = vpack.c.bf16 %v7458_v53, %v7457_v62  ;;  %v7459_v19 = vmax.f32 %v6297_v50, 0.0  ;;  %v7470_v20 = vld [vmem:[#allocation43_spill] sm:$0xff]  ;;  %v7479_v62 = vld [vmem:[#allocation40_spill] sm:$0xff] }
 0x1bc   : > { %v1569_v2 = vpop.f32.mrf.mxu0  ;;  %2588 = vmatpush1.bf16.msra.mxu0 %v2535_v7  ;;  %v7460_v25 = vmax.f32 %v6329_v43, 0.0  ;;  %v2327_v37 = vmax.f32 %v6376_v10, 0.0  ;;  %v2233_v14 = vmax.f32 %v1564_v57, 0.0  ;;  %v1682_v8 = vpop.f32.mrf.mxu1  ;;  %2629 = vmatpush1.bf16.msra.mxu1 %v2537_v31  ;;  %v7461_v55 = vmax.f32 %v6353_v4, 0.0  ;;  %v7467_v7 = vld [vmem:[#allocation45_spill] sm:$0xff] }
 0x1bd   : > { %v2249_v38 = vmax.f32 %v1568_v47, 0.0  ;;  %v1570_v58 = vadd.f32 %v1569_v2, %v6291_v45  ;;  %2589 = vmatprep.subr.bf16.mxu0 %v2520_v32  ;;  %v2235_v39 = vmax.f32 %v1677_v22, 0.0  ;;  %v2251_v5 = vmax.f32 %v1681_v1, 0.0  ;;  %2630 = vmatprep.subr.bf16.mxu1 %v2522_v28  ;;  %v7468_v22 = vld [vmem:[#allocation41_spill] sm:$0xff] }
 0x1be   : > { %v2504_v30 = vpack.c.bf16 %v7460_v25, %v7459_v19  ;;  %v2519_v61 = vpack.c.bf16 %v2341_v46, %v7461_v55  ;;  %v1683_v3 = vadd.f32 %v1682_v8, %v6304_v60  ;;  %v6494_v50 = vpop.f32.mrf.mxu0  ;;  %v2521_v43 = vpack.c.bf16 %v2343_v13, %v2327_v37  ;;  %v6498_v26 = vpop.f32.mrf.mxu1  ;;  %v7481_v55 = vld [vmem:[#allocation33_spill] sm:$0xff] }
 0x1bf   : > { %v2234_v9 = vmax.f32 %v1566_v36, 0.0  ;;  %v6496_v10 = vpack.c.bf16 %v2249_v38, %v2233_v14  ;;  %v2250_v34 = vmax.f32 %v1570_v58, 0.0  ;;  %v2236_v44 = vmax.f32 %v1679_v42, 0.0  ;;  %v7474_v36 = vld [vmem:[#allocation44_spill] sm:$0xff]  ;;  %v7478_v42 = vld [vmem:[#allocation42_spill] sm:$0xff] }
 0x1c0   : > { %v6500_v54 = vpack.c.bf16 %v2251_v5, %v2235_v39  ;;  %v2252_v48 = vmax.f32 %v1683_v3, 0.0  ;;  %v6502_v4 = vpop.f32.mrf.mxu0  ;;  %2590 = vmatpush1.bf16.msra.mxu0 %v2519_v61  ;;  %v7464_v21 = vmax.f32 %v6300_v51, 0.0  ;;  %v7465_v24 = vmax.f32 %v6340_v23, 0.0  ;;  %v6514_v11 = vpop.f32.mrf.mxu1  ;;  %2631 = vmatpush1.bf16.msra.mxu1 %v2521_v43  ;;  %v7482_v61 = vld [vmem:[#allocation34_spill] sm:$0xff]  ;;  %v7483_v43 = vld [vmem:[#allocation31_spill] sm:$0xff] }
 0x1c1   : > { %7462 = vst [vmem:[#allocation51_spill] sm:$0xff] %v6496_v10  ;;  %v1461_v18 = vadd.f32 %v6228_v49, %v6181_v41  ;;  %v2262_v57 = vmax.f32 %v6311_v33, 0.0  ;;  %v2295_v52 = vmax.f32 %v6346_v17, 0.0  ;;  %v6512_v13 = vpack.c.bf16 %v2250_v34, %v2234_v9  ;;  %2591 = vmatprep.subr.bf16.mxu0 %v2504_v30  ;;  %v7473_v49 = vld [vmem:[#allocation46_spill] sm:$0xff]  ;;  %v7484_v34 = vld [vmem:[#allocation32_spill] sm:$0xff] }
 0x1c2   : > { %7463 = vst [vmem:[#allocation52_spill] sm:$0xff] %v6500_v54  ;;  %v2506_v46 = vpack.c.bf16 %v7465_v24, %v7464_v21  ;;  %v2264_v15 = vmax.f32 %v6323_v35, 0.0  ;;  %v2277_v51 = vmax.f32 %v7467_v7, 0.0  ;;  %v7469_v23 = vmax.f32 %v7468_v22, 0.0  ;;  %v6524_v33 = vpop.f32.mrf.mxu0  ;;  %v6529_v16 = vpop.f32.mrf.mxu1  ;;  %v7476_v35 = vld [vmem:[#allocation39_spill] sm:$0xff] }
 0x1c3   : > { %7466 = vst [vmem:[#allocation53_spill] sm:$0xff] %v6512_v13  ;;  %v7471_v63 = vmax.f32 %v7470_v20, 0.0  ;;  %v6522_v41 = vpack.c.bf16 %v2252_v48, %v2236_v44  ;;  %v2279_v17 = vmax.f32 %v7473_v49, 0.0  ;;  %v7475_v47 = vmax.f32 %v7474_v36, 0.0  ;;  %v7485_v44 = vld [vmem:[#allocation29_spill] sm:$0xff]  ;;  %v7486_v48 = vld [vmem:[#allocation30_spill] sm:$0xff] }
 0x1c4   : > { %2632 = vmatprep.subr.bf16.mxu1 %v2506_v46  ;;  %v7477_v59 = vmax.f32 %v7476_v35, 0.0  ;;  %v2261_v1 = vmax.f32 %v7478_v42, 0.0  ;;  %v1579_v2 = vpop.f32.mrf.mxu0  ;;  %v7480_v53 = vmax.f32 %v7479_v62, 0.0  ;;  %v2263_v19 = vmax.f32 %v1461_v18, 0.0  ;;  %v1692_v25 = vpop.f32.mrf.mxu1  ;;  %v7487_v18 = vld [vmem:[#allocation27_spill] sm:$0xff]  ;;  %v6558_v36 = vld [vmem:[#allocation8 + $0x8] sm:$0xff] }
 0x1c5   : > { %v2503_v31 = vpack.c.bf16 %v7471_v63, %v7469_v23  ;;  %7472 = vst [vmem:[#allocation45_spill] sm:$0xff] %v6522_v41  ;;  %v2505_v0 = vpack.c.bf16 %v7475_v47, %v2295_v52  ;;  %v7488_v52 = vld [vmem:[#allocation28_spill] sm:$0xff]  ;;  %v7489_v23 = vmov 0   ;;  %7490 = vst [vmem:[#allocation41_spill] sm:$0xff] %v6558_v36  ;;  %v6561_v35 = vadd.f32 %v1579_v2, %v6291_v45  ;;  %v7493_v42 = vld [vmem:[#allocation23_spill] sm:$0xff] }
 0x1c6   : > { %v2488_v32 = vpack.c.bf16 %v7477_v59, %v2262_v57  ;;  %v2490_v28 = vpack.c.bf16 %v7480_v53, %v2264_v15  ;;  %v2487_v30 = vpack.c.bf16 %v2277_v51, %v2261_v1  ;;  %v1583_v37 = vpop.f32.mrf.mxu0  ;;  %v2489_v14 = vpack.c.bf16 %v2279_v17, %v2263_v19  ;;  %v6536_v38 = vpop.f32.mrf.mxu1  ;;  %v7494_v62 = vld [vmem:[#allocation24_spill] sm:$0xff] }
 0x1c7   : > { %2592 = vmatpush1.bf16.msra.mxu0 %v2503_v31  ;;  %2633 = vmatpush1.bf16.msra.mxu1 %v2505_v0  ;;  %v7374_v51 = vmov 1065369472   ;;  %7491 = vst [vmem:[#allocation43_spill] sm:$0xff] %v6561_v35  ;;  %v6564_v59 = vadd.f32 %v1692_v25, %v6304_v60  ;;  %v6568_v1 = vrot.slane %v6558_v36, %v7493_v42  ;;  %v7496_v25 = vld [vmem:[#allocation25_spill] sm:$0xff] }
 0x1c8   : > { %2593 = vmatprep.subr.bf16.mxu0 %v2488_v32  ;;  %2634 = vmatprep.subr.bf16.mxu1 %v2490_v28  ;;  %v1585_v58 = vpop.f32.mrf.mxu0  ;;  %v1698_v8 = vpop.f32.mrf.mxu1  ;;  %v6572_v53 = vrot.slane %v6558_v36, %v7494_v62  ;;  %v6575_v28 = vadd.f32 %v1583_v37, %v6277_v29  ;;  %v6624_v42 = vadd.f32 %v6536_v38, %v6287_v40 }
 0x1c9   : > { %7492 = vst [vmem:[#allocation46_spill] sm:$0xff] %v6564_v59  ;;  %v1586_v19 = vadd.f32 %v1585_v58, %v6291_v45  ;;  %v6579_v2 = vadd.f32 %v1698_v8, %v6304_v60  ;;  %v6598_v8 = vadd.f32 %v6494_v50, %v6277_v29 }
 0x1ca   : > { %v1587_v39 = vpop.f32.mrf.mxu0  ;;  %v1700_v5 = vpop.f32.mrf.mxu1  ;;  %7495 = vst [vmem:[#allocation44_spill] sm:$0xff] %v6575_v28 }
 0x1cb   : > { %2594 = vmatpush1.bf16.msra.mxu0 %v2487_v30  ;;  %2635 = vmatpush1.bf16.msra.mxu1 %v2489_v14  ;;  %v6583_v14 = vrot.slane %v6558_v36, %v7496_v25  ;;  %7500 = vst [vmem:[#allocation40_spill] sm:$0xff] %v6598_v8 }
 0x1cc   : > { %2595 = vmatprep.subr.bf16.mxu0 %v7481_v55  ;;  %2636 = vmatprep.subr.bf16.mxu1 %v7482_v61  ;;  %v1589_v3 = vpop.f32.mrf.mxu0  ;;  %v1702_v9 = vpop.f32.mrf.mxu1  ;;  %v6586_v55 = vadd.f32 %v1587_v39, %v6277_v29  ;;  %v6589_v61 = vadd.f32 %v1700_v5, %v6287_v40  ;;  %v6606_v39 = vadd.f32 %v6514_v11, %v6304_v60 }
 0x1cd   : > { %v6610_v5 = vadd.f32 %v6524_v33, %v6277_v29  ;;  %v2298_v33 = vmax.f32 %v1586_v19, 0.0 }
 0x1ce   : > { %v1593_v21 = vpop.f32.mrf.mxu0  ;;  %v6544_v24 = vpop.f32.mrf.mxu1  ;;  %7497 = vst [vmem:[#allocation39_spill] sm:$0xff] %v6586_v55  ;;  %7498 = vst [vmem:[#allocation42_spill] sm:$0xff] %v6589_v61 }
 0x1cf   : > { %2596 = vmatpush1.bf16.msra.mxu0 %v7483_v43  ;;  %2637 = vmatpush1.bf16.msra.mxu1 %v7484_v34  ;;  %v1590_v43 = vadd.f32 %v1589_v3, %v6291_v45  ;;  %v7499_v34 = vld [vmem:[#allocation26_spill] sm:$0xff]  ;;  %v6633_v50 = vadd.f32 %v1593_v21, %v6277_v29 }
 0x1d0   : > { %2597 = vmatprep.subr.bf16.mxu0 %v7485_v44  ;;  %2638 = vmatprep.subr.bf16.mxu1 %v7486_v48  ;;  %v1595_v46 = vpop.f32.mrf.mxu0  ;;  %v1708_v57 = vpop.f32.mrf.mxu1  ;;  %v6594_v58 = vrot.slane %v6558_v36, %v7499_v34  ;;  %v6602_v44 = vadd.f32 %v6502_v4, %v6291_v45  ;;  %v6614_v48 = vadd.f32 %v6529_v16, %v6287_v40 }
 0x1d1   : > { %v6619_v4 = vadd.f32 %v1702_v9, %v6304_v60  ;;  %v6636_v11 = vadd.f32 %v1708_v57, %v6304_v60  ;;  %v6652_v57 = vadd.f32 %v6544_v24, %v6287_v40 }
 0x1d2   : > { %v6548_v15 = vpop.f32.mrf.mxu0  ;;  %v6550_v7 = vpop.f32.mrf.mxu1  ;;  %7501 = vst [vmem:[#allocation33_spill] sm:$0xff] %v6614_v48 }
 0x1d3   : > { %2598 = vmatpush1.bf16.msra.mxu0 %v7487_v18  ;;  %2639 = vmatpush1.bf16.msra.mxu1 %v7488_v52  ;;  %v6630_v18 = vadd.f32 %v1595_v46, %v6291_v45 }
 0x1d4   : > { %v1599_v22 = vpop.f32.mrf.mxu0  ;;  %v1712_v20 = vpop.f32.mrf.mxu1 }
 0x1d5   : > { %v6639_v38 = vadd.f32 %v1599_v22, %v6291_v45 }
 0x1d6   : > { %2616 = vmatmul.mubr.bf16.vlgmr.msra.gmra.mxu0 %v7374_v51  ;;  %2657 = vmatmul.mubr.bf16.vlgmr.msra.gmra.mxu1 %v7374_v51  ;;  %v1603_v63 = vpop.f32.mrf.mxu0  ;;  %v6556_v31 = vpop.f32.mrf.mxu1  ;;  %v2314_v51 = vmax.f32 %v1590_v43, 0.0  ;;  %v6644_v43 = vadd.f32 %v1712_v20, %v6304_v60 }
 0x1d7   : > { %2697 = vmatprep.mubr.bf16.mxu0 %v7489_v23  ;;  %2738 = vmatprep.mubr.bf16.mxu1 %v7489_v23  ;;  %v6647_v46 = vadd.f32 %v1603_v63, %v6277_v29 }
 0x1d8   : > { %v1605_v49 = vpop.f32.mrf.mxu0  ;;  %v1718_v17 = vpop.f32.mrf.mxu1  ;;  %v6663_v36 = vpack.c.bf16 %v2314_v51, %v2298_v33 }
 0x1d9   : > { %v1606_v21 = vadd.f32 %v1605_v49, %v6291_v45  ;;  %v6655_v22 = vadd.f32 %v1718_v17, %v6304_v60  ;;  %v6668_v49 = vadd.f32 %v6548_v15, %v6277_v29  ;;  %v6683_v15 = vadd.f32 %v6556_v31, %v6287_v40 }
 0x1da   : > { %v1607_v47 = vpop.f32.mrf.mxu0  ;;  %v1720_v0 = vpop.f32.mrf.mxu1 }
 0x1db   : > { %v6661_v16 = vadd.f32 %v1720_v0, %v6287_v40 }
 0x1dc   : > { %v1609_v32 = vpop.f32.mrf.mxu0  ;;  %v1722_v30 = vpop.f32.mrf.mxu1 }
 0x1dd   : > { %v1610_v19 = vadd.f32 %v1609_v32, %v6291_v45  ;;  %v6658_v32 = vadd.f32 %v1607_v47, %v6277_v29  ;;  %v6671_v24 = vadd.f32 %v1722_v30, %v6304_v60  ;;  %v6676_v47 = vadd.f32 %v6550_v7, %v6287_v40 }
 0x1de   : > { %v1613_v37 = vpop.f32.mrf.mxu0  ;;  %v1726_v3 = vpop.f32.mrf.mxu1  ;;  %v2362_v30 = vmax.f32 %v1606_v21, 0.0 }
 0x1df   : > { %v2378_v51 = vmax.f32 %v1610_v19, 0.0  ;;  %v6691_v63 = vadd.f32 %v1613_v37, %v6277_v29  ;;  %v6694_v6 = vadd.f32 %v1726_v3, %v6287_v40 }
 0x1e0   : > { %v1615_v52 = vpop.f32.mrf.mxu0  ;;  %v1728_v25 = vpop.f32.mrf.mxu1 }
 0x1e1   : > { %v1616_v0 = vadd.f32 %v1615_v52, %v6291_v45  ;;  %v1729_v31 = vadd.f32 %v1728_v25, %v6304_v60  ;;  %v6697_v54 = vpack.c.bf16 %v2378_v51, %v2362_v30 }
 0x1e2   : > { %v1617_v9 = vpop.f32.mrf.mxu0  ;;  %v1730_v62 = vpop.f32.mrf.mxu1 }
 0x1e3   : > { %v2394_v25 = vmax.f32 %v1616_v0, 0.0  ;;  %v1618_v51 = vadd.f32 %v1617_v9, %v6277_v29  ;;  %v2396_v13 = vmax.f32 %v1729_v31, 0.0 }
 0x1e4   : > { %v1619_v34 = vpop.f32.mrf.mxu0  ;;  %v1732_v20 = vpop.f32.mrf.mxu1 }
 0x1e5   : > { %v1620_v56 = vadd.f32 %v1619_v34, %v6291_v45  ;;  %v1733_v12 = vadd.f32 %v1732_v20, %v6304_v60  ;;  %v2409_v55 = vmax.f32 %v1618_v51, 0.0  ;;  %v2393_v51 = vmax.f32 %v6691_v63, 0.0 }
 0x1e6   : > { %v1623_v17 = vpop.f32.mrf.mxu0  ;;  %v1736_v33 = vpop.f32.mrf.mxu1 }
 0x1e7   : > { %v1624_v37 = vadd.f32 %v1623_v17, %v6277_v29  ;;  %v1737_v30 = vadd.f32 %v1736_v33, %v6287_v40  ;;  %v2410_v8 = vmax.f32 %v1620_v56, 0.0  ;;  %v2412_v0 = vmax.f32 %v1733_v12, 0.0 }
 0x1e8   : > { %v1625_v27 = vpop.f32.mrf.mxu0  ;;  %v1738_v19 = vpop.f32.mrf.mxu1 }
 0x1e9   : > { %v1626_v7 = vadd.f32 %v1625_v27, %v6291_v45  ;;  %v1739_v10 = vadd.f32 %v1738_v19, %v6304_v60  ;;  %v2425_v48 = vmax.f32 %v1624_v37, 0.0 }
 0x1ea   : > { %v1627_v21 = vpop.f32.mrf.mxu0  ;;  %v1740_v23 = vpop.f32.mrf.mxu1 }
 0x1eb   : > { %v1628_v52 = vadd.f32 %v1627_v21, %v6277_v29  ;;  %v1741_v3 = vadd.f32 %v1740_v23, %v6287_v40  ;;  %v1731_v21 = vadd.f32 %v1730_v62, %v6287_v40  ;;  %v2426_v19 = vmax.f32 %v1626_v7, 0.0 }
 0x1ec   : > { %v1629_v41 = vpop.f32.mrf.mxu0  ;;  %v1742_v27 = vpop.f32.mrf.mxu1  ;;  %v2428_v29 = vmax.f32 %v1739_v10, 0.0 }
 0x1ed   : > { %v1630_v34 = vadd.f32 %v1629_v41, %v6291_v45  ;;  %v2441_v59 = vmax.f32 %v1628_v52, 0.0  ;;  %v1743_v20 = vadd.f32 %v1742_v27, %v6304_v60  ;;  %v2443_v61 = vmax.f32 %v1741_v3, 0.0 }
 0x1ee   : > { %v1779_v17 = vpop.f32.mrf.mxu0  ;;  %v1892_v35 = vpop.f32.mrf.mxu1  ;;  %v2427_v45 = vmax.f32 %v1737_v30, 0.0  ;;  %v2411_v52 = vmax.f32 %v1731_v21, 0.0  ;;  %v2556_v3 = vpack.c.bf16 %v2410_v8, %v2394_v25  ;;  %v2558_v30 = vpack.c.bf16 %v2412_v0, %v2396_v13 }
 0x1ef   : > { %v2442_v23 = vmax.f32 %v1630_v34, 0.0  ;;  %v2444_v9 = vmax.f32 %v1743_v20, 0.0  ;;  %v1780_v31 = vadd.f32 %v1779_v17, %v6568_v1  ;;  %v2571_v28 = vpack.c.bf16 %v2441_v59, %v2425_v48 }
 0x1f0   : > { %v1781_v33 = vpop.f32.mrf.mxu0  ;;  %v1894_v62 = vpop.f32.mrf.mxu1  ;;  %v1893_v56 = vadd.f32 %v1892_v35, %v6572_v53  ;;  %v2573_v34 = vpack.c.bf16 %v2443_v61, %v2427_v45  ;;  %v2395_v35 = vmax.f32 %v6694_v6, 0.0  ;;  %v2555_v20 = vpack.c.bf16 %v2409_v55, %v2393_v51 }
 0x1f1   : > { %v2572_v41 = vpack.c.bf16 %v2442_v23, %v2426_v19  ;;  %v2574_v60 = vpack.c.bf16 %v2444_v9, %v2428_v29  ;;  %v1782_v12 = vadd.f32 %v1781_v33, %v6583_v14  ;;  %v1895_v27 = vadd.f32 %v1894_v62, %v6594_v58 }
 0x1f2   : > { %v1783_v7 = vpop.f32.mrf.mxu0  ;;  %v1896_v37 = vpop.f32.mrf.mxu1  ;;  %v2205_v8 = vmax.f32 %v1780_v31, 0.0  ;;  %v2207_v17 = vmax.f32 %v1893_v56, 0.0  ;;  %v2557_v23 = vpack.c.bf16 %v2411_v52, %v2395_v35  ;;  %v7503_v9 = vmax.f32 %v6655_v22, 0.0 }
 0x1f3   : > { %v1784_v10 = vadd.f32 %v1783_v7, %v6568_v1  ;;  %2665 = vmatprep.subr.bf16.mxu0 %v2572_v41  ;;  %v1897_v21 = vadd.f32 %v1896_v37, %v6572_v53  ;;  %2706 = vmatprep.subr.bf16.mxu1 %v2574_v60  ;;  %v2206_v0 = vmax.f32 %v1782_v12, 0.0  ;;  %v7504_v33 = vmax.f32 %v6671_v24, 0.0 }
 0x1f4   : > { %v1785_v59 = vpop.f32.mrf.mxu0  ;;  %2666 = vmatpush1.bf16.msra.mxu0 %v2571_v28  ;;  %v1898_v25 = vpop.f32.mrf.mxu1  ;;  %2707 = vmatpush1.bf16.msra.mxu1 %v2573_v34  ;;  %v2208_v41 = vmax.f32 %v1895_v27, 0.0  ;;  %v2345_v60 = vmax.f32 %v6668_v49, 0.0  ;;  %v2363_v52 = vmax.f32 %v6683_v15, 0.0  ;;  %v2347_v22 = vmax.f32 %v6676_v47, 0.0 }
 0x1f5   : > { %v2221_v61 = vmax.f32 %v1784_v10, 0.0  ;;  %v1786_v48 = vadd.f32 %v1785_v59, %v6583_v14  ;;  %2667 = vmatprep.subr.bf16.mxu0 %v2556_v3  ;;  %v2223_v63 = vmax.f32 %v1897_v21, 0.0  ;;  %v1899_v13 = vadd.f32 %v1898_v25, %v6594_v58  ;;  %2708 = vmatprep.subr.bf16.mxu1 %v2558_v30 }
 0x1f6   : > { %v1789_v19 = vpop.f32.mrf.mxu0  ;;  %v1902_v6 = vpop.f32.mrf.mxu1  ;;  %v2542_v45 = vpack.c.bf16 %v7504_v33, %v7503_v9  ;;  %v7507_v24 = vmax.f32 %v6647_v46, 0.0  ;;  %v7508_v34 = vmax.f32 %v6658_v32, 0.0  ;;  %v7510_v37 = vmax.f32 %v6630_v18, 0.0 }
 0x1f7   : > { %v6721_v29 = vpack.c.bf16 %v2221_v61, %v2205_v8  ;;  %v2222_v28 = vmax.f32 %v1786_v48, 0.0  ;;  %v6727_v31 = vpack.c.bf16 %v2223_v63, %v2207_v17  ;;  %v2224_v55 = vmax.f32 %v1899_v13, 0.0 }
 0x1f8   : > { %v1791_v62 = vpop.f32.mrf.mxu0  ;;  %2668 = vmatpush1.bf16.msra.mxu0 %v2555_v20  ;;  %v1790_v7 = vadd.f32 %v1789_v19, %v6568_v1  ;;  %v1904_v3 = vpop.f32.mrf.mxu1  ;;  %2709 = vmatpush1.bf16.msra.mxu1 %v2557_v23  ;;  %v2539_v12 = vpack.c.bf16 %v7508_v34, %v7507_v24  ;;  %v1903_v49 = vadd.f32 %v1902_v6, %v6572_v53  ;;  %v7511_v51 = vmax.f32 %v6639_v38, 0.0  ;;  %v7520_v24 = vld [vmem:[#allocation44_spill] sm:$0xff] }
 0x1f9   : > { %7502 = vst [vmem:[#allocation34_spill] sm:$0xff] %v6721_v29  ;;  %7505 = vst [vmem:[#allocation31_spill] sm:$0xff] %v6727_v31  ;;  %v6731_v56 = vpack.c.bf16 %v2222_v28, %v2206_v0  ;;  %2669 = vmatprep.subr.bf16.mxu0 %v6697_v54  ;;  %v6740_v10 = vpack.c.bf16 %v2224_v55, %v2208_v41  ;;  %2710 = vmatprep.subr.bf16.mxu1 %v2542_v45  ;;  %v7512_v54 = vmax.f32 %v6661_v16, 0.0 }
 0x1fa   : > { %v1793_v15 = vpop.f32.mrf.mxu0  ;;  %v2524_v30 = vpack.c.bf16 %v7511_v51, %v7510_v37  ;;  %v1792_v47 = vadd.f32 %v1791_v62, %v6583_v14  ;;  %v1906_v32 = vpop.f32.mrf.mxu1  ;;  %v2329_v21 = vmax.f32 %v6633_v50, 0.0  ;;  %v7513_v59 = vmax.f32 %v6636_v11, 0.0  ;;  %v7526_v37 = vld [vmem:[#allocation43_spill] sm:$0xff] }
 0x1fb   : > { %7506 = vst [vmem:[#allocation32_spill] sm:$0xff] %v6731_v56  ;;  %7509 = vst [vmem:[#allocation29_spill] sm:$0xff] %v6740_v10  ;;  %v2541_v27 = vpack.c.bf16 %v7512_v54, %v2363_v52  ;;  %v1794_v46 = vadd.f32 %v1793_v15, %v6568_v1  ;;  %v7514_v35 = vmax.f32 %v6644_v43, 0.0  ;;  %v1905_v18 = vadd.f32 %v1904_v3, %v6594_v58 }
 0x1fc   : > { %v1907_v38 = vadd.f32 %v1906_v32, %v6572_v53  ;;  %v1795_v61 = vpop.f32.mrf.mxu0  ;;  %2670 = vmatpush1.bf16.msra.mxu0 %v2539_v12  ;;  %v2331_v16 = vmax.f32 %v6652_v57, 0.0  ;;  %v2237_v48 = vmax.f32 %v1790_v7, 0.0  ;;  %v1908_v17 = vpop.f32.mrf.mxu1  ;;  %v2523_v50 = vpack.c.bf16 %v2345_v60, %v2329_v21  ;;  %v7522_v12 = vld [vmem:[#allocation39_spill] sm:$0xff] }
 0x1fd   : > { %v2526_v8 = vpack.c.bf16 %v7514_v35, %v7513_v59  ;;  %v2253_v25 = vmax.f32 %v1794_v46, 0.0  ;;  %v1796_v20 = vadd.f32 %v1795_v61, %v6583_v14  ;;  %2711 = vmatpush1.bf16.msra.mxu1 %v2541_v27  ;;  %2671 = vmatprep.subr.bf16.mxu0 %v2524_v30  ;;  %v2239_v11 = vmax.f32 %v1903_v49, 0.0  ;;  %v7531_v46 = vld [vmem:[#allocation46_spill] sm:$0xff] }
 0x1fe   : > { %v2255_v63 = vmax.f32 %v1907_v38, 0.0  ;;  %v1909_v43 = vadd.f32 %v1908_v17, %v6594_v58  ;;  %v6761_v13 = vpop.f32.mrf.mxu0  ;;  %v2525_v19 = vpack.c.bf16 %v2347_v22, %v2331_v16  ;;  %v2238_v23 = vmax.f32 %v1792_v47, 0.0  ;;  %v6765_v28 = vpop.f32.mrf.mxu1  ;;  %v7534_v17 = vld [vmem:[#allocation45_spill] sm:$0xff] }
 0x1ff   : > { %2712 = vmatprep.subr.bf16.mxu1 %v2526_v8  ;;  %v6763_v0 = vpack.c.bf16 %v2253_v25, %v2237_v48  ;;  %v2254_v57 = vmax.f32 %v1796_v20, 0.0  ;;  %v7516_v6 = vmax.f32 %v6579_v2, 0.0  ;;  %v7517_v9 = vmax.f32 %v6619_v4, 0.0  ;;  %v7533_v20 = vld [vmem:[#allocation53_spill] sm:$0xff] }
 0x200   : > { %v2240_v45 = vmax.f32 %v1905_v18, 0.0  ;;  %v6771_v41 = vpack.c.bf16 %v2255_v63, %v2239_v11  ;;  %v2256_v55 = vmax.f32 %v1909_v43, 0.0  ;;  %v6773_v62 = vpop.f32.mrf.mxu0  ;;  %2672 = vmatpush1.bf16.msra.mxu0 %v2523_v50  ;;  %v1687_v60 = vadd.f32 %v6498_v26, %v6287_v40  ;;  %v6781_v2 = vpop.f32.mrf.mxu1  ;;  %v7535_v43 = vld [vmem:[#allocation51_spill] sm:$0xff] }
 0x201   : > { %7515 = vst [vmem:[#allocation30_spill] sm:$0xff] %v6763_v0  ;;  %v2510_v33 = vpack.c.bf16 %v7517_v9, %v7516_v6  ;;  %v2266_v52 = vmax.f32 %v6602_v44, 0.0  ;;  %v2299_v7 = vmax.f32 %v6624_v42, 0.0  ;;  %v6779_v3 = vpack.c.bf16 %v2254_v57, %v2238_v23  ;;  %2713 = vmatpush1.bf16.msra.mxu1 %v2525_v19  ;;  %2673 = vmatprep.subr.bf16.mxu0 %v6663_v36  ;;  %v7525_v42 = vld [vmem:[#allocation33_spill] sm:$0xff]  ;;  %v7528_v36 = vld [vmem:[#allocation42_spill] sm:$0xff]  ;;  %v7536_v23 = vld [vmem:[#allocation52_spill] sm:$0xff] }
 0x202   : > { %7518 = vst [vmem:[#allocation27_spill] sm:$0xff] %v6771_v41  ;;  %v2268_v4 = vmax.f32 %v6606_v39, 0.0  ;;  %v2281_v22 = vmax.f32 %v6610_v5, 0.0  ;;  %v7521_v34 = vmax.f32 %v7520_v24, 0.0  ;;  %v7523_v49 = vmax.f32 %v7522_v12, 0.0  ;;  %v6792_v44 = vpop.f32.mrf.mxu0  ;;  %v6799_v27 = vpop.f32.mrf.mxu1  ;;  %v7530_v5 = vld [vmem:[#allocation40_spill] sm:$0xff] }
 0x203   : > { %7519 = vst [vmem:[#allocation28_spill] sm:$0xff] %v6779_v3  ;;  %v6790_v26 = vpack.c.bf16 %v2256_v55, %v2240_v45  ;;  %2714 = vmatprep.subr.bf16.mxu1 %v2510_v33  ;;  %v2283_v15 = vmax.f32 %v7525_v42, 0.0  ;;  %v7527_v51 = vmax.f32 %v7526_v37, 0.0  ;;  %v7529_v54 = vmax.f32 %v7528_v36, 0.0  ;;  %v7537_v57 = vld [vmem:[#allocation49_spill] sm:$0xff]  ;;  %v7538_v6 = vld [vmem:[#allocation50_spill] sm:$0xff] }
 0x204   : > { %v2507_v40 = vpack.c.bf16 %v7523_v49, %v7521_v34  ;;  %v2265_v47 = vmax.f32 %v7530_v5, 0.0  ;;  %v7532_v32 = vmax.f32 %v7531_v46, 0.0  ;;  %v1805_v59 = vpop.f32.mrf.mxu0  ;;  %v2267_v35 = vmax.f32 %v1687_v60, 0.0  ;;  %v1918_v8 = vpop.f32.mrf.mxu1  ;;  %v7539_v55 = vld [vmem:[#allocation47_spill] sm:$0xff]  ;;  %v7546_v5 = vld [vmem:[#allocation41_spill] sm:$0xff]  ;;  %v7547_v46 = vld [vmem:[#allocation36_spill] sm:$0xff] }
 0x205   : > { %7524 = vst [vmem:[#allocation44_spill] sm:$0xff] %v6790_v26  ;;  %v2492_v30 = vpack.c.bf16 %v7527_v51, %v2266_v52  ;;  %v2509_v39 = vpack.c.bf16 %v7529_v54, %v2299_v7  ;;  %v7540_v52 = vld [vmem:[#allocation48_spill] sm:$0xff]  ;;  %v7542_v34 = vmov 0   ;;  %v6828_v36 = vadd.f32 %v1918_v8, %v6594_v58  ;;  %v7549_v8 = vld [vmem:[#allocation37_spill] sm:$0xff] }
 0x206   : > { %v2494_v21 = vpack.c.bf16 %v7532_v32, %v2268_v4  ;;  %2674 = vmatpush1.bf16.msra.mxu0 %v2507_v40  ;;  %v2491_v18 = vpack.c.bf16 %v2281_v22, %v2265_v47  ;;  %v1809_v38 = vpop.f32.mrf.mxu0  ;;  %v2493_v61 = vpack.c.bf16 %v2283_v15, %v2267_v35  ;;  %v1922_v16 = vpop.f32.mrf.mxu1  ;;  %v7541_v22 = vmov 1065369472  }
 0x207   : > { %2715 = vmatpush1.bf16.msra.mxu1 %v2509_v39  ;;  %2675 = vmatprep.subr.bf16.mxu0 %v2492_v30  ;;  %v6825_v30 = vadd.f32 %v1805_v59, %v6583_v14  ;;  %7544 = vst [vmem:[#allocation33_spill] sm:$0xff] %v6828_v36  ;;  %v7545_v39 = vld [vmem:[#allocation35_spill] sm:$0xff]  ;;  %v6836_v32 = vrot.slane %v7546_v5, %v7547_v46 }
 0x208   : > { %2716 = vmatprep.subr.bf16.mxu1 %v2494_v21  ;;  %v1811_v48 = vpop.f32.mrf.mxu0  ;;  %v1924_v25 = vpop.f32.mrf.mxu1  ;;  %v6832_v47 = vrot.slane %v7546_v5, %v7545_v39  ;;  %v6839_v21 = vadd.f32 %v1809_v38, %v6568_v1  ;;  %v6887_v39 = vadd.f32 %v1922_v16, %v6572_v53 }
 0x209   : > { %7543 = vst [vmem:[#allocation39_spill] sm:$0xff] %v6825_v30  ;;  %v1812_v35 = vadd.f32 %v1811_v48, %v6583_v14  ;;  %v6843_v59 = vadd.f32 %v1924_v25, %v6594_v58  ;;  %v6862_v25 = vadd.f32 %v6761_v13, %v6568_v1 }
 0x20a   : > { %2676 = vmatpush1.bf16.msra.mxu0 %v2491_v18  ;;  %v1813_v50 = vpop.f32.mrf.mxu0  ;;  %v1926_v11 = vpop.f32.mrf.mxu1  ;;  %7548 = vst [vmem:[#allocation43_spill] sm:$0xff] %v6839_v21 }
 0x20b   : > { %2717 = vmatpush1.bf16.msra.mxu1 %v2493_v61  ;;  %2677 = vmatprep.subr.bf16.mxu0 %v7533_v20  ;;  %v6847_v61 = vrot.slane %v7546_v5, %v7549_v8  ;;  %v6850_v20 = vadd.f32 %v1813_v50, %v6568_v1  ;;  %7553 = vst [vmem:[#allocation46_spill] sm:$0xff] %v6862_v25 }
 0x20c   : > { %2718 = vmatprep.subr.bf16.mxu1 %v7534_v17  ;;  %v1815_v63 = vpop.f32.mrf.mxu0  ;;  %v1928_v19 = vpop.f32.mrf.mxu1  ;;  %v6853_v17 = vadd.f32 %v1926_v11, %v6572_v53  ;;  %v6870_v50 = vadd.f32 %v6781_v2, %v6594_v58  ;;  %v6874_v11 = vadd.f32 %v6792_v44, %v6568_v1  ;;  %v2302_v44 = vmax.f32 %v1812_v35, 0.0 }
 0x20d   : > { %7550 = vst [vmem:[#allocation42_spill] sm:$0xff] %v6850_v20 }
 0x20e   : > { %2678 = vmatpush1.bf16.msra.mxu0 %v7535_v43  ;;  %v1819_v9 = vpop.f32.mrf.mxu0  ;;  %v6810_v33 = vpop.f32.mrf.mxu1  ;;  %7551 = vst [vmem:[#allocation40_spill] sm:$0xff] %v6853_v17  ;;  %v1816_v43 = vadd.f32 %v1815_v63, %v6583_v14 }
 0x20f   : > { %2719 = vmatpush1.bf16.msra.mxu1 %v7536_v23  ;;  %2679 = vmatprep.subr.bf16.mxu0 %v7537_v57  ;;  %v7552_v23 = vld [vmem:[#allocation38_spill] sm:$0xff]  ;;  %v6866_v57 = vadd.f32 %v6773_v62, %v6583_v14  ;;  %v6883_v62 = vadd.f32 %v1928_v19, %v6594_v58  ;;  %v6896_v13 = vadd.f32 %v1819_v9, %v6568_v1 }
 0x210   : > { %2720 = vmatprep.subr.bf16.mxu1 %v7538_v6  ;;  %v1821_v45 = vpop.f32.mrf.mxu0  ;;  %v1934_v60 = vpop.f32.mrf.mxu1  ;;  %v6858_v48 = vrot.slane %v7546_v5, %v7552_v23  ;;  %v6878_v6 = vadd.f32 %v6799_v27, %v6572_v53  ;;  %v2318_v23 = vmax.f32 %v1816_v43, 0.0 }
 0x211   : > { %v6899_v2 = vadd.f32 %v1934_v60, %v6594_v58  ;;  %v6915_v60 = vadd.f32 %v6810_v33, %v6572_v53 }
 0x212   : > { %2680 = vmatpush1.bf16.msra.mxu0 %v7539_v55  ;;  %v6814_v7 = vpop.f32.mrf.mxu0  ;;  %v6816_v4 = vpop.f32.mrf.mxu1  ;;  %7554 = vst [vmem:[#allocation53_spill] sm:$0xff] %v6878_v6  ;;  %v6893_v55 = vadd.f32 %v1821_v45, %v6583_v14 }
 0x213   : > { %2721 = vmatpush1.bf16.msra.mxu1 %v7540_v52 }
 0x214   : > { %v1825_v24 = vpop.f32.mrf.mxu0  ;;  %v1938_v12 = vpop.f32.mrf.mxu1 }
 0x215   : > { %2698 = vmatmul.mubr.bf16.vlgmr.msra.gmra.mxu0 %v7541_v22  ;;  %v6902_v16 = vadd.f32 %v1825_v24, %v6583_v14  ;;  %v6907_v43 = vadd.f32 %v1938_v12, %v6594_v58 }
 0x216   : > { %2739 = vmatmul.mubr.bf16.vlgmr.msra.gmra.mxu1 %v7541_v22  ;;  %2779 = vmatprep.mubr.bf16.mxu0 %v7542_v34  ;;  %v1829_v49 = vpop.f32.mrf.mxu0  ;;  %v6822_v40 = vpop.f32.mrf.mxu1 }
 0x217   : > { %2820 = vmatprep.mubr.bf16.mxu1 %v7542_v34  ;;  %v6910_v45 = vadd.f32 %v1829_v49, %v6568_v1  ;;  %v6926_v34 = vpack.c.bf16 %v2318_v23, %v2302_v44 }
 0x218   : > { %v1831_v42 = vpop.f32.mrf.mxu0  ;;  %v1944_v15 = vpop.f32.mrf.mxu1 }
 0x219   : > { %v1832_v9 = vadd.f32 %v1831_v42, %v6583_v14  ;;  %v6918_v24 = vadd.f32 %v1944_v15, %v6594_v58  ;;  %v6931_v42 = vadd.f32 %v6814_v7, %v6568_v1  ;;  %v6946_v7 = vadd.f32 %v6822_v40, %v6572_v53 }
 0x21a   : > { %v1833_v37 = vpop.f32.mrf.mxu0  ;;  %v1946_v51 = vpop.f32.mrf.mxu1 }
 0x21b   : > { %v6924_v27 = vadd.f32 %v1946_v51, %v6572_v53 }
 0x21c   : > { %v1835_v54 = vpop.f32.mrf.mxu0  ;;  %v1948_v18 = vpop.f32.mrf.mxu1 }
 0x21d   : > { %v1836_v35 = vadd.f32 %v1835_v54, %v6583_v14  ;;  %v6921_v54 = vadd.f32 %v1833_v37, %v6568_v1  ;;  %v6934_v33 = vadd.f32 %v1948_v18, %v6594_v58  ;;  %v6939_v37 = vadd.f32 %v6816_v4, %v6572_v53 }
 0x21e   : > { %v1839_v38 = vpop.f32.mrf.mxu0  ;;  %v1952_v63 = vpop.f32.mrf.mxu1  ;;  %v2366_v18 = vmax.f32 %v1832_v9, 0.0 }
 0x21f   : > { %v2382_v44 = vmax.f32 %v1836_v35, 0.0  ;;  %v6954_v49 = vadd.f32 %v1839_v38, %v6568_v1  ;;  %v6957_v31 = vadd.f32 %v1952_v63, %v6572_v53 }
 0x220   : > { %v1841_v52 = vpop.f32.mrf.mxu0  ;;  %v1954_v46 = vpop.f32.mrf.mxu1 }
 0x221   : > { %v1842_v51 = vadd.f32 %v1841_v52, %v6583_v14  ;;  %v1955_v40 = vadd.f32 %v1954_v46, %v6594_v58  ;;  %v6960_v41 = vpack.c.bf16 %v2382_v44, %v2366_v18 }
 0x222   : > { %v1843_v19 = vpop.f32.mrf.mxu0  ;;  %v1956_v5 = vpop.f32.mrf.mxu1 }
 0x223   : > { %v2398_v46 = vmax.f32 %v1842_v51, 0.0  ;;  %v1844_v44 = vadd.f32 %v1843_v19, %v6568_v1  ;;  %v2400_v3 = vmax.f32 %v1955_v40, 0.0 }
 0x224   : > { %v1845_v8 = vpop.f32.mrf.mxu0  ;;  %v1958_v12 = vpop.f32.mrf.mxu1 }
 0x225   : > { %v1846_v10 = vadd.f32 %v1845_v8, %v6583_v14  ;;  %v1959_v56 = vadd.f32 %v1958_v12, %v6594_v58  ;;  %v2413_v20 = vmax.f32 %v1844_v44, 0.0  ;;  %v2397_v44 = vmax.f32 %v6954_v49, 0.0 }
 0x226   : > { %v1849_v15 = vpop.f32.mrf.mxu0  ;;  %v1962_v23 = vpop.f32.mrf.mxu1 }
 0x227   : > { %v1850_v38 = vadd.f32 %v1849_v15, %v6568_v1  ;;  %v1963_v18 = vadd.f32 %v1962_v23, %v6572_v53  ;;  %v2414_v25 = vmax.f32 %v1846_v10, 0.0  ;;  %v2416_v51 = vmax.f32 %v1959_v56, 0.0 }
 0x228   : > { %v1851_v29 = vpop.f32.mrf.mxu0  ;;  %v1964_v35 = vpop.f32.mrf.mxu1 }
 0x229   : > { %v1852_v4 = vadd.f32 %v1851_v29, %v6583_v14  ;;  %v1965_v0 = vadd.f32 %v1964_v35, %v6594_v58  ;;  %v2429_v6 = vmax.f32 %v1850_v38, 0.0 }
 0x22a   : > { %v1853_v9 = vpop.f32.mrf.mxu0  ;;  %v1966_v22 = vpop.f32.mrf.mxu1 }
 0x22b   : > { %v1854_v52 = vadd.f32 %v1853_v9, %v6568_v1  ;;  %v1967_v63 = vadd.f32 %v1966_v22, %v6572_v53  ;;  %v1957_v9 = vadd.f32 %v1956_v5, %v6572_v53  ;;  %v2430_v35 = vmax.f32 %v1852_v4, 0.0 }
 0x22c   : > { %v1855_v26 = vpop.f32.mrf.mxu0  ;;  %v1968_v29 = vpop.f32.mrf.mxu1  ;;  %v2432_v1 = vmax.f32 %v1965_v0, 0.0 }
 0x22d   : > { %v1856_v8 = vadd.f32 %v1855_v26, %v6583_v14  ;;  %v2445_v36 = vmax.f32 %v1854_v52, 0.0  ;;  %v1969_v12 = vadd.f32 %v1968_v29, %v6594_v58  ;;  %v2447_v17 = vmax.f32 %v1967_v63, 0.0 }
 0x22e   : > { %v2005_v15 = vpop.f32.mrf.mxu0  ;;  %v2118_v30 = vpop.f32.mrf.mxu1  ;;  %v2431_v14 = vmax.f32 %v1963_v18, 0.0  ;;  %v2415_v52 = vmax.f32 %v1957_v9, 0.0  ;;  %v2560_v63 = vpack.c.bf16 %v2414_v25, %v2398_v46  ;;  %v2562_v18 = vpack.c.bf16 %v2416_v51, %v2400_v3 }
 0x22f   : > { %v2446_v22 = vmax.f32 %v1856_v8, 0.0  ;;  %v2448_v19 = vmax.f32 %v1969_v12, 0.0  ;;  %v2006_v40 = vadd.f32 %v2005_v15, %v6832_v47  ;;  %v2575_v21 = vpack.c.bf16 %v2445_v36, %v2429_v6 }
 0x230   : > { %v2007_v23 = vpop.f32.mrf.mxu0  ;;  %v2120_v5 = vpop.f32.mrf.mxu1  ;;  %v2119_v10 = vadd.f32 %v2118_v30, %v6836_v32  ;;  %v2577_v8 = vpack.c.bf16 %v2447_v17, %v2431_v14  ;;  %v2399_v30 = vmax.f32 %v6957_v31, 0.0  ;;  %v2559_v12 = vpack.c.bf16 %v2413_v20, %v2397_v44 }
 0x231   : > { %v2576_v26 = vpack.c.bf16 %v2446_v22, %v2430_v35  ;;  %v2578_v58 = vpack.c.bf16 %v2448_v19, %v2432_v1  ;;  %v2008_v56 = vadd.f32 %v2007_v23, %v6847_v61  ;;  %v2121_v29 = vadd.f32 %v2120_v5, %v6858_v48 }
 0x232   : > { %v2009_v4 = vpop.f32.mrf.mxu0  ;;  %v2122_v38 = vpop.f32.mrf.mxu1  ;;  %v2209_v25 = vmax.f32 %v2006_v40, 0.0  ;;  %v2211_v15 = vmax.f32 %v2119_v10, 0.0  ;;  %v2561_v22 = vpack.c.bf16 %v2415_v52, %v2399_v30  ;;  %v7556_v19 = vmax.f32 %v6918_v24, 0.0 }
 0x233   : > { %v2010_v0 = vadd.f32 %v2009_v4, %v6832_v47  ;;  %2747 = vmatprep.subr.bf16.mxu0 %v2576_v26  ;;  %v2123_v9 = vadd.f32 %v2122_v38, %v6836_v32  ;;  %2788 = vmatprep.subr.bf16.mxu1 %v2578_v58  ;;  %v2210_v51 = vmax.f32 %v2008_v56, 0.0  ;;  %v7557_v23 = vmax.f32 %v6934_v33, 0.0 }
 0x234   : > { %v2011_v36 = vpop.f32.mrf.mxu0  ;;  %2748 = vmatpush1.bf16.msra.mxu0 %v2575_v21  ;;  %v2124_v46 = vpop.f32.mrf.mxu1  ;;  %2789 = vmatpush1.bf16.msra.mxu1 %v2577_v8  ;;  %v2212_v26 = vmax.f32 %v2121_v29, 0.0  ;;  %v2349_v58 = vmax.f32 %v6931_v42, 0.0  ;;  %v2367_v52 = vmax.f32 %v6946_v7, 0.0  ;;  %v2351_v24 = vmax.f32 %v6939_v37, 0.0 }
 0x235   : > { %v2225_v17 = vmax.f32 %v2010_v0, 0.0  ;;  %v2012_v6 = vadd.f32 %v2011_v36, %v6847_v61  ;;  %2749 = vmatprep.subr.bf16.mxu0 %v2560_v63  ;;  %v2227_v49 = vmax.f32 %v2123_v9, 0.0  ;;  %v2125_v3 = vadd.f32 %v2124_v46, %v6858_v48  ;;  %2790 = vmatprep.subr.bf16.mxu1 %v2562_v18 }
 0x236   : > { %v2015_v35 = vpop.f32.mrf.mxu0  ;;  %v2128_v31 = vpop.f32.mrf.mxu1  ;;  %v2546_v14 = vpack.c.bf16 %v7557_v23, %v7556_v19  ;;  %v7560_v33 = vmax.f32 %v6910_v45, 0.0  ;;  %v7561_v8 = vmax.f32 %v6921_v54, 0.0  ;;  %v7563_v38 = vmax.f32 %v6893_v55, 0.0 }
 0x237   : > { %v6984_v1 = vpack.c.bf16 %v2225_v17, %v2209_v25  ;;  %v2226_v21 = vmax.f32 %v2012_v6, 0.0  ;;  %v6990_v40 = vpack.c.bf16 %v2227_v49, %v2211_v15  ;;  %v2228_v20 = vmax.f32 %v2125_v3, 0.0 }
 0x238   : > { %v2017_v5 = vpop.f32.mrf.mxu0  ;;  %2750 = vmatpush1.bf16.msra.mxu0 %v2559_v12  ;;  %v2016_v4 = vadd.f32 %v2015_v35, %v6832_v47  ;;  %v2130_v63 = vpop.f32.mrf.mxu1  ;;  %2791 = vmatpush1.bf16.msra.mxu1 %v2561_v22  ;;  %v2543_v56 = vpack.c.bf16 %v7561_v8, %v7560_v33  ;;  %v2129_v42 = vadd.f32 %v2128_v31, %v6836_v32  ;;  %v7564_v44 = vmax.f32 %v6902_v16, 0.0  ;;  %v7575_v33 = vld [vmem:[#allocation43_spill] sm:$0xff] }
 0x239   : > { %7555 = vst [vmem:[#allocation45_spill] sm:$0xff] %v6984_v1  ;;  %7558 = vst [vmem:[#allocation51_spill] sm:$0xff] %v6990_v40  ;;  %v6994_v10 = vpack.c.bf16 %v2226_v21, %v2210_v51  ;;  %2751 = vmatprep.subr.bf16.mxu0 %v6960_v41  ;;  %v7003_v0 = vpack.c.bf16 %v2228_v20, %v2212_v26  ;;  %2792 = vmatprep.subr.bf16.mxu1 %v2546_v14  ;;  %v7565_v41 = vmax.f32 %v6924_v27, 0.0 }
 0x23a   : > { %v2019_v7 = vpop.f32.mrf.mxu0  ;;  %v2528_v18 = vpack.c.bf16 %v7564_v44, %v7563_v38  ;;  %v2018_v37 = vadd.f32 %v2017_v5, %v6847_v61  ;;  %v2132_v54 = vpop.f32.mrf.mxu1  ;;  %v2333_v9 = vmax.f32 %v6896_v13, 0.0  ;;  %v7566_v36 = vmax.f32 %v6899_v2, 0.0  ;;  %v7581_v38 = vld [vmem:[#allocation39_spill] sm:$0xff] }
 0x23b   : > { %7559 = vst [vmem:[#allocation52_spill] sm:$0xff] %v6994_v10  ;;  %7562 = vst [vmem:[#allocation49_spill] sm:$0xff] %v7003_v0  ;;  %v2545_v29 = vpack.c.bf16 %v7565_v41, %v2367_v52  ;;  %v2020_v45 = vadd.f32 %v2019_v7, %v6832_v47  ;;  %v7567_v30 = vmax.f32 %v6907_v43, 0.0  ;;  %v2131_v55 = vadd.f32 %v2130_v63, %v6858_v48 }
 0x23c   : > { %v2133_v16 = vadd.f32 %v2132_v54, %v6836_v32  ;;  %v2021_v17 = vpop.f32.mrf.mxu0  ;;  %2752 = vmatpush1.bf16.msra.mxu0 %v2543_v56  ;;  %v2335_v27 = vmax.f32 %v6915_v60, 0.0  ;;  %v2241_v6 = vmax.f32 %v2016_v4, 0.0  ;;  %v2134_v15 = vpop.f32.mrf.mxu1  ;;  %v2527_v13 = vpack.c.bf16 %v2349_v58, %v2333_v9  ;;  %v7577_v56 = vld [vmem:[#allocation42_spill] sm:$0xff] }
 0x23d   : > { %v2530_v25 = vpack.c.bf16 %v7567_v30, %v7566_v36  ;;  %v2257_v46 = vmax.f32 %v2020_v45, 0.0  ;;  %v2022_v12 = vadd.f32 %v2021_v17, %v6847_v61  ;;  %2793 = vmatpush1.bf16.msra.mxu1 %v2545_v29  ;;  %2753 = vmatprep.subr.bf16.mxu0 %v2528_v18  ;;  %v2243_v2 = vmax.f32 %v2129_v42, 0.0  ;;  %v7586_v45 = vld [vmem:[#allocation33_spill] sm:$0xff] }
 0x23e   : > { %v2259_v49 = vmax.f32 %v2133_v16, 0.0  ;;  %v2135_v43 = vadd.f32 %v2134_v15, %v6858_v48  ;;  %v7024_v3 = vpop.f32.mrf.mxu0  ;;  %v2529_v35 = vpack.c.bf16 %v2351_v24, %v2335_v27  ;;  %v2242_v22 = vmax.f32 %v2018_v37, 0.0  ;;  %v7028_v21 = vpop.f32.mrf.mxu1  ;;  %v7589_v15 = vld [vmem:[#allocation44_spill] sm:$0xff] }
 0x23f   : > { %2794 = vmatprep.subr.bf16.mxu1 %v2530_v25  ;;  %7568 = vst [vmem:[#allocation50_spill] sm:$0xff] %v7024_v3  ;;  %v7026_v51 = vpack.c.bf16 %v2257_v46, %v2241_v6  ;;  %v2258_v60 = vmax.f32 %v2022_v12, 0.0  ;;  %7570 = vst [vmem:[#allocation48_spill] sm:$0xff] %v7028_v21  ;;  %v7571_v31 = vmax.f32 %v6843_v59, 0.0  ;;  %v7572_v19 = vmax.f32 %v6883_v62, 0.0  ;;  %v7588_v12 = vld [vmem:[#allocation28_spill] sm:$0xff] }
 0x240   : > { %v2244_v14 = vmax.f32 %v2131_v55, 0.0  ;;  %v7034_v26 = vpack.c.bf16 %v2259_v49, %v2243_v2  ;;  %v2260_v20 = vmax.f32 %v2135_v43, 0.0  ;;  %v7036_v5 = vpop.f32.mrf.mxu0  ;;  %2754 = vmatpush1.bf16.msra.mxu0 %v2527_v13  ;;  %v1913_v58 = vadd.f32 %v6765_v28, %v6572_v53  ;;  %v7044_v59 = vpop.f32.mrf.mxu1  ;;  %v7590_v43 = vld [vmem:[#allocation30_spill] sm:$0xff] }
 0x241   : > { %7569 = vst [vmem:[#allocation47_spill] sm:$0xff] %v7026_v51  ;;  %v2514_v23 = vpack.c.bf16 %v7572_v19, %v7571_v31  ;;  %v2270_v52 = vmax.f32 %v6866_v57, 0.0  ;;  %v2303_v4 = vmax.f32 %v6887_v39, 0.0  ;;  %v7042_v63 = vpack.c.bf16 %v2258_v60, %v2242_v22  ;;  %2795 = vmatpush1.bf16.msra.mxu1 %v2529_v35  ;;  %2755 = vmatprep.subr.bf16.mxu0 %v6926_v34  ;;  %v7580_v39 = vld [vmem:[#allocation53_spill] sm:$0xff]  ;;  %v7583_v34 = vld [vmem:[#allocation40_spill] sm:$0xff]  ;;  %v7591_v22 = vld [vmem:[#allocation27_spill] sm:$0xff] }
 0x242   : > { %7573 = vst [vmem:[#allocation41_spill] sm:$0xff] %v7034_v26  ;;  %v2272_v62 = vmax.f32 %v6870_v50, 0.0  ;;  %v2285_v24 = vmax.f32 %v6874_v11, 0.0  ;;  %v7576_v8 = vmax.f32 %v7575_v33, 0.0  ;;  %v7578_v42 = vmax.f32 %v7577_v56, 0.0  ;;  %v7055_v57 = vpop.f32.mrf.mxu0  ;;  %v7062_v29 = vpop.f32.mrf.mxu1  ;;  %v7585_v11 = vld [vmem:[#allocation46_spill] sm:$0xff] }
 0x243   : > { %7574 = vst [vmem:[#allocation54_spill] sm:$0xff] %v7042_v63  ;;  %v7053_v28 = vpack.c.bf16 %v2260_v20, %v2244_v14  ;;  %2796 = vmatprep.subr.bf16.mxu1 %v2514_v23  ;;  %v2287_v7 = vmax.f32 %v7580_v39, 0.0  ;;  %v7582_v44 = vmax.f32 %v7581_v38, 0.0  ;;  %v7584_v41 = vmax.f32 %v7583_v34, 0.0  ;;  %v7592_v60 = vld [vmem:[#allocation32_spill] sm:$0xff]  ;;  %v7593_v31 = vld [vmem:[#allocation29_spill] sm:$0xff] }
 0x244   : > { %v2511_v53 = vpack.c.bf16 %v7578_v42, %v7576_v8  ;;  %v2269_v37 = vmax.f32 %v7585_v11, 0.0  ;;  %v7587_v54 = vmax.f32 %v7586_v45, 0.0  ;;  %v2031_v36 = vpop.f32.mrf.mxu0  ;;  %v2271_v30 = vmax.f32 %v1913_v58, 0.0  ;;  %v2144_v25 = vpop.f32.mrf.mxu1  ;;  %v7594_v20 = vld [vmem:[#allocation34_spill] sm:$0xff] }
 0x245   : > { %7579 = vst [vmem:[#allocation43_spill] sm:$0xff] %v7053_v28  ;;  %v2496_v18 = vpack.c.bf16 %v7582_v44, %v2270_v52  ;;  %v2513_v50 = vpack.c.bf16 %v7584_v41, %v2303_v4  ;;  %v7595_v52 = vld [vmem:[#allocation31_spill] sm:$0xff]  ;;  %v7597_v8 = vmov 0  }
 0x246   : > { %v2498_v9 = vpack.c.bf16 %v7587_v54, %v2272_v62  ;;  %2756 = vmatpush1.bf16.msra.mxu0 %v2511_v53  ;;  %v2495_v55 = vpack.c.bf16 %v2285_v24, %v2269_v37  ;;  %v7067_v16 = vpop.f32.mrf.mxu0  ;;  %v2497_v17 = vpack.c.bf16 %v2287_v7, %v2271_v30  ;;  %v7069_v27 = vpop.f32.mrf.mxu1  ;;  %v7596_v24 = vmov 1065369472  }
 0x247   : > { %2797 = vmatpush1.bf16.msra.mxu1 %v2513_v50  ;;  %2757 = vmatprep.subr.bf16.mxu0 %v2496_v18 }
 0x248   : > { %2798 = vmatprep.subr.bf16.mxu1 %v2498_v9  ;;  %v2037_v6 = vpop.f32.mrf.mxu0  ;;  %v2150_v46 = vpop.f32.mrf.mxu1 }
 0x24a   : > { %2758 = vmatpush1.bf16.msra.mxu0 %v2495_v55  ;;  %v7073_v13 = vpop.f32.mrf.mxu0  ;;  %v7075_v2 = vpop.f32.mrf.mxu1  ;;  %v7101_v55 = vadd.f32 %v7036_v5, %v6847_v61 }
 0x24b   : > { %2799 = vmatpush1.bf16.msra.mxu1 %v2497_v17  ;;  %2759 = vmatprep.subr.bf16.mxu0 %v7588_v12  ;;  %v7105_v17 = vadd.f32 %v7044_v59, %v6858_v48 }
 0x24c   : > { %2800 = vmatprep.subr.bf16.mxu1 %v7589_v15  ;;  %v2041_v49 = vpop.f32.mrf.mxu0  ;;  %v2154_v35 = vpop.f32.mrf.mxu1  ;;  %7598 = vst [vmem:[#allocation42_spill] sm:$0xff] %v7101_v55  ;;  %v7108_v15 = vadd.f32 %v2031_v36, %v6847_v61 }
 0x24d   : > { %7599 = vst [vmem:[#allocation53_spill] sm:$0xff] %v7105_v17  ;;  %v7120_v5 = vadd.f32 %v2041_v49, %v6847_v61  ;;  %v7123_v59 = vadd.f32 %v2154_v35, %v6858_v48 }
 0x24e   : > { %2760 = vmatpush1.bf16.msra.mxu0 %v7590_v43  ;;  %v7081_v19 = vpop.f32.mrf.mxu0  ;;  %v7083_v23 = vpop.f32.mrf.mxu1  ;;  %v7111_v43 = vadd.f32 %v2144_v25, %v6858_v48 }
 0x24f   : > { %2801 = vmatpush1.bf16.msra.mxu1 %v7591_v22  ;;  %2761 = vmatprep.subr.bf16.mxu0 %v7592_v60  ;;  %v7114_v22 = vadd.f32 %v2037_v6, %v6847_v61  ;;  %v7117_v60 = vadd.f32 %v2150_v46, %v6858_v48 }
 0x250   : > { %2802 = vmatprep.subr.bf16.mxu1 %v7593_v31  ;;  %v2047_v14 = vpop.f32.mrf.mxu0  ;;  %v2160_v58 = vpop.f32.mrf.mxu1  ;;  %7600 = vst [vmem:[#allocation39_spill] sm:$0xff] %v7111_v43 }
 0x251   : > { %v7129_v36 = vadd.f32 %v2160_v58, %v6858_v48 }
 0x252   : > { %2762 = vmatpush1.bf16.msra.mxu0 %v7594_v20  ;;  %v7087_v4 = vpop.f32.mrf.mxu0  ;;  %v7089_v62 = vpop.f32.mrf.mxu1  ;;  %v7126_v20 = vadd.f32 %v2047_v14, %v6847_v61 }
 0x253   : > { %2803 = vmatpush1.bf16.msra.mxu1 %v7595_v52 }
 0x254   : > { %v2051_v33 = vpop.f32.mrf.mxu0  ;;  %v2164_v56 = vpop.f32.mrf.mxu1 }
 0x255   : > { %2780 = vmatmul.mubr.bf16.vlgmr.msra.gmra.mxu0 %v7596_v24  ;;  %v7132_v6 = vadd.f32 %v2051_v33, %v6847_v61  ;;  %v7135_v46 = vadd.f32 %v2164_v56, %v6858_v48 }
 0x256   : > { %2821 = vmatmul.mubr.bf16.vlgmr.msra.gmra.mxu1 %v7596_v24  ;;  %2861 = vmatprep.mubr.bf16.mxu0 %v7597_v8  ;;  %v7095_v42 = vpop.f32.mrf.mxu0  ;;  %v7097_v53 = vpop.f32.mrf.mxu1 }
 0x257   : > { %2902 = vmatprep.mubr.bf16.mxu1 %v7597_v8 }
 0x258   : > { %v2057_v39 = vpop.f32.mrf.mxu0  ;;  %v2170_v7 = vpop.f32.mrf.mxu1 }
 0x259   : > { %v7138_v52 = vadd.f32 %v2057_v39, %v6847_v61  ;;  %v7141_v49 = vadd.f32 %v2170_v7, %v6858_v48 }
 0x25a   : > { %v2059_v38 = vpop.f32.mrf.mxu0  ;;  %v2172_v44 = vpop.f32.mrf.mxu1 }
 0x25b   : > { %v7144_v14 = vadd.f32 %v2059_v38, %v6832_v47  ;;  %v7147_v58 = vadd.f32 %v2172_v44, %v6836_v32 }
 0x25c   : > { %v2061_v18 = vpop.f32.mrf.mxu0  ;;  %v2174_v34 = vpop.f32.mrf.mxu1 }
 0x25d   : > { %v7150_v8 = vadd.f32 %v2061_v18, %v6847_v61  ;;  %v7153_v33 = vadd.f32 %v2174_v34, %v6858_v48 }
 0x25e   : > { %v2065_v41 = vpop.f32.mrf.mxu0  ;;  %v2178_v50 = vpop.f32.mrf.mxu1 }
 0x25f   : > { %v2066_v39 = vadd.f32 %v2065_v41, %v6832_v47 }
 0x260   : > { %v2067_v11 = vpop.f32.mrf.mxu0  ;;  %v2180_v37 = vpop.f32.mrf.mxu1 }
 0x261   : > { %v2068_v10 = vadd.f32 %v2067_v11, %v6847_v61  ;;  %v2181_v41 = vadd.f32 %v2180_v37, %v6858_v48 }
 0x262   : > { %v2069_v45 = vpop.f32.mrf.mxu0  ;;  %v2182_v54 = vpop.f32.mrf.mxu1 }
 0x263   : > { %v2402_v21 = vmax.f32 %v2068_v10, 0.0  ;;  %v2404_v43 = vmax.f32 %v2181_v41, 0.0  ;;  %v2050_v10 = vadd.f32 %v7087_v4, %v6832_v47  ;;  %v2387_v4 = vmax.f32 %v7147_v58, 0.0 }
 0x264   : > { %v2071_v9 = vpop.f32.mrf.mxu0  ;;  %v2184_v30 = vpop.f32.mrf.mxu1  ;;  %v2153_v58 = vadd.f32 %v7075_v2, %v6836_v32  ;;  %v2030_v2 = vadd.f32 %v7055_v57, %v6832_v47 }
 0x265   : > { %v2072_v24 = vadd.f32 %v2071_v9, %v6847_v61  ;;  %v2185_v1 = vadd.f32 %v2184_v30, %v6858_v48  ;;  %v2183_v30 = vadd.f32 %v2182_v54, %v6836_v32 }
 0x266   : > { %v2075_v12 = vpop.f32.mrf.mxu0  ;;  %v2188_v31 = vpop.f32.mrf.mxu1 }
 0x267   : > { %v2076_v44 = vadd.f32 %v2075_v12, %v6832_v47  ;;  %v2189_v9 = vadd.f32 %v2188_v31, %v6836_v32  ;;  %v2420_v17 = vmax.f32 %v2185_v1, 0.0  ;;  %v2179_v31 = vadd.f32 %v2178_v50, %v6836_v32 }
 0x268   : > { %v2077_v25 = vpop.f32.mrf.mxu0  ;;  %v2190_v35 = vpop.f32.mrf.mxu1  ;;  %v2056_v1 = vadd.f32 %v7095_v42, %v6832_v47  ;;  %v2372_v42 = vmax.f32 %v7141_v49, 0.0  ;;  %v2159_v49 = vadd.f32 %v7083_v23, %v6836_v32  ;;  %v2036_v23 = vadd.f32 %v7067_v16, %v6832_v47 }
 0x269   : > { %v2078_v7 = vadd.f32 %v2077_v25, %v6847_v61  ;;  %v2191_v18 = vadd.f32 %v2190_v35, %v6858_v48  ;;  %v2418_v35 = vmax.f32 %v2072_v24, 0.0  ;;  %v2433_v11 = vmax.f32 %v2076_v44, 0.0 }
 0x26a   : > { %v2079_v56 = vpop.f32.mrf.mxu0  ;;  %v2192_v38 = vpop.f32.mrf.mxu1  ;;  %v2566_v50 = vpack.c.bf16 %v2420_v17, %v2404_v43  ;;  %v2308_v16 = vmax.f32 %v7117_v60, 0.0  ;;  %v7604_v60 = vld [vmem:[#allocation42_spill] sm:$0xff] }
 0x26b   : > { %v2080_v40 = vadd.f32 %v2079_v56, %v6832_v47  ;;  %v2193_v0 = vadd.f32 %v2192_v38, %v6836_v32  ;;  %v2070_v56 = vadd.f32 %v2069_v45, %v6832_v47  ;;  %v2434_v28 = vmax.f32 %v2078_v7, 0.0 }
 0x26c   : > { %v2081_v34 = vpop.f32.mrf.mxu0  ;;  %v2194_v26 = vpop.f32.mrf.mxu1  ;;  %v2436_v55 = vmax.f32 %v2191_v18, 0.0  ;;  %v2401_v7 = vmax.f32 %v2066_v39, 0.0  ;;  %v2322_v18 = vmax.f32 %v7120_v5, 0.0  ;;  %v2339_v5 = vmax.f32 %v2159_v49, 0.0  ;;  %v7615_v49 = vld [vmem:[#allocation22_spill] sm:$0xff] }
 0x26d   : > { %v2082_v25 = vadd.f32 %v2081_v34, %v6847_v61  ;;  %v2449_v51 = vmax.f32 %v2080_v40, 0.0  ;;  %v2195_v12 = vadd.f32 %v2194_v26, %v6858_v48  ;;  %v2451_v38 = vmax.f32 %v2193_v0, 0.0 }
 0x26e   : > { %v2435_v61 = vmax.f32 %v2189_v9, 0.0  ;;  %v2417_v45 = vmax.f32 %v2070_v56, 0.0  ;;  %v2386_v40 = vmax.f32 %v7150_v8, 0.0  ;;  %v2419_v48 = vmax.f32 %v2183_v30, 0.0 }
 0x26f   : > { %v2450_v63 = vmax.f32 %v2082_v25, 0.0  ;;  %v2452_v37 = vmax.f32 %v2195_v12, 0.0  ;;  %v2579_v3 = vpack.c.bf16 %v2449_v51, %v2433_v11  ;;  %v2564_v26 = vpack.c.bf16 %v2418_v35, %v2402_v21 }
 0x270   : > { %v2581_v24 = vpack.c.bf16 %v2451_v38, %v2435_v61  ;;  %v2388_v0 = vmax.f32 %v7153_v33, 0.0  ;;  %v2169_v51 = vadd.f32 %v7097_v53, %v6836_v32  ;;  %v2403_v21 = vmax.f32 %v2179_v31, 0.0 }
 0x271   : > { %v2580_v34 = vpack.c.bf16 %v2450_v63, %v2434_v28  ;;  %v2582_v54 = vpack.c.bf16 %v2452_v37, %v2436_v55  ;;  %v2370_v63 = vmax.f32 %v7138_v52, 0.0  ;;  %v2163_v28 = vadd.f32 %v7089_v62, %v6836_v32 }
 0x272   : > { %v2385_v55 = vmax.f32 %v7144_v14, 0.0  ;;  %v2563_v17 = vpack.c.bf16 %v2417_v45, %v2401_v7  ;;  %v2565_v53 = vpack.c.bf16 %v2419_v48, %v2403_v21  ;;  %v2046_v52 = vadd.f32 %v7081_v19, %v6832_v47  ;;  %v7606_v21 = vld [vmem:[#allocation54_spill] sm:$0xff] }
 0x273   : > { %2829 = vmatprep.subr.bf16.mxu0 %v2580_v34  ;;  %2870 = vmatprep.subr.bf16.mxu1 %v2582_v54  ;;  %v2548_v43 = vpack.c.bf16 %v2386_v40, %v2370_v63  ;;  %v2356_v8 = vmax.f32 %v7135_v46, 0.0  ;;  %v2369_v33 = vmax.f32 %v2056_v1, 0.0  ;;  %v2550_v39 = vpack.c.bf16 %v2388_v0, %v2372_v42  ;;  %v7608_v42 = vld [vmem:[#allocation47_spill] sm:$0xff] }
 0x274   : > { %2830 = vmatpush1.bf16.msra.mxu0 %v2579_v3  ;;  %2871 = vmatpush1.bf16.msra.mxu1 %v2581_v24  ;;  %v2354_v3 = vmax.f32 %v7132_v6, 0.0  ;;  %v2040_v62 = vadd.f32 %v7073_v13, %v6832_v47  ;;  %v2338_v6 = vmax.f32 %v7126_v20, 0.0  ;;  %v2371_v14 = vmax.f32 %v2169_v51, 0.0 }
 0x275   : > { %2831 = vmatprep.subr.bf16.mxu0 %v2564_v26  ;;  %2872 = vmatprep.subr.bf16.mxu1 %v2566_v50  ;;  %v2340_v19 = vmax.f32 %v7129_v36, 0.0  ;;  %v2353_v46 = vmax.f32 %v2050_v10, 0.0  ;;  %v2547_v44 = vpack.c.bf16 %v2385_v55, %v2369_v33  ;;  %v2355_v41 = vmax.f32 %v2163_v28, 0.0  ;;  %v7607_v28 = vld [vmem:[#allocation43_spill] sm:$0xff] }
 0x276   : > { %v2532_v13 = vpack.c.bf16 %v2354_v3, %v2338_v6  ;;  %v2549_v9 = vpack.c.bf16 %v2387_v4, %v2371_v14  ;;  %v2324_v20 = vmax.f32 %v7123_v59, 0.0  ;;  %v2337_v25 = vmax.f32 %v2046_v52, 0.0  ;;  %v7609_v3 = vld [vmem:[#allocation41_spill] sm:$0xff]  ;;  %v7610_v4 = vld [vmem:[#allocation52_spill] sm:$0xff] }
 0x277   : > { %v2534_v56 = vpack.c.bf16 %v2356_v8, %v2340_v19  ;;  %v2149_v36 = vadd.f32 %v7069_v27, %v6836_v32  ;;  %v2306_v30 = vmax.f32 %v7114_v22, 0.0  ;;  %v2143_v12 = vadd.f32 %v7062_v29, %v6836_v32  ;;  %v7601_v27 = vld [vmem:[#allocation50_spill] sm:$0xff]  ;;  %v7602_v22 = vld [vmem:[#allocation39_spill] sm:$0xff]  ;;  %v7603_v29 = vld [vmem:[#allocation48_spill] sm:$0xff] }
 0x278   : > { %2832 = vmatpush1.bf16.msra.mxu0 %v2563_v17  ;;  %2873 = vmatpush1.bf16.msra.mxu1 %v2565_v53  ;;  %v2321_v59 = vmax.f32 %v2040_v62, 0.0  ;;  %v2531_v35 = vpack.c.bf16 %v2353_v46, %v2337_v25  ;;  %v2290_v38 = vmax.f32 %v7108_v15, 0.0  ;;  %v2323_v11 = vmax.f32 %v2153_v58, 0.0  ;;  %v7605_v15 = vld [vmem:[#allocation53_spill] sm:$0xff]  ;;  %v7613_v8 = vld [vmem:[#allocation51_spill] sm:$0xff] }
 0x279   : > { %2833 = vmatprep.subr.bf16.mxu0 %v2548_v43  ;;  %2874 = vmatprep.subr.bf16.mxu1 %v2550_v39  ;;  %v2516_v57 = vpack.c.bf16 %v2322_v18, %v2306_v30  ;;  %v2533_v37 = vpack.c.bf16 %v2355_v41, %v2339_v5  ;;  %v2026_v31 = vadd.f32 %v7601_v27, %v6832_v47  ;;  %v2292_v61 = vmax.f32 %v7602_v22, 0.0  ;;  %v7611_v43 = vld [vmem:[#allocation49_spill] sm:$0xff] }
 0x27a   : > { %v2305_v34 = vmax.f32 %v2036_v23, 0.0  ;;  %v2518_v45 = vpack.c.bf16 %v2324_v20, %v2308_v16  ;;  %v2139_v54 = vadd.f32 %v7603_v29, %v6836_v32  ;;  %v2274_v40 = vmax.f32 %v7604_v60, 0.0  ;;  %v7612_v53 = vld [vmem:[#allocation45_spill] sm:$0xff] }
 0x27b   : > { %v2307_v48 = vmax.f32 %v2149_v36, 0.0  ;;  %v2276_v26 = vmax.f32 %v7605_v15, 0.0  ;;  %v2289_v24 = vmax.f32 %v2030_v2, 0.0  ;;  %v2291_v0 = vmax.f32 %v2143_v12, 0.0 }
 0x27c   : > { %2834 = vmatpush1.bf16.msra.mxu0 %v2547_v44  ;;  %2875 = vmatpush1.bf16.msra.mxu1 %v2549_v9  ;;  %v2515_v1 = vpack.c.bf16 %v2321_v59, %v2305_v34  ;;  %v2500_v47 = vpack.c.bf16 %v2290_v38, %v2274_v40  ;;  %v2273_v50 = vmax.f32 %v2026_v31, 0.0  ;;  %v2275_v51 = vmax.f32 %v2139_v54, 0.0  ;;  %v2453_v31 = vld [vmem:[#allocation2] sm:$0xff] }
 0x27d   : > { %2835 = vmatprep.subr.bf16.mxu0 %v2532_v13  ;;  %2876 = vmatprep.subr.bf16.mxu1 %v2534_v56  ;;  %v2517_v7 = vpack.c.bf16 %v2323_v11, %v2307_v48  ;;  %v2502_v10 = vpack.c.bf16 %v2292_v61, %v2276_v26  ;;  %v5789_v55 = vmov 1966171168   ;;  %v7614_v33 = vmov 1065369472  }
 0x27e   : > { %v2499_v32 = vpack.c.bf16 %v2289_v24, %v2273_v50  ;;  %v2501_v63 = vpack.c.bf16 %v2291_v0, %v2275_v51  ;;  %v2932_v17 = vunpack.c.l.s4 %v5789_v55 }
 0x280   : > { %2836 = vmatpush1.bf16.msra.mxu0 %v2531_v35  ;;  %2877 = vmatpush1.bf16.msra.mxu1 %v2533_v37  ;;  %v2933_v52 = vunpack.c.0.s8 %v2932_v17 }
 0x281   : > { %2837 = vmatprep.subr.bf16.mxu0 %v2516_v57  ;;  %2878 = vmatprep.subr.bf16.mxu1 %v2518_v45 }
 0x282   : > { %v2936_v6 = vsub.s32 %v2933_v52, %v7615_v49  ;;  %v2454_v52 = vld [vmem:[#allocation2 + $0x8] sm:$0xff] }
 0x284   : > { %2838 = vmatpush1.bf16.msra.mxu0 %v2515_v1  ;;  %2879 = vmatpush1.bf16.msra.mxu1 %v2517_v7 }
 0x285   : > { %2839 = vmatprep.subr.bf16.mxu0 %v2500_v47  ;;  %2880 = vmatprep.subr.bf16.mxu1 %v2502_v10 }
 0x288   : > { %2840 = vmatpush1.bf16.msra.mxu0 %v2499_v32  ;;  %2881 = vmatpush1.bf16.msra.mxu1 %v2501_v63 }
 0x289   : > { %2841 = vmatprep.subr.bf16.mxu0 %v7606_v21  ;;  %2882 = vmatprep.subr.bf16.mxu1 %v7607_v28 }
 0x28c   : > { %2842 = vmatpush1.bf16.msra.mxu0 %v7608_v42  ;;  %2883 = vmatpush1.bf16.msra.mxu1 %v7609_v3 }
 0x28d   : > { %2843 = vmatprep.subr.bf16.mxu0 %v7610_v4  ;;  %2884 = vmatprep.subr.bf16.mxu1 %v7611_v43 }
 0x290   : > { %2844 = vmatpush1.bf16.msra.mxu0 %v7612_v53  ;;  %2885 = vmatpush1.bf16.msra.mxu1 %v7613_v8 }
 0x293   : > { %2862 = vmatmul.mubr.bf16.vlgmr.msra.gmra.mxu0 %v7614_v33  ;;  %2903 = vmatmul.mubr.bf16.vlgmr.msra.gmra.mxu1 %v7614_v33 }
 0x296   : > { %v2617_v39 = vpop.f32.mrf.mxu0  ;;  %v2658_v62 = vpop.f32.mrf.mxu1 }
 0x298   : > { %v2619_v14 = vpop.f32.mrf.mxu0  ;;  %v2660_v19 = vpop.f32.mrf.mxu1 }
 0x299   : > { %v2927_v58 = vcombine.low %v2617_v39, %v2619_v14  ;;  %v2928_v46 = vcombine.low %v2658_v62, %v2660_v19 }
 0x29a   : > { %v2621_v44 = vpop.f32.mrf.mxu0  ;;  %v2662_v41 = vpop.f32.mrf.mxu1 }
 0x29b   : > { %v2937_v18 = vrot.slane %v2927_v58, %v2936_v6  ;;  %v2944_v13 = vrot.slane %v2928_v46, %v2936_v6 }
 0x29c   : > { %v2622_v9 = vpop.f32.mrf.mxu0  ;;  %v2663_v23 = vpop.f32.mrf.mxu1 }
 0x29d   : > { %v2959_v20 = vcombine.low %v2937_v18, %v2944_v13 }
 0x29f   : > { %v2967_v57 = vrot.slane %v2959_v20, %v2936_v6 }
 0x2d5   : > { %v2699_v25 = vpop.f32.mrf.mxu0 }
 0x2d6   : > { %v2740_v56 = vpop.f32.mrf.mxu1 }
 0x2d7   : > { %v2701_v2 = vpop.f32.mrf.mxu0 }
 0x2d8   : > { %v2929_v36 = vcombine.low %v2699_v25, %v2701_v2  ;;  %v2742_v30 = vpop.f32.mrf.mxu1 }
 0x2d9   : > { %v2930_v5 = vcombine.low %v2740_v56, %v2742_v30  ;;  %v2703_v12 = vpop.f32.mrf.mxu0 }
 0x2da   : > { %v2951_v16 = vrot.slane %v2929_v36, %v2936_v6  ;;  %v2744_v59 = vpop.f32.mrf.mxu1 }
 0x2db   : > { %v2958_v35 = vrot.slane %v2930_v5, %v2936_v6  ;;  %v2704_v38 = vpop.f32.mrf.mxu0 }
 0x2dc   : > { %v2745_v11 = vpop.f32.mrf.mxu1 }
 0x2dd   : > { %v2960_v37 = vcombine.low %v2951_v16, %v2958_v35 }
 0x2df   : > { %v2974_v27 = vrot.slane %v2960_v37, %v2936_v6 }
 0x2e1   : > { %v2975_v22 = vcombine.low %v2967_v57, %v2974_v27 }
 0x2e3   : > { %v3027_v61 = vadd.f32 %v2975_v22, %v2453_v31 }
 0x2e5   : > { %3029 = vst [vmem:[#allocation2] sm:$0xff] %v3027_v61 }
 0x315   : > { %v2781_v34 = vpop.f32.mrf.mxu0 }
 0x316   : > { %v2822_v45 = vpop.f32.mrf.mxu1 }
 0x317   : > { %v2783_v29 = vpop.f32.mrf.mxu0 }
 0x318   : > { %v2976_v54 = vcombine.low %v2781_v34, %v2783_v29  ;;  %v2824_v60 = vpop.f32.mrf.mxu1 }
 0x319   : > { %v2977_v40 = vcombine.low %v2822_v45, %v2824_v60  ;;  %v2785_v48 = vpop.f32.mrf.mxu0 }
 0x31a   : > { %v2986_v15 = vrot.slane %v2976_v54, %v2936_v6  ;;  %v2826_v26 = vpop.f32.mrf.mxu1 }
 0x31b   : > { %v2993_v24 = vrot.slane %v2977_v40, %v2936_v6  ;;  %v2786_v1 = vpop.f32.mrf.mxu0 }
 0x31c   : > { %v2827_v0 = vpop.f32.mrf.mxu1 }
 0x31d   : > { %v3008_v47 = vcombine.low %v2986_v15, %v2993_v24 }
 0x31f   : > { %v3016_v43 = vrot.slane %v3008_v47, %v2936_v6 }
 0x353   : > { %v2863_v7 = vpop.f32.mrf.mxu0  ;;  %v2904_v50 = vpop.f32.mrf.mxu1 }
 0x355   : > { %v2865_v10 = vpop.f32.mrf.mxu0  ;;  %v2906_v32 = vpop.f32.mrf.mxu1 }
 0x356   : > { %v2978_v51 = vcombine.low %v2863_v7, %v2865_v10  ;;  %v2979_v63 = vcombine.low %v2904_v50, %v2906_v32 }
 0x357   : > { %v2867_v21 = vpop.f32.mrf.mxu0  ;;  %v2908_v42 = vpop.f32.mrf.mxu1 }
 0x358   : > { %v3000_v28 = vrot.slane %v2978_v51, %v2936_v6  ;;  %v3007_v55 = vrot.slane %v2979_v63, %v2936_v6 }
 0x359   : > { %v2868_v17 = vpop.f32.mrf.mxu0  ;;  %v2909_v3 = vpop.f32.mrf.mxu1 }
 0x35a   : > { %v3009_v4 = vcombine.low %v3000_v28, %v3007_v55 }
 0x35c   : > { %v3023_v53 = vrot.slane %v3009_v4, %v2936_v6 }
 0x35e   : > { %v3024_v8 = vcombine.low %v3016_v43, %v3023_v53  ;;  %3034 = sbr.rel (%p4875_p2) target bundleno = 1399 (0x577), region = 76 }
 0x360   : > { %v3028_v33 = vadd.f32 %v3024_v8, %v2454_v52 }
 0x362   : > { %3030 = vst [vmem:[#allocation2 + $0x8] sm:$0xff] %v3028_v33 }
 0x363   : > { %v5380_v39 = vld [vmem:[#allocation9 + $0x78] sm:$0xff]   ;;  %v5384_v58 = vld [vmem:[#allocation9 + $0x70] sm:$0xff]   ;;  %v5388_v44 = vld [vmem:[#allocation9 + $0x68] sm:$0xff]   ;;  %vm5791_vm0 = vmmov 0  }
 0x364   : > { %v5381_v62 = vld [vmem:[#allocation9 + $0xf8] sm:$0xff]   ;;  %5015 = vmatprep.subr.bf16.mxu0 %v5380_v39  ;;  %v5385_v19 = vld [vmem:[#allocation9 + $0xf0] sm:$0xff]   ;;  %v5389_v18 = vld [vmem:[#allocation9 + $0xe8] sm:$0xff]  }
 0x365   : > { %v5382_v49 = vld [vmem:[#allocation9 + $0x38] sm:$0xff]   ;;  %5037 = vmatprep.subr.bf16.mxu1 %v5381_v62  ;;  %v5386_v46 = vld [vmem:[#allocation9 + $0x30] sm:$0xff]   ;;  %v5390_v41 = vld [vmem:[#allocation9 + $0x28] sm:$0xff]  }
 0x366   : > { %v5383_v14 = vld [vmem:[#allocation9 + $0xb8] sm:$0xff]   ;;  %5016 = vmatpush3.bf16.msra.mxu0 %v5382_v49  ;;  %v5387_v6 = vld [vmem:[#allocation9 + $0xb0] sm:$0xff]   ;;  %v5391_v13 = vld [vmem:[#allocation9 + $0xa8] sm:$0xff]  }
 0x367   : > { %5038 = vmatpush3.bf16.msra.mxu1 %v5383_v14  ;;  %5017 = vmatprep.subr.bf16.mxu0 %v5384_v58  ;;  %v5392_v9 = vld [vmem:[#allocation9 + $0x60] sm:$0xff]   ;;  %v5396_v56 = vld [vmem:[#allocation9 + $0x58] sm:$0xff]   ;;  %v5400_v5 = vld [vmem:[#allocation9 + $0x50] sm:$0xff]  }
 0x368   : > { %5039 = vmatprep.subr.bf16.mxu1 %v5385_v19  ;;  %v5393_v23 = vld [vmem:[#allocation9 + $0xe0] sm:$0xff]   ;;  %v5397_v2 = vld [vmem:[#allocation9 + $0xd8] sm:$0xff]   ;;  %v5401_v12 = vld [vmem:[#allocation9 + $0xd0] sm:$0xff]  }
 0x369   : > { %v5394_v20 = vld [vmem:[#allocation9 + $0x20] sm:$0xff]   ;;  %v5398_v36 = vld [vmem:[#allocation9 + $0x18] sm:$0xff]   ;;  %v5402_v16 = vld [vmem:[#allocation9 + $0x10] sm:$0xff]  }
 0x36a   : > { %5018 = vmatpush3.bf16.msra.mxu0 %v5386_v46  ;;  %v5395_v25 = vld [vmem:[#allocation9 + $0xa0] sm:$0xff]   ;;  %v5399_v30 = vld [vmem:[#allocation9 + $0x98] sm:$0xff]   ;;  %v5403_v59 = vld [vmem:[#allocation9 + $0x90] sm:$0xff]  }
 0x36b   : > { %5040 = vmatpush3.bf16.msra.mxu1 %v5387_v6  ;;  %5019 = vmatprep.subr.bf16.mxu0 %v5388_v44  ;;  %v5404_v35 = vld [vmem:[#allocation9 + $0x48] sm:$0xff]   ;;  %v5408_v37 = vld [vmem:[#allocation9 + $0x40] sm:$0xff]   ;;  %v5412_v45 = vld [vmem:[#allocation9 + $0x178] sm:$0xff]  }
 0x36c   : > { %5041 = vmatprep.subr.bf16.mxu1 %v5389_v18  ;;  %v5405_v38 = vld [vmem:[#allocation9 + $0xc8] sm:$0xff]   ;;  %v5409_v27 = vld [vmem:[#allocation9 + $0xc0] sm:$0xff]   ;;  %v5413_v29 = vld [vmem:[#allocation9 + $0x1f8] sm:$0xff]  }
 0x36d   : > { %v5406_v11 = vld [vmem:[#allocation9 + $0x8] sm:$0xff]   ;;  %v5410_v31 = vld [vmem:[#allocation9] sm:$0xff]   ;;  %v7619_v24 = vld [vmem:[#allocation24_spill] sm:$0xff] }
 0x36e   : > { %5020 = vmatpush3.bf16.msra.mxu0 %v5390_v41  ;;  %v5407_v57 = vld [vmem:[#allocation9 + $0x88] sm:$0xff]   ;;  %v5411_v22 = vld [vmem:[#allocation9 + $0x80] sm:$0xff]   ;;  %v5414_v0 = vld [vmem:[#allocation9 + $0x138] sm:$0xff]  }
 0x36f   : > { %5042 = vmatpush3.bf16.msra.mxu1 %v5391_v13  ;;  %5021 = vmatprep.subr.bf16.mxu0 %v5392_v9  ;;  %v3035_v61 = vld [vmem:[#allocation2] sm:$0xff]  ;;  %v7618_v15 = vld [vmem:[#allocation23_spill] sm:$0xff]  ;;  %v5415_v47 = vld [vmem:[#allocation9 + $0x1b8] sm:$0xff]  }
 0x370   : > { %5043 = vmatprep.subr.bf16.mxu1 %v5393_v23  ;;  %v7229_v34 = vmul.f32 0.00390625, %v3035_v61  ;;  %v7616_v54 = vld [vmem:[#allocation25_spill] sm:$0xff]  ;;  %v7617_v40 = vld [vmem:[#allocation26_spill] sm:$0xff]  ;;  %v5416_v42 = vld [vmem:[#allocation9 + $0x170] sm:$0xff]  }
 0x371   : > { %v7620_v7 = vld [vmem:[#allocation37_spill] sm:$0xff]  ;;  %v7621_v10 = vld [vmem:[#allocation38_spill] sm:$0xff]  ;;  %v5417_v55 = vld [vmem:[#allocation9 + $0x1f0] sm:$0xff]  }
 0x372   : > { %5022 = vmatpush3.bf16.msra.mxu0 %v5394_v20  ;;  %v3048_v60 = vrot.slane %v7229_v34, %v7616_v54  ;;  %v3056_v48 = vrot.slane %v7229_v34, %v7617_v40  ;;  %v3044_v26 = vrot.slane %v7229_v34, %v7618_v15  ;;  %v3052_v1 = vrot.slane %v7229_v34, %v7619_v24  ;;  %v5418_v17 = vld [vmem:[#allocation9 + $0x130] sm:$0xff]   ;;  %v5420_v53 = vld [vmem:[#allocation9 + $0x168] sm:$0xff]   ;;  %v5424_v39 = vld [vmem:[#allocation9 + $0x160] sm:$0xff]  }
 0x373   : > { %5044 = vmatpush3.bf16.msra.mxu1 %v5395_v25  ;;  %5023 = vmatprep.subr.bf16.mxu0 %v5396_v56  ;;  %v3064_v50 = vrot.slane %v7229_v34, %v7620_v7  ;;  %v3072_v51 = vrot.slane %v7229_v34, %v7621_v10  ;;  %v5419_v43 = vld [vmem:[#allocation9 + $0x1b0] sm:$0xff]   ;;  %v5421_v52 = vld [vmem:[#allocation9 + $0x1e8] sm:$0xff]   ;;  %v5425_v62 = vld [vmem:[#allocation9 + $0x1e0] sm:$0xff]  }
 0x374   : > { %5045 = vmatprep.subr.bf16.mxu1 %v5397_v2  ;;  %v3122_v32 = vpack.c.bf16 %v3048_v60, %v3048_v60  ;;  %v3124_v63 = vpack.c.bf16 %v3056_v48, %v3056_v48  ;;  %v3121_v21 = vpack.c.bf16 %v3044_v26, %v3044_v26  ;;  %v3123_v28 = vpack.c.bf16 %v3052_v1, %v3052_v1  ;;  %v5422_v8 = vld [vmem:[#allocation9 + $0x128] sm:$0xff]   ;;  %v5426_v49 = vld [vmem:[#allocation9 + $0x120] sm:$0xff]   ;;  %v5428_v58 = vld [vmem:[#allocation9 + $0x158] sm:$0xff]  }
 0x375   : > { %v3126_v3 = vpack.c.bf16 %v3064_v50, %v3064_v50  ;;  %v3128_v4 = vpack.c.bf16 %v3072_v51, %v3072_v51  ;;  %v5423_v33 = vld [vmem:[#allocation9 + $0x1a8] sm:$0xff]   ;;  %v5427_v14 = vld [vmem:[#allocation9 + $0x1a0] sm:$0xff]   ;;  %v5429_v19 = vld [vmem:[#allocation9 + $0x1d8] sm:$0xff]  }
 0x376   : > { %5024 = vmatpush3.bf16.msra.mxu0 %v5398_v36  ;;  %4194 = vmatprep.mubr.bf16.mxu0 %v3122_v32  ;;  %v5430_v46 = vld [vmem:[#allocation9 + $0x118] sm:$0xff]   ;;  %v5432_v44 = vld [vmem:[#allocation9 + $0x150] sm:$0xff]   ;;  %v5436_v9 = vld [vmem:[#allocation9 + $0x148] sm:$0xff]  }
 0x377   : > { %5046 = vmatpush3.bf16.msra.mxu1 %v5399_v30  ;;  %5025 = vmatprep.subr.bf16.mxu0 %v5400_v5  ;;  %v5431_v6 = vld [vmem:[#allocation9 + $0x198] sm:$0xff]   ;;  %v5433_v18 = vld [vmem:[#allocation9 + $0x1d0] sm:$0xff]   ;;  %v5437_v23 = vld [vmem:[#allocation9 + $0x1c8] sm:$0xff]  }
 0x378   : > { %5047 = vmatprep.subr.bf16.mxu1 %v5401_v12  ;;  %4234 = vmatprep.mubr.bf16.mxu1 %v3124_v63  ;;  %v5434_v41 = vld [vmem:[#allocation9 + $0x110] sm:$0xff]   ;;  %v5438_v20 = vld [vmem:[#allocation9 + $0x108] sm:$0xff]   ;;  %v5440_v56 = vld [vmem:[#allocation9 + $0x140] sm:$0xff]  }
 0x379   : > { %v5435_v13 = vld [vmem:[#allocation9 + $0x190] sm:$0xff]   ;;  %v5439_v25 = vld [vmem:[#allocation9 + $0x188] sm:$0xff]   ;;  %v5441_v2 = vld [vmem:[#allocation9 + $0x1c0] sm:$0xff]  }
 0x37a   : > { %5026 = vmatpush3.bf16.msra.mxu0 %v5402_v16  ;;  %v5442_v36 = vld [vmem:[#allocation9 + $0x100] sm:$0xff]   ;;  %v7622_v5 = vld [vmem:[#allocation35_spill] sm:$0xff]  ;;  %v7623_v16 = vld [vmem:[#allocation36_spill] sm:$0xff] }
 0x37b   : > { %5048 = vmatpush3.bf16.msra.mxu1 %v5403_v59  ;;  %5027 = vmatprep.subr.bf16.mxu0 %v5404_v35  ;;  %v5443_v30 = vld [vmem:[#allocation9 + $0x180] sm:$0xff]   ;;  %v3060_v12 = vrot.slane %v7229_v34, %v7622_v5  ;;  %v3068_v59 = vrot.slane %v7229_v34, %v7623_v16  ;;  %v5444_v35 = vld [vmem:[#allocation9 + $0x278] sm:$0xff]   ;;  %v5450_v61 = vld [vmem:[#allocation9 + $0x230] sm:$0xff]  }
 0x37c   : > { %5049 = vmatprep.subr.bf16.mxu1 %v5405_v38  ;;  %v5445_v38 = vld [vmem:[#allocation9 + $0x2f8] sm:$0xff]   ;;  %v5451_v34 = vld [vmem:[#allocation9 + $0x2b0] sm:$0xff]   ;;  %v5454_v60 = vld [vmem:[#allocation9 + $0x228] sm:$0xff]  }
 0x37d   : > { %v5455_v48 = vld [vmem:[#allocation9 + $0x2a8] sm:$0xff]   ;;  %v5456_v26 = vld [vmem:[#allocation9 + $0x260] sm:$0xff]   ;;  %v5460_v50 = vld [vmem:[#allocation9 + $0x258] sm:$0xff]  }
 0x37e   : > { %5028 = vmatpush3.bf16.msra.mxu0 %v5406_v11  ;;  %v5446_v11 = vld [vmem:[#allocation9 + $0x238] sm:$0xff]   ;;  %v5457_v1 = vld [vmem:[#allocation9 + $0x2e0] sm:$0xff]  }
 0x37f   : > { %5050 = vmatpush3.bf16.msra.mxu1 %v5407_v57  ;;  %5029 = vmatprep.subr.bf16.mxu0 %v5408_v37  ;;  %v3125_v57 = vpack.c.bf16 %v3060_v12, %v3060_v12  ;;  %v3127_v37 = vpack.c.bf16 %v3068_v59, %v3068_v59  ;;  %v5461_v51 = vld [vmem:[#allocation9 + $0x2d8] sm:$0xff]   ;;  %v5488_v12 = vld [vmem:[#allocation9 + $0x360] sm:$0xff]  }
 0x380   : > { %5051 = vmatprep.subr.bf16.mxu1 %v5409_v27  ;;  %v5447_v27 = vld [vmem:[#allocation9 + $0x2b8] sm:$0xff]   ;;  %v5489_v59 = vld [vmem:[#allocation9 + $0x3e0] sm:$0xff]  }
 0x381   : > { %v5462_v32 = vld [vmem:[#allocation9 + $0x218] sm:$0xff]  }
 0x382   : > { %5030 = vmatpush3.bf16.msra.mxu0 %v5410_v31  ;;  %v5448_v31 = vld [vmem:[#allocation9 + $0x270] sm:$0xff]   ;;  %v5463_v63 = vld [vmem:[#allocation9 + $0x298] sm:$0xff]  }
 0x383   : > { %5052 = vmatpush3.bf16.msra.mxu1 %v5411_v22  ;;  %5059 = vmatprep.subr.bf16.mxu0 %v5412_v45  ;;  %v5449_v22 = vld [vmem:[#allocation9 + $0x2f0] sm:$0xff]   ;;  %v5452_v45 = vld [vmem:[#allocation9 + $0x268] sm:$0xff]  }
 0x384   : > { %5081 = vmatprep.subr.bf16.mxu1 %v5413_v29  ;;  %v5453_v29 = vld [vmem:[#allocation9 + $0x2e8] sm:$0xff]  }
 0x385   : > { %4195 = vmatmul.mubr.bf16.vlgmr.msra.gmra.mxu0 %v3121_v21  ;;  %v5464_v21 = vld [vmem:[#allocation9 + $0x250] sm:$0xff]  }
 0x386   : > { %4235 = vmatmul.mubr.bf16.vlgmr.msra.gmra.mxu1 %v3123_v28  ;;  %5060 = vmatpush3.bf16.msra.mxu0 %v5414_v0  ;;  %v5458_v0 = vld [vmem:[#allocation9 + $0x220] sm:$0xff]   ;;  %v5465_v28 = vld [vmem:[#allocation9 + $0x2d0] sm:$0xff]  }
 0x387   : > { %5082 = vmatpush3.bf16.msra.mxu1 %v5415_v47  ;;  %5061 = vmatprep.subr.bf16.mxu0 %v5416_v42  ;;  %v5459_v47 = vld [vmem:[#allocation9 + $0x2a0] sm:$0xff]   ;;  %v5466_v42 = vld [vmem:[#allocation9 + $0x210] sm:$0xff]  }
 0x388   : > { %5083 = vmatprep.subr.bf16.mxu1 %v5417_v55  ;;  %4274 = vmatprep.mubr.bf16.mxu0 %v3126_v3  ;;  %v5467_v55 = vld [vmem:[#allocation9 + $0x290] sm:$0xff]   ;;  %v5469_v3 = vld [vmem:[#allocation9 + $0x2c8] sm:$0xff]  }
 0x389   : > { %4314 = vmatprep.mubr.bf16.mxu1 %v3128_v4  ;;  %v5470_v4 = vld [vmem:[#allocation9 + $0x208] sm:$0xff]  }
 0x38a   : > { %5062 = vmatpush3.bf16.msra.mxu0 %v5418_v17  ;;  %v5468_v17 = vld [vmem:[#allocation9 + $0x248] sm:$0xff]  }
 0x38b   : > { %5084 = vmatpush3.bf16.msra.mxu1 %v5419_v43  ;;  %5063 = vmatprep.subr.bf16.mxu0 %v5420_v53  ;;  %v5471_v43 = vld [vmem:[#allocation9 + $0x288] sm:$0xff]   ;;  %v5472_v53 = vld [vmem:[#allocation9 + $0x240] sm:$0xff]  }
 0x38c   : > { %5085 = vmatprep.subr.bf16.mxu1 %v5421_v52  ;;  %v5473_v52 = vld [vmem:[#allocation9 + $0x2c0] sm:$0xff]  }
 0x38e   : > { %5064 = vmatpush3.bf16.msra.mxu0 %v5422_v8  ;;  %v5474_v8 = vld [vmem:[#allocation9 + $0x200] sm:$0xff]  }
 0x38f   : > { %5086 = vmatpush3.bf16.msra.mxu1 %v5423_v33  ;;  %5065 = vmatprep.subr.bf16.mxu0 %v5424_v39  ;;  %v5475_v33 = vld [vmem:[#allocation9 + $0x280] sm:$0xff]   ;;  %v3036_v39 = vld [vmem:[#allocation2 + $0x8] sm:$0xff] }
 0x390   : > { %5087 = vmatprep.subr.bf16.mxu1 %v5425_v62  ;;  %v7247_v62 = vmul.f32 0.00390625, %v3036_v39 }
 0x392   : > { %5066 = vmatpush3.bf16.msra.mxu0 %v5426_v49  ;;  %v5476_v49 = vld [vmem:[#allocation9 + $0x378] sm:$0xff]  }
 0x393   : > { %5088 = vmatpush3.bf16.msra.mxu1 %v5427_v14  ;;  %5067 = vmatprep.subr.bf16.mxu0 %v5428_v58  ;;  %v5477_v14 = vld [vmem:[#allocation9 + $0x3f8] sm:$0xff]   ;;  %v3080_v58 = vrot.slane %v7247_v62, %v7616_v54 }
 0x394   : > { %5089 = vmatprep.subr.bf16.mxu1 %v5429_v19  ;;  %v3088_v19 = vrot.slane %v7247_v62, %v7617_v40  ;;  %v5480_v40 = vld [vmem:[#allocation9 + $0x370] sm:$0xff]  }
 0x395   : > { %v3130_v54 = vpack.c.bf16 %v3080_v58, %v3080_v58 }
 0x396   : > { %5068 = vmatpush3.bf16.msra.mxu0 %v5430_v46  ;;  %v3076_v46 = vrot.slane %v7247_v62, %v7618_v15  ;;  %v5481_v15 = vld [vmem:[#allocation9 + $0x3f0] sm:$0xff]  }
 0x397   : > { %5090 = vmatpush3.bf16.msra.mxu1 %v5431_v6  ;;  %5069 = vmatprep.subr.bf16.mxu0 %v5432_v44  ;;  %v3084_v6 = vrot.slane %v7247_v62, %v7619_v24  ;;  %v5478_v44 = vld [vmem:[#allocation9 + $0x338] sm:$0xff]   ;;  %v5482_v24 = vld [vmem:[#allocation9 + $0x330] sm:$0xff]  }
 0x398   : > { %5091 = vmatprep.subr.bf16.mxu1 %v5433_v18  ;;  %v5479_v18 = vld [vmem:[#allocation9 + $0x3b8] sm:$0xff]  }
 0x39a   : > { %5070 = vmatpush3.bf16.msra.mxu0 %v5434_v41  ;;  %v3096_v41 = vrot.slane %v7247_v62, %v7620_v7  ;;  %v5483_v7 = vld [vmem:[#allocation9 + $0x3b0] sm:$0xff]  }
 0x39b   : > { %5092 = vmatpush3.bf16.msra.mxu1 %v5435_v13  ;;  %5071 = vmatprep.subr.bf16.mxu0 %v5436_v9  ;;  %v3104_v13 = vrot.slane %v7247_v62, %v7621_v10  ;;  %v3132_v9 = vpack.c.bf16 %v3088_v19, %v3088_v19  ;;  %v5484_v10 = vld [vmem:[#allocation9 + $0x368] sm:$0xff]  }
 0x39c   : > { %5093 = vmatprep.subr.bf16.mxu1 %v5437_v23  ;;  %v3129_v23 = vpack.c.bf16 %v3076_v46, %v3076_v46 }
 0x39e   : > { %5072 = vmatpush3.bf16.msra.mxu0 %v5438_v20  ;;  %v3131_v20 = vpack.c.bf16 %v3084_v6, %v3084_v6 }
 0x39f   : > { %5094 = vmatpush3.bf16.msra.mxu1 %v5439_v25  ;;  %5073 = vmatprep.subr.bf16.mxu0 %v5440_v56  ;;  %v3134_v25 = vpack.c.bf16 %v3096_v41, %v3096_v41  ;;  %v3136_v56 = vpack.c.bf16 %v3104_v13, %v3104_v13 }
 0x3a0   : > { %5095 = vmatprep.subr.bf16.mxu1 %v5441_v2  ;;  %v5485_v2 = vld [vmem:[#allocation9 + $0x3e8] sm:$0xff]  }
 0x3a2   : > { %5074 = vmatpush3.bf16.msra.mxu0 %v5442_v36  ;;  %v5486_v36 = vld [vmem:[#allocation9 + $0x328] sm:$0xff]  }
 0x3a3   : > { %5096 = vmatpush3.bf16.msra.mxu1 %v5443_v30  ;;  %5103 = vmatprep.subr.bf16.mxu0 %v5444_v35  ;;  %v5487_v30 = vld [vmem:[#allocation9 + $0x3a8] sm:$0xff]   ;;  %v5490_v35 = vld [vmem:[#allocation9 + $0x320] sm:$0xff]  }
 0x3a4   : > { %5125 = vmatprep.subr.bf16.mxu1 %v5445_v38  ;;  %v5491_v38 = vld [vmem:[#allocation9 + $0x3a0] sm:$0xff]  }
 0x3a5   : > { %4275 = vmatmul.mubr.bf16.vlgmr.msra.gmra.mxu0 %v3125_v57  ;;  %v5493_v57 = vld [vmem:[#allocation9 + $0x3d8] sm:$0xff]  }
 0x3a6   : > { %4315 = vmatmul.mubr.bf16.vlgmr.msra.gmra.mxu1 %v3127_v37  ;;  %5104 = vmatpush3.bf16.msra.mxu0 %v5446_v11  ;;  %v5492_v11 = vld [vmem:[#allocation9 + $0x358] sm:$0xff]  }
 0x3a7   : > { %5126 = vmatpush3.bf16.msra.mxu1 %v5447_v27  ;;  %5105 = vmatprep.subr.bf16.mxu0 %v5448_v31  ;;  %v5494_v37 = vld [vmem:[#allocation9 + $0x318] sm:$0xff]   ;;  %v5496_v31 = vld [vmem:[#allocation9 + $0x350] sm:$0xff]  }
 0x3a8   : > { %5127 = vmatprep.subr.bf16.mxu1 %v5449_v22  ;;  %4354 = vmatprep.mubr.bf16.mxu0 %v3130_v54  ;;  %v5495_v27 = vld [vmem:[#allocation9 + $0x398] sm:$0xff]   ;;  %v5497_v22 = vld [vmem:[#allocation9 + $0x3d0] sm:$0xff]  }
 0x3a9   : > { %4394 = vmatprep.mubr.bf16.mxu1 %v3132_v9 }
 0x3aa   : > { %5106 = vmatpush3.bf16.msra.mxu0 %v5450_v61  ;;  %v5498_v61 = vld [vmem:[#allocation9 + $0x310] sm:$0xff]  }
 0x3ab   : > { %5128 = vmatpush3.bf16.msra.mxu1 %v5451_v34  ;;  %5107 = vmatprep.subr.bf16.mxu0 %v5452_v45  ;;  %v5499_v34 = vld [vmem:[#allocation9 + $0x390] sm:$0xff]   ;;  %v5500_v45 = vld [vmem:[#allocation9 + $0x348] sm:$0xff]  }
 0x3ac   : > { %5129 = vmatprep.subr.bf16.mxu1 %v5453_v29  ;;  %v5501_v29 = vld [vmem:[#allocation9 + $0x3c8] sm:$0xff]  }
 0x3ae   : > { %5108 = vmatpush3.bf16.msra.mxu0 %v5454_v60  ;;  %v5502_v60 = vld [vmem:[#allocation9 + $0x308] sm:$0xff]  }
 0x3af   : > { %5130 = vmatpush3.bf16.msra.mxu1 %v5455_v48  ;;  %5109 = vmatprep.subr.bf16.mxu0 %v5456_v26  ;;  %v5503_v48 = vld [vmem:[#allocation9 + $0x388] sm:$0xff]   ;;  %v5504_v26 = vld [vmem:[#allocation9 + $0x340] sm:$0xff]  }
 0x3b0   : > { %5131 = vmatprep.subr.bf16.mxu1 %v5457_v1  ;;  %v5505_v1 = vld [vmem:[#allocation9 + $0x3c0] sm:$0xff]  }
 0x3b2   : > { %5110 = vmatpush3.bf16.msra.mxu0 %v5458_v0  ;;  %v5506_v0 = vld [vmem:[#allocation9 + $0x300] sm:$0xff]  }
 0x3b3   : > { %5132 = vmatpush3.bf16.msra.mxu1 %v5459_v47  ;;  %5111 = vmatprep.subr.bf16.mxu0 %v5460_v50  ;;  %v5507_v47 = vld [vmem:[#allocation9 + $0x380] sm:$0xff]   ;;  %v3092_v50 = vrot.slane %v7247_v62, %v7622_v5  ;;  %v5510_v5 = vld [vmem:[#allocation11 + $0x28] sm:$0xff]  }
 0x3b4   : > { %5133 = vmatprep.subr.bf16.mxu1 %v5461_v51  ;;  %v3100_v51 = vrot.slane %v7247_v62, %v7623_v16  ;;  %v5511_v16 = vld [vmem:[#allocation11 + $0x20] sm:$0xff]  }
 0x3b6   : > { %5112 = vmatpush3.bf16.msra.mxu0 %v5462_v32  ;;  %v3133_v32 = vpack.c.bf16 %v3092_v50, %v3092_v50 }
 0x3b7   : > { %5134 = vmatpush3.bf16.msra.mxu1 %v5463_v63  ;;  %5113 = vmatprep.subr.bf16.mxu0 %v5464_v21  ;;  %v3135_v63 = vpack.c.bf16 %v3100_v51, %v3100_v51  ;;  %v5508_v21 = vld [vmem:[#allocation11 + $0x38] sm:$0xff]  }
 0x3b8   : > { %5135 = vmatprep.subr.bf16.mxu1 %v5465_v28  ;;  %v5790_v28 = vmov 0.0  }
 0x3ba   : > { %5114 = vmatpush3.bf16.msra.mxu0 %v5466_v42  ;;  %v5509_v42 = vld [vmem:[#allocation11 + $0x30] sm:$0xff]  }
 0x3bb   : > { %5136 = vmatpush3.bf16.msra.mxu1 %v5467_v55  ;;  %5115 = vmatprep.subr.bf16.mxu0 %v5468_v17  ;;  %v5512_v55 = vld [vmem:[#allocation11 + $0x18] sm:$0xff]   ;;  %v5513_v17 = vld [vmem:[#allocation11 + $0x10] sm:$0xff]  }
 0x3bc   : > { %5137 = vmatprep.subr.bf16.mxu1 %v5469_v3  ;;  %v5514_v3 = vld [vmem:[#allocation11 + $0x8] sm:$0xff]  }
 0x3be   : > { %5116 = vmatpush3.bf16.msra.mxu0 %v5470_v4  ;;  %v5515_v4 = vld [vmem:[#allocation11] sm:$0xff]  }
 0x3bf   : > { %5138 = vmatpush3.bf16.msra.mxu1 %v5471_v43  ;;  %5117 = vmatprep.subr.bf16.mxu0 %v5472_v53 }
 0x3c0   : > { %5139 = vmatprep.subr.bf16.mxu1 %v5473_v52  ;;  %v3393_v52 = vld [vmem:[%s7332_s4] sm:$0x1] }
 0x3c2   : > { %5118 = vmatpush3.bf16.msra.mxu0 %v5474_v8 }
 0x3c3   : > { %5140 = vmatpush3.bf16.msra.mxu1 %v5475_v33  ;;  %5147 = vmatprep.subr.bf16.mxu0 %v5476_v49 }
 0x3c4   : > { %5169 = vmatprep.subr.bf16.mxu1 %v5477_v14 }
 0x3c5   : > { %4355 = vmatmul.mubr.bf16.vlgmr.msra.gmra.mxu0 %v3129_v23 }
 0x3c6   : > { %4395 = vmatmul.mubr.bf16.vlgmr.msra.gmra.mxu1 %v3131_v20  ;;  %5148 = vmatpush3.bf16.msra.mxu0 %v5478_v44 }
 0x3c7   : > { %5170 = vmatpush3.bf16.msra.mxu1 %v5479_v18  ;;  %5149 = vmatprep.subr.bf16.mxu0 %v5480_v40 }
 0x3c8   : > { %5171 = vmatprep.subr.bf16.mxu1 %v5481_v15  ;;  %4434 = vmatprep.mubr.bf16.mxu0 %v3134_v25 }
 0x3c9   : > { %4474 = vmatprep.mubr.bf16.mxu1 %v3136_v56 }
 0x3ca   : > { %5150 = vmatpush3.bf16.msra.mxu0 %v5482_v24 }
 0x3cb   : > { %5172 = vmatpush3.bf16.msra.mxu1 %v5483_v7  ;;  %5151 = vmatprep.subr.bf16.mxu0 %v5484_v10 }
 0x3cc   : > { %5173 = vmatprep.subr.bf16.mxu1 %v5485_v2 }
 0x3ce   : > { %5152 = vmatpush3.bf16.msra.mxu0 %v5486_v36 }
 0x3cf   : > { %5174 = vmatpush3.bf16.msra.mxu1 %v5487_v30  ;;  %5153 = vmatprep.subr.bf16.mxu0 %v5488_v12 }
 0x3d0   : > { %5175 = vmatprep.subr.bf16.mxu1 %v5489_v59 }
 0x3d2   : > { %5154 = vmatpush3.bf16.msra.mxu0 %v5490_v35 }
 0x3d3   : > { %5176 = vmatpush3.bf16.msra.mxu1 %v5491_v38  ;;  %5155 = vmatprep.subr.bf16.mxu0 %v5492_v11 }
 0x3d4   : > { %5177 = vmatprep.subr.bf16.mxu1 %v5493_v57 }
 0x3d6   : > { %5156 = vmatpush3.bf16.msra.mxu0 %v5494_v37 }
 0x3d7   : > { %5178 = vmatpush3.bf16.msra.mxu1 %v5495_v27  ;;  %5157 = vmatprep.subr.bf16.mxu0 %v5496_v31 }
 0x3d8   : > { %5179 = vmatprep.subr.bf16.mxu1 %v5497_v22 }
 0x3da   : > { %5158 = vmatpush3.bf16.msra.mxu0 %v5498_v61 }
 0x3db   : > { %5180 = vmatpush3.bf16.msra.mxu1 %v5499_v34  ;;  %5159 = vmatprep.subr.bf16.mxu0 %v5500_v45 }
 0x3dc   : > { %5181 = vmatprep.subr.bf16.mxu1 %v5501_v29 }
 0x3de   : > { %5160 = vmatpush3.bf16.msra.mxu0 %v5502_v60 }
 0x3df   : > { %5182 = vmatpush3.bf16.msra.mxu1 %v5503_v48  ;;  %5161 = vmatprep.subr.bf16.mxu0 %v5504_v26 }
 0x3e0   : > { %5183 = vmatprep.subr.bf16.mxu1 %v5505_v1 }
 0x3e2   : > { %5162 = vmatpush3.bf16.msra.mxu0 %v5506_v0 }
 0x3e3   : > { %5184 = vmatpush3.bf16.msra.mxu1 %v5507_v47  ;;  %5200 = vmatprep.subr.bf16.mxu0 %v5790_v28  ;;  %v4499_v47 = vld [vmem:[%s7624_s22] sm:$0x1] }
 0x3e5   : > { %4435 = vmatmul.mubr.bf16.vlgmr.msra.gmra.mxu0 %v3133_v32 }
 0x3e6   : > { %4475 = vmatmul.mubr.bf16.vlgmr.msra.gmra.mxu1 %v3135_v63  ;;  %5201 = vmatpush3.bf16.msra.mxu0 %v5508_v21 }
 0x3e7   : > { %5202 = vmatprep.subr.bf16.mxu0 %v5790_v28  ;;  %5216 = vmatprep.mubr.msk.bf16.mxu0 %vm5791_vm0, %v5790_v28 }
 0x3ea   : > { %5203 = vmatpush3.bf16.msra.mxu0 %v5509_v42 }
 0x3eb   : > { %5204 = vmatprep.subr.bf16.mxu0 %v5790_v28 }
 0x3ee   : > { %5205 = vmatpush3.bf16.msra.mxu0 %v5510_v5 }
 0x3ef   : > { %5206 = vmatprep.subr.bf16.mxu0 %v5790_v28 }
 0x3f2   : > { %5207 = vmatpush3.bf16.msra.mxu0 %v5511_v16 }
 0x3f3   : > { %5208 = vmatprep.subr.bf16.mxu0 %v5790_v28 }
 0x3f6   : > { %5209 = vmatpush3.bf16.msra.mxu0 %v5512_v55 }
 0x3f7   : > { %5210 = vmatprep.subr.bf16.mxu0 %v5790_v28 }
 0x3fa   : > { %5211 = vmatpush3.bf16.msra.mxu0 %v5513_v17 }
 0x3fb   : > { %5212 = vmatprep.subr.bf16.mxu0 %v5790_v28 }
 0x3fe   : > { %5213 = vmatpush3.bf16.msra.mxu0 %v5514_v3 }
 0x3ff   : > { %5214 = vmatprep.subr.bf16.mxu0 %v5790_v28 }
 0x402   : > { %5215 = vmatpush3.bf16.msra.mxu0 %v5515_v4 }
 0x445   : > { %v5031_v43 = vpop.f32.mrf.mxu0 }
 0x446   : > { %v5053_v53 = vpop.f32.mrf.mxu1 }
 0x447   : > { %v5032_v8 = vpop.f32.mrf.mxu0 }
 0x448   : > { %v5054_v33 = vpop.f32.mrf.mxu1  ;;  %v5033_v39 = vadd.f32 %v5032_v8, %v5031_v43 }
 0x449   : > { %v5055_v62 = vadd.f32 %v5054_v33, %v5053_v53  ;;  %v5034_v49 = vpop.f32.mrf.mxu0 }
 0x44a   : > { %v5056_v14 = vpop.f32.mrf.mxu1  ;;  %v4197_v58 = vadd.f32 %v5033_v39, %v3393_v52 }
 0x44b   : > { %v5035_v19 = vpop.f32.mrf.mxu0 }
 0x44c   : > { %v5057_v46 = vpop.f32.mrf.mxu1  ;;  %v4237_v6 = vadd.f32 %v5055_v62, %v4197_v58 }
 0x465   : > { %v5075_v44 = vpop.f32.mrf.mxu0 }
 0x466   : > { %v5097_v18 = vpop.f32.mrf.mxu1 }
 0x467   : > { %v5076_v41 = vpop.f32.mrf.mxu0 }
 0x468   : > { %v5098_v13 = vpop.f32.mrf.mxu1  ;;  %v5077_v36 = vadd.f32 %v5076_v41, %v5075_v44 }
 0x469   : > { %v5078_v54 = vpop.f32.mrf.mxu0  ;;  %v5099_v12 = vadd.f32 %v5098_v13, %v5097_v18 }
 0x46a   : > { %v5100_v9 = vpop.f32.mrf.mxu1  ;;  %v4277_v30 = vadd.f32 %v5077_v36, %v4237_v6 }
 0x46b   : > { %v5079_v23 = vpop.f32.mrf.mxu0 }
 0x46c   : > { %v5101_v40 = vpop.f32.mrf.mxu1  ;;  %v4317_v35 = vadd.f32 %v5099_v12, %v4277_v30 }
 0x485   : > { %v5119_v20 = vpop.f32.mrf.mxu0 }
 0x486   : > { %v5141_v15 = vpop.f32.mrf.mxu1 }
 0x487   : > { %v5120_v24 = vpop.f32.mrf.mxu0 }
 0x488   : > { %v5142_v25 = vpop.f32.mrf.mxu1  ;;  %v5121_v59 = vadd.f32 %v5120_v24, %v5119_v20 }
 0x489   : > { %v5122_v56 = vpop.f32.mrf.mxu0  ;;  %v5143_v11 = vadd.f32 %v5142_v25, %v5141_v15 }
 0x48a   : > { %v5144_v7 = vpop.f32.mrf.mxu1  ;;  %v4357_v38 = vadd.f32 %v5121_v59, %v4317_v35 }
 0x48b   : > { %v5123_v10 = vpop.f32.mrf.mxu0 }
 0x48c   : > { %v5145_v2 = vpop.f32.mrf.mxu1  ;;  %v4397_v22 = vadd.f32 %v5143_v11, %v4357_v38 }
 0x4a5   : > { %v5163_v57 = vpop.f32.mrf.mxu0 }
 0x4a6   : > { %v5185_v37 = vpop.f32.mrf.mxu1 }
 0x4a7   : > { %v5164_v27 = vpop.f32.mrf.mxu0 }
 0x4a8   : > { %v5186_v31 = vpop.f32.mrf.mxu1  ;;  %v5165_v61 = vadd.f32 %v5164_v27, %v5163_v57 }
 0x4a9   : > { %v5166_v34 = vpop.f32.mrf.mxu0  ;;  %v5187_v60 = vadd.f32 %v5186_v31, %v5185_v37 }
 0x4aa   : > { %v5188_v45 = vpop.f32.mrf.mxu1  ;;  %v4437_v29 = vadd.f32 %v5165_v61, %v4397_v22 }
 0x4ab   : > { %v5167_v48 = vpop.f32.mrf.mxu0 }
 0x4ac   : > { %v5189_v26 = vpop.f32.mrf.mxu1  ;;  %v4477_v1 = vadd.f32 %v5187_v60, %v4437_v29 }
 0x4ae   : > { %v4482_v0 = vpack.c.bf16 %v4477_v1, %v4477_v1 }
 0x4b0   : > { %5217 = vmatmul.mubr.bf16.vlgmr.msra.gmra.mxu0 %v4482_v0 }
 0x570   : > { %v4582_v50 = vpop.f32.mrf.mxu0 }
 0x571   : > { %v4583_v51 = vadd.f32 %v4582_v50, %v4499_v47 }
 0x572   : > { %v5218_v32 = vpop.f32.mrf.mxu0 }
 0x573   : > { %4588 = vst [vmem:[%s6034_s7] sm:$0x1] %v4583_v51 }
 0x574   : > { %v4585_v63 = vpop.f32.mrf.mxu0 }
 0x576   : > { %v5219_v21 = vpop.f32.mrf.mxu0 }
 0x577 PF: > { %s7625_s13 = sld [smem:[#allocation18_spill]]  ;;  %s4602_s23 = sshll.u32 %s6034_s7, 4  ;;  %s4603_s23 = int_to_ptr.vmem [resolvable:$true] %s4602_s23 }
 0x578   : > { %s7626_s1 = sld [smem:[#allocation19_spill]]  ;;  %s4590_s19 = scalar_lea.sflag [#allocation5], %s366_s6 }
 0x579   : > { %s7627_s27 = sld [smem:[#allocation60_spill]]  ;;  %s5648_s20 = scalar_lea.vmem %s4603_s23, 16 }
 0x57a   : > { %p5649_p3 = scmp.ne.s32.totalorder %s4603_s23, %s5648_s20  ;;  %s5792_s24 = smov [#allocation12]  }
 0x57b   : > { %s5652_s30 = sshll.u32 %s5792_s24, 4  ;;  %s5653_s30 = int_to_ptr.vmem [resolvable:$false] %s5652_s30 }
 0x57c   : > { %s5654_s14 = scalar_lea.vmem %s5653_s30, 32  ;;  %p5655_p6 = scmp.lt.s32.totalorder %s4603_s23, %s5653_s30 }
 0x57d   : > { %s5012_s17 = sshll.u32 %s7625_s13, 4  ;;  %p5656_p10 = scmp.lt.s32.totalorder %s5654_s14, %s5648_s20 }
 0x57e   : > { %p7629_p7 = scmp.ne.s32.totalorder %s7626_s1, 0 }
 0x57f   : > { %s7628_s12 = smov %s7627_s27  ;;  %s4600_s8 = scalar_lea.hbm %s7627_s27, %s5012_s17 }
 0x580   : > { %p5650_p5 = pnand %p5649_p3, %p7629_p7  ;;  %p5657_p1 = por %p5656_p10, %p5655_p6 }
 0x582   : > { %p5651_p8 = pneg %p5650_p5 }
 0x584   : > { %p5658_p4 = pnand %p5657_p1, %p5651_p8 }
 0x586   : > { %5661 = shalt.err (!%p5658_p4)
}
 0x587   : > { %s5662_s15 = scalar_lea.hbm %s4600_s8, 16  ;;  %s5666_s18 = scalar_lea.hbm %s7628_s12, 32 }
 0x588   : > { %p5663_p11 = scmp.ne.s32.totalorder %s4600_s8, %s5662_s15  ;;  %p5667_p9 = scmp.lt.s32.totalorder %s4600_s8, %s7628_s12 }
 0x589   : > { %p5668_p12 = scmp.lt.s32.totalorder %s5666_s18, %s5662_s15 }
 0x58a   : > { %p5664_p0 = pnand %p5663_p11, %p7629_p7 }
 0x58b   : > { %p5669_p2 = por %p5668_p12, %p5667_p9 }
 0x58c   : > { %p5665_p13 = pneg %p5664_p0 }
 0x58e   : > { %p5670_p3 = pnand %p5669_p2, %p5665_p13 }
 0x590   : > { %5673 = shalt.err (!%p5670_p3)
}
 0x591   : > { %5238 = dma.vmem_to_hbm [thread:$0]  (%p7629_p7), %s4603_s23, 16, %s4600_s8, %s4590_s19  }
 0x592 PF: > { %s7630_s17 = sld [smem:[#allocation17_spill]]  ;;  %p5270_p5 = scmp.ge.s32.totalorder %s5776_s11, 2 }
 0x593   : > { %s7631_s5 = sld [smem:[#allocation20_spill]] }
 0x598   : > { %s4614_s16 = sand.u32 1, %s7630_s17  }
 0x599   : > { %p7632_p8 = scmp.ne.s32.totalorder %s7631_s5, 0  ;;  %s4615_s27 = scalar_lea.sflag [#allocation5], %s4614_s16 }
 0x59b   : > { %p5258_p6 = pnand %p5270_p5, %p7632_p8 }
 0x59d   : > { %p5259_p10 = pneg %p5258_p6 }
 0x59f   : > { %5731 = dma.done.wait (%p5259_p10), %s4615_s27, 16  }
 0x5a0   : > { %5733 = vsyncadd (%p5259_p10), %s4615_s27, 4294967280  ;;  %s25_s11 = sadd.s32 1, %s5776_s11   ;;  %s7633_s1 = sld [smem:[#allocation21_spill]] }
 0x5a1   : > { %p22_p1 = scmp.ge.s32.totalorder %s25_s11, 6   ;;  %s7634_s24 = smov %s5740_s25 }
 0x5a2   : > { %s7635_s25 = smov %s5744_s26  ;;  %s7636_s26 = smov %s5990_s2 }
 0x5a3   : > { %s7637_s27 = smov %s5752_s28  ;;  %s7638_s28 = smov %s5756_s29 }
 0x5a4   : > { %s7639_s29 = smov %s5993_s3  ;;  %s7640_s30 = smov %s5768_s9 }
 0x5a5   : > { %s7641_s8 = smov %s5772_s10  ;;  %s7643_s10 = smov %s7649_s21 }
 0x5a6   : > { %s7642_s9 = smov %s7633_s1  ;;  %24 = sbr.rel (!%p22_p1) target bundleno = 18 (0x12), region = 117 }
 0x5ab   :  { %4619 = vsyncpa [#allocation4], 1 }
 0x5ac   :  { %4621 = vsyncpa [#allocation4 + $0x1], 1 }
 0x5ad   :  { %4622 = vsyncpa [#allocation7], 1 }
 0x5ae   :  { %4623 = vsyncpa [#allocation10], 1 }
 0x5af   :  { %4624 = vsyncpa [#allocation5], 1 }
 0x5b0   :  { %4626 = vsyncpa [#allocation5 + $0x1], 1 }

</bundles_post_ra>
